<compile_context>
chip_gen: v5e
topology: v5e:2x2
jax: 0.10.0
libtpu: 0.0.40
codegen_flags: <defaults>
</compile_context>

<pallas_src>
import math

import jax
import jax.numpy as jnp
from jax import lax
from jax.experimental import pallas as pl
from jax.experimental.pallas import tpu as pltpu


# direction unit steps (row, col): horizontal, vertical, main-diag, anti-diag
_DIRS = ((0, 1), (1, 0), (1, 1), (1, -1))
_LANES = 128


def _make_kernel(Cc, Oc, Cd, Od, Kc, Kd, Wf, Rout):
    """Fused depthwise + factored-pointwise kernel for fixed static shapes.

    Per-channel spatial data arrives pre-padded and row-major-folded into a
    (Rpad, 128) slab.  A conv tap at image offset (dy, dx) is a flat shift by
    off = (P+dy)*Wf + (P+dx), implemented as a sublane-offset slice plus a static
    lane rotation (two lane slices + concat -> XLU), never a masked narrow slice.
    """
    P = Kd // 2
    pc = Kc // 2

    def kernel(cen_w, dir_w, c2c, p2c, d2c, c2d, d2d, x_ref, o_ref, dw_ref, cp_ref):

        def tap(c, dy, dx):
            off = (P + dy) * Wf + (P + dx)            # always >= 0 (Kd >= Kc)
            sa, la = divmod(off, _LANES)
            if la == 0:
                return x_ref[0, c, sa:sa + Rout, :]
            hi = x_ref[0, c, sa:sa + Rout, la:_LANES]
            lo = x_ref[0, c, sa + 1:sa + 1 + Rout, 0:la]
            return jnp.concatenate([hi, lo], axis=1)

        # ---------------- 1) depthwise stage (per-channel shift-and-scale) ----------
        for c in range(Cc):                           # central: Kc x Kc taps
            acc = None
            for kh in range(Kc):
                for kw in range(Kc):
                    term = cen_w[c * Kc * Kc + kh * Kc + kw] * tap(c, kh - pc, kw - pc)
                    acc = term if acc is None else acc + term
            dw_ref[c] = acc

        for g, (sh, sw) in enumerate(_DIRS):          # directional: Kd taps per line
            for j in range(Cd):
                c = Cc + g * Cd + j
                acc = None
                for t in range(Kd):
                    term = dir_w[j * Kd + t] * tap(c, (t - P) * sh, (t - P) * sw)
                    acc = term if acc is None else acc + term
                dw_ref[c] = acc

        # ---------------- 2) factored pointwise channel mixing ----------------------
        # cen2dir @ cen computed ONCE and reused by all four direction groups.
        for o in range(Od):
            acc = None
            for c in range(Cc):
                term = c2d[o * Cc + c] * dw_ref[c]
                acc = term if acc is None else acc + term
            cp_ref[o] = acc

        # directional outputs (need each direction group individually).
        for g in range(4):
            for o in range(Od):
                acc = cp_ref[o]
                for j in range(Cd):
                    acc = acc + d2d[o * Cd + j] * dw_ref[Cc + g * Cd + j]
                o_ref[0, Oc + g * Od + o] = acc.astype(o_ref.dtype)

        # (h+v) and (d+a) formed once, in place (the directional outputs above no
        # longer need the individual groups).
        for j in range(Cd):
            dw_ref[Cc + j] = dw_ref[Cc + j] + dw_ref[Cc + Cd + j]                  # h+v
            dw_ref[Cc + 2 * Cd + j] = dw_ref[Cc + 2 * Cd + j] + dw_ref[Cc + 3 * Cd + j]  # d+a

        # central outputs.
        for o in range(Oc):
            acc = None
            for c in range(Cc):
                term = c2c[o * Cc + c] * dw_ref[c]
                acc = term if acc is None else acc + term
            for j in range(Cd):
                acc = acc + p2c[o * Cd + j] * dw_ref[Cc + j]            # par2cen @ (h+v)
                acc = acc + d2c[o * Cd + j] * dw_ref[Cc + 2 * Cd + j]   # dia2cen @ (d+a)
            o_ref[0, o] = acc.astype(o_ref.dtype)

    return kernel


def directional_separable_conv2d(x, cen_tensor, dir_tensor,
                                 cen2cen, par2cen, dia2cen, cen2dir, dir2dir):
    """Forward pass of DirectionalSeparableConv2D (NCHW in, NCHW out)."""
    N, C, H, W = x.shape
    Cc, Kc, _ = cen_tensor.shape
    Cd, Kd = dir_tensor.shape
    Oc = cen2cen.shape[0]
    Od = cen2dir.shape[0]
    Cin = Cc + 4 * Cd
    Cout = Oc + 4 * Od

    assert C == Cin, "input channels must be cen_in + 4*dir_in"
    assert Kc % 2 == 1 and Kd % 2 == 1, "only odd kernel sizes are supported"
    assert Kd >= Kc, "directional kernel must not be smaller than central kernel"
    P = Kd // 2
    Wf = W + 2 * P            # padded (and folded) row length
    Hp = H + 2 * P            # padded image height

    f32 = jnp.float32
    x = x.astype(f32)

    # ---- wrapper-side layout plumbing: zero 'same' border + row-major lane fold ----
    Rout = pl.cdiv(H * Wf, _LANES)                    # folded output rows per channel
    max_off = 2 * P * Wf + 2 * P                      # largest flat tap offset
    Rpad = Rout + pl.cdiv(max_off, _LANES) + 1        # folded padded rows per channel

    xp = jnp.pad(x, ((0, 0), (0, 0), (P, P), (P, P)))             # (N, Cin, Hp, Wf)
    flat = xp.reshape(N, Cin, Hp * Wf)
    flat = jnp.pad(flat, ((0, 0), (0, 0), (0, Rpad * _LANES - Hp * Wf)))
    x_fold = flat.reshape(N, Cin, Rpad, _LANES)

    cen_flat = cen_tensor.astype(f32).reshape(-1)
    dir_flat = dir_tensor.astype(f32).reshape(-1)
    c2c_flat = cen2cen.astype(f32).reshape(-1)
    p2c_flat = par2cen.astype(f32).reshape(-1)
    d2c_flat = dia2cen.astype(f32).reshape(-1)
    c2d_flat = cen2dir.astype(f32).reshape(-1)
    d2d_flat = dir2dir.astype(f32).reshape(-1)

    def smem_spec(n):
        return pl.BlockSpec((n,), lambda b: (0,),
                            memory_space=pltpu.MemorySpace.SMEM)

    x_spec = pl.BlockSpec((1, Cin, Rpad, _LANES), lambda b: (b, 0, 0, 0))
    o_spec = pl.BlockSpec((1, Cout, Rout, _LANES), lambda b: (b, 0, 0, 0))

    # ---- per-generation VMEM budget (double-buffered streams + scratch) ----
    est_vmem = 4 * (2 * Cin * Rpad * _LANES            # input block (double buffered)
                    + 2 * Cout * Rout * _LANES         # output block (double buffered)
                    + Cin * Rout * _LANES              # depthwise scratch
                    + Od * Rout * _LANES)              # cen2dir@cen scratch
    try:
        info = pltpu.get_tpu_info()
        vmem_phys = int(getattr(info, "vmem_capacity_bytes", 64 << 20))
    except Exception:
        vmem_phys = 64 << 20                           # conservative (v7x per-core)
    vmem_cap = (vmem_phys * 3) // 4                    # headroom for compiler scratch
    assert est_vmem <= vmem_cap, (
        f"padded image tile ({est_vmem} B) exceeds the VMEM budget ({vmem_cap} B); "
        "TODO(synk): row-tiled variant of the folded layout for very large images")
    vmem_limit = int(min(max(2 * est_vmem, 4 << 20), vmem_cap))

    # ---- advisory cost estimate (reflects the factored pointwise + folded streams) --
    dw_macs = Cc * Kc * Kc + 4 * Cd * Kd
    pw_macs = Od * Cc + 4 * Od * Cd + Oc * Cc + 2 * Oc * Cd + 2 * Cd
    flops = 2 * N * H * W * (dw_macs + pw_macs)
    bytes_accessed = 4 * (N * Cin * Rpad * _LANES + N * Cout * Rout * _LANES
                          + cen_flat.size + dir_flat.size + c2c_flat.size
                          + p2c_flat.size + d2c_flat.size + c2d_flat.size
                          + d2d_flat.size)
    cost = pl.CostEstimate(flops=int(flops), transcendentals=0,
                           bytes_accessed=int(bytes_accessed))

    kernel = _make_kernel(Cc, Oc, Cd, Od, Kc, Kd, Wf, Rout)

    out_fold = pl.pallas_call(
        kernel,
        out_shape=jax.ShapeDtypeStruct((N, Cout, Rout, _LANES), f32),
        grid=(N,),
        in_specs=[
            smem_spec(cen_flat.size), smem_spec(dir_flat.size),
            smem_spec(c2c_flat.size), smem_spec(p2c_flat.size),
            smem_spec(d2c_flat.size), smem_spec(c2d_flat.size),
            smem_spec(d2d_flat.size),
            x_spec,
        ],
        out_specs=o_spec,
        scratch_shapes=[
            pltpu.VMEM((Cin, Rout, _LANES), f32),      # depthwise results
            pltpu.VMEM((Od, Rout, _LANES), f32),       # cen2dir @ cen (reused 4x)
        ],
        compiler_params=pltpu.CompilerParams(
            dimension_semantics=("parallel",),         # batch shards across v7x cores
            vmem_limit_bytes=vmem_limit),
        cost_estimate=cost,
    )(cen_flat, dir_flat, c2c_flat, p2c_flat, d2c_flat, c2d_flat, d2d_flat, x_fold)

    # ---- unfold back to NCHW (drops the lane-fold junk columns / tail) ----
    out_flat = out_fold.reshape(N, Cout, Rout * _LANES)[:, :, :H * Wf]
    out = out_flat.reshape(N, Cout, H, Wf)[..., :W]
    return out


# ------------------------------------------------------------------------------------
# Pure-JAX reference (XLA grouped conv + einsum) used for validation.
# ------------------------------------------------------------------------------------
def _reference(x, cen_tensor, dir_tensor, c2c, p2c, d2c, c2d, d2d):
    Cc, Kc, _ = cen_tensor.shape
    Cd, Kd = dir_tensor.shape
    Cin = Cc + 4 * Cd
    mid = Kd // 2
    off = (Kd - Kc) // 2
    idx = jnp.arange(Kd)

    w = jnp.zeros((Cin, 1, Kd, Kd), jnp.float32)
    w = w.at[:Cc, 0, off:off + Kc, off:off + Kc].set(cen_tensor)
    w = w.at[Cc:Cc + Cd, 0, mid, :].set(dir_tensor)                          # horizontal
    w = w.at[Cc + Cd:Cc + 2 * Cd, 0, :, mid].set(dir_tensor)                 # vertical
    w = w.at[Cc + 2 * Cd:Cc + 3 * Cd, 0, idx, idx].set(dir_tensor)           # main diag
    w = w.at[Cc + 3 * Cd:Cc + 4 * Cd, 0, idx, Kd - 1 - idx].set(dir_tensor)  # anti diag

    dw = lax.conv_general_dilated(
        x, w, window_strides=(1, 1), padding="SAME",
        dimension_numbers=("NCHW", "OIHW", "NCHW"),
        feature_group_count=Cin)

    cen = dw[:, :Cc]
    dh = dw[:, Cc:Cc + Cd]
    dv = dw[:, Cc + Cd:Cc + 2 * Cd]
    dd = dw[:, Cc + 2 * Cd:Cc + 3 * Cd]
    da = dw[:, Cc + 3 * Cd:Cc + 4 * Cd]

    mix = lambda m, t: jnp.einsum("oc,nchw->nohw", m, t)
    outs = [mix(c2c, cen) + mix(p2c, dh + dv) + mix(d2c, dd + da)]
    for t in (dh, dv, dd, da):
        outs.append(mix(c2d, cen) + mix(d2d, t))
    return jnp.concatenate(outs, axis=1)


if __name__ == "__main__":
    # Small shapes consistent with the module.
    cen_in, cen_out = 4, 8
    dir_in, dir_out = 4, 4
    cen_k, dir_k = 3, 5
    N, H, W = 2, 16, 16

    key = jax.random.PRNGKey(0)
    ks = jax.random.split(key, 8)

    def kaiming_normal(k, shape, fan_out):
        # matches nn.init.kaiming_normal_(mode='fan_out', nonlinearity='relu')
        return math.sqrt(2.0 / fan_out) * jax.random.normal(k, shape, jnp.float32)

    cen_tensor = kaiming_normal(ks[0], (cen_in, cen_k, cen_k), cen_in * cen_k)
    dir_tensor = kaiming_normal(ks[1], (dir_in, dir_k), dir_in)
    cen2cen = kaiming_normal(ks[2], (cen_out, cen_in), cen_out)
    par2cen = kaiming_normal(ks[3], (cen_out, dir_in), cen_out)
    dia2cen = kaiming_normal(ks[4], (cen_out, dir_in), cen_out)
    cen2dir = kaiming_normal(ks[5], (dir_out, cen_in), dir_out)
    dir2dir = kaiming_normal(ks[6], (dir_out, dir_in), dir_out)
    x = jax.random.normal(ks[7], (N, cen_in + 4 * dir_in, H, W), jnp.float32)

    out = directional_separable_conv2d(
        x, cen_tensor, dir_tensor, cen2cen, par2cen, dia2cen, cen2dir, dir2dir)
    out = jax.block_until_ready(out)
    assert out.shape == (N, cen_out + 4 * dir_out, H, W)

    ref = _reference(x, cen_tensor, dir_tensor,
                     cen2cen, par2cen, dia2cen, cen2dir, dir2dir)
    err = jnp.max(jnp.abs(out - ref))
    assert jnp.allclose(out, ref, atol=2e-4, rtol=2e-4), f"mismatch, max abs err {err}"

    print("KERNEL_OK")
</pallas_src>

<mosaic_0001>
module attributes {stable_mosaic.version = 11 : i64} {
  func.func @kernel(%arg0: i32, %arg1: memref<36xf32, #tpu.memory_space<smem>>, %arg2: memref<20xf32, #tpu.memory_space<smem>>, %arg3: memref<32xf32, #tpu.memory_space<smem>>, %arg4: memref<32xf32, #tpu.memory_space<smem>>, %arg5: memref<32xf32, #tpu.memory_space<smem>>, %arg6: memref<16xf32, #tpu.memory_space<smem>>, %arg7: memref<16xf32, #tpu.memory_space<smem>>, %arg8: memref<1x20x5x128xf32, #tpu.memory_space<vmem>>, %arg9: memref<1x24x3x128xf32, #tpu.memory_space<vmem>>, %arg10: memref<20x3x128xf32, #tpu.memory_space<vmem>>, %arg11: memref<4x3x128xf32, #tpu.memory_space<vmem>>) attributes {dimension_semantics = [#tpu.dimension_semantics<parallel>], iteration_bounds = array<i64: 2>, scalar_prefetch = 0 : i64, scratch_operands = 2 : i64, tpu.core_type = #tpu.core_type<tc>, window_params = [{transform_indices = @transform_0, window_bounds = array<i64: 36>}, {transform_indices = @transform_1, window_bounds = array<i64: 20>}, {transform_indices = @transform_2, window_bounds = array<i64: 32>}, {transform_indices = @transform_3, window_bounds = array<i64: 32>}, {transform_indices = @transform_4, window_bounds = array<i64: 32>}, {transform_indices = @transform_5, window_bounds = array<i64: 16>}, {transform_indices = @transform_6, window_bounds = array<i64: 16>}, {transform_indices = @transform_7, window_bounds = array<i64: 1, 20, 5, 128>}, {transform_indices = @transform_8, window_bounds = array<i64: 1, 24, 3, 128>}]} {
    %c0 = arith.constant 0 : index
    %0 = memref.load %arg1[%c0] : memref<36xf32, #tpu.memory_space<smem>>
    %c0_0 = arith.constant 0 : index
    %c0_1 = arith.constant 0 : index
    %c0_2 = arith.constant 0 : index
    %c21 = arith.constant 21 : index
    %1 = vector.load %arg8[%c0_0, %c0_1, %c0_2, %c21] : memref<1x20x5x128xf32, #tpu.memory_space<vmem>>, vector<1x1x3x107xf32>
    %2 = vector.shape_cast %1 : vector<1x1x3x107xf32> to vector<3x107xf32>
    %c0_3 = arith.constant 0 : index
    %c0_4 = arith.constant 0 : index
    %c1 = arith.constant 1 : index
    %c0_5 = arith.constant 0 : index
    %3 = vector.load %arg8[%c0_3, %c0_4, %c1, %c0_5] : memref<1x20x5x128xf32, #tpu.memory_space<vmem>>, vector<1x1x3x21xf32>
    %4 = vector.shape_cast %3 : vector<1x1x3x21xf32> to vector<3x21xf32>
    %5 = tpu.concatenate %2, %4 in 1 : vector<3x107xf32>, vector<3x21xf32> -> vector<3x128xf32>
    %6 = vector.broadcast %0 : f32 to vector<3x128xf32>
    %7 = arith.mulf %6, %5 : vector<3x128xf32>
    %c1_6 = arith.constant 1 : index
    %8 = memref.load %arg1[%c1_6] : memref<36xf32, #tpu.memory_space<smem>>
    %c0_7 = arith.constant 0 : index
    %c0_8 = arith.constant 0 : index
    %c0_9 = arith.constant 0 : index
    %c22 = arith.constant 22 : index
    %9 = vector.load %arg8[%c0_7, %c0_8, %c0_9, %c22] : memref<1x20x5x128xf32, #tpu.memory_space<vmem>>, vector<1x1x3x106xf32>
    %10 = vector.shape_cast %9 : vector<1x1x3x106xf32> to vector<3x106xf32>
    %c0_10 = arith.constant 0 : index
    %c0_11 = arith.constant 0 : index
    %c1_12 = arith.constant 1 : index
    %c0_13 = arith.constant 0 : index
    %11 = vector.load %arg8[%c0_10, %c0_11, %c1_12, %c0_13] : memref<1x20x5x128xf32, #tpu.memory_space<vmem>>, vector<1x1x3x22xf32>
    %12 = vector.shape_cast %11 : vector<1x1x3x22xf32> to vector<3x22xf32>
    %13 = tpu.concatenate %10, %12 in 1 : vector<3x106xf32>, vector<3x22xf32> -> vector<3x128xf32>
    %14 = vector.broadcast %8 : f32 to vector<3x128xf32>
    %15 = arith.mulf %14, %13 : vector<3x128xf32>
    %16 = arith.addf %7, %15 : vector<3x128xf32>
    %c2 = arith.constant 2 : index
    %17 = memref.load %arg1[%c2] : memref<36xf32, #tpu.memory_space<smem>>
    %c0_14 = arith.constant 0 : index
    %c0_15 = arith.constant 0 : index
    %c0_16 = arith.constant 0 : index
    %c23 = arith.constant 23 : index
    %18 = vector.load %arg8[%c0_14, %c0_15, %c0_16, %c23] : memref<1x20x5x128xf32, #tpu.memory_space<vmem>>, vector<1x1x3x105xf32>
    %19 = vector.shape_cast %18 : vector<1x1x3x105xf32> to vector<3x105xf32>
    %c0_17 = arith.constant 0 : index
    %c0_18 = arith.constant 0 : index
    %c1_19 = arith.constant 1 : index
    %c0_20 = arith.constant 0 : index
    %20 = vector.load %arg8[%c0_17, %c0_18, %c1_19, %c0_20] : memref<1x20x5x128xf32, #tpu.memory_space<vmem>>, vector<1x1x3x23xf32>
    %21 = vector.shape_cast %20 : vector<1x1x3x23xf32> to vector<3x23xf32>
    %22 = tpu.concatenate %19, %21 in 1 : vector<3x105xf32>, vector<3x23xf32> -> vector<3x128xf32>
    %23 = vector.broadcast %17 : f32 to vector<3x128xf32>
    %24 = arith.mulf %23, %22 : vector<3x128xf32>
    %25 = arith.addf %16, %24 : vector<3x128xf32>
    %c3 = arith.constant 3 : index
    %26 = memref.load %arg1[%c3] : memref<36xf32, #tpu.memory_space<smem>>
    %c0_21 = arith.constant 0 : index
    %c0_22 = arith.constant 0 : index
    %c0_23 = arith.constant 0 : index
    %c41 = arith.constant 41 : index
    %27 = vector.load %arg8[%c0_21, %c0_22, %c0_23, %c41] : memref<1x20x5x128xf32, #tpu.memory_space<vmem>>, vector<1x1x3x87xf32>
    %28 = vector.shape_cast %27 : vector<1x1x3x87xf32> to vector<3x87xf32>
    %c0_24 = arith.constant 0 : index
    %c0_25 = arith.constant 0 : index
    %c1_26 = arith.constant 1 : index
    %c0_27 = arith.constant 0 : index
    %29 = vector.load %arg8[%c0_24, %c0_25, %c1_26, %c0_27] : memref<1x20x5x128xf32, #tpu.memory_space<vmem>>, vector<1x1x3x41xf32>
    %30 = vector.shape_cast %29 : vector<1x1x3x41xf32> to vector<3x41xf32>
    %31 = tpu.concatenate %28, %30 in 1 : vector<3x87xf32>, vector<3x41xf32> -> vector<3x128xf32>
    %32 = vector.broadcast %26 : f32 to vector<3x128xf32>
    %33 = arith.mulf %32, %31 : vector<3x128xf32>
    %34 = arith.addf %25, %33 : vector<3x128xf32>
    %c4 = arith.constant 4 : index
    %35 = memref.load %arg1[%c4] : memref<36xf32, #tpu.memory_space<smem>>
    %c0_28 = arith.constant 0 : index
    %c0_29 = arith.constant 0 : index
    %c0_30 = arith.constant 0 : index
    %c42 = arith.constant 42 : index
    %36 = vector.load %arg8[%c0_28, %c0_29, %c0_30, %c42] : memref<1x20x5x128xf32, #tpu.memory_space<vmem>>, vector<1x1x3x86xf32>
    %37 = vector.shape_cast %36 : vector<1x1x3x86xf32> to vector<3x86xf32>
    %c0_31 = arith.constant 0 : index
    %c0_32 = arith.constant 0 : index
    %c1_33 = arith.constant 1 : index
    %c0_34 = arith.constant 0 : index
    %38 = vector.load %arg8[%c0_31, %c0_32, %c1_33, %c0_34] : memref<1x20x5x128xf32, #tpu.memory_space<vmem>>, vector<1x1x3x42xf32>
    %39 = vector.shape_cast %38 : vector<1x1x3x42xf32> to vector<3x42xf32>
    %40 = tpu.concatenate %37, %39 in 1 : vector<3x86xf32>, vector<3x42xf32> -> vector<3x128xf32>
    %41 = vector.broadcast %35 : f32 to vector<3x128xf32>
    %42 = arith.mulf %41, %40 : vector<3x128xf32>
    %43 = arith.addf %34, %42 : vector<3x128xf32>
    %c5 = arith.constant 5 : index
    %44 = memref.load %arg1[%c5] : memref<36xf32, #tpu.memory_space<smem>>
    %c0_35 = arith.constant 0 : index
    %c0_36 = arith.constant 0 : index
    %c0_37 = arith.constant 0 : index
    %c43 = arith.constant 43 : index
    %45 = vector.load %arg8[%c0_35, %c0_36, %c0_37, %c43] : memref<1x20x5x128xf32, #tpu.memory_space<vmem>>, vector<1x1x3x85xf32>
    %46 = vector.shape_cast %45 : vector<1x1x3x85xf32> to vector<3x85xf32>
    %c0_38 = arith.constant 0 : index
    %c0_39 = arith.constant 0 : index
    %c1_40 = arith.constant 1 : index
    %c0_41 = arith.constant 0 : index
    %47 = vector.load %arg8[%c0_38, %c0_39, %c1_40, %c0_41] : memref<1x20x5x128xf32, #tpu.memory_space<vmem>>, vector<1x1x3x43xf32>
    %48 = vector.shape_cast %47 : vector<1x1x3x43xf32> to vector<3x43xf32>
    %49 = tpu.concatenate %46, %48 in 1 : vector<3x85xf32>, vector<3x43xf32> -> vector<3x128xf32>
    %50 = vector.broadcast %44 : f32 to vector<3x128xf32>
    %51 = arith.mulf %50, %49 : vector<3x128xf32>
    %52 = arith.addf %43, %51 : vector<3x128xf32>
    %c6 = arith.constant 6 : index
    %53 = memref.load %arg1[%c6] : memref<36xf32, #tpu.memory_space<smem>>
    %c0_42 = arith.constant 0 : index
    %c0_43 = arith.constant 0 : index
    %c0_44 = arith.constant 0 : index
    %c61 = arith.constant 61 : index
    %54 = vector.load %arg8[%c0_42, %c0_43, %c0_44, %c61] : memref<1x20x5x128xf32, #tpu.memory_space<vmem>>, vector<1x1x3x67xf32>
    %55 = vector.shape_cast %54 : vector<1x1x3x67xf32> to vector<3x67xf32>
    %c0_45 = arith.constant 0 : index
    %c0_46 = arith.constant 0 : index
    %c1_47 = arith.constant 1 : index
    %c0_48 = arith.constant 0 : index
    %56 = vector.load %arg8[%c0_45, %c0_46, %c1_47, %c0_48] : memref<1x20x5x128xf32, #tpu.memory_space<vmem>>, vector<1x1x3x61xf32>
    %57 = vector.shape_cast %56 : vector<1x1x3x61xf32> to vector<3x61xf32>
    %58 = tpu.concatenate %55, %57 in 1 : vector<3x67xf32>, vector<3x61xf32> -> vector<3x128xf32>
    %59 = vector.broadcast %53 : f32 to vector<3x128xf32>
    %60 = arith.mulf %59, %58 : vector<3x128xf32>
    %61 = arith.addf %52, %60 : vector<3x128xf32>
    %c7 = arith.constant 7 : index
    %62 = memref.load %arg1[%c7] : memref<36xf32, #tpu.memory_space<smem>>
    %c0_49 = arith.constant 0 : index
    %c0_50 = arith.constant 0 : index
    %c0_51 = arith.constant 0 : index
    %c62 = arith.constant 62 : index
    %63 = vector.load %arg8[%c0_49, %c0_50, %c0_51, %c62] : memref<1x20x5x128xf32, #tpu.memory_space<vmem>>, vector<1x1x3x66xf32>
    %64 = vector.shape_cast %63 : vector<1x1x3x66xf32> to vector<3x66xf32>
    %c0_52 = arith.constant 0 : index
    %c0_53 = arith.constant 0 : index
    %c1_54 = arith.constant 1 : index
    %c0_55 = arith.constant 0 : index
    %65 = vector.load %arg8[%c0_52, %c0_53, %c1_54, %c0_55] : memref<1x20x5x128xf32, #tpu.memory_space<vmem>>, vector<1x1x3x62xf32>
    %66 = vector.shape_cast %65 : vector<1x1x3x62xf32> to vector<3x62xf32>
    %67 = tpu.concatenate %64, %66 in 1 : vector<3x66xf32>, vector<3x62xf32> -> vector<3x128xf32>
    %68 = vector.broadcast %62 : f32 to vector<3x128xf32>
    %69 = arith.mulf %68, %67 : vector<3x128xf32>
    %70 = arith.addf %61, %69 : vector<3x128xf32>
    %c8 = arith.constant 8 : index
    %71 = memref.load %arg1[%c8] : memref<36xf32, #tpu.memory_space<smem>>
    %c0_56 = arith.constant 0 : index
    %c0_57 = arith.constant 0 : index
    %c0_58 = arith.constant 0 : index
    %c63 = arith.constant 63 : index
    %72 = vector.load %arg8[%c0_56, %c0_57, %c0_58, %c63] : memref<1x20x5x128xf32, #tpu.memory_space<vmem>>, vector<1x1x3x65xf32>
    %73 = vector.shape_cast %72 : vector<1x1x3x65xf32> to vector<3x65xf32>
    %c0_59 = arith.constant 0 : index
    %c0_60 = arith.constant 0 : index
    %c1_61 = arith.constant 1 : index
    %c0_62 = arith.constant 0 : index
    %74 = vector.load %arg8[%c0_59, %c0_60, %c1_61, %c0_62] : memref<1x20x5x128xf32, #tpu.memory_space<vmem>>, vector<1x1x3x63xf32>
    %75 = vector.shape_cast %74 : vector<1x1x3x63xf32> to vector<3x63xf32>
    %76 = tpu.concatenate %73, %75 in 1 : vector<3x65xf32>, vector<3x63xf32> -> vector<3x128xf32>
    %77 = vector.broadcast %71 : f32 to vector<3x128xf32>
    %78 = arith.mulf %77, %76 : vector<3x128xf32>
    %79 = arith.addf %70, %78 : vector<3x128xf32>
    %c0_63 = arith.constant 0 : index
    %c0_64 = arith.constant 0 : index
    %c0_65 = arith.constant 0 : index
    %80 = vector.load %arg10[%c0_63, %c0_64, %c0_65] : memref<20x3x128xf32, #tpu.memory_space<vmem>>, vector<1x3x128xf32>
    %81 = vector.shape_cast %80 : vector<1x3x128xf32> to vector<3x128xf32>
    %82 = vector.shape_cast %79 : vector<3x128xf32> to vector<1x3x128xf32>
    tpu.vector_store %arg10[%c0_63, %c0_64, %c0_65], %82 {strides = array<i32>} : memref<20x3x128xf32, #tpu.memory_space<vmem>>, vector<1x3x128xf32>,
    %c9 = arith.constant 9 : index
    %83 = memref.load %arg1[%c9] : memref<36xf32, #tpu.memory_space<smem>>
    %c0_66 = arith.constant 0 : index
    %c1_67 = arith.constant 1 : index
    %c0_68 = arith.constant 0 : index
    %c21_69 = arith.constant 21 : index
    %84 = vector.load %arg8[%c0_66, %c1_67, %c0_68, %c21_69] : memref<1x20x5x128xf32, #tpu.memory_space<vmem>>, vector<1x1x3x107xf32>
    %85 = vector.shape_cast %84 : vector<1x1x3x107xf32> to vector<3x107xf32>
    %c0_70 = arith.constant 0 : index
    %c1_71 = arith.constant 1 : index
    %c1_72 = arith.constant 1 : index
    %c0_73 = arith.constant 0 : index
    %86 = vector.load %arg8[%c0_70, %c1_71, %c1_72, %c0_73] : memref<1x20x5x128xf32, #tpu.memory_space<vmem>>, vector<1x1x3x21xf32>
    %87 = vector.shape_cast %86 : vector<1x1x3x21xf32> to vector<3x21xf32>
    %88 = tpu.concatenate %85, %87 in 1 : vector<3x107xf32>, vector<3x21xf32> -> vector<3x128xf32>
    %89 = vector.broadcast %83 : f32 to vector<3x128xf32>
    %90 = arith.mulf %89, %88 : vector<3x128xf32>
    %c10 = arith.constant 10 : index
    %91 = memref.load %arg1[%c10] : memref<36xf32, #tpu.memory_space<smem>>
    %c0_74 = arith.constant 0 : index
    %c1_75 = arith.constant 1 : index
    %c0_76 = arith.constant 0 : index
    %c22_77 = arith.constant 22 : index
    %92 = vector.load %arg8[%c0_74, %c1_75, %c0_76, %c22_77] : memref<1x20x5x128xf32, #tpu.memory_space<vmem>>, vector<1x1x3x106xf32>
    %93 = vector.shape_cast %92 : vector<1x1x3x106xf32> to vector<3x106xf32>
    %c0_78 = arith.constant 0 : index
    %c1_79 = arith.constant 1 : index
    %c1_80 = arith.constant 1 : index
    %c0_81 = arith.constant 0 : index
    %94 = vector.load %arg8[%c0_78, %c1_79, %c1_80, %c0_81] : memref<1x20x5x128xf32, #tpu.memory_space<vmem>>, vector<1x1x3x22xf32>
    %95 = vector.shape_cast %94 : vector<1x1x3x22xf32> to vector<3x22xf32>
    %96 = tpu.concatenate %93, %95 in 1 : vector<3x106xf32>, vector<3x22xf32> -> vector<3x128xf32>
    %97 = vector.broadcast %91 : f32 to vector<3x128xf32>
    %98 = arith.mulf %97, %96 : vector<3x128xf32>
    %99 = arith.addf %90, %98 : vector<3x128xf32>
    %c11 = arith.constant 11 : index
    %100 = memref.load %arg1[%c11] : memref<36xf32, #tpu.memory_space<smem>>
    %c0_82 = arith.constant 0 : index
    %c1_83 = arith.constant 1 : index
    %c0_84 = arith.constant 0 : index
    %c23_85 = arith.constant 23 : index
    %101 = vector.load %arg8[%c0_82, %c1_83, %c0_84, %c23_85] : memref<1x20x5x128xf32, #tpu.memory_space<vmem>>, vector<1x1x3x105xf32>
    %102 = vector.shape_cast %101 : vector<1x1x3x105xf32> to vector<3x105xf32>
    %c0_86 = arith.constant 0 : index
    %c1_87 = arith.constant 1 : index
    %c1_88 = arith.constant 1 : index
    %c0_89 = arith.constant 0 : index
    %103 = vector.load %arg8[%c0_86, %c1_87, %c1_88, %c0_89] : memref<1x20x5x128xf32, #tpu.memory_space<vmem>>, vector<1x1x3x23xf32>
    %104 = vector.shape_cast %103 : vector<1x1x3x23xf32> to vector<3x23xf32>
    %105 = tpu.concatenate %102, %104 in 1 : vector<3x105xf32>, vector<3x23xf32> -> vector<3x128xf32>
    %106 = vector.broadcast %100 : f32 to vector<3x128xf32>
    %107 = arith.mulf %106, %105 : vector<3x128xf32>
    %108 = arith.addf %99, %107 : vector<3x128xf32>
    %c12 = arith.constant 12 : index
    %109 = memref.load %arg1[%c12] : memref<36xf32, #tpu.memory_space<smem>>
    %c0_90 = arith.constant 0 : index
    %c1_91 = arith.constant 1 : index
    %c0_92 = arith.constant 0 : index
    %c41_93 = arith.constant 41 : index
    %110 = vector.load %arg8[%c0_90, %c1_91, %c0_92, %c41_93] : memref<1x20x5x128xf32, #tpu.memory_space<vmem>>, vector<1x1x3x87xf32>
    %111 = vector.shape_cast %110 : vector<1x1x3x87xf32> to vector<3x87xf32>
    %c0_94 = arith.constant 0 : index
    %c1_95 = arith.constant 1 : index
    %c1_96 = arith.constant 1 : index
    %c0_97 = arith.constant 0 : index
    %112 = vector.load %arg8[%c0_94, %c1_95, %c1_96, %c0_97] : memref<1x20x5x128xf32, #tpu.memory_space<vmem>>, vector<1x1x3x41xf32>
    %113 = vector.shape_cast %112 : vector<1x1x3x41xf32> to vector<3x41xf32>
    %114 = tpu.concatenate %111, %113 in 1 : vector<3x87xf32>, vector<3x41xf32> -> vector<3x128xf32>
    %115 = vector.broadcast %109 : f32 to vector<3x128xf32>
    %116 = arith.mulf %115, %114 : vector<3x128xf32>
    %117 = arith.addf %108, %116 : vector<3x128xf32>
    %c13 = arith.constant 13 : index
    %118 = memref.load %arg1[%c13] : memref<36xf32, #tpu.memory_space<smem>>
    %c0_98 = arith.constant 0 : index
    %c1_99 = arith.constant 1 : index
    %c0_100 = arith.constant 0 : index
    %c42_101 = arith.constant 42 : index
    %119 = vector.load %arg8[%c0_98, %c1_99, %c0_100, %c42_101] : memref<1x20x5x128xf32, #tpu.memory_space<vmem>>, vector<1x1x3x86xf32>
    %120 = vector.shape_cast %119 : vector<1x1x3x86xf32> to vector<3x86xf32>
    %c0_102 = arith.constant 0 : index
    %c1_103 = arith.constant 1 : index
    %c1_104 = arith.constant 1 : index
    %c0_105 = arith.constant 0 : index
    %121 = vector.load %arg8[%c0_102, %c1_103, %c1_104, %c0_105] : memref<1x20x5x128xf32, #tpu.memory_space<vmem>>, vector<1x1x3x42xf32>
    %122 = vector.shape_cast %121 : vector<1x1x3x42xf32> to vector<3x42xf32>
    %123 = tpu.concatenate %120, %122 in 1 : vector<3x86xf32>, vector<3x42xf32> -> vector<3x128xf32>
    %124 = vector.broadcast %118 : f32 to vector<3x128xf32>
    %125 = arith.mulf %124, %123 : vector<3x128xf32>
    %126 = arith.addf %117, %125 : vector<3x128xf32>
    %c14 = arith.constant 14 : index
    %127 = memref.load %arg1[%c14] : memref<36xf32, #tpu.memory_space<smem>>
    %c0_106 = arith.constant 0 : index
    %c1_107 = arith.constant 1 : index
    %c0_108 = arith.constant 0 : index
    %c43_109 = arith.constant 43 : index
    %128 = vector.load %arg8[%c0_106, %c1_107, %c0_108, %c43_109] : memref<1x20x5x128xf32, #tpu.memory_space<vmem>>, vector<1x1x3x85xf32>
    %129 = vector.shape_cast %128 : vector<1x1x3x85xf32> to vector<3x85xf32>
    %c0_110 = arith.constant 0 : index
    %c1_111 = arith.constant 1 : index
    %c1_112 = arith.constant 1 : index
    %c0_113 = arith.constant 0 : index
    %130 = vector.load %arg8[%c0_110, %c1_111, %c1_112, %c0_113] : memref<1x20x5x128xf32, #tpu.memory_space<vmem>>, vector<1x1x3x43xf32>
    %131 = vector.shape_cast %130 : vector<1x1x3x43xf32> to vector<3x43xf32>
    %132 = tpu.concatenate %129, %131 in 1 : vector<3x85xf32>, vector<3x43xf32> -> vector<3x128xf32>
    %133 = vector.broadcast %127 : f32 to vector<3x128xf32>
    %134 = arith.mulf %133, %132 : vector<3x128xf32>
    %135 = arith.addf %126, %134 : vector<3x128xf32>
    %c15 = arith.constant 15 : index
    %136 = memref.load %arg1[%c15] : memref<36xf32, #tpu.memory_space<smem>>
    %c0_114 = arith.constant 0 : index
    %c1_115 = arith.constant 1 : index
    %c0_116 = arith.constant 0 : index
    %c61_117 = arith.constant 61 : index
    %137 = vector.load %arg8[%c0_114, %c1_115, %c0_116, %c61_117] : memref<1x20x5x128xf32, #tpu.memory_space<vmem>>, vector<1x1x3x67xf32>
    %138 = vector.shape_cast %137 : vector<1x1x3x67xf32> to vector<3x67xf32>
    %c0_118 = arith.constant 0 : index
    %c1_119 = arith.constant 1 : index
    %c1_120 = arith.constant 1 : index
    %c0_121 = arith.constant 0 : index
    %139 = vector.load %arg8[%c0_118, %c1_119, %c1_120, %c0_121] : memref<1x20x5x128xf32, #tpu.memory_space<vmem>>, vector<1x1x3x61xf32>
    %140 = vector.shape_cast %139 : vector<1x1x3x61xf32> to vector<3x61xf32>
    %141 = tpu.concatenate %138, %140 in 1 : vector<3x67xf32>, vector<3x61xf32> -> vector<3x128xf32>
    %142 = vector.broadcast %136 : f32 to vector<3x128xf32>
    %143 = arith.mulf %142, %141 : vector<3x128xf32>
    %144 = arith.addf %135, %143 : vector<3x128xf32>
    %c16 = arith.constant 16 : index
    %145 = memref.load %arg1[%c16] : memref<36xf32, #tpu.memory_space<smem>>
    %c0_122 = arith.constant 0 : index
    %c1_123 = arith.constant 1 : index
    %c0_124 = arith.constant 0 : index
    %c62_125 = arith.constant 62 : index
    %146 = vector.load %arg8[%c0_122, %c1_123, %c0_124, %c62_125] : memref<1x20x5x128xf32, #tpu.memory_space<vmem>>, vector<1x1x3x66xf32>
    %147 = vector.shape_cast %146 : vector<1x1x3x66xf32> to vector<3x66xf32>
    %c0_126 = arith.constant 0 : index
    %c1_127 = arith.constant 1 : index
    %c1_128 = arith.constant 1 : index
    %c0_129 = arith.constant 0 : index
    %148 = vector.load %arg8[%c0_126, %c1_127, %c1_128, %c0_129] : memref<1x20x5x128xf32, #tpu.memory_space<vmem>>, vector<1x1x3x62xf32>
    %149 = vector.shape_cast %148 : vector<1x1x3x62xf32> to vector<3x62xf32>
    %150 = tpu.concatenate %147, %149 in 1 : vector<3x66xf32>, vector<3x62xf32> -> vector<3x128xf32>
    %151 = vector.broadcast %145 : f32 to vector<3x128xf32>
    %152 = arith.mulf %151, %150 : vector<3x128xf32>
    %153 = arith.addf %144, %152 : vector<3x128xf32>
    %c17 = arith.constant 17 : index
    %154 = memref.load %arg1[%c17] : memref<36xf32, #tpu.memory_space<smem>>
    %c0_130 = arith.constant 0 : index
    %c1_131 = arith.constant 1 : index
    %c0_132 = arith.constant 0 : index
    %c63_133 = arith.constant 63 : index
    %155 = vector.load %arg8[%c0_130, %c1_131, %c0_132, %c63_133] : memref<1x20x5x128xf32, #tpu.memory_space<vmem>>, vector<1x1x3x65xf32>
    %156 = vector.shape_cast %155 : vector<1x1x3x65xf32> to vector<3x65xf32>
    %c0_134 = arith.constant 0 : index
    %c1_135 = arith.constant 1 : index
    %c1_136 = arith.constant 1 : index
    %c0_137 = arith.constant 0 : index
    %157 = vector.load %arg8[%c0_134, %c1_135, %c1_136, %c0_137] : memref<1x20x5x128xf32, #tpu.memory_space<vmem>>, vector<1x1x3x63xf32>
    %158 = vector.shape_cast %157 : vector<1x1x3x63xf32> to vector<3x63xf32>
    %159 = tpu.concatenate %156, %158 in 1 : vector<3x65xf32>, vector<3x63xf32> -> vector<3x128xf32>
    %160 = vector.broadcast %154 : f32 to vector<3x128xf32>
    %161 = arith.mulf %160, %159 : vector<3x128xf32>
    %162 = arith.addf %153, %161 : vector<3x128xf32>
    %c1_138 = arith.constant 1 : index
    %c0_139 = arith.constant 0 : index
    %c0_140 = arith.constant 0 : index
    %163 = vector.load %arg10[%c1_138, %c0_139, %c0_140] : memref<20x3x128xf32, #tpu.memory_space<vmem>>, vector<1x3x128xf32>
    %164 = vector.shape_cast %163 : vector<1x3x128xf32> to vector<3x128xf32>
    %165 = vector.shape_cast %162 : vector<3x128xf32> to vector<1x3x128xf32>
    tpu.vector_store %arg10[%c1_138, %c0_139, %c0_140], %165 {strides = array<i32>} : memref<20x3x128xf32, #tpu.memory_space<vmem>>, vector<1x3x128xf32>,
    %c18 = arith.constant 18 : index
    %166 = memref.load %arg1[%c18] : memref<36xf32, #tpu.memory_space<smem>>
    %c0_141 = arith.constant 0 : index
    %c2_142 = arith.constant 2 : index
    %c0_143 = arith.constant 0 : index
    %c21_144 = arith.constant 21 : index
    %167 = vector.load %arg8[%c0_141, %c2_142, %c0_143, %c21_144] : memref<1x20x5x128xf32, #tpu.memory_space<vmem>>, vector<1x1x3x107xf32>
    %168 = vector.shape_cast %167 : vector<1x1x3x107xf32> to vector<3x107xf32>
    %c0_145 = arith.constant 0 : index
    %c2_146 = arith.constant 2 : index
    %c1_147 = arith.constant 1 : index
    %c0_148 = arith.constant 0 : index
    %169 = vector.load %arg8[%c0_145, %c2_146, %c1_147, %c0_148] : memref<1x20x5x128xf32, #tpu.memory_space<vmem>>, vector<1x1x3x21xf32>
    %170 = vector.shape_cast %169 : vector<1x1x3x21xf32> to vector<3x21xf32>
    %171 = tpu.concatenate %168, %170 in 1 : vector<3x107xf32>, vector<3x21xf32> -> vector<3x128xf32>
    %172 = vector.broadcast %166 : f32 to vector<3x128xf32>
    %173 = arith.mulf %172, %171 : vector<3x128xf32>
    %c19 = arith.constant 19 : index
    %174 = memref.load %arg1[%c19] : memref<36xf32, #tpu.memory_space<smem>>
    %c0_149 = arith.constant 0 : index
    %c2_150 = arith.constant 2 : index
    %c0_151 = arith.constant 0 : index
    %c22_152 = arith.constant 22 : index
    %175 = vector.load %arg8[%c0_149, %c2_150, %c0_151, %c22_152] : memref<1x20x5x128xf32, #tpu.memory_space<vmem>>, vector<1x1x3x106xf32>
    %176 = vector.shape_cast %175 : vector<1x1x3x106xf32> to vector<3x106xf32>
    %c0_153 = arith.constant 0 : index
    %c2_154 = arith.constant 2 : index
    %c1_155 = arith.constant 1 : index
    %c0_156 = arith.constant 0 : index
    %177 = vector.load %arg8[%c0_153, %c2_154, %c1_155, %c0_156] : memref<1x20x5x128xf32, #tpu.memory_space<vmem>>, vector<1x1x3x22xf32>
    %178 = vector.shape_cast %177 : vector<1x1x3x22xf32> to vector<3x22xf32>
    %179 = tpu.concatenate %176, %178 in 1 : vector<3x106xf32>, vector<3x22xf32> -> vector<3x128xf32>
    %180 = vector.broadcast %174 : f32 to vector<3x128xf32>
    %181 = arith.mulf %180, %179 : vector<3x128xf32>
    %182 = arith.addf %173, %181 : vector<3x128xf32>
    %c20 = arith.constant 20 : index
    %183 = memref.load %arg1[%c20] : memref<36xf32, #tpu.memory_space<smem>>
    %c0_157 = arith.constant 0 : index
    %c2_158 = arith.constant 2 : index
    %c0_159 = arith.constant 0 : index
    %c23_160 = arith.constant 23 : index
    %184 = vector.load %arg8[%c0_157, %c2_158, %c0_159, %c23_160] : memref<1x20x5x128xf32, #tpu.memory_space<vmem>>, vector<1x1x3x105xf32>
    %185 = vector.shape_cast %184 : vector<1x1x3x105xf32> to vector<3x105xf32>
    %c0_161 = arith.constant 0 : index
    %c2_162 = arith.constant 2 : index
    %c1_163 = arith.constant 1 : index
    %c0_164 = arith.constant 0 : index
    %186 = vector.load %arg8[%c0_161, %c2_162, %c1_163, %c0_164] : memref<1x20x5x128xf32, #tpu.memory_space<vmem>>, vector<1x1x3x23xf32>
    %187 = vector.shape_cast %186 : vector<1x1x3x23xf32> to vector<3x23xf32>
    %188 = tpu.concatenate %185, %187 in 1 : vector<3x105xf32>, vector<3x23xf32> -> vector<3x128xf32>
    %189 = vector.broadcast %183 : f32 to vector<3x128xf32>
    %190 = arith.mulf %189, %188 : vector<3x128xf32>
    %191 = arith.addf %182, %190 : vector<3x128xf32>
    %c21_165 = arith.constant 21 : index
    %192 = memref.load %arg1[%c21_165] : memref<36xf32, #tpu.memory_space<smem>>
    %c0_166 = arith.constant 0 : index
    %c2_167 = arith.constant 2 : index
    %c0_168 = arith.constant 0 : index
    %c41_169 = arith.constant 41 : index
    %193 = vector.load %arg8[%c0_166, %c2_167, %c0_168, %c41_169] : memref<1x20x5x128xf32, #tpu.memory_space<vmem>>, vector<1x1x3x87xf32>
    %194 = vector.shape_cast %193 : vector<1x1x3x87xf32> to vector<3x87xf32>
    %c0_170 = arith.constant 0 : index
    %c2_171 = arith.constant 2 : index
    %c1_172 = arith.constant 1 : index
    %c0_173 = arith.constant 0 : index
    %195 = vector.load %arg8[%c0_170, %c2_171, %c1_172, %c0_173] : memref<1x20x5x128xf32, #tpu.memory_space<vmem>>, vector<1x1x3x41xf32>
    %196 = vector.shape_cast %195 : vector<1x1x3x41xf32> to vector<3x41xf32>
    %197 = tpu.concatenate %194, %196 in 1 : vector<3x87xf32>, vector<3x41xf32> -> vector<3x128xf32>
    %198 = vector.broadcast %192 : f32 to vector<3x128xf32>
    %199 = arith.mulf %198, %197 : vector<3x128xf32>
    %200 = arith.addf %191, %199 : vector<3x128xf32>
    %c22_174 = arith.constant 22 : index
    %201 = memref.load %arg1[%c22_174] : memref<36xf32, #tpu.memory_space<smem>>
    %c0_175 = arith.constant 0 : index
    %c2_176 = arith.constant 2 : index
    %c0_177 = arith.constant 0 : index
    %c42_178 = arith.constant 42 : index
    %202 = vector.load %arg8[%c0_175, %c2_176, %c0_177, %c42_178] : memref<1x20x5x128xf32, #tpu.memory_space<vmem>>, vector<1x1x3x86xf32>
    %203 = vector.shape_cast %202 : vector<1x1x3x86xf32> to vector<3x86xf32>
    %c0_179 = arith.constant 0 : index
    %c2_180 = arith.constant 2 : index
    %c1_181 = arith.constant 1 : index
    %c0_182 = arith.constant 0 : index
    %204 = vector.load %arg8[%c0_179, %c2_180, %c1_181, %c0_182] : memref<1x20x5x128xf32, #tpu.memory_space<vmem>>, vector<1x1x3x42xf32>
    %205 = vector.shape_cast %204 : vector<1x1x3x42xf32> to vector<3x42xf32>
    %206 = tpu.concatenate %203, %205 in 1 : vector<3x86xf32>, vector<3x42xf32> -> vector<3x128xf32>
    %207 = vector.broadcast %201 : f32 to vector<3x128xf32>
    %208 = arith.mulf %207, %206 : vector<3x128xf32>
    %209 = arith.addf %200, %208 : vector<3x128xf32>
    %c23_183 = arith.constant 23 : index
    %210 = memref.load %arg1[%c23_183] : memref<36xf32, #tpu.memory_space<smem>>
    %c0_184 = arith.constant 0 : index
    %c2_185 = arith.constant 2 : index
    %c0_186 = arith.constant 0 : index
    %c43_187 = arith.constant 43 : index
    %211 = vector.load %arg8[%c0_184, %c2_185, %c0_186, %c43_187] : memref<1x20x5x128xf32, #tpu.memory_space<vmem>>, vector<1x1x3x85xf32>
    %212 = vector.shape_cast %211 : vector<1x1x3x85xf32> to vector<3x85xf32>
    %c0_188 = arith.constant 0 : index
    %c2_189 = arith.constant 2 : index
    %c1_190 = arith.constant 1 : index
    %c0_191 = arith.constant 0 : index
    %213 = vector.load %arg8[%c0_188, %c2_189, %c1_190, %c0_191] : memref<1x20x5x128xf32, #tpu.memory_space<vmem>>, vector<1x1x3x43xf32>
    %214 = vector.shape_cast %213 : vector<1x1x3x43xf32> to vector<3x43xf32>
    %215 = tpu.concatenate %212, %214 in 1 : vector<3x85xf32>, vector<3x43xf32> -> vector<3x128xf32>
    %216 = vector.broadcast %210 : f32 to vector<3x128xf32>
    %217 = arith.mulf %216, %215 : vector<3x128xf32>
    %218 = arith.addf %209, %217 : vector<3x128xf32>
    %c24 = arith.constant 24 : index
    %219 = memref.load %arg1[%c24] : memref<36xf32, #tpu.memory_space<smem>>
    %c0_192 = arith.constant 0 : index
    %c2_193 = arith.constant 2 : index
    %c0_194 = arith.constant 0 : index
    %c61_195 = arith.constant 61 : index
    %220 = vector.load %arg8[%c0_192, %c2_193, %c0_194, %c61_195] : memref<1x20x5x128xf32, #tpu.memory_space<vmem>>, vector<1x1x3x67xf32>
    %221 = vector.shape_cast %220 : vector<1x1x3x67xf32> to vector<3x67xf32>
    %c0_196 = arith.constant 0 : index
    %c2_197 = arith.constant 2 : index
    %c1_198 = arith.constant 1 : index
    %c0_199 = arith.constant 0 : index
    %222 = vector.load %arg8[%c0_196, %c2_197, %c1_198, %c0_199] : memref<1x20x5x128xf32, #tpu.memory_space<vmem>>, vector<1x1x3x61xf32>
    %223 = vector.shape_cast %222 : vector<1x1x3x61xf32> to vector<3x61xf32>
    %224 = tpu.concatenate %221, %223 in 1 : vector<3x67xf32>, vector<3x61xf32> -> vector<3x128xf32>
    %225 = vector.broadcast %219 : f32 to vector<3x128xf32>
    %226 = arith.mulf %225, %224 : vector<3x128xf32>
    %227 = arith.addf %218, %226 : vector<3x128xf32>
    %c25 = arith.constant 25 : index
    %228 = memref.load %arg1[%c25] : memref<36xf32, #tpu.memory_space<smem>>
    %c0_200 = arith.constant 0 : index
    %c2_201 = arith.constant 2 : index
    %c0_202 = arith.constant 0 : index
    %c62_203 = arith.constant 62 : index
    %229 = vector.load %arg8[%c0_200, %c2_201, %c0_202, %c62_203] : memref<1x20x5x128xf32, #tpu.memory_space<vmem>>, vector<1x1x3x66xf32>
    %230 = vector.shape_cast %229 : vector<1x1x3x66xf32> to vector<3x66xf32>
    %c0_204 = arith.constant 0 : index
    %c2_205 = arith.constant 2 : index
    %c1_206 = arith.constant 1 : index
    %c0_207 = arith.constant 0 : index
    %231 = vector.load %arg8[%c0_204, %c2_205, %c1_206, %c0_207] : memref<1x20x5x128xf32, #tpu.memory_space<vmem>>, vector<1x1x3x62xf32>
    %232 = vector.shape_cast %231 : vector<1x1x3x62xf32> to vector<3x62xf32>
    %233 = tpu.concatenate %230, %232 in 1 : vector<3x66xf32>, vector<3x62xf32> -> vector<3x128xf32>
    %234 = vector.broadcast %228 : f32 to vector<3x128xf32>
    %235 = arith.mulf %234, %233 : vector<3x128xf32>
    %236 = arith.addf %227, %235 : vector<3x128xf32>
    %c26 = arith.constant 26 : index
    %237 = memref.load %arg1[%c26] : memref<36xf32, #tpu.memory_space<smem>>
    %c0_208 = arith.constant 0 : index
    %c2_209 = arith.constant 2 : index
    %c0_210 = arith.constant 0 : index
    %c63_211 = arith.constant 63 : index
    %238 = vector.load %arg8[%c0_208, %c2_209, %c0_210, %c63_211] : memref<1x20x5x128xf32, #tpu.memory_space<vmem>>, vector<1x1x3x65xf32>
    %239 = vector.shape_cast %238 : vector<1x1x3x65xf32> to vector<3x65xf32>
    %c0_212 = arith.constant 0 : index
    %c2_213 = arith.constant 2 : index
    %c1_214 = arith.constant 1 : index
    %c0_215 = arith.constant 0 : index
    %240 = vector.load %arg8[%c0_212, %c2_213, %c1_214, %c0_215] : memref<1x20x5x128xf32, #tpu.memory_space<vmem>>, vector<1x1x3x63xf32>
    %241 = vector.shape_cast %240 : vector<1x1x3x63xf32> to vector<3x63xf32>
    %242 = tpu.concatenate %239, %241 in 1 : vector<3x65xf32>, vector<3x63xf32> -> vector<3x128xf32>
    %243 = vector.broadcast %237 : f32 to vector<3x128xf32>
    %244 = arith.mulf %243, %242 : vector<3x128xf32>
    %245 = arith.addf %236, %244 : vector<3x128xf32>
    %c2_216 = arith.constant 2 : index
    %c0_217 = arith.constant 0 : index
    %c0_218 = arith.constant 0 : index
    %246 = vector.load %arg10[%c2_216, %c0_217, %c0_218] : memref<20x3x128xf32, #tpu.memory_space<vmem>>, vector<1x3x128xf32>
    %247 = vector.shape_cast %246 : vector<1x3x128xf32> to vector<3x128xf32>
    %248 = vector.shape_cast %245 : vector<3x128xf32> to vector<1x3x128xf32>
    tpu.vector_store %arg10[%c2_216, %c0_217, %c0_218], %248 {strides = array<i32>} : memref<20x3x128xf32, #tpu.memory_space<vmem>>, vector<1x3x128xf32>,
    %c27 = arith.constant 27 : index
    %249 = memref.load %arg1[%c27] : memref<36xf32, #tpu.memory_space<smem>>
    %c0_219 = arith.constant 0 : index
    %c3_220 = arith.constant 3 : index
    %c0_221 = arith.constant 0 : index
    %c21_222 = arith.constant 21 : index
    %250 = vector.load %arg8[%c0_219, %c3_220, %c0_221, %c21_222] : memref<1x20x5x128xf32, #tpu.memory_space<vmem>>, vector<1x1x3x107xf32>
    %251 = vector.shape_cast %250 : vector<1x1x3x107xf32> to vector<3x107xf32>
    %c0_223 = arith.constant 0 : index
    %c3_224 = arith.constant 3 : index
    %c1_225 = arith.constant 1 : index
    %c0_226 = arith.constant 0 : index
    %252 = vector.load %arg8[%c0_223, %c3_224, %c1_225, %c0_226] : memref<1x20x5x128xf32, #tpu.memory_space<vmem>>, vector<1x1x3x21xf32>
    %253 = vector.shape_cast %252 : vector<1x1x3x21xf32> to vector<3x21xf32>
    %254 = tpu.concatenate %251, %253 in 1 : vector<3x107xf32>, vector<3x21xf32> -> vector<3x128xf32>
    %255 = vector.broadcast %249 : f32 to vector<3x128xf32>
    %256 = arith.mulf %255, %254 : vector<3x128xf32>
    %c28 = arith.constant 28 : index
    %257 = memref.load %arg1[%c28] : memref<36xf32, #tpu.memory_space<smem>>
    %c0_227 = arith.constant 0 : index
    %c3_228 = arith.constant 3 : index
    %c0_229 = arith.constant 0 : index
    %c22_230 = arith.constant 22 : index
    %258 = vector.load %arg8[%c0_227, %c3_228, %c0_229, %c22_230] : memref<1x20x5x128xf32, #tpu.memory_space<vmem>>, vector<1x1x3x106xf32>
    %259 = vector.shape_cast %258 : vector<1x1x3x106xf32> to vector<3x106xf32>
    %c0_231 = arith.constant 0 : index
    %c3_232 = arith.constant 3 : index
    %c1_233 = arith.constant 1 : index
    %c0_234 = arith.constant 0 : index
    %260 = vector.load %arg8[%c0_231, %c3_232, %c1_233, %c0_234] : memref<1x20x5x128xf32, #tpu.memory_space<vmem>>, vector<1x1x3x22xf32>
    %261 = vector.shape_cast %260 : vector<1x1x3x22xf32> to vector<3x22xf32>
    %262 = tpu.concatenate %259, %261 in 1 : vector<3x106xf32>, vector<3x22xf32> -> vector<3x128xf32>
    %263 = vector.broadcast %257 : f32 to vector<3x128xf32>
    %264 = arith.mulf %263, %262 : vector<3x128xf32>
    %265 = arith.addf %256, %264 : vector<3x128xf32>
    %c29 = arith.constant 29 : index
    %266 = memref.load %arg1[%c29] : memref<36xf32, #tpu.memory_space<smem>>
    %c0_235 = arith.constant 0 : index
    %c3_236 = arith.constant 3 : index
    %c0_237 = arith.constant 0 : index
    %c23_238 = arith.constant 23 : index
    %267 = vector.load %arg8[%c0_235, %c3_236, %c0_237, %c23_238] : memref<1x20x5x128xf32, #tpu.memory_space<vmem>>, vector<1x1x3x105xf32>
    %268 = vector.shape_cast %267 : vector<1x1x3x105xf32> to vector<3x105xf32>
    %c0_239 = arith.constant 0 : index
    %c3_240 = arith.constant 3 : index
    %c1_241 = arith.constant 1 : index
    %c0_242 = arith.constant 0 : index
    %269 = vector.load %arg8[%c0_239, %c3_240, %c1_241, %c0_242] : memref<1x20x5x128xf32, #tpu.memory_space<vmem>>, vector<1x1x3x23xf32>
    %270 = vector.shape_cast %269 : vector<1x1x3x23xf32> to vector<3x23xf32>
    %271 = tpu.concatenate %268, %270 in 1 : vector<3x105xf32>, vector<3x23xf32> -> vector<3x128xf32>
    %272 = vector.broadcast %266 : f32 to vector<3x128xf32>
    %273 = arith.mulf %272, %271 : vector<3x128xf32>
    %274 = arith.addf %265, %273 : vector<3x128xf32>
    %c30 = arith.constant 30 : index
    %275 = memref.load %arg1[%c30] : memref<36xf32, #tpu.memory_space<smem>>
    %c0_243 = arith.constant 0 : index
    %c3_244 = arith.constant 3 : index
    %c0_245 = arith.constant 0 : index
    %c41_246 = arith.constant 41 : index
    %276 = vector.load %arg8[%c0_243, %c3_244, %c0_245, %c41_246] : memref<1x20x5x128xf32, #tpu.memory_space<vmem>>, vector<1x1x3x87xf32>
    %277 = vector.shape_cast %276 : vector<1x1x3x87xf32> to vector<3x87xf32>
    %c0_247 = arith.constant 0 : index
    %c3_248 = arith.constant 3 : index
    %c1_249 = arith.constant 1 : index
    %c0_250 = arith.constant 0 : index
    %278 = vector.load %arg8[%c0_247, %c3_248, %c1_249, %c0_250] : memref<1x20x5x128xf32, #tpu.memory_space<vmem>>, vector<1x1x3x41xf32>
    %279 = vector.shape_cast %278 : vector<1x1x3x41xf32> to vector<3x41xf32>
    %280 = tpu.concatenate %277, %279 in 1 : vector<3x87xf32>, vector<3x41xf32> -> vector<3x128xf32>
    %281 = vector.broadcast %275 : f32 to vector<3x128xf32>
    %282 = arith.mulf %281, %280 : vector<3x128xf32>
    %283 = arith.addf %274, %282 : vector<3x128xf32>
    %c31 = arith.constant 31 : index
    %284 = memref.load %arg1[%c31] : memref<36xf32, #tpu.memory_space<smem>>
    %c0_251 = arith.constant 0 : index
    %c3_252 = arith.constant 3 : index
    %c0_253 = arith.constant 0 : index
    %c42_254 = arith.constant 42 : index
    %285 = vector.load %arg8[%c0_251, %c3_252, %c0_253, %c42_254] : memref<1x20x5x128xf32, #tpu.memory_space<vmem>>, vector<1x1x3x86xf32>
    %286 = vector.shape_cast %285 : vector<1x1x3x86xf32> to vector<3x86xf32>
    %c0_255 = arith.constant 0 : index
    %c3_256 = arith.constant 3 : index
    %c1_257 = arith.constant 1 : index
    %c0_258 = arith.constant 0 : index
    %287 = vector.load %arg8[%c0_255, %c3_256, %c1_257, %c0_258] : memref<1x20x5x128xf32, #tpu.memory_space<vmem>>, vector<1x1x3x42xf32>
    %288 = vector.shape_cast %287 : vector<1x1x3x42xf32> to vector<3x42xf32>
    %289 = tpu.concatenate %286, %288 in 1 : vector<3x86xf32>, vector<3x42xf32> -> vector<3x128xf32>
    %290 = vector.broadcast %284 : f32 to vector<3x128xf32>
    %291 = arith.mulf %290, %289 : vector<3x128xf32>
    %292 = arith.addf %283, %291 : vector<3x128xf32>
    %c32 = arith.constant 32 : index
    %293 = memref.load %arg1[%c32] : memref<36xf32, #tpu.memory_space<smem>>
    %c0_259 = arith.constant 0 : index
    %c3_260 = arith.constant 3 : index
    %c0_261 = arith.constant 0 : index
    %c43_262 = arith.constant 43 : index
    %294 = vector.load %arg8[%c0_259, %c3_260, %c0_261, %c43_262] : memref<1x20x5x128xf32, #tpu.memory_space<vmem>>, vector<1x1x3x85xf32>
    %295 = vector.shape_cast %294 : vector<1x1x3x85xf32> to vector<3x85xf32>
    %c0_263 = arith.constant 0 : index
    %c3_264 = arith.constant 3 : index
    %c1_265 = arith.constant 1 : index
    %c0_266 = arith.constant 0 : index
    %296 = vector.load %arg8[%c0_263, %c3_264, %c1_265, %c0_266] : memref<1x20x5x128xf32, #tpu.memory_space<vmem>>, vector<1x1x3x43xf32>
    %297 = vector.shape_cast %296 : vector<1x1x3x43xf32> to vector<3x43xf32>
    %298 = tpu.concatenate %295, %297 in 1 : vector<3x85xf32>, vector<3x43xf32> -> vector<3x128xf32>
    %299 = vector.broadcast %293 : f32 to vector<3x128xf32>
    %300 = arith.mulf %299, %298 : vector<3x128xf32>
    %301 = arith.addf %292, %300 : vector<3x128xf32>
    %c33 = arith.constant 33 : index
    %302 = memref.load %arg1[%c33] : memref<36xf32, #tpu.memory_space<smem>>
    %c0_267 = arith.constant 0 : index
    %c3_268 = arith.constant 3 : index
    %c0_269 = arith.constant 0 : index
    %c61_270 = arith.constant 61 : index
    %303 = vector.load %arg8[%c0_267, %c3_268, %c0_269, %c61_270] : memref<1x20x5x128xf32, #tpu.memory_space<vmem>>, vector<1x1x3x67xf32>
    %304 = vector.shape_cast %303 : vector<1x1x3x67xf32> to vector<3x67xf32>
    %c0_271 = arith.constant 0 : index
    %c3_272 = arith.constant 3 : index
    %c1_273 = arith.constant 1 : index
    %c0_274 = arith.constant 0 : index
    %305 = vector.load %arg8[%c0_271, %c3_272, %c1_273, %c0_274] : memref<1x20x5x128xf32, #tpu.memory_space<vmem>>, vector<1x1x3x61xf32>
    %306 = vector.shape_cast %305 : vector<1x1x3x61xf32> to vector<3x61xf32>
    %307 = tpu.concatenate %304, %306 in 1 : vector<3x67xf32>, vector<3x61xf32> -> vector<3x128xf32>
    %308 = vector.broadcast %302 : f32 to vector<3x128xf32>
    %309 = arith.mulf %308, %307 : vector<3x128xf32>
    %310 = arith.addf %301, %309 : vector<3x128xf32>
    %c34 = arith.constant 34 : index
    %311 = memref.load %arg1[%c34] : memref<36xf32, #tpu.memory_space<smem>>
    %c0_275 = arith.constant 0 : index
    %c3_276 = arith.constant 3 : index
    %c0_277 = arith.constant 0 : index
    %c62_278 = arith.constant 62 : index
    %312 = vector.load %arg8[%c0_275, %c3_276, %c0_277, %c62_278] : memref<1x20x5x128xf32, #tpu.memory_space<vmem>>, vector<1x1x3x66xf32>
    %313 = vector.shape_cast %312 : vector<1x1x3x66xf32> to vector<3x66xf32>
    %c0_279 = arith.constant 0 : index
    %c3_280 = arith.constant 3 : index
    %c1_281 = arith.constant 1 : index
    %c0_282 = arith.constant 0 : index
    %314 = vector.load %arg8[%c0_279, %c3_280, %c1_281, %c0_282] : memref<1x20x5x128xf32, #tpu.memory_space<vmem>>, vector<1x1x3x62xf32>
    %315 = vector.shape_cast %314 : vector<1x1x3x62xf32> to vector<3x62xf32>
    %316 = tpu.concatenate %313, %315 in 1 : vector<3x66xf32>, vector<3x62xf32> -> vector<3x128xf32>
    %317 = vector.broadcast %311 : f32 to vector<3x128xf32>
    %318 = arith.mulf %317, %316 : vector<3x128xf32>
    %319 = arith.addf %310, %318 : vector<3x128xf32>
    %c35 = arith.constant 35 : index
    %320 = memref.load %arg1[%c35] : memref<36xf32, #tpu.memory_space<smem>>
    %c0_283 = arith.constant 0 : index
    %c3_284 = arith.constant 3 : index
    %c0_285 = arith.constant 0 : index
    %c63_286 = arith.constant 63 : index
    %321 = vector.load %arg8[%c0_283, %c3_284, %c0_285, %c63_286] : memref<1x20x5x128xf32, #tpu.memory_space<vmem>>, vector<1x1x3x65xf32>
    %322 = vector.shape_cast %321 : vector<1x1x3x65xf32> to vector<3x65xf32>
    %c0_287 = arith.constant 0 : index
    %c3_288 = arith.constant 3 : index
    %c1_289 = arith.constant 1 : index
    %c0_290 = arith.constant 0 : index
    %323 = vector.load %arg8[%c0_287, %c3_288, %c1_289, %c0_290] : memref<1x20x5x128xf32, #tpu.memory_space<vmem>>, vector<1x1x3x63xf32>
    %324 = vector.shape_cast %323 : vector<1x1x3x63xf32> to vector<3x63xf32>
    %325 = tpu.concatenate %322, %324 in 1 : vector<3x65xf32>, vector<3x63xf32> -> vector<3x128xf32>
    %326 = vector.broadcast %320 : f32 to vector<3x128xf32>
    %327 = arith.mulf %326, %325 : vector<3x128xf32>
    %328 = arith.addf %319, %327 : vector<3x128xf32>
    %c3_291 = arith.constant 3 : index
    %c0_292 = arith.constant 0 : index
    %c0_293 = arith.constant 0 : index
    %329 = vector.load %arg10[%c3_291, %c0_292, %c0_293] : memref<20x3x128xf32, #tpu.memory_space<vmem>>, vector<1x3x128xf32>
    %330 = vector.shape_cast %329 : vector<1x3x128xf32> to vector<3x128xf32>
    %331 = vector.shape_cast %328 : vector<3x128xf32> to vector<1x3x128xf32>
    tpu.vector_store %arg10[%c3_291, %c0_292, %c0_293], %331 {strides = array<i32>} : memref<20x3x128xf32, #tpu.memory_space<vmem>>, vector<1x3x128xf32>,
    %c0_294 = arith.constant 0 : index
    %332 = memref.load %arg2[%c0_294] : memref<20xf32, #tpu.memory_space<smem>>
    %c0_295 = arith.constant 0 : index
    %c4_296 = arith.constant 4 : index
    %c0_297 = arith.constant 0 : index
    %c40 = arith.constant 40 : index
    %333 = vector.load %arg8[%c0_295, %c4_296, %c0_297, %c40] : memref<1x20x5x128xf32, #tpu.memory_space<vmem>>, vector<1x1x3x88xf32>
    %334 = vector.shape_cast %333 : vector<1x1x3x88xf32> to vector<3x88xf32>
    %c0_298 = arith.constant 0 : index
    %c4_299 = arith.constant 4 : index
    %c1_300 = arith.constant 1 : index
    %c0_301 = arith.constant 0 : index
    %335 = vector.load %arg8[%c0_298, %c4_299, %c1_300, %c0_301] : memref<1x20x5x128xf32, #tpu.memory_space<vmem>>, vector<1x1x3x40xf32>
    %336 = vector.shape_cast %335 : vector<1x1x3x40xf32> to vector<3x40xf32>
    %337 = tpu.concatenate %334, %336 in 1 : vector<3x88xf32>, vector<3x40xf32> -> vector<3x128xf32>
    %338 = vector.broadcast %332 : f32 to vector<3x128xf32>
    %339 = arith.mulf %338, %337 : vector<3x128xf32>
    %c1_302 = arith.constant 1 : index
    %340 = memref.load %arg2[%c1_302] : memref<20xf32, #tpu.memory_space<smem>>
    %c0_303 = arith.constant 0 : index
    %c4_304 = arith.constant 4 : index
    %c0_305 = arith.constant 0 : index
    %c41_306 = arith.constant 41 : index
    %341 = vector.load %arg8[%c0_303, %c4_304, %c0_305, %c41_306] : memref<1x20x5x128xf32, #tpu.memory_space<vmem>>, vector<1x1x3x87xf32>
    %342 = vector.shape_cast %341 : vector<1x1x3x87xf32> to vector<3x87xf32>
    %c0_307 = arith.constant 0 : index
    %c4_308 = arith.constant 4 : index
    %c1_309 = arith.constant 1 : index
    %c0_310 = arith.constant 0 : index
    %343 = vector.load %arg8[%c0_307, %c4_308, %c1_309, %c0_310] : memref<1x20x5x128xf32, #tpu.memory_space<vmem>>, vector<1x1x3x41xf32>
    %344 = vector.shape_cast %343 : vector<1x1x3x41xf32> to vector<3x41xf32>
    %345 = tpu.concatenate %342, %344 in 1 : vector<3x87xf32>, vector<3x41xf32> -> vector<3x128xf32>
    %346 = vector.broadcast %340 : f32 to vector<3x128xf32>
    %347 = arith.mulf %346, %345 : vector<3x128xf32>
    %348 = arith.addf %339, %347 : vector<3x128xf32>
    %c2_311 = arith.constant 2 : index
    %349 = memref.load %arg2[%c2_311] : memref<20xf32, #tpu.memory_space<smem>>
    %c0_312 = arith.constant 0 : index
    %c4_313 = arith.constant 4 : index
    %c0_314 = arith.constant 0 : index
    %c42_315 = arith.constant 42 : index
    %350 = vector.load %arg8[%c0_312, %c4_313, %c0_314, %c42_315] : memref<1x20x5x128xf32, #tpu.memory_space<vmem>>, vector<1x1x3x86xf32>
    %351 = vector.shape_cast %350 : vector<1x1x3x86xf32> to vector<3x86xf32>
    %c0_316 = arith.constant 0 : index
    %c4_317 = arith.constant 4 : index
    %c1_318 = arith.constant 1 : index
    %c0_319 = arith.constant 0 : index
    %352 = vector.load %arg8[%c0_316, %c4_317, %c1_318, %c0_319] : memref<1x20x5x128xf32, #tpu.memory_space<vmem>>, vector<1x1x3x42xf32>
    %353 = vector.shape_cast %352 : vector<1x1x3x42xf32> to vector<3x42xf32>
    %354 = tpu.concatenate %351, %353 in 1 : vector<3x86xf32>, vector<3x42xf32> -> vector<3x128xf32>
    %355 = vector.broadcast %349 : f32 to vector<3x128xf32>
    %356 = arith.mulf %355, %354 : vector<3x128xf32>
    %357 = arith.addf %348, %356 : vector<3x128xf32>
    %c3_320 = arith.constant 3 : index
    %358 = memref.load %arg2[%c3_320] : memref<20xf32, #tpu.memory_space<smem>>
    %c0_321 = arith.constant 0 : index
    %c4_322 = arith.constant 4 : index
    %c0_323 = arith.constant 0 : index
    %c43_324 = arith.constant 43 : index
    %359 = vector.load %arg8[%c0_321, %c4_322, %c0_323, %c43_324] : memref<1x20x5x128xf32, #tpu.memory_space<vmem>>, vector<1x1x3x85xf32>
    %360 = vector.shape_cast %359 : vector<1x1x3x85xf32> to vector<3x85xf32>
    %c0_325 = arith.constant 0 : index
    %c4_326 = arith.constant 4 : index
    %c1_327 = arith.constant 1 : index
    %c0_328 = arith.constant 0 : index
    %361 = vector.load %arg8[%c0_325, %c4_326, %c1_327, %c0_328] : memref<1x20x5x128xf32, #tpu.memory_space<vmem>>, vector<1x1x3x43xf32>
    %362 = vector.shape_cast %361 : vector<1x1x3x43xf32> to vector<3x43xf32>
    %363 = tpu.concatenate %360, %362 in 1 : vector<3x85xf32>, vector<3x43xf32> -> vector<3x128xf32>
    %364 = vector.broadcast %358 : f32 to vector<3x128xf32>
    %365 = arith.mulf %364, %363 : vector<3x128xf32>
    %366 = arith.addf %357, %365 : vector<3x128xf32>
    %c4_329 = arith.constant 4 : index
    %367 = memref.load %arg2[%c4_329] : memref<20xf32, #tpu.memory_space<smem>>
    %c0_330 = arith.constant 0 : index
    %c4_331 = arith.constant 4 : index
    %c0_332 = arith.constant 0 : index
    %c44 = arith.constant 44 : index
    %368 = vector.load %arg8[%c0_330, %c4_331, %c0_332, %c44] : memref<1x20x5x128xf32, #tpu.memory_space<vmem>>, vector<1x1x3x84xf32>
    %369 = vector.shape_cast %368 : vector<1x1x3x84xf32> to vector<3x84xf32>
    %c0_333 = arith.constant 0 : index
    %c4_334 = arith.constant 4 : index
    %c1_335 = arith.constant 1 : index
    %c0_336 = arith.constant 0 : index
    %370 = vector.load %arg8[%c0_333, %c4_334, %c1_335, %c0_336] : memref<1x20x5x128xf32, #tpu.memory_space<vmem>>, vector<1x1x3x44xf32>
    %371 = vector.shape_cast %370 : vector<1x1x3x44xf32> to vector<3x44xf32>
    %372 = tpu.concatenate %369, %371 in 1 : vector<3x84xf32>, vector<3x44xf32> -> vector<3x128xf32>
    %373 = vector.broadcast %367 : f32 to vector<3x128xf32>
    %374 = arith.mulf %373, %372 : vector<3x128xf32>
    %375 = arith.addf %366, %374 : vector<3x128xf32>
    %c4_337 = arith.constant 4 : index
    %c0_338 = arith.constant 0 : index
    %c0_339 = arith.constant 0 : index
    %376 = vector.load %arg10[%c4_337, %c0_338, %c0_339] : memref<20x3x128xf32, #tpu.memory_space<vmem>>, vector<1x3x128xf32>
    %377 = vector.shape_cast %376 : vector<1x3x128xf32> to vector<3x128xf32>
    %378 = vector.shape_cast %375 : vector<3x128xf32> to vector<1x3x128xf32>
    tpu.vector_store %arg10[%c4_337, %c0_338, %c0_339], %378 {strides = array<i32>} : memref<20x3x128xf32, #tpu.memory_space<vmem>>, vector<1x3x128xf32>,
    %c5_340 = arith.constant 5 : index
    %379 = memref.load %arg2[%c5_340] : memref<20xf32, #tpu.memory_space<smem>>
    %c0_341 = arith.constant 0 : index
    %c5_342 = arith.constant 5 : index
    %c0_343 = arith.constant 0 : index
    %c40_344 = arith.constant 40 : index
    %380 = vector.load %arg8[%c0_341, %c5_342, %c0_343, %c40_344] : memref<1x20x5x128xf32, #tpu.memory_space<vmem>>, vector<1x1x3x88xf32>
    %381 = vector.shape_cast %380 : vector<1x1x3x88xf32> to vector<3x88xf32>
    %c0_345 = arith.constant 0 : index
    %c5_346 = arith.constant 5 : index
    %c1_347 = arith.constant 1 : index
    %c0_348 = arith.constant 0 : index
    %382 = vector.load %arg8[%c0_345, %c5_346, %c1_347, %c0_348] : memref<1x20x5x128xf32, #tpu.memory_space<vmem>>, vector<1x1x3x40xf32>
    %383 = vector.shape_cast %382 : vector<1x1x3x40xf32> to vector<3x40xf32>
    %384 = tpu.concatenate %381, %383 in 1 : vector<3x88xf32>, vector<3x40xf32> -> vector<3x128xf32>
    %385 = vector.broadcast %379 : f32 to vector<3x128xf32>
    %386 = arith.mulf %385, %384 : vector<3x128xf32>
    %c6_349 = arith.constant 6 : index
    %387 = memref.load %arg2[%c6_349] : memref<20xf32, #tpu.memory_space<smem>>
    %c0_350 = arith.constant 0 : index
    %c5_351 = arith.constant 5 : index
    %c0_352 = arith.constant 0 : index
    %c41_353 = arith.constant 41 : index
    %388 = vector.load %arg8[%c0_350, %c5_351, %c0_352, %c41_353] : memref<1x20x5x128xf32, #tpu.memory_space<vmem>>, vector<1x1x3x87xf32>
    %389 = vector.shape_cast %388 : vector<1x1x3x87xf32> to vector<3x87xf32>
    %c0_354 = arith.constant 0 : index
    %c5_355 = arith.constant 5 : index
    %c1_356 = arith.constant 1 : index
    %c0_357 = arith.constant 0 : index
    %390 = vector.load %arg8[%c0_354, %c5_355, %c1_356, %c0_357] : memref<1x20x5x128xf32, #tpu.memory_space<vmem>>, vector<1x1x3x41xf32>
    %391 = vector.shape_cast %390 : vector<1x1x3x41xf32> to vector<3x41xf32>
    %392 = tpu.concatenate %389, %391 in 1 : vector<3x87xf32>, vector<3x41xf32> -> vector<3x128xf32>
    %393 = vector.broadcast %387 : f32 to vector<3x128xf32>
    %394 = arith.mulf %393, %392 : vector<3x128xf32>
    %395 = arith.addf %386, %394 : vector<3x128xf32>
    %c7_358 = arith.constant 7 : index
    %396 = memref.load %arg2[%c7_358] : memref<20xf32, #tpu.memory_space<smem>>
    %c0_359 = arith.constant 0 : index
    %c5_360 = arith.constant 5 : index
    %c0_361 = arith.constant 0 : index
    %c42_362 = arith.constant 42 : index
    %397 = vector.load %arg8[%c0_359, %c5_360, %c0_361, %c42_362] : memref<1x20x5x128xf32, #tpu.memory_space<vmem>>, vector<1x1x3x86xf32>
    %398 = vector.shape_cast %397 : vector<1x1x3x86xf32> to vector<3x86xf32>
    %c0_363 = arith.constant 0 : index
    %c5_364 = arith.constant 5 : index
    %c1_365 = arith.constant 1 : index
    %c0_366 = arith.constant 0 : index
    %399 = vector.load %arg8[%c0_363, %c5_364, %c1_365, %c0_366] : memref<1x20x5x128xf32, #tpu.memory_space<vmem>>, vector<1x1x3x42xf32>
    %400 = vector.shape_cast %399 : vector<1x1x3x42xf32> to vector<3x42xf32>
    %401 = tpu.concatenate %398, %400 in 1 : vector<3x86xf32>, vector<3x42xf32> -> vector<3x128xf32>
    %402 = vector.broadcast %396 : f32 to vector<3x128xf32>
    %403 = arith.mulf %402, %401 : vector<3x128xf32>
    %404 = arith.addf %395, %403 : vector<3x128xf32>
    %c8_367 = arith.constant 8 : index
    %405 = memref.load %arg2[%c8_367] : memref<20xf32, #tpu.memory_space<smem>>
    %c0_368 = arith.constant 0 : index
    %c5_369 = arith.constant 5 : index
    %c0_370 = arith.constant 0 : index
    %c43_371 = arith.constant 43 : index
    %406 = vector.load %arg8[%c0_368, %c5_369, %c0_370, %c43_371] : memref<1x20x5x128xf32, #tpu.memory_space<vmem>>, vector<1x1x3x85xf32>
    %407 = vector.shape_cast %406 : vector<1x1x3x85xf32> to vector<3x85xf32>
    %c0_372 = arith.constant 0 : index
    %c5_373 = arith.constant 5 : index
    %c1_374 = arith.constant 1 : index
    %c0_375 = arith.constant 0 : index
    %408 = vector.load %arg8[%c0_372, %c5_373, %c1_374, %c0_375] : memref<1x20x5x128xf32, #tpu.memory_space<vmem>>, vector<1x1x3x43xf32>
    %409 = vector.shape_cast %408 : vector<1x1x3x43xf32> to vector<3x43xf32>
    %410 = tpu.concatenate %407, %409 in 1 : vector<3x85xf32>, vector<3x43xf32> -> vector<3x128xf32>
    %411 = vector.broadcast %405 : f32 to vector<3x128xf32>
    %412 = arith.mulf %411, %410 : vector<3x128xf32>
    %413 = arith.addf %404, %412 : vector<3x128xf32>
    %c9_376 = arith.constant 9 : index
    %414 = memref.load %arg2[%c9_376] : memref<20xf32, #tpu.memory_space<smem>>
    %c0_377 = arith.constant 0 : index
    %c5_378 = arith.constant 5 : index
    %c0_379 = arith.constant 0 : index
    %c44_380 = arith.constant 44 : index
    %415 = vector.load %arg8[%c0_377, %c5_378, %c0_379, %c44_380] : memref<1x20x5x128xf32, #tpu.memory_space<vmem>>, vector<1x1x3x84xf32>
    %416 = vector.shape_cast %415 : vector<1x1x3x84xf32> to vector<3x84xf32>
    %c0_381 = arith.constant 0 : index
    %c5_382 = arith.constant 5 : index
    %c1_383 = arith.constant 1 : index
    %c0_384 = arith.constant 0 : index
    %417 = vector.load %arg8[%c0_381, %c5_382, %c1_383, %c0_384] : memref<1x20x5x128xf32, #tpu.memory_space<vmem>>, vector<1x1x3x44xf32>
    %418 = vector.shape_cast %417 : vector<1x1x3x44xf32> to vector<3x44xf32>
    %419 = tpu.concatenate %416, %418 in 1 : vector<3x84xf32>, vector<3x44xf32> -> vector<3x128xf32>
    %420 = vector.broadcast %414 : f32 to vector<3x128xf32>
    %421 = arith.mulf %420, %419 : vector<3x128xf32>
    %422 = arith.addf %413, %421 : vector<3x128xf32>
    %c5_385 = arith.constant 5 : index
    %c0_386 = arith.constant 0 : index
    %c0_387 = arith.constant 0 : index
    %423 = vector.load %arg10[%c5_385, %c0_386, %c0_387] : memref<20x3x128xf32, #tpu.memory_space<vmem>>, vector<1x3x128xf32>
    %424 = vector.shape_cast %423 : vector<1x3x128xf32> to vector<3x128xf32>
    %425 = vector.shape_cast %422 : vector<3x128xf32> to vector<1x3x128xf32>
    tpu.vector_store %arg10[%c5_385, %c0_386, %c0_387], %425 {strides = array<i32>} : memref<20x3x128xf32, #tpu.memory_space<vmem>>, vector<1x3x128xf32>,
    %c10_388 = arith.constant 10 : index
    %426 = memref.load %arg2[%c10_388] : memref<20xf32, #tpu.memory_space<smem>>
    %c0_389 = arith.constant 0 : index
    %c6_390 = arith.constant 6 : index
    %c0_391 = arith.constant 0 : index
    %c40_392 = arith.constant 40 : index
    %427 = vector.load %arg8[%c0_389, %c6_390, %c0_391, %c40_392] : memref<1x20x5x128xf32, #tpu.memory_space<vmem>>, vector<1x1x3x88xf32>
    %428 = vector.shape_cast %427 : vector<1x1x3x88xf32> to vector<3x88xf32>
    %c0_393 = arith.constant 0 : index
    %c6_394 = arith.constant 6 : index
    %c1_395 = arith.constant 1 : index
    %c0_396 = arith.constant 0 : index
    %429 = vector.load %arg8[%c0_393, %c6_394, %c1_395, %c0_396] : memref<1x20x5x128xf32, #tpu.memory_space<vmem>>, vector<1x1x3x40xf32>
    %430 = vector.shape_cast %429 : vector<1x1x3x40xf32> to vector<3x40xf32>
    %431 = tpu.concatenate %428, %430 in 1 : vector<3x88xf32>, vector<3x40xf32> -> vector<3x128xf32>
    %432 = vector.broadcast %426 : f32 to vector<3x128xf32>
    %433 = arith.mulf %432, %431 : vector<3x128xf32>
    %c11_397 = arith.constant 11 : index
    %434 = memref.load %arg2[%c11_397] : memref<20xf32, #tpu.memory_space<smem>>
    %c0_398 = arith.constant 0 : index
    %c6_399 = arith.constant 6 : index
    %c0_400 = arith.constant 0 : index
    %c41_401 = arith.constant 41 : index
    %435 = vector.load %arg8[%c0_398, %c6_399, %c0_400, %c41_401] : memref<1x20x5x128xf32, #tpu.memory_space<vmem>>, vector<1x1x3x87xf32>
    %436 = vector.shape_cast %435 : vector<1x1x3x87xf32> to vector<3x87xf32>
    %c0_402 = arith.constant 0 : index
    %c6_403 = arith.constant 6 : index
    %c1_404 = arith.constant 1 : index
    %c0_405 = arith.constant 0 : index
    %437 = vector.load %arg8[%c0_402, %c6_403, %c1_404, %c0_405] : memref<1x20x5x128xf32, #tpu.memory_space<vmem>>, vector<1x1x3x41xf32>
    %438 = vector.shape_cast %437 : vector<1x1x3x41xf32> to vector<3x41xf32>
    %439 = tpu.concatenate %436, %438 in 1 : vector<3x87xf32>, vector<3x41xf32> -> vector<3x128xf32>
    %440 = vector.broadcast %434 : f32 to vector<3x128xf32>
    %441 = arith.mulf %440, %439 : vector<3x128xf32>
    %442 = arith.addf %433, %441 : vector<3x128xf32>
    %c12_406 = arith.constant 12 : index
    %443 = memref.load %arg2[%c12_406] : memref<20xf32, #tpu.memory_space<smem>>
    %c0_407 = arith.constant 0 : index
    %c6_408 = arith.constant 6 : index
    %c0_409 = arith.constant 0 : index
    %c42_410 = arith.constant 42 : index
    %444 = vector.load %arg8[%c0_407, %c6_408, %c0_409, %c42_410] : memref<1x20x5x128xf32, #tpu.memory_space<vmem>>, vector<1x1x3x86xf32>
    %445 = vector.shape_cast %444 : vector<1x1x3x86xf32> to vector<3x86xf32>
    %c0_411 = arith.constant 0 : index
    %c6_412 = arith.constant 6 : index
    %c1_413 = arith.constant 1 : index
    %c0_414 = arith.constant 0 : index
    %446 = vector.load %arg8[%c0_411, %c6_412, %c1_413, %c0_414] : memref<1x20x5x128xf32, #tpu.memory_space<vmem>>, vector<1x1x3x42xf32>
    %447 = vector.shape_cast %446 : vector<1x1x3x42xf32> to vector<3x42xf32>
    %448 = tpu.concatenate %445, %447 in 1 : vector<3x86xf32>, vector<3x42xf32> -> vector<3x128xf32>
    %449 = vector.broadcast %443 : f32 to vector<3x128xf32>
    %450 = arith.mulf %449, %448 : vector<3x128xf32>
    %451 = arith.addf %442, %450 : vector<3x128xf32>
    %c13_415 = arith.constant 13 : index
    %452 = memref.load %arg2[%c13_415] : memref<20xf32, #tpu.memory_space<smem>>
    %c0_416 = arith.constant 0 : index
    %c6_417 = arith.constant 6 : index
    %c0_418 = arith.constant 0 : index
    %c43_419 = arith.constant 43 : index
    %453 = vector.load %arg8[%c0_416, %c6_417, %c0_418, %c43_419] : memref<1x20x5x128xf32, #tpu.memory_space<vmem>>, vector<1x1x3x85xf32>
    %454 = vector.shape_cast %453 : vector<1x1x3x85xf32> to vector<3x85xf32>
    %c0_420 = arith.constant 0 : index
    %c6_421 = arith.constant 6 : index
    %c1_422 = arith.constant 1 : index
    %c0_423 = arith.constant 0 : index
    %455 = vector.load %arg8[%c0_420, %c6_421, %c1_422, %c0_423] : memref<1x20x5x128xf32, #tpu.memory_space<vmem>>, vector<1x1x3x43xf32>
    %456 = vector.shape_cast %455 : vector<1x1x3x43xf32> to vector<3x43xf32>
    %457 = tpu.concatenate %454, %456 in 1 : vector<3x85xf32>, vector<3x43xf32> -> vector<3x128xf32>
    %458 = vector.broadcast %452 : f32 to vector<3x128xf32>
    %459 = arith.mulf %458, %457 : vector<3x128xf32>
    %460 = arith.addf %451, %459 : vector<3x128xf32>
    %c14_424 = arith.constant 14 : index
    %461 = memref.load %arg2[%c14_424] : memref<20xf32, #tpu.memory_space<smem>>
    %c0_425 = arith.constant 0 : index
    %c6_426 = arith.constant 6 : index
    %c0_427 = arith.constant 0 : index
    %c44_428 = arith.constant 44 : index
    %462 = vector.load %arg8[%c0_425, %c6_426, %c0_427, %c44_428] : memref<1x20x5x128xf32, #tpu.memory_space<vmem>>, vector<1x1x3x84xf32>
    %463 = vector.shape_cast %462 : vector<1x1x3x84xf32> to vector<3x84xf32>
    %c0_429 = arith.constant 0 : index
    %c6_430 = arith.constant 6 : index
    %c1_431 = arith.constant 1 : index
    %c0_432 = arith.constant 0 : index
    %464 = vector.load %arg8[%c0_429, %c6_430, %c1_431, %c0_432] : memref<1x20x5x128xf32, #tpu.memory_space<vmem>>, vector<1x1x3x44xf32>
    %465 = vector.shape_cast %464 : vector<1x1x3x44xf32> to vector<3x44xf32>
    %466 = tpu.concatenate %463, %465 in 1 : vector<3x84xf32>, vector<3x44xf32> -> vector<3x128xf32>
    %467 = vector.broadcast %461 : f32 to vector<3x128xf32>
    %468 = arith.mulf %467, %466 : vector<3x128xf32>
    %469 = arith.addf %460, %468 : vector<3x128xf32>
    %c6_433 = arith.constant 6 : index
    %c0_434 = arith.constant 0 : index
    %c0_435 = arith.constant 0 : index
    %470 = vector.load %arg10[%c6_433, %c0_434, %c0_435] : memref<20x3x128xf32, #tpu.memory_space<vmem>>, vector<1x3x128xf32>
    %471 = vector.shape_cast %470 : vector<1x3x128xf32> to vector<3x128xf32>
    %472 = vector.shape_cast %469 : vector<3x128xf32> to vector<1x3x128xf32>
    tpu.vector_store %arg10[%c6_433, %c0_434, %c0_435], %472 {strides = array<i32>} : memref<20x3x128xf32, #tpu.memory_space<vmem>>, vector<1x3x128xf32>,
    %c15_436 = arith.constant 15 : index
    %473 = memref.load %arg2[%c15_436] : memref<20xf32, #tpu.memory_space<smem>>
    %c0_437 = arith.constant 0 : index
    %c7_438 = arith.constant 7 : index
    %c0_439 = arith.constant 0 : index
    %c40_440 = arith.constant 40 : index
    %474 = vector.load %arg8[%c0_437, %c7_438, %c0_439, %c40_440] : memref<1x20x5x128xf32, #tpu.memory_space<vmem>>, vector<1x1x3x88xf32>
    %475 = vector.shape_cast %474 : vector<1x1x3x88xf32> to vector<3x88xf32>
    %c0_441 = arith.constant 0 : index
    %c7_442 = arith.constant 7 : index
    %c1_443 = arith.constant 1 : index
    %c0_444 = arith.constant 0 : index
    %476 = vector.load %arg8[%c0_441, %c7_442, %c1_443, %c0_444] : memref<1x20x5x128xf32, #tpu.memory_space<vmem>>, vector<1x1x3x40xf32>
    %477 = vector.shape_cast %476 : vector<1x1x3x40xf32> to vector<3x40xf32>
    %478 = tpu.concatenate %475, %477 in 1 : vector<3x88xf32>, vector<3x40xf32> -> vector<3x128xf32>
    %479 = vector.broadcast %473 : f32 to vector<3x128xf32>
    %480 = arith.mulf %479, %478 : vector<3x128xf32>
    %c16_445 = arith.constant 16 : index
    %481 = memref.load %arg2[%c16_445] : memref<20xf32, #tpu.memory_space<smem>>
    %c0_446 = arith.constant 0 : index
    %c7_447 = arith.constant 7 : index
    %c0_448 = arith.constant 0 : index
    %c41_449 = arith.constant 41 : index
    %482 = vector.load %arg8[%c0_446, %c7_447, %c0_448, %c41_449] : memref<1x20x5x128xf32, #tpu.memory_space<vmem>>, vector<1x1x3x87xf32>
    %483 = vector.shape_cast %482 : vector<1x1x3x87xf32> to vector<3x87xf32>
    %c0_450 = arith.constant 0 : index
    %c7_451 = arith.constant 7 : index
    %c1_452 = arith.constant 1 : index
    %c0_453 = arith.constant 0 : index
    %484 = vector.load %arg8[%c0_450, %c7_451, %c1_452, %c0_453] : memref<1x20x5x128xf32, #tpu.memory_space<vmem>>, vector<1x1x3x41xf32>
    %485 = vector.shape_cast %484 : vector<1x1x3x41xf32> to vector<3x41xf32>
    %486 = tpu.concatenate %483, %485 in 1 : vector<3x87xf32>, vector<3x41xf32> -> vector<3x128xf32>
    %487 = vector.broadcast %481 : f32 to vector<3x128xf32>
    %488 = arith.mulf %487, %486 : vector<3x128xf32>
    %489 = arith.addf %480, %488 : vector<3x128xf32>
    %c17_454 = arith.constant 17 : index
    %490 = memref.load %arg2[%c17_454] : memref<20xf32, #tpu.memory_space<smem>>
    %c0_455 = arith.constant 0 : index
    %c7_456 = arith.constant 7 : index
    %c0_457 = arith.constant 0 : index
    %c42_458 = arith.constant 42 : index
    %491 = vector.load %arg8[%c0_455, %c7_456, %c0_457, %c42_458] : memref<1x20x5x128xf32, #tpu.memory_space<vmem>>, vector<1x1x3x86xf32>
    %492 = vector.shape_cast %491 : vector<1x1x3x86xf32> to vector<3x86xf32>
    %c0_459 = arith.constant 0 : index
    %c7_460 = arith.constant 7 : index
    %c1_461 = arith.constant 1 : index
    %c0_462 = arith.constant 0 : index
    %493 = vector.load %arg8[%c0_459, %c7_460, %c1_461, %c0_462] : memref<1x20x5x128xf32, #tpu.memory_space<vmem>>, vector<1x1x3x42xf32>
    %494 = vector.shape_cast %493 : vector<1x1x3x42xf32> to vector<3x42xf32>
    %495 = tpu.concatenate %492, %494 in 1 : vector<3x86xf32>, vector<3x42xf32> -> vector<3x128xf32>
    %496 = vector.broadcast %490 : f32 to vector<3x128xf32>
    %497 = arith.mulf %496, %495 : vector<3x128xf32>
    %498 = arith.addf %489, %497 : vector<3x128xf32>
    %c18_463 = arith.constant 18 : index
    %499 = memref.load %arg2[%c18_463] : memref<20xf32, #tpu.memory_space<smem>>
    %c0_464 = arith.constant 0 : index
    %c7_465 = arith.constant 7 : index
    %c0_466 = arith.constant 0 : index
    %c43_467 = arith.constant 43 : index
    %500 = vector.load %arg8[%c0_464, %c7_465, %c0_466, %c43_467] : memref<1x20x5x128xf32, #tpu.memory_space<vmem>>, vector<1x1x3x85xf32>
    %501 = vector.shape_cast %500 : vector<1x1x3x85xf32> to vector<3x85xf32>
    %c0_468 = arith.constant 0 : index
    %c7_469 = arith.constant 7 : index
    %c1_470 = arith.constant 1 : index
    %c0_471 = arith.constant 0 : index
    %502 = vector.load %arg8[%c0_468, %c7_469, %c1_470, %c0_471] : memref<1x20x5x128xf32, #tpu.memory_space<vmem>>, vector<1x1x3x43xf32>
    %503 = vector.shape_cast %502 : vector<1x1x3x43xf32> to vector<3x43xf32>
    %504 = tpu.concatenate %501, %503 in 1 : vector<3x85xf32>, vector<3x43xf32> -> vector<3x128xf32>
    %505 = vector.broadcast %499 : f32 to vector<3x128xf32>
    %506 = arith.mulf %505, %504 : vector<3x128xf32>
    %507 = arith.addf %498, %506 : vector<3x128xf32>
    %c19_472 = arith.constant 19 : index
    %508 = memref.load %arg2[%c19_472] : memref<20xf32, #tpu.memory_space<smem>>
    %c0_473 = arith.constant 0 : index
    %c7_474 = arith.constant 7 : index
    %c0_475 = arith.constant 0 : index
    %c44_476 = arith.constant 44 : index
    %509 = vector.load %arg8[%c0_473, %c7_474, %c0_475, %c44_476] : memref<1x20x5x128xf32, #tpu.memory_space<vmem>>, vector<1x1x3x84xf32>
    %510 = vector.shape_cast %509 : vector<1x1x3x84xf32> to vector<3x84xf32>
    %c0_477 = arith.constant 0 : index
    %c7_478 = arith.constant 7 : index
    %c1_479 = arith.constant 1 : index
    %c0_480 = arith.constant 0 : index
    %511 = vector.load %arg8[%c0_477, %c7_478, %c1_479, %c0_480] : memref<1x20x5x128xf32, #tpu.memory_space<vmem>>, vector<1x1x3x44xf32>
    %512 = vector.shape_cast %511 : vector<1x1x3x44xf32> to vector<3x44xf32>
    %513 = tpu.concatenate %510, %512 in 1 : vector<3x84xf32>, vector<3x44xf32> -> vector<3x128xf32>
    %514 = vector.broadcast %508 : f32 to vector<3x128xf32>
    %515 = arith.mulf %514, %513 : vector<3x128xf32>
    %516 = arith.addf %507, %515 : vector<3x128xf32>
    %c7_481 = arith.constant 7 : index
    %c0_482 = arith.constant 0 : index
    %c0_483 = arith.constant 0 : index
    %517 = vector.load %arg10[%c7_481, %c0_482, %c0_483] : memref<20x3x128xf32, #tpu.memory_space<vmem>>, vector<1x3x128xf32>
    %518 = vector.shape_cast %517 : vector<1x3x128xf32> to vector<3x128xf32>
    %519 = vector.shape_cast %516 : vector<3x128xf32> to vector<1x3x128xf32>
    tpu.vector_store %arg10[%c7_481, %c0_482, %c0_483], %519 {strides = array<i32>} : memref<20x3x128xf32, #tpu.memory_space<vmem>>, vector<1x3x128xf32>,
    %c0_484 = arith.constant 0 : index
    %520 = memref.load %arg2[%c0_484] : memref<20xf32, #tpu.memory_space<smem>>
    %c0_485 = arith.constant 0 : index
    %c8_486 = arith.constant 8 : index
    %c0_487 = arith.constant 0 : index
    %c2_488 = arith.constant 2 : index
    %521 = vector.load %arg8[%c0_485, %c8_486, %c0_487, %c2_488] : memref<1x20x5x128xf32, #tpu.memory_space<vmem>>, vector<1x1x3x126xf32>
    %522 = vector.shape_cast %521 : vector<1x1x3x126xf32> to vector<3x126xf32>
    %c0_489 = arith.constant 0 : index
    %c8_490 = arith.constant 8 : index
    %c1_491 = arith.constant 1 : index
    %c0_492 = arith.constant 0 : index
    %523 = vector.load %arg8[%c0_489, %c8_490, %c1_491, %c0_492] : memref<1x20x5x128xf32, #tpu.memory_space<vmem>>, vector<1x1x3x2xf32>
    %524 = vector.shape_cast %523 : vector<1x1x3x2xf32> to vector<3x2xf32>
    %525 = tpu.concatenate %522, %524 in 1 : vector<3x126xf32>, vector<3x2xf32> -> vector<3x128xf32>
    %526 = vector.broadcast %520 : f32 to vector<3x128xf32>
    %527 = arith.mulf %526, %525 : vector<3x128xf32>
    %c1_493 = arith.constant 1 : index
    %528 = memref.load %arg2[%c1_493] : memref<20xf32, #tpu.memory_space<smem>>
    %c0_494 = arith.constant 0 : index
    %c8_495 = arith.constant 8 : index
    %c0_496 = arith.constant 0 : index
    %c22_497 = arith.constant 22 : index
    %529 = vector.load %arg8[%c0_494, %c8_495, %c0_496, %c22_497] : memref<1x20x5x128xf32, #tpu.memory_space<vmem>>, vector<1x1x3x106xf32>
    %530 = vector.shape_cast %529 : vector<1x1x3x106xf32> to vector<3x106xf32>
    %c0_498 = arith.constant 0 : index
    %c8_499 = arith.constant 8 : index
    %c1_500 = arith.constant 1 : index
    %c0_501 = arith.constant 0 : index
    %531 = vector.load %arg8[%c0_498, %c8_499, %c1_500, %c0_501] : memref<1x20x5x128xf32, #tpu.memory_space<vmem>>, vector<1x1x3x22xf32>
    %532 = vector.shape_cast %531 : vector<1x1x3x22xf32> to vector<3x22xf32>
    %533 = tpu.concatenate %530, %532 in 1 : vector<3x106xf32>, vector<3x22xf32> -> vector<3x128xf32>
    %534 = vector.broadcast %528 : f32 to vector<3x128xf32>
    %535 = arith.mulf %534, %533 : vector<3x128xf32>
    %536 = arith.addf %527, %535 : vector<3x128xf32>
    %c2_502 = arith.constant 2 : index
    %537 = memref.load %arg2[%c2_502] : memref<20xf32, #tpu.memory_space<smem>>
    %c0_503 = arith.constant 0 : index
    %c8_504 = arith.constant 8 : index
    %c0_505 = arith.constant 0 : index
    %c42_506 = arith.constant 42 : index
    %538 = vector.load %arg8[%c0_503, %c8_504, %c0_505, %c42_506] : memref<1x20x5x128xf32, #tpu.memory_space<vmem>>, vector<1x1x3x86xf32>
    %539 = vector.shape_cast %538 : vector<1x1x3x86xf32> to vector<3x86xf32>
    %c0_507 = arith.constant 0 : index
    %c8_508 = arith.constant 8 : index
    %c1_509 = arith.constant 1 : index
    %c0_510 = arith.constant 0 : index
    %540 = vector.load %arg8[%c0_507, %c8_508, %c1_509, %c0_510] : memref<1x20x5x128xf32, #tpu.memory_space<vmem>>, vector<1x1x3x42xf32>
    %541 = vector.shape_cast %540 : vector<1x1x3x42xf32> to vector<3x42xf32>
    %542 = tpu.concatenate %539, %541 in 1 : vector<3x86xf32>, vector<3x42xf32> -> vector<3x128xf32>
    %543 = vector.broadcast %537 : f32 to vector<3x128xf32>
    %544 = arith.mulf %543, %542 : vector<3x128xf32>
    %545 = arith.addf %536, %544 : vector<3x128xf32>
    %c3_511 = arith.constant 3 : index
    %546 = memref.load %arg2[%c3_511] : memref<20xf32, #tpu.memory_space<smem>>
    %c0_512 = arith.constant 0 : index
    %c8_513 = arith.constant 8 : index
    %c0_514 = arith.constant 0 : index
    %c62_515 = arith.constant 62 : index
    %547 = vector.load %arg8[%c0_512, %c8_513, %c0_514, %c62_515] : memref<1x20x5x128xf32, #tpu.memory_space<vmem>>, vector<1x1x3x66xf32>
    %548 = vector.shape_cast %547 : vector<1x1x3x66xf32> to vector<3x66xf32>
    %c0_516 = arith.constant 0 : index
    %c8_517 = arith.constant 8 : index
    %c1_518 = arith.constant 1 : index
    %c0_519 = arith.constant 0 : index
    %549 = vector.load %arg8[%c0_516, %c8_517, %c1_518, %c0_519] : memref<1x20x5x128xf32, #tpu.memory_space<vmem>>, vector<1x1x3x62xf32>
    %550 = vector.shape_cast %549 : vector<1x1x3x62xf32> to vector<3x62xf32>
    %551 = tpu.concatenate %548, %550 in 1 : vector<3x66xf32>, vector<3x62xf32> -> vector<3x128xf32>
    %552 = vector.broadcast %546 : f32 to vector<3x128xf32>
    %553 = arith.mulf %552, %551 : vector<3x128xf32>
    %554 = arith.addf %545, %553 : vector<3x128xf32>
    %c4_520 = arith.constant 4 : index
    %555 = memref.load %arg2[%c4_520] : memref<20xf32, #tpu.memory_space<smem>>
    %c0_521 = arith.constant 0 : index
    %c8_522 = arith.constant 8 : index
    %c0_523 = arith.constant 0 : index
    %c82 = arith.constant 82 : index
    %556 = vector.load %arg8[%c0_521, %c8_522, %c0_523, %c82] : memref<1x20x5x128xf32, #tpu.memory_space<vmem>>, vector<1x1x3x46xf32>
    %557 = vector.shape_cast %556 : vector<1x1x3x46xf32> to vector<3x46xf32>
    %c0_524 = arith.constant 0 : index
    %c8_525 = arith.constant 8 : index
    %c1_526 = arith.constant 1 : index
    %c0_527 = arith.constant 0 : index
    %558 = vector.load %arg8[%c0_524, %c8_525, %c1_526, %c0_527] : memref<1x20x5x128xf32, #tpu.memory_space<vmem>>, vector<1x1x3x82xf32>
    %559 = vector.shape_cast %558 : vector<1x1x3x82xf32> to vector<3x82xf32>
    %560 = tpu.concatenate %557, %559 in 1 : vector<3x46xf32>, vector<3x82xf32> -> vector<3x128xf32>
    %561 = vector.broadcast %555 : f32 to vector<3x128xf32>
    %562 = arith.mulf %561, %560 : vector<3x128xf32>
    %563 = arith.addf %554, %562 : vector<3x128xf32>
    %c8_528 = arith.constant 8 : index
    %c0_529 = arith.constant 0 : index
    %c0_530 = arith.constant 0 : index
    %564 = vector.load %arg10[%c8_528, %c0_529, %c0_530] : memref<20x3x128xf32, #tpu.memory_space<vmem>>, vector<1x3x128xf32>
    %565 = vector.shape_cast %564 : vector<1x3x128xf32> to vector<3x128xf32>
    %566 = vector.shape_cast %563 : vector<3x128xf32> to vector<1x3x128xf32>
    tpu.vector_store %arg10[%c8_528, %c0_529, %c0_530], %566 {strides = array<i32>} : memref<20x3x128xf32, #tpu.memory_space<vmem>>, vector<1x3x128xf32>,
    %c5_531 = arith.constant 5 : index
    %567 = memref.load %arg2[%c5_531] : memref<20xf32, #tpu.memory_space<smem>>
    %c0_532 = arith.constant 0 : index
    %c9_533 = arith.constant 9 : index
    %c0_534 = arith.constant 0 : index
    %c2_535 = arith.constant 2 : index
    %568 = vector.load %arg8[%c0_532, %c9_533, %c0_534, %c2_535] : memref<1x20x5x128xf32, #tpu.memory_space<vmem>>, vector<1x1x3x126xf32>
    %569 = vector.shape_cast %568 : vector<1x1x3x126xf32> to vector<3x126xf32>
    %c0_536 = arith.constant 0 : index
    %c9_537 = arith.constant 9 : index
    %c1_538 = arith.constant 1 : index
    %c0_539 = arith.constant 0 : index
    %570 = vector.load %arg8[%c0_536, %c9_537, %c1_538, %c0_539] : memref<1x20x5x128xf32, #tpu.memory_space<vmem>>, vector<1x1x3x2xf32>
    %571 = vector.shape_cast %570 : vector<1x1x3x2xf32> to vector<3x2xf32>
    %572 = tpu.concatenate %569, %571 in 1 : vector<3x126xf32>, vector<3x2xf32> -> vector<3x128xf32>
    %573 = vector.broadcast %567 : f32 to vector<3x128xf32>
    %574 = arith.mulf %573, %572 : vector<3x128xf32>
    %c6_540 = arith.constant 6 : index
    %575 = memref.load %arg2[%c6_540] : memref<20xf32, #tpu.memory_space<smem>>
    %c0_541 = arith.constant 0 : index
    %c9_542 = arith.constant 9 : index
    %c0_543 = arith.constant 0 : index
    %c22_544 = arith.constant 22 : index
    %576 = vector.load %arg8[%c0_541, %c9_542, %c0_543, %c22_544] : memref<1x20x5x128xf32, #tpu.memory_space<vmem>>, vector<1x1x3x106xf32>
    %577 = vector.shape_cast %576 : vector<1x1x3x106xf32> to vector<3x106xf32>
    %c0_545 = arith.constant 0 : index
    %c9_546 = arith.constant 9 : index
    %c1_547 = arith.constant 1 : index
    %c0_548 = arith.constant 0 : index
    %578 = vector.load %arg8[%c0_545, %c9_546, %c1_547, %c0_548] : memref<1x20x5x128xf32, #tpu.memory_space<vmem>>, vector<1x1x3x22xf32>
    %579 = vector.shape_cast %578 : vector<1x1x3x22xf32> to vector<3x22xf32>
    %580 = tpu.concatenate %577, %579 in 1 : vector<3x106xf32>, vector<3x22xf32> -> vector<3x128xf32>
    %581 = vector.broadcast %575 : f32 to vector<3x128xf32>
    %582 = arith.mulf %581, %580 : vector<3x128xf32>
    %583 = arith.addf %574, %582 : vector<3x128xf32>
    %c7_549 = arith.constant 7 : index
    %584 = memref.load %arg2[%c7_549] : memref<20xf32, #tpu.memory_space<smem>>
    %c0_550 = arith.constant 0 : index
    %c9_551 = arith.constant 9 : index
    %c0_552 = arith.constant 0 : index
    %c42_553 = arith.constant 42 : index
    %585 = vector.load %arg8[%c0_550, %c9_551, %c0_552, %c42_553] : memref<1x20x5x128xf32, #tpu.memory_space<vmem>>, vector<1x1x3x86xf32>
    %586 = vector.shape_cast %585 : vector<1x1x3x86xf32> to vector<3x86xf32>
    %c0_554 = arith.constant 0 : index
    %c9_555 = arith.constant 9 : index
    %c1_556 = arith.constant 1 : index
    %c0_557 = arith.constant 0 : index
    %587 = vector.load %arg8[%c0_554, %c9_555, %c1_556, %c0_557] : memref<1x20x5x128xf32, #tpu.memory_space<vmem>>, vector<1x1x3x42xf32>
    %588 = vector.shape_cast %587 : vector<1x1x3x42xf32> to vector<3x42xf32>
    %589 = tpu.concatenate %586, %588 in 1 : vector<3x86xf32>, vector<3x42xf32> -> vector<3x128xf32>
    %590 = vector.broadcast %584 : f32 to vector<3x128xf32>
    %591 = arith.mulf %590, %589 : vector<3x128xf32>
    %592 = arith.addf %583, %591 : vector<3x128xf32>
    %c8_558 = arith.constant 8 : index
    %593 = memref.load %arg2[%c8_558] : memref<20xf32, #tpu.memory_space<smem>>
    %c0_559 = arith.constant 0 : index
    %c9_560 = arith.constant 9 : index
    %c0_561 = arith.constant 0 : index
    %c62_562 = arith.constant 62 : index
    %594 = vector.load %arg8[%c0_559, %c9_560, %c0_561, %c62_562] : memref<1x20x5x128xf32, #tpu.memory_space<vmem>>, vector<1x1x3x66xf32>
    %595 = vector.shape_cast %594 : vector<1x1x3x66xf32> to vector<3x66xf32>
    %c0_563 = arith.constant 0 : index
    %c9_564 = arith.constant 9 : index
    %c1_565 = arith.constant 1 : index
    %c0_566 = arith.constant 0 : index
    %596 = vector.load %arg8[%c0_563, %c9_564, %c1_565, %c0_566] : memref<1x20x5x128xf32, #tpu.memory_space<vmem>>, vector<1x1x3x62xf32>
    %597 = vector.shape_cast %596 : vector<1x1x3x62xf32> to vector<3x62xf32>
    %598 = tpu.concatenate %595, %597 in 1 : vector<3x66xf32>, vector<3x62xf32> -> vector<3x128xf32>
    %599 = vector.broadcast %593 : f32 to vector<3x128xf32>
    %600 = arith.mulf %599, %598 : vector<3x128xf32>
    %601 = arith.addf %592, %600 : vector<3x128xf32>
    %c9_567 = arith.constant 9 : index
    %602 = memref.load %arg2[%c9_567] : memref<20xf32, #tpu.memory_space<smem>>
    %c0_568 = arith.constant 0 : index
    %c9_569 = arith.constant 9 : index
    %c0_570 = arith.constant 0 : index
    %c82_571 = arith.constant 82 : index
    %603 = vector.load %arg8[%c0_568, %c9_569, %c0_570, %c82_571] : memref<1x20x5x128xf32, #tpu.memory_space<vmem>>, vector<1x1x3x46xf32>
    %604 = vector.shape_cast %603 : vector<1x1x3x46xf32> to vector<3x46xf32>
    %c0_572 = arith.constant 0 : index
    %c9_573 = arith.constant 9 : index
    %c1_574 = arith.constant 1 : index
    %c0_575 = arith.constant 0 : index
    %605 = vector.load %arg8[%c0_572, %c9_573, %c1_574, %c0_575] : memref<1x20x5x128xf32, #tpu.memory_space<vmem>>, vector<1x1x3x82xf32>
    %606 = vector.shape_cast %605 : vector<1x1x3x82xf32> to vector<3x82xf32>
    %607 = tpu.concatenate %604, %606 in 1 : vector<3x46xf32>, vector<3x82xf32> -> vector<3x128xf32>
    %608 = vector.broadcast %602 : f32 to vector<3x128xf32>
    %609 = arith.mulf %608, %607 : vector<3x128xf32>
    %610 = arith.addf %601, %609 : vector<3x128xf32>
    %c9_576 = arith.constant 9 : index
    %c0_577 = arith.constant 0 : index
    %c0_578 = arith.constant 0 : index
    %611 = vector.load %arg10[%c9_576, %c0_577, %c0_578] : memref<20x3x128xf32, #tpu.memory_space<vmem>>, vector<1x3x128xf32>
    %612 = vector.shape_cast %611 : vector<1x3x128xf32> to vector<3x128xf32>
    %613 = vector.shape_cast %610 : vector<3x128xf32> to vector<1x3x128xf32>
    tpu.vector_store %arg10[%c9_576, %c0_577, %c0_578], %613 {strides = array<i32>} : memref<20x3x128xf32, #tpu.memory_space<vmem>>, vector<1x3x128xf32>,
    %c10_579 = arith.constant 10 : index
    %614 = memref.load %arg2[%c10_579] : memref<20xf32, #tpu.memory_space<smem>>
    %c0_580 = arith.constant 0 : index
    %c10_581 = arith.constant 10 : index
    %c0_582 = arith.constant 0 : index
    %c2_583 = arith.constant 2 : index
    %615 = vector.load %arg8[%c0_580, %c10_581, %c0_582, %c2_583] : memref<1x20x5x128xf32, #tpu.memory_space<vmem>>, vector<1x1x3x126xf32>
    %616 = vector.shape_cast %615 : vector<1x1x3x126xf32> to vector<3x126xf32>
    %c0_584 = arith.constant 0 : index
    %c10_585 = arith.constant 10 : index
    %c1_586 = arith.constant 1 : index
    %c0_587 = arith.constant 0 : index
    %617 = vector.load %arg8[%c0_584, %c10_585, %c1_586, %c0_587] : memref<1x20x5x128xf32, #tpu.memory_space<vmem>>, vector<1x1x3x2xf32>
    %618 = vector.shape_cast %617 : vector<1x1x3x2xf32> to vector<3x2xf32>
    %619 = tpu.concatenate %616, %618 in 1 : vector<3x126xf32>, vector<3x2xf32> -> vector<3x128xf32>
    %620 = vector.broadcast %614 : f32 to vector<3x128xf32>
    %621 = arith.mulf %620, %619 : vector<3x128xf32>
    %c11_588 = arith.constant 11 : index
    %622 = memref.load %arg2[%c11_588] : memref<20xf32, #tpu.memory_space<smem>>
    %c0_589 = arith.constant 0 : index
    %c10_590 = arith.constant 10 : index
    %c0_591 = arith.constant 0 : index
    %c22_592 = arith.constant 22 : index
    %623 = vector.load %arg8[%c0_589, %c10_590, %c0_591, %c22_592] : memref<1x20x5x128xf32, #tpu.memory_space<vmem>>, vector<1x1x3x106xf32>
    %624 = vector.shape_cast %623 : vector<1x1x3x106xf32> to vector<3x106xf32>
    %c0_593 = arith.constant 0 : index
    %c10_594 = arith.constant 10 : index
    %c1_595 = arith.constant 1 : index
    %c0_596 = arith.constant 0 : index
    %625 = vector.load %arg8[%c0_593, %c10_594, %c1_595, %c0_596] : memref<1x20x5x128xf32, #tpu.memory_space<vmem>>, vector<1x1x3x22xf32>
    %626 = vector.shape_cast %625 : vector<1x1x3x22xf32> to vector<3x22xf32>
    %627 = tpu.concatenate %624, %626 in 1 : vector<3x106xf32>, vector<3x22xf32> -> vector<3x128xf32>
    %628 = vector.broadcast %622 : f32 to vector<3x128xf32>
    %629 = arith.mulf %628, %627 : vector<3x128xf32>
    %630 = arith.addf %621, %629 : vector<3x128xf32>
    %c12_597 = arith.constant 12 : index
    %631 = memref.load %arg2[%c12_597] : memref<20xf32, #tpu.memory_space<smem>>
    %c0_598 = arith.constant 0 : index
    %c10_599 = arith.constant 10 : index
    %c0_600 = arith.constant 0 : index
    %c42_601 = arith.constant 42 : index
    %632 = vector.load %arg8[%c0_598, %c10_599, %c0_600, %c42_601] : memref<1x20x5x128xf32, #tpu.memory_space<vmem>>, vector<1x1x3x86xf32>
    %633 = vector.shape_cast %632 : vector<1x1x3x86xf32> to vector<3x86xf32>
    %c0_602 = arith.constant 0 : index
    %c10_603 = arith.constant 10 : index
    %c1_604 = arith.constant 1 : index
    %c0_605 = arith.constant 0 : index
    %634 = vector.load %arg8[%c0_602, %c10_603, %c1_604, %c0_605] : memref<1x20x5x128xf32, #tpu.memory_space<vmem>>, vector<1x1x3x42xf32>
    %635 = vector.shape_cast %634 : vector<1x1x3x42xf32> to vector<3x42xf32>
    %636 = tpu.concatenate %633, %635 in 1 : vector<3x86xf32>, vector<3x42xf32> -> vector<3x128xf32>
    %637 = vector.broadcast %631 : f32 to vector<3x128xf32>
    %638 = arith.mulf %637, %636 : vector<3x128xf32>
    %639 = arith.addf %630, %638 : vector<3x128xf32>
    %c13_606 = arith.constant 13 : index
    %640 = memref.load %arg2[%c13_606] : memref<20xf32, #tpu.memory_space<smem>>
    %c0_607 = arith.constant 0 : index
    %c10_608 = arith.constant 10 : index
    %c0_609 = arith.constant 0 : index
    %c62_610 = arith.constant 62 : index
    %641 = vector.load %arg8[%c0_607, %c10_608, %c0_609, %c62_610] : memref<1x20x5x128xf32, #tpu.memory_space<vmem>>, vector<1x1x3x66xf32>
    %642 = vector.shape_cast %641 : vector<1x1x3x66xf32> to vector<3x66xf32>
    %c0_611 = arith.constant 0 : index
    %c10_612 = arith.constant 10 : index
    %c1_613 = arith.constant 1 : index
    %c0_614 = arith.constant 0 : index
    %643 = vector.load %arg8[%c0_611, %c10_612, %c1_613, %c0_614] : memref<1x20x5x128xf32, #tpu.memory_space<vmem>>, vector<1x1x3x62xf32>
    %644 = vector.shape_cast %643 : vector<1x1x3x62xf32> to vector<3x62xf32>
    %645 = tpu.concatenate %642, %644 in 1 : vector<3x66xf32>, vector<3x62xf32> -> vector<3x128xf32>
    %646 = vector.broadcast %640 : f32 to vector<3x128xf32>
    %647 = arith.mulf %646, %645 : vector<3x128xf32>
    %648 = arith.addf %639, %647 : vector<3x128xf32>
    %c14_615 = arith.constant 14 : index
    %649 = memref.load %arg2[%c14_615] : memref<20xf32, #tpu.memory_space<smem>>
    %c0_616 = arith.constant 0 : index
    %c10_617 = arith.constant 10 : index
    %c0_618 = arith.constant 0 : index
    %c82_619 = arith.constant 82 : index
    %650 = vector.load %arg8[%c0_616, %c10_617, %c0_618, %c82_619] : memref<1x20x5x128xf32, #tpu.memory_space<vmem>>, vector<1x1x3x46xf32>
    %651 = vector.shape_cast %650 : vector<1x1x3x46xf32> to vector<3x46xf32>
    %c0_620 = arith.constant 0 : index
    %c10_621 = arith.constant 10 : index
    %c1_622 = arith.constant 1 : index
    %c0_623 = arith.constant 0 : index
    %652 = vector.load %arg8[%c0_620, %c10_621, %c1_622, %c0_623] : memref<1x20x5x128xf32, #tpu.memory_space<vmem>>, vector<1x1x3x82xf32>
    %653 = vector.shape_cast %652 : vector<1x1x3x82xf32> to vector<3x82xf32>
    %654 = tpu.concatenate %651, %653 in 1 : vector<3x46xf32>, vector<3x82xf32> -> vector<3x128xf32>
    %655 = vector.broadcast %649 : f32 to vector<3x128xf32>
    %656 = arith.mulf %655, %654 : vector<3x128xf32>
    %657 = arith.addf %648, %656 : vector<3x128xf32>
    %c10_624 = arith.constant 10 : index
    %c0_625 = arith.constant 0 : index
    %c0_626 = arith.constant 0 : index
    %658 = vector.load %arg10[%c10_624, %c0_625, %c0_626] : memref<20x3x128xf32, #tpu.memory_space<vmem>>, vector<1x3x128xf32>
    %659 = vector.shape_cast %658 : vector<1x3x128xf32> to vector<3x128xf32>
    %660 = vector.shape_cast %657 : vector<3x128xf32> to vector<1x3x128xf32>
    tpu.vector_store %arg10[%c10_624, %c0_625, %c0_626], %660 {strides = array<i32>} : memref<20x3x128xf32, #tpu.memory_space<vmem>>, vector<1x3x128xf32>,
    %c15_627 = arith.constant 15 : index
    %661 = memref.load %arg2[%c15_627] : memref<20xf32, #tpu.memory_space<smem>>
    %c0_628 = arith.constant 0 : index
    %c11_629 = arith.constant 11 : index
    %c0_630 = arith.constant 0 : index
    %c2_631 = arith.constant 2 : index
    %662 = vector.load %arg8[%c0_628, %c11_629, %c0_630, %c2_631] : memref<1x20x5x128xf32, #tpu.memory_space<vmem>>, vector<1x1x3x126xf32>
    %663 = vector.shape_cast %662 : vector<1x1x3x126xf32> to vector<3x126xf32>
    %c0_632 = arith.constant 0 : index
    %c11_633 = arith.constant 11 : index
    %c1_634 = arith.constant 1 : index
    %c0_635 = arith.constant 0 : index
    %664 = vector.load %arg8[%c0_632, %c11_633, %c1_634, %c0_635] : memref<1x20x5x128xf32, #tpu.memory_space<vmem>>, vector<1x1x3x2xf32>
    %665 = vector.shape_cast %664 : vector<1x1x3x2xf32> to vector<3x2xf32>
    %666 = tpu.concatenate %663, %665 in 1 : vector<3x126xf32>, vector<3x2xf32> -> vector<3x128xf32>
    %667 = vector.broadcast %661 : f32 to vector<3x128xf32>
    %668 = arith.mulf %667, %666 : vector<3x128xf32>
    %c16_636 = arith.constant 16 : index
    %669 = memref.load %arg2[%c16_636] : memref<20xf32, #tpu.memory_space<smem>>
    %c0_637 = arith.constant 0 : index
    %c11_638 = arith.constant 11 : index
    %c0_639 = arith.constant 0 : index
    %c22_640 = arith.constant 22 : index
    %670 = vector.load %arg8[%c0_637, %c11_638, %c0_639, %c22_640] : memref<1x20x5x128xf32, #tpu.memory_space<vmem>>, vector<1x1x3x106xf32>
    %671 = vector.shape_cast %670 : vector<1x1x3x106xf32> to vector<3x106xf32>
    %c0_641 = arith.constant 0 : index
    %c11_642 = arith.constant 11 : index
    %c1_643 = arith.constant 1 : index
    %c0_644 = arith.constant 0 : index
    %672 = vector.load %arg8[%c0_641, %c11_642, %c1_643, %c0_644] : memref<1x20x5x128xf32, #tpu.memory_space<vmem>>, vector<1x1x3x22xf32>
    %673 = vector.shape_cast %672 : vector<1x1x3x22xf32> to vector<3x22xf32>
    %674 = tpu.concatenate %671, %673 in 1 : vector<3x106xf32>, vector<3x22xf32> -> vector<3x128xf32>
    %675 = vector.broadcast %669 : f32 to vector<3x128xf32>
    %676 = arith.mulf %675, %674 : vector<3x128xf32>
    %677 = arith.addf %668, %676 : vector<3x128xf32>
    %c17_645 = arith.constant 17 : index
    %678 = memref.load %arg2[%c17_645] : memref<20xf32, #tpu.memory_space<smem>>
    %c0_646 = arith.constant 0 : index
    %c11_647 = arith.constant 11 : index
    %c0_648 = arith.constant 0 : index
    %c42_649 = arith.constant 42 : index
    %679 = vector.load %arg8[%c0_646, %c11_647, %c0_648, %c42_649] : memref<1x20x5x128xf32, #tpu.memory_space<vmem>>, vector<1x1x3x86xf32>
    %680 = vector.shape_cast %679 : vector<1x1x3x86xf32> to vector<3x86xf32>
    %c0_650 = arith.constant 0 : index
    %c11_651 = arith.constant 11 : index
    %c1_652 = arith.constant 1 : index
    %c0_653 = arith.constant 0 : index
    %681 = vector.load %arg8[%c0_650, %c11_651, %c1_652, %c0_653] : memref<1x20x5x128xf32, #tpu.memory_space<vmem>>, vector<1x1x3x42xf32>
    %682 = vector.shape_cast %681 : vector<1x1x3x42xf32> to vector<3x42xf32>
    %683 = tpu.concatenate %680, %682 in 1 : vector<3x86xf32>, vector<3x42xf32> -> vector<3x128xf32>
    %684 = vector.broadcast %678 : f32 to vector<3x128xf32>
    %685 = arith.mulf %684, %683 : vector<3x128xf32>
    %686 = arith.addf %677, %685 : vector<3x128xf32>
    %c18_654 = arith.constant 18 : index
    %687 = memref.load %arg2[%c18_654] : memref<20xf32, #tpu.memory_space<smem>>
    %c0_655 = arith.constant 0 : index
    %c11_656 = arith.constant 11 : index
    %c0_657 = arith.constant 0 : index
    %c62_658 = arith.constant 62 : index
    %688 = vector.load %arg8[%c0_655, %c11_656, %c0_657, %c62_658] : memref<1x20x5x128xf32, #tpu.memory_space<vmem>>, vector<1x1x3x66xf32>
    %689 = vector.shape_cast %688 : vector<1x1x3x66xf32> to vector<3x66xf32>
    %c0_659 = arith.constant 0 : index
    %c11_660 = arith.constant 11 : index
    %c1_661 = arith.constant 1 : index
    %c0_662 = arith.constant 0 : index
    %690 = vector.load %arg8[%c0_659, %c11_660, %c1_661, %c0_662] : memref<1x20x5x128xf32, #tpu.memory_space<vmem>>, vector<1x1x3x62xf32>
    %691 = vector.shape_cast %690 : vector<1x1x3x62xf32> to vector<3x62xf32>
    %692 = tpu.concatenate %689, %691 in 1 : vector<3x66xf32>, vector<3x62xf32> -> vector<3x128xf32>
    %693 = vector.broadcast %687 : f32 to vector<3x128xf32>
    %694 = arith.mulf %693, %692 : vector<3x128xf32>
    %695 = arith.addf %686, %694 : vector<3x128xf32>
    %c19_663 = arith.constant 19 : index
    %696 = memref.load %arg2[%c19_663] : memref<20xf32, #tpu.memory_space<smem>>
    %c0_664 = arith.constant 0 : index
    %c11_665 = arith.constant 11 : index
    %c0_666 = arith.constant 0 : index
    %c82_667 = arith.constant 82 : index
    %697 = vector.load %arg8[%c0_664, %c11_665, %c0_666, %c82_667] : memref<1x20x5x128xf32, #tpu.memory_space<vmem>>, vector<1x1x3x46xf32>
    %698 = vector.shape_cast %697 : vector<1x1x3x46xf32> to vector<3x46xf32>
    %c0_668 = arith.constant 0 : index
    %c11_669 = arith.constant 11 : index
    %c1_670 = arith.constant 1 : index
    %c0_671 = arith.constant 0 : index
    %699 = vector.load %arg8[%c0_668, %c11_669, %c1_670, %c0_671] : memref<1x20x5x128xf32, #tpu.memory_space<vmem>>, vector<1x1x3x82xf32>
    %700 = vector.shape_cast %699 : vector<1x1x3x82xf32> to vector<3x82xf32>
    %701 = tpu.concatenate %698, %700 in 1 : vector<3x46xf32>, vector<3x82xf32> -> vector<3x128xf32>
    %702 = vector.broadcast %696 : f32 to vector<3x128xf32>
    %703 = arith.mulf %702, %701 : vector<3x128xf32>
    %704 = arith.addf %695, %703 : vector<3x128xf32>
    %c11_672 = arith.constant 11 : index
    %c0_673 = arith.constant 0 : index
    %c0_674 = arith.constant 0 : index
    %705 = vector.load %arg10[%c11_672, %c0_673, %c0_674] : memref<20x3x128xf32, #tpu.memory_space<vmem>>, vector<1x3x128xf32>
    %706 = vector.shape_cast %705 : vector<1x3x128xf32> to vector<3x128xf32>
    %707 = vector.shape_cast %704 : vector<3x128xf32> to vector<1x3x128xf32>
    tpu.vector_store %arg10[%c11_672, %c0_673, %c0_674], %707 {strides = array<i32>} : memref<20x3x128xf32, #tpu.memory_space<vmem>>, vector<1x3x128xf32>,
    %c0_675 = arith.constant 0 : index
    %708 = memref.load %arg2[%c0_675] : memref<20xf32, #tpu.memory_space<smem>>
    %c0_676 = arith.constant 0 : index
    %c12_677 = arith.constant 12 : index
    %c0_678 = arith.constant 0 : index
    %c0_679 = arith.constant 0 : index
    %709 = vector.load %arg8[%c0_676, %c12_677, %c0_678, %c0_679] : memref<1x20x5x128xf32, #tpu.memory_space<vmem>>, vector<1x1x3x128xf32>
    %710 = vector.shape_cast %709 : vector<1x1x3x128xf32> to vector<3x128xf32>
    %711 = vector.broadcast %708 : f32 to vector<3x128xf32>
    %712 = arith.mulf %711, %710 : vector<3x128xf32>
    %c1_680 = arith.constant 1 : index
    %713 = memref.load %arg2[%c1_680] : memref<20xf32, #tpu.memory_space<smem>>
    %c0_681 = arith.constant 0 : index
    %c12_682 = arith.constant 12 : index
    %c0_683 = arith.constant 0 : index
    %c21_684 = arith.constant 21 : index
    %714 = vector.load %arg8[%c0_681, %c12_682, %c0_683, %c21_684] : memref<1x20x5x128xf32, #tpu.memory_space<vmem>>, vector<1x1x3x107xf32>
    %715 = vector.shape_cast %714 : vector<1x1x3x107xf32> to vector<3x107xf32>
    %c0_685 = arith.constant 0 : index
    %c12_686 = arith.constant 12 : index
    %c1_687 = arith.constant 1 : index
    %c0_688 = arith.constant 0 : index
    %716 = vector.load %arg8[%c0_685, %c12_686, %c1_687, %c0_688] : memref<1x20x5x128xf32, #tpu.memory_space<vmem>>, vector<1x1x3x21xf32>
    %717 = vector.shape_cast %716 : vector<1x1x3x21xf32> to vector<3x21xf32>
    %718 = tpu.concatenate %715, %717 in 1 : vector<3x107xf32>, vector<3x21xf32> -> vector<3x128xf32>
    %719 = vector.broadcast %713 : f32 to vector<3x128xf32>
    %720 = arith.mulf %719, %718 : vector<3x128xf32>
    %721 = arith.addf %712, %720 : vector<3x128xf32>
    %c2_689 = arith.constant 2 : index
    %722 = memref.load %arg2[%c2_689] : memref<20xf32, #tpu.memory_space<smem>>
    %c0_690 = arith.constant 0 : index
    %c12_691 = arith.constant 12 : index
    %c0_692 = arith.constant 0 : index
    %c42_693 = arith.constant 42 : index
    %723 = vector.load %arg8[%c0_690, %c12_691, %c0_692, %c42_693] : memref<1x20x5x128xf32, #tpu.memory_space<vmem>>, vector<1x1x3x86xf32>
    %724 = vector.shape_cast %723 : vector<1x1x3x86xf32> to vector<3x86xf32>
    %c0_694 = arith.constant 0 : index
    %c12_695 = arith.constant 12 : index
    %c1_696 = arith.constant 1 : index
    %c0_697 = arith.constant 0 : index
    %725 = vector.load %arg8[%c0_694, %c12_695, %c1_696, %c0_697] : memref<1x20x5x128xf32, #tpu.memory_space<vmem>>, vector<1x1x3x42xf32>
    %726 = vector.shape_cast %725 : vector<1x1x3x42xf32> to vector<3x42xf32>
    %727 = tpu.concatenate %724, %726 in 1 : vector<3x86xf32>, vector<3x42xf32> -> vector<3x128xf32>
    %728 = vector.broadcast %722 : f32 to vector<3x128xf32>
    %729 = arith.mulf %728, %727 : vector<3x128xf32>
    %730 = arith.addf %721, %729 : vector<3x128xf32>
    %c3_698 = arith.constant 3 : index
    %731 = memref.load %arg2[%c3_698] : memref<20xf32, #tpu.memory_space<smem>>
    %c0_699 = arith.constant 0 : index
    %c12_700 = arith.constant 12 : index
    %c0_701 = arith.constant 0 : index
    %c63_702 = arith.constant 63 : index
    %732 = vector.load %arg8[%c0_699, %c12_700, %c0_701, %c63_702] : memref<1x20x5x128xf32, #tpu.memory_space<vmem>>, vector<1x1x3x65xf32>
    %733 = vector.shape_cast %732 : vector<1x1x3x65xf32> to vector<3x65xf32>
    %c0_703 = arith.constant 0 : index
    %c12_704 = arith.constant 12 : index
    %c1_705 = arith.constant 1 : index
    %c0_706 = arith.constant 0 : index
    %734 = vector.load %arg8[%c0_703, %c12_704, %c1_705, %c0_706] : memref<1x20x5x128xf32, #tpu.memory_space<vmem>>, vector<1x1x3x63xf32>
    %735 = vector.shape_cast %734 : vector<1x1x3x63xf32> to vector<3x63xf32>
    %736 = tpu.concatenate %733, %735 in 1 : vector<3x65xf32>, vector<3x63xf32> -> vector<3x128xf32>
    %737 = vector.broadcast %731 : f32 to vector<3x128xf32>
    %738 = arith.mulf %737, %736 : vector<3x128xf32>
    %739 = arith.addf %730, %738 : vector<3x128xf32>
    %c4_707 = arith.constant 4 : index
    %740 = memref.load %arg2[%c4_707] : memref<20xf32, #tpu.memory_space<smem>>
    %c0_708 = arith.constant 0 : index
    %c12_709 = arith.constant 12 : index
    %c0_710 = arith.constant 0 : index
    %c84 = arith.constant 84 : index
    %741 = vector.load %arg8[%c0_708, %c12_709, %c0_710, %c84] : memref<1x20x5x128xf32, #tpu.memory_space<vmem>>, vector<1x1x3x44xf32>
    %742 = vector.shape_cast %741 : vector<1x1x3x44xf32> to vector<3x44xf32>
    %c0_711 = arith.constant 0 : index
    %c12_712 = arith.constant 12 : index
    %c1_713 = arith.constant 1 : index
    %c0_714 = arith.constant 0 : index
    %743 = vector.load %arg8[%c0_711, %c12_712, %c1_713, %c0_714] : memref<1x20x5x128xf32, #tpu.memory_space<vmem>>, vector<1x1x3x84xf32>
    %744 = vector.shape_cast %743 : vector<1x1x3x84xf32> to vector<3x84xf32>
    %745 = tpu.concatenate %742, %744 in 1 : vector<3x44xf32>, vector<3x84xf32> -> vector<3x128xf32>
    %746 = vector.broadcast %740 : f32 to vector<3x128xf32>
    %747 = arith.mulf %746, %745 : vector<3x128xf32>
    %748 = arith.addf %739, %747 : vector<3x128xf32>
    %c12_715 = arith.constant 12 : index
    %c0_716 = arith.constant 0 : index
    %c0_717 = arith.constant 0 : index
    %749 = vector.load %arg10[%c12_715, %c0_716, %c0_717] : memref<20x3x128xf32, #tpu.memory_space<vmem>>, vector<1x3x128xf32>
    %750 = vector.shape_cast %749 : vector<1x3x128xf32> to vector<3x128xf32>
    %751 = vector.shape_cast %748 : vector<3x128xf32> to vector<1x3x128xf32>
    tpu.vector_store %arg10[%c12_715, %c0_716, %c0_717], %751 {strides = array<i32>} : memref<20x3x128xf32, #tpu.memory_space<vmem>>, vector<1x3x128xf32>,
    %c5_718 = arith.constant 5 : index
    %752 = memref.load %arg2[%c5_718] : memref<20xf32, #tpu.memory_space<smem>>
    %c0_719 = arith.constant 0 : index
    %c13_720 = arith.constant 13 : index
    %c0_721 = arith.constant 0 : index
    %c0_722 = arith.constant 0 : index
    %753 = vector.load %arg8[%c0_719, %c13_720, %c0_721, %c0_722] : memref<1x20x5x128xf32, #tpu.memory_space<vmem>>, vector<1x1x3x128xf32>
    %754 = vector.shape_cast %753 : vector<1x1x3x128xf32> to vector<3x128xf32>
    %755 = vector.broadcast %752 : f32 to vector<3x128xf32>
    %756 = arith.mulf %755, %754 : vector<3x128xf32>
    %c6_723 = arith.constant 6 : index
    %757 = memref.load %arg2[%c6_723] : memref<20xf32, #tpu.memory_space<smem>>
    %c0_724 = arith.constant 0 : index
    %c13_725 = arith.constant 13 : index
    %c0_726 = arith.constant 0 : index
    %c21_727 = arith.constant 21 : index
    %758 = vector.load %arg8[%c0_724, %c13_725, %c0_726, %c21_727] : memref<1x20x5x128xf32, #tpu.memory_space<vmem>>, vector<1x1x3x107xf32>
    %759 = vector.shape_cast %758 : vector<1x1x3x107xf32> to vector<3x107xf32>
    %c0_728 = arith.constant 0 : index
    %c13_729 = arith.constant 13 : index
    %c1_730 = arith.constant 1 : index
    %c0_731 = arith.constant 0 : index
    %760 = vector.load %arg8[%c0_728, %c13_729, %c1_730, %c0_731] : memref<1x20x5x128xf32, #tpu.memory_space<vmem>>, vector<1x1x3x21xf32>
    %761 = vector.shape_cast %760 : vector<1x1x3x21xf32> to vector<3x21xf32>
    %762 = tpu.concatenate %759, %761 in 1 : vector<3x107xf32>, vector<3x21xf32> -> vector<3x128xf32>
    %763 = vector.broadcast %757 : f32 to vector<3x128xf32>
    %764 = arith.mulf %763, %762 : vector<3x128xf32>
    %765 = arith.addf %756, %764 : vector<3x128xf32>
    %c7_732 = arith.constant 7 : index
    %766 = memref.load %arg2[%c7_732] : memref<20xf32, #tpu.memory_space<smem>>
    %c0_733 = arith.constant 0 : index
    %c13_734 = arith.constant 13 : index
    %c0_735 = arith.constant 0 : index
    %c42_736 = arith.constant 42 : index
    %767 = vector.load %arg8[%c0_733, %c13_734, %c0_735, %c42_736] : memref<1x20x5x128xf32, #tpu.memory_space<vmem>>, vector<1x1x3x86xf32>
    %768 = vector.shape_cast %767 : vector<1x1x3x86xf32> to vector<3x86xf32>
    %c0_737 = arith.constant 0 : index
    %c13_738 = arith.constant 13 : index
    %c1_739 = arith.constant 1 : index
    %c0_740 = arith.constant 0 : index
    %769 = vector.load %arg8[%c0_737, %c13_738, %c1_739, %c0_740] : memref<1x20x5x128xf32, #tpu.memory_space<vmem>>, vector<1x1x3x42xf32>
    %770 = vector.shape_cast %769 : vector<1x1x3x42xf32> to vector<3x42xf32>
    %771 = tpu.concatenate %768, %770 in 1 : vector<3x86xf32>, vector<3x42xf32> -> vector<3x128xf32>
    %772 = vector.broadcast %766 : f32 to vector<3x128xf32>
    %773 = arith.mulf %772, %771 : vector<3x128xf32>
    %774 = arith.addf %765, %773 : vector<3x128xf32>
    %c8_741 = arith.constant 8 : index
    %775 = memref.load %arg2[%c8_741] : memref<20xf32, #tpu.memory_space<smem>>
    %c0_742 = arith.constant 0 : index
    %c13_743 = arith.constant 13 : index
    %c0_744 = arith.constant 0 : index
    %c63_745 = arith.constant 63 : index
    %776 = vector.load %arg8[%c0_742, %c13_743, %c0_744, %c63_745] : memref<1x20x5x128xf32, #tpu.memory_space<vmem>>, vector<1x1x3x65xf32>
    %777 = vector.shape_cast %776 : vector<1x1x3x65xf32> to vector<3x65xf32>
    %c0_746 = arith.constant 0 : index
    %c13_747 = arith.constant 13 : index
    %c1_748 = arith.constant 1 : index
    %c0_749 = arith.constant 0 : index
    %778 = vector.load %arg8[%c0_746, %c13_747, %c1_748, %c0_749] : memref<1x20x5x128xf32, #tpu.memory_space<vmem>>, vector<1x1x3x63xf32>
    %779 = vector.shape_cast %778 : vector<1x1x3x63xf32> to vector<3x63xf32>
    %780 = tpu.concatenate %777, %779 in 1 : vector<3x65xf32>, vector<3x63xf32> -> vector<3x128xf32>
    %781 = vector.broadcast %775 : f32 to vector<3x128xf32>
    %782 = arith.mulf %781, %780 : vector<3x128xf32>
    %783 = arith.addf %774, %782 : vector<3x128xf32>
    %c9_750 = arith.constant 9 : index
    %784 = memref.load %arg2[%c9_750] : memref<20xf32, #tpu.memory_space<smem>>
    %c0_751 = arith.constant 0 : index
    %c13_752 = arith.constant 13 : index
    %c0_753 = arith.constant 0 : index
    %c84_754 = arith.constant 84 : index
    %785 = vector.load %arg8[%c0_751, %c13_752, %c0_753, %c84_754] : memref<1x20x5x128xf32, #tpu.memory_space<vmem>>, vector<1x1x3x44xf32>
    %786 = vector.shape_cast %785 : vector<1x1x3x44xf32> to vector<3x44xf32>
    %c0_755 = arith.constant 0 : index
    %c13_756 = arith.constant 13 : index
    %c1_757 = arith.constant 1 : index
    %c0_758 = arith.constant 0 : index
    %787 = vector.load %arg8[%c0_755, %c13_756, %c1_757, %c0_758] : memref<1x20x5x128xf32, #tpu.memory_space<vmem>>, vector<1x1x3x84xf32>
    %788 = vector.shape_cast %787 : vector<1x1x3x84xf32> to vector<3x84xf32>
    %789 = tpu.concatenate %786, %788 in 1 : vector<3x44xf32>, vector<3x84xf32> -> vector<3x128xf32>
    %790 = vector.broadcast %784 : f32 to vector<3x128xf32>
    %791 = arith.mulf %790, %789 : vector<3x128xf32>
    %792 = arith.addf %783, %791 : vector<3x128xf32>
    %c13_759 = arith.constant 13 : index
    %c0_760 = arith.constant 0 : index
    %c0_761 = arith.constant 0 : index
    %793 = vector.load %arg10[%c13_759, %c0_760, %c0_761] : memref<20x3x128xf32, #tpu.memory_space<vmem>>, vector<1x3x128xf32>
    %794 = vector.shape_cast %793 : vector<1x3x128xf32> to vector<3x128xf32>
    %795 = vector.shape_cast %792 : vector<3x128xf32> to vector<1x3x128xf32>
    tpu.vector_store %arg10[%c13_759, %c0_760, %c0_761], %795 {strides = array<i32>} : memref<20x3x128xf32, #tpu.memory_space<vmem>>, vector<1x3x128xf32>,
    %c10_762 = arith.constant 10 : index
    %796 = memref.load %arg2[%c10_762] : memref<20xf32, #tpu.memory_space<smem>>
    %c0_763 = arith.constant 0 : index
    %c14_764 = arith.constant 14 : index
    %c0_765 = arith.constant 0 : index
    %c0_766 = arith.constant 0 : index
    %797 = vector.load %arg8[%c0_763, %c14_764, %c0_765, %c0_766] : memref<1x20x5x128xf32, #tpu.memory_space<vmem>>, vector<1x1x3x128xf32>
    %798 = vector.shape_cast %797 : vector<1x1x3x128xf32> to vector<3x128xf32>
    %799 = vector.broadcast %796 : f32 to vector<3x128xf32>
    %800 = arith.mulf %799, %798 : vector<3x128xf32>
    %c11_767 = arith.constant 11 : index
    %801 = memref.load %arg2[%c11_767] : memref<20xf32, #tpu.memory_space<smem>>
    %c0_768 = arith.constant 0 : index
    %c14_769 = arith.constant 14 : index
    %c0_770 = arith.constant 0 : index
    %c21_771 = arith.constant 21 : index
    %802 = vector.load %arg8[%c0_768, %c14_769, %c0_770, %c21_771] : memref<1x20x5x128xf32, #tpu.memory_space<vmem>>, vector<1x1x3x107xf32>
    %803 = vector.shape_cast %802 : vector<1x1x3x107xf32> to vector<3x107xf32>
    %c0_772 = arith.constant 0 : index
    %c14_773 = arith.constant 14 : index
    %c1_774 = arith.constant 1 : index
    %c0_775 = arith.constant 0 : index
    %804 = vector.load %arg8[%c0_772, %c14_773, %c1_774, %c0_775] : memref<1x20x5x128xf32, #tpu.memory_space<vmem>>, vector<1x1x3x21xf32>
    %805 = vector.shape_cast %804 : vector<1x1x3x21xf32> to vector<3x21xf32>
    %806 = tpu.concatenate %803, %805 in 1 : vector<3x107xf32>, vector<3x21xf32> -> vector<3x128xf32>
    %807 = vector.broadcast %801 : f32 to vector<3x128xf32>
    %808 = arith.mulf %807, %806 : vector<3x128xf32>
    %809 = arith.addf %800, %808 : vector<3x128xf32>
    %c12_776 = arith.constant 12 : index
    %810 = memref.load %arg2[%c12_776] : memref<20xf32, #tpu.memory_space<smem>>
    %c0_777 = arith.constant 0 : index
    %c14_778 = arith.constant 14 : index
    %c0_779 = arith.constant 0 : index
    %c42_780 = arith.constant 42 : index
    %811 = vector.load %arg8[%c0_777, %c14_778, %c0_779, %c42_780] : memref<1x20x5x128xf32, #tpu.memory_space<vmem>>, vector<1x1x3x86xf32>
    %812 = vector.shape_cast %811 : vector<1x1x3x86xf32> to vector<3x86xf32>
    %c0_781 = arith.constant 0 : index
    %c14_782 = arith.constant 14 : index
    %c1_783 = arith.constant 1 : index
    %c0_784 = arith.constant 0 : index
    %813 = vector.load %arg8[%c0_781, %c14_782, %c1_783, %c0_784] : memref<1x20x5x128xf32, #tpu.memory_space<vmem>>, vector<1x1x3x42xf32>
    %814 = vector.shape_cast %813 : vector<1x1x3x42xf32> to vector<3x42xf32>
    %815 = tpu.concatenate %812, %814 in 1 : vector<3x86xf32>, vector<3x42xf32> -> vector<3x128xf32>
    %816 = vector.broadcast %810 : f32 to vector<3x128xf32>
    %817 = arith.mulf %816, %815 : vector<3x128xf32>
    %818 = arith.addf %809, %817 : vector<3x128xf32>
    %c13_785 = arith.constant 13 : index
    %819 = memref.load %arg2[%c13_785] : memref<20xf32, #tpu.memory_space<smem>>
    %c0_786 = arith.constant 0 : index
    %c14_787 = arith.constant 14 : index
    %c0_788 = arith.constant 0 : index
    %c63_789 = arith.constant 63 : index
    %820 = vector.load %arg8[%c0_786, %c14_787, %c0_788, %c63_789] : memref<1x20x5x128xf32, #tpu.memory_space<vmem>>, vector<1x1x3x65xf32>
    %821 = vector.shape_cast %820 : vector<1x1x3x65xf32> to vector<3x65xf32>
    %c0_790 = arith.constant 0 : index
    %c14_791 = arith.constant 14 : index
    %c1_792 = arith.constant 1 : index
    %c0_793 = arith.constant 0 : index
    %822 = vector.load %arg8[%c0_790, %c14_791, %c1_792, %c0_793] : memref<1x20x5x128xf32, #tpu.memory_space<vmem>>, vector<1x1x3x63xf32>
    %823 = vector.shape_cast %822 : vector<1x1x3x63xf32> to vector<3x63xf32>
    %824 = tpu.concatenate %821, %823 in 1 : vector<3x65xf32>, vector<3x63xf32> -> vector<3x128xf32>
    %825 = vector.broadcast %819 : f32 to vector<3x128xf32>
    %826 = arith.mulf %825, %824 : vector<3x128xf32>
    %827 = arith.addf %818, %826 : vector<3x128xf32>
    %c14_794 = arith.constant 14 : index
    %828 = memref.load %arg2[%c14_794] : memref<20xf32, #tpu.memory_space<smem>>
    %c0_795 = arith.constant 0 : index
    %c14_796 = arith.constant 14 : index
    %c0_797 = arith.constant 0 : index
    %c84_798 = arith.constant 84 : index
    %829 = vector.load %arg8[%c0_795, %c14_796, %c0_797, %c84_798] : memref<1x20x5x128xf32, #tpu.memory_space<vmem>>, vector<1x1x3x44xf32>
    %830 = vector.shape_cast %829 : vector<1x1x3x44xf32> to vector<3x44xf32>
    %c0_799 = arith.constant 0 : index
    %c14_800 = arith.constant 14 : index
    %c1_801 = arith.constant 1 : index
    %c0_802 = arith.constant 0 : index
    %831 = vector.load %arg8[%c0_799, %c14_800, %c1_801, %c0_802] : memref<1x20x5x128xf32, #tpu.memory_space<vmem>>, vector<1x1x3x84xf32>
    %832 = vector.shape_cast %831 : vector<1x1x3x84xf32> to vector<3x84xf32>
    %833 = tpu.concatenate %830, %832 in 1 : vector<3x44xf32>, vector<3x84xf32> -> vector<3x128xf32>
    %834 = vector.broadcast %828 : f32 to vector<3x128xf32>
    %835 = arith.mulf %834, %833 : vector<3x128xf32>
    %836 = arith.addf %827, %835 : vector<3x128xf32>
    %c14_803 = arith.constant 14 : index
    %c0_804 = arith.constant 0 : index
    %c0_805 = arith.constant 0 : index
    %837 = vector.load %arg10[%c14_803, %c0_804, %c0_805] : memref<20x3x128xf32, #tpu.memory_space<vmem>>, vector<1x3x128xf32>
    %838 = vector.shape_cast %837 : vector<1x3x128xf32> to vector<3x128xf32>
    %839 = vector.shape_cast %836 : vector<3x128xf32> to vector<1x3x128xf32>
    tpu.vector_store %arg10[%c14_803, %c0_804, %c0_805], %839 {strides = array<i32>} : memref<20x3x128xf32, #tpu.memory_space<vmem>>, vector<1x3x128xf32>,
    %c15_806 = arith.constant 15 : index
    %840 = memref.load %arg2[%c15_806] : memref<20xf32, #tpu.memory_space<smem>>
    %c0_807 = arith.constant 0 : index
    %c15_808 = arith.constant 15 : index
    %c0_809 = arith.constant 0 : index
    %c0_810 = arith.constant 0 : index
    %841 = vector.load %arg8[%c0_807, %c15_808, %c0_809, %c0_810] : memref<1x20x5x128xf32, #tpu.memory_space<vmem>>, vector<1x1x3x128xf32>
    %842 = vector.shape_cast %841 : vector<1x1x3x128xf32> to vector<3x128xf32>
    %843 = vector.broadcast %840 : f32 to vector<3x128xf32>
    %844 = arith.mulf %843, %842 : vector<3x128xf32>
    %c16_811 = arith.constant 16 : index
    %845 = memref.load %arg2[%c16_811] : memref<20xf32, #tpu.memory_space<smem>>
    %c0_812 = arith.constant 0 : index
    %c15_813 = arith.constant 15 : index
    %c0_814 = arith.constant 0 : index
    %c21_815 = arith.constant 21 : index
    %846 = vector.load %arg8[%c0_812, %c15_813, %c0_814, %c21_815] : memref<1x20x5x128xf32, #tpu.memory_space<vmem>>, vector<1x1x3x107xf32>
    %847 = vector.shape_cast %846 : vector<1x1x3x107xf32> to vector<3x107xf32>
    %c0_816 = arith.constant 0 : index
    %c15_817 = arith.constant 15 : index
    %c1_818 = arith.constant 1 : index
    %c0_819 = arith.constant 0 : index
    %848 = vector.load %arg8[%c0_816, %c15_817, %c1_818, %c0_819] : memref<1x20x5x128xf32, #tpu.memory_space<vmem>>, vector<1x1x3x21xf32>
    %849 = vector.shape_cast %848 : vector<1x1x3x21xf32> to vector<3x21xf32>
    %850 = tpu.concatenate %847, %849 in 1 : vector<3x107xf32>, vector<3x21xf32> -> vector<3x128xf32>
    %851 = vector.broadcast %845 : f32 to vector<3x128xf32>
    %852 = arith.mulf %851, %850 : vector<3x128xf32>
    %853 = arith.addf %844, %852 : vector<3x128xf32>
    %c17_820 = arith.constant 17 : index
    %854 = memref.load %arg2[%c17_820] : memref<20xf32, #tpu.memory_space<smem>>
    %c0_821 = arith.constant 0 : index
    %c15_822 = arith.constant 15 : index
    %c0_823 = arith.constant 0 : index
    %c42_824 = arith.constant 42 : index
    %855 = vector.load %arg8[%c0_821, %c15_822, %c0_823, %c42_824] : memref<1x20x5x128xf32, #tpu.memory_space<vmem>>, vector<1x1x3x86xf32>
    %856 = vector.shape_cast %855 : vector<1x1x3x86xf32> to vector<3x86xf32>
    %c0_825 = arith.constant 0 : index
    %c15_826 = arith.constant 15 : index
    %c1_827 = arith.constant 1 : index
    %c0_828 = arith.constant 0 : index
    %857 = vector.load %arg8[%c0_825, %c15_826, %c1_827, %c0_828] : memref<1x20x5x128xf32, #tpu.memory_space<vmem>>, vector<1x1x3x42xf32>
    %858 = vector.shape_cast %857 : vector<1x1x3x42xf32> to vector<3x42xf32>
    %859 = tpu.concatenate %856, %858 in 1 : vector<3x86xf32>, vector<3x42xf32> -> vector<3x128xf32>
    %860 = vector.broadcast %854 : f32 to vector<3x128xf32>
    %861 = arith.mulf %860, %859 : vector<3x128xf32>
    %862 = arith.addf %853, %861 : vector<3x128xf32>
    %c18_829 = arith.constant 18 : index
    %863 = memref.load %arg2[%c18_829] : memref<20xf32, #tpu.memory_space<smem>>
    %c0_830 = arith.constant 0 : index
    %c15_831 = arith.constant 15 : index
    %c0_832 = arith.constant 0 : index
    %c63_833 = arith.constant 63 : index
    %864 = vector.load %arg8[%c0_830, %c15_831, %c0_832, %c63_833] : memref<1x20x5x128xf32, #tpu.memory_space<vmem>>, vector<1x1x3x65xf32>
    %865 = vector.shape_cast %864 : vector<1x1x3x65xf32> to vector<3x65xf32>
    %c0_834 = arith.constant 0 : index
    %c15_835 = arith.constant 15 : index
    %c1_836 = arith.constant 1 : index
    %c0_837 = arith.constant 0 : index
    %866 = vector.load %arg8[%c0_834, %c15_835, %c1_836, %c0_837] : memref<1x20x5x128xf32, #tpu.memory_space<vmem>>, vector<1x1x3x63xf32>
    %867 = vector.shape_cast %866 : vector<1x1x3x63xf32> to vector<3x63xf32>
    %868 = tpu.concatenate %865, %867 in 1 : vector<3x65xf32>, vector<3x63xf32> -> vector<3x128xf32>
    %869 = vector.broadcast %863 : f32 to vector<3x128xf32>
    %870 = arith.mulf %869, %868 : vector<3x128xf32>
    %871 = arith.addf %862, %870 : vector<3x128xf32>
    %c19_838 = arith.constant 19 : index
    %872 = memref.load %arg2[%c19_838] : memref<20xf32, #tpu.memory_space<smem>>
    %c0_839 = arith.constant 0 : index
    %c15_840 = arith.constant 15 : index
    %c0_841 = arith.constant 0 : index
    %c84_842 = arith.constant 84 : index
    %873 = vector.load %arg8[%c0_839, %c15_840, %c0_841, %c84_842] : memref<1x20x5x128xf32, #tpu.memory_space<vmem>>, vector<1x1x3x44xf32>
    %874 = vector.shape_cast %873 : vector<1x1x3x44xf32> to vector<3x44xf32>
    %c0_843 = arith.constant 0 : index
    %c15_844 = arith.constant 15 : index
    %c1_845 = arith.constant 1 : index
    %c0_846 = arith.constant 0 : index
    %875 = vector.load %arg8[%c0_843, %c15_844, %c1_845, %c0_846] : memref<1x20x5x128xf32, #tpu.memory_space<vmem>>, vector<1x1x3x84xf32>
    %876 = vector.shape_cast %875 : vector<1x1x3x84xf32> to vector<3x84xf32>
    %877 = tpu.concatenate %874, %876 in 1 : vector<3x44xf32>, vector<3x84xf32> -> vector<3x128xf32>
    %878 = vector.broadcast %872 : f32 to vector<3x128xf32>
    %879 = arith.mulf %878, %877 : vector<3x128xf32>
    %880 = arith.addf %871, %879 : vector<3x128xf32>
    %c15_847 = arith.constant 15 : index
    %c0_848 = arith.constant 0 : index
    %c0_849 = arith.constant 0 : index
    %881 = vector.load %arg10[%c15_847, %c0_848, %c0_849] : memref<20x3x128xf32, #tpu.memory_space<vmem>>, vector<1x3x128xf32>
    %882 = vector.shape_cast %881 : vector<1x3x128xf32> to vector<3x128xf32>
    %883 = vector.shape_cast %880 : vector<3x128xf32> to vector<1x3x128xf32>
    tpu.vector_store %arg10[%c15_847, %c0_848, %c0_849], %883 {strides = array<i32>} : memref<20x3x128xf32, #tpu.memory_space<vmem>>, vector<1x3x128xf32>,
    %c0_850 = arith.constant 0 : index
    %884 = memref.load %arg2[%c0_850] : memref<20xf32, #tpu.memory_space<smem>>
    %c0_851 = arith.constant 0 : index
    %c16_852 = arith.constant 16 : index
    %c0_853 = arith.constant 0 : index
    %c4_854 = arith.constant 4 : index
    %885 = vector.load %arg8[%c0_851, %c16_852, %c0_853, %c4_854] : memref<1x20x5x128xf32, #tpu.memory_space<vmem>>, vector<1x1x3x124xf32>
    %886 = vector.shape_cast %885 : vector<1x1x3x124xf32> to vector<3x124xf32>
    %c0_855 = arith.constant 0 : index
    %c16_856 = arith.constant 16 : index
    %c1_857 = arith.constant 1 : index
    %c0_858 = arith.constant 0 : index
    %887 = vector.load %arg8[%c0_855, %c16_856, %c1_857, %c0_858] : memref<1x20x5x128xf32, #tpu.memory_space<vmem>>, vector<1x1x3x4xf32>
    %888 = vector.shape_cast %887 : vector<1x1x3x4xf32> to vector<3x4xf32>
    %889 = tpu.concatenate %886, %888 in 1 : vector<3x124xf32>, vector<3x4xf32> -> vector<3x128xf32>
    %890 = vector.broadcast %884 : f32 to vector<3x128xf32>
    %891 = arith.mulf %890, %889 : vector<3x128xf32>
    %c1_859 = arith.constant 1 : index
    %892 = memref.load %arg2[%c1_859] : memref<20xf32, #tpu.memory_space<smem>>
    %c0_860 = arith.constant 0 : index
    %c16_861 = arith.constant 16 : index
    %c0_862 = arith.constant 0 : index
    %c23_863 = arith.constant 23 : index
    %893 = vector.load %arg8[%c0_860, %c16_861, %c0_862, %c23_863] : memref<1x20x5x128xf32, #tpu.memory_space<vmem>>, vector<1x1x3x105xf32>
    %894 = vector.shape_cast %893 : vector<1x1x3x105xf32> to vector<3x105xf32>
    %c0_864 = arith.constant 0 : index
    %c16_865 = arith.constant 16 : index
    %c1_866 = arith.constant 1 : index
    %c0_867 = arith.constant 0 : index
    %895 = vector.load %arg8[%c0_864, %c16_865, %c1_866, %c0_867] : memref<1x20x5x128xf32, #tpu.memory_space<vmem>>, vector<1x1x3x23xf32>
    %896 = vector.shape_cast %895 : vector<1x1x3x23xf32> to vector<3x23xf32>
    %897 = tpu.concatenate %894, %896 in 1 : vector<3x105xf32>, vector<3x23xf32> -> vector<3x128xf32>
    %898 = vector.broadcast %892 : f32 to vector<3x128xf32>
    %899 = arith.mulf %898, %897 : vector<3x128xf32>
    %900 = arith.addf %891, %899 : vector<3x128xf32>
    %c2_868 = arith.constant 2 : index
    %901 = memref.load %arg2[%c2_868] : memref<20xf32, #tpu.memory_space<smem>>
    %c0_869 = arith.constant 0 : index
    %c16_870 = arith.constant 16 : index
    %c0_871 = arith.constant 0 : index
    %c42_872 = arith.constant 42 : index
    %902 = vector.load %arg8[%c0_869, %c16_870, %c0_871, %c42_872] : memref<1x20x5x128xf32, #tpu.memory_space<vmem>>, vector<1x1x3x86xf32>
    %903 = vector.shape_cast %902 : vector<1x1x3x86xf32> to vector<3x86xf32>
    %c0_873 = arith.constant 0 : index
    %c16_874 = arith.constant 16 : index
    %c1_875 = arith.constant 1 : index
    %c0_876 = arith.constant 0 : index
    %904 = vector.load %arg8[%c0_873, %c16_874, %c1_875, %c0_876] : memref<1x20x5x128xf32, #tpu.memory_space<vmem>>, vector<1x1x3x42xf32>
    %905 = vector.shape_cast %904 : vector<1x1x3x42xf32> to vector<3x42xf32>
    %906 = tpu.concatenate %903, %905 in 1 : vector<3x86xf32>, vector<3x42xf32> -> vector<3x128xf32>
    %907 = vector.broadcast %901 : f32 to vector<3x128xf32>
    %908 = arith.mulf %907, %906 : vector<3x128xf32>
    %909 = arith.addf %900, %908 : vector<3x128xf32>
    %c3_877 = arith.constant 3 : index
    %910 = memref.load %arg2[%c3_877] : memref<20xf32, #tpu.memory_space<smem>>
    %c0_878 = arith.constant 0 : index
    %c16_879 = arith.constant 16 : index
    %c0_880 = arith.constant 0 : index
    %c61_881 = arith.constant 61 : index
    %911 = vector.load %arg8[%c0_878, %c16_879, %c0_880, %c61_881] : memref<1x20x5x128xf32, #tpu.memory_space<vmem>>, vector<1x1x3x67xf32>
    %912 = vector.shape_cast %911 : vector<1x1x3x67xf32> to vector<3x67xf32>
    %c0_882 = arith.constant 0 : index
    %c16_883 = arith.constant 16 : index
    %c1_884 = arith.constant 1 : index
    %c0_885 = arith.constant 0 : index
    %913 = vector.load %arg8[%c0_882, %c16_883, %c1_884, %c0_885] : memref<1x20x5x128xf32, #tpu.memory_space<vmem>>, vector<1x1x3x61xf32>
    %914 = vector.shape_cast %913 : vector<1x1x3x61xf32> to vector<3x61xf32>
    %915 = tpu.concatenate %912, %914 in 1 : vector<3x67xf32>, vector<3x61xf32> -> vector<3x128xf32>
    %916 = vector.broadcast %910 : f32 to vector<3x128xf32>
    %917 = arith.mulf %916, %915 : vector<3x128xf32>
    %918 = arith.addf %909, %917 : vector<3x128xf32>
    %c4_886 = arith.constant 4 : index
    %919 = memref.load %arg2[%c4_886] : memref<20xf32, #tpu.memory_space<smem>>
    %c0_887 = arith.constant 0 : index
    %c16_888 = arith.constant 16 : index
    %c0_889 = arith.constant 0 : index
    %c80 = arith.constant 80 : index
    %920 = vector.load %arg8[%c0_887, %c16_888, %c0_889, %c80] : memref<1x20x5x128xf32, #tpu.memory_space<vmem>>, vector<1x1x3x48xf32>
    %921 = vector.shape_cast %920 : vector<1x1x3x48xf32> to vector<3x48xf32>
    %c0_890 = arith.constant 0 : index
    %c16_891 = arith.constant 16 : index
    %c1_892 = arith.constant 1 : index
    %c0_893 = arith.constant 0 : index
    %922 = vector.load %arg8[%c0_890, %c16_891, %c1_892, %c0_893] : memref<1x20x5x128xf32, #tpu.memory_space<vmem>>, vector<1x1x3x80xf32>
    %923 = vector.shape_cast %922 : vector<1x1x3x80xf32> to vector<3x80xf32>
    %924 = tpu.concatenate %921, %923 in 1 : vector<3x48xf32>, vector<3x80xf32> -> vector<3x128xf32>
    %925 = vector.broadcast %919 : f32 to vector<3x128xf32>
    %926 = arith.mulf %925, %924 : vector<3x128xf32>
    %927 = arith.addf %918, %926 : vector<3x128xf32>
    %c16_894 = arith.constant 16 : index
    %c0_895 = arith.constant 0 : index
    %c0_896 = arith.constant 0 : index
    %928 = vector.load %arg10[%c16_894, %c0_895, %c0_896] : memref<20x3x128xf32, #tpu.memory_space<vmem>>, vector<1x3x128xf32>
    %929 = vector.shape_cast %928 : vector<1x3x128xf32> to vector<3x128xf32>
    %930 = vector.shape_cast %927 : vector<3x128xf32> to vector<1x3x128xf32>
    tpu.vector_store %arg10[%c16_894, %c0_895, %c0_896], %930 {strides = array<i32>} : memref<20x3x128xf32, #tpu.memory_space<vmem>>, vector<1x3x128xf32>,
    %c5_897 = arith.constant 5 : index
    %931 = memref.load %arg2[%c5_897] : memref<20xf32, #tpu.memory_space<smem>>
    %c0_898 = arith.constant 0 : index
    %c17_899 = arith.constant 17 : index
    %c0_900 = arith.constant 0 : index
    %c4_901 = arith.constant 4 : index
    %932 = vector.load %arg8[%c0_898, %c17_899, %c0_900, %c4_901] : memref<1x20x5x128xf32, #tpu.memory_space<vmem>>, vector<1x1x3x124xf32>
    %933 = vector.shape_cast %932 : vector<1x1x3x124xf32> to vector<3x124xf32>
    %c0_902 = arith.constant 0 : index
    %c17_903 = arith.constant 17 : index
    %c1_904 = arith.constant 1 : index
    %c0_905 = arith.constant 0 : index
    %934 = vector.load %arg8[%c0_902, %c17_903, %c1_904, %c0_905] : memref<1x20x5x128xf32, #tpu.memory_space<vmem>>, vector<1x1x3x4xf32>
    %935 = vector.shape_cast %934 : vector<1x1x3x4xf32> to vector<3x4xf32>
    %936 = tpu.concatenate %933, %935 in 1 : vector<3x124xf32>, vector<3x4xf32> -> vector<3x128xf32>
    %937 = vector.broadcast %931 : f32 to vector<3x128xf32>
    %938 = arith.mulf %937, %936 : vector<3x128xf32>
    %c6_906 = arith.constant 6 : index
    %939 = memref.load %arg2[%c6_906] : memref<20xf32, #tpu.memory_space<smem>>
    %c0_907 = arith.constant 0 : index
    %c17_908 = arith.constant 17 : index
    %c0_909 = arith.constant 0 : index
    %c23_910 = arith.constant 23 : index
    %940 = vector.load %arg8[%c0_907, %c17_908, %c0_909, %c23_910] : memref<1x20x5x128xf32, #tpu.memory_space<vmem>>, vector<1x1x3x105xf32>
    %941 = vector.shape_cast %940 : vector<1x1x3x105xf32> to vector<3x105xf32>
    %c0_911 = arith.constant 0 : index
    %c17_912 = arith.constant 17 : index
    %c1_913 = arith.constant 1 : index
    %c0_914 = arith.constant 0 : index
    %942 = vector.load %arg8[%c0_911, %c17_912, %c1_913, %c0_914] : memref<1x20x5x128xf32, #tpu.memory_space<vmem>>, vector<1x1x3x23xf32>
    %943 = vector.shape_cast %942 : vector<1x1x3x23xf32> to vector<3x23xf32>
    %944 = tpu.concatenate %941, %943 in 1 : vector<3x105xf32>, vector<3x23xf32> -> vector<3x128xf32>
    %945 = vector.broadcast %939 : f32 to vector<3x128xf32>
    %946 = arith.mulf %945, %944 : vector<3x128xf32>
    %947 = arith.addf %938, %946 : vector<3x128xf32>
    %c7_915 = arith.constant 7 : index
    %948 = memref.load %arg2[%c7_915] : memref<20xf32, #tpu.memory_space<smem>>
    %c0_916 = arith.constant 0 : index
    %c17_917 = arith.constant 17 : index
    %c0_918 = arith.constant 0 : index
    %c42_919 = arith.constant 42 : index
    %949 = vector.load %arg8[%c0_916, %c17_917, %c0_918, %c42_919] : memref<1x20x5x128xf32, #tpu.memory_space<vmem>>, vector<1x1x3x86xf32>
    %950 = vector.shape_cast %949 : vector<1x1x3x86xf32> to vector<3x86xf32>
    %c0_920 = arith.constant 0 : index
    %c17_921 = arith.constant 17 : index
    %c1_922 = arith.constant 1 : index
    %c0_923 = arith.constant 0 : index
    %951 = vector.load %arg8[%c0_920, %c17_921, %c1_922, %c0_923] : memref<1x20x5x128xf32, #tpu.memory_space<vmem>>, vector<1x1x3x42xf32>
    %952 = vector.shape_cast %951 : vector<1x1x3x42xf32> to vector<3x42xf32>
    %953 = tpu.concatenate %950, %952 in 1 : vector<3x86xf32>, vector<3x42xf32> -> vector<3x128xf32>
    %954 = vector.broadcast %948 : f32 to vector<3x128xf32>
    %955 = arith.mulf %954, %953 : vector<3x128xf32>
    %956 = arith.addf %947, %955 : vector<3x128xf32>
    %c8_924 = arith.constant 8 : index
    %957 = memref.load %arg2[%c8_924] : memref<20xf32, #tpu.memory_space<smem>>
    %c0_925 = arith.constant 0 : index
    %c17_926 = arith.constant 17 : index
    %c0_927 = arith.constant 0 : index
    %c61_928 = arith.constant 61 : index
    %958 = vector.load %arg8[%c0_925, %c17_926, %c0_927, %c61_928] : memref<1x20x5x128xf32, #tpu.memory_space<vmem>>, vector<1x1x3x67xf32>
    %959 = vector.shape_cast %958 : vector<1x1x3x67xf32> to vector<3x67xf32>
    %c0_929 = arith.constant 0 : index
    %c17_930 = arith.constant 17 : index
    %c1_931 = arith.constant 1 : index
    %c0_932 = arith.constant 0 : index
    %960 = vector.load %arg8[%c0_929, %c17_930, %c1_931, %c0_932] : memref<1x20x5x128xf32, #tpu.memory_space<vmem>>, vector<1x1x3x61xf32>
    %961 = vector.shape_cast %960 : vector<1x1x3x61xf32> to vector<3x61xf32>
    %962 = tpu.concatenate %959, %961 in 1 : vector<3x67xf32>, vector<3x61xf32> -> vector<3x128xf32>
    %963 = vector.broadcast %957 : f32 to vector<3x128xf32>
    %964 = arith.mulf %963, %962 : vector<3x128xf32>
    %965 = arith.addf %956, %964 : vector<3x128xf32>
    %c9_933 = arith.constant 9 : index
    %966 = memref.load %arg2[%c9_933] : memref<20xf32, #tpu.memory_space<smem>>
    %c0_934 = arith.constant 0 : index
    %c17_935 = arith.constant 17 : index
    %c0_936 = arith.constant 0 : index
    %c80_937 = arith.constant 80 : index
    %967 = vector.load %arg8[%c0_934, %c17_935, %c0_936, %c80_937] : memref<1x20x5x128xf32, #tpu.memory_space<vmem>>, vector<1x1x3x48xf32>
    %968 = vector.shape_cast %967 : vector<1x1x3x48xf32> to vector<3x48xf32>
    %c0_938 = arith.constant 0 : index
    %c17_939 = arith.constant 17 : index
    %c1_940 = arith.constant 1 : index
    %c0_941 = arith.constant 0 : index
    %969 = vector.load %arg8[%c0_938, %c17_939, %c1_940, %c0_941] : memref<1x20x5x128xf32, #tpu.memory_space<vmem>>, vector<1x1x3x80xf32>
    %970 = vector.shape_cast %969 : vector<1x1x3x80xf32> to vector<3x80xf32>
    %971 = tpu.concatenate %968, %970 in 1 : vector<3x48xf32>, vector<3x80xf32> -> vector<3x128xf32>
    %972 = vector.broadcast %966 : f32 to vector<3x128xf32>
    %973 = arith.mulf %972, %971 : vector<3x128xf32>
    %974 = arith.addf %965, %973 : vector<3x128xf32>
    %c17_942 = arith.constant 17 : index
    %c0_943 = arith.constant 0 : index
    %c0_944 = arith.constant 0 : index
    %975 = vector.load %arg10[%c17_942, %c0_943, %c0_944] : memref<20x3x128xf32, #tpu.memory_space<vmem>>, vector<1x3x128xf32>
    %976 = vector.shape_cast %975 : vector<1x3x128xf32> to vector<3x128xf32>
    %977 = vector.shape_cast %974 : vector<3x128xf32> to vector<1x3x128xf32>
    tpu.vector_store %arg10[%c17_942, %c0_943, %c0_944], %977 {strides = array<i32>} : memref<20x3x128xf32, #tpu.memory_space<vmem>>, vector<1x3x128xf32>,
    %c10_945 = arith.constant 10 : index
    %978 = memref.load %arg2[%c10_945] : memref<20xf32, #tpu.memory_space<smem>>
    %c0_946 = arith.constant 0 : index
    %c18_947 = arith.constant 18 : index
    %c0_948 = arith.constant 0 : index
    %c4_949 = arith.constant 4 : index
    %979 = vector.load %arg8[%c0_946, %c18_947, %c0_948, %c4_949] : memref<1x20x5x128xf32, #tpu.memory_space<vmem>>, vector<1x1x3x124xf32>
    %980 = vector.shape_cast %979 : vector<1x1x3x124xf32> to vector<3x124xf32>
    %c0_950 = arith.constant 0 : index
    %c18_951 = arith.constant 18 : index
    %c1_952 = arith.constant 1 : index
    %c0_953 = arith.constant 0 : index
    %981 = vector.load %arg8[%c0_950, %c18_951, %c1_952, %c0_953] : memref<1x20x5x128xf32, #tpu.memory_space<vmem>>, vector<1x1x3x4xf32>
    %982 = vector.shape_cast %981 : vector<1x1x3x4xf32> to vector<3x4xf32>
    %983 = tpu.concatenate %980, %982 in 1 : vector<3x124xf32>, vector<3x4xf32> -> vector<3x128xf32>
    %984 = vector.broadcast %978 : f32 to vector<3x128xf32>
    %985 = arith.mulf %984, %983 : vector<3x128xf32>
    %c11_954 = arith.constant 11 : index
    %986 = memref.load %arg2[%c11_954] : memref<20xf32, #tpu.memory_space<smem>>
    %c0_955 = arith.constant 0 : index
    %c18_956 = arith.constant 18 : index
    %c0_957 = arith.constant 0 : index
    %c23_958 = arith.constant 23 : index
    %987 = vector.load %arg8[%c0_955, %c18_956, %c0_957, %c23_958] : memref<1x20x5x128xf32, #tpu.memory_space<vmem>>, vector<1x1x3x105xf32>
    %988 = vector.shape_cast %987 : vector<1x1x3x105xf32> to vector<3x105xf32>
    %c0_959 = arith.constant 0 : index
    %c18_960 = arith.constant 18 : index
    %c1_961 = arith.constant 1 : index
    %c0_962 = arith.constant 0 : index
    %989 = vector.load %arg8[%c0_959, %c18_960, %c1_961, %c0_962] : memref<1x20x5x128xf32, #tpu.memory_space<vmem>>, vector<1x1x3x23xf32>
    %990 = vector.shape_cast %989 : vector<1x1x3x23xf32> to vector<3x23xf32>
    %991 = tpu.concatenate %988, %990 in 1 : vector<3x105xf32>, vector<3x23xf32> -> vector<3x128xf32>
    %992 = vector.broadcast %986 : f32 to vector<3x128xf32>
    %993 = arith.mulf %992, %991 : vector<3x128xf32>
    %994 = arith.addf %985, %993 : vector<3x128xf32>
    %c12_963 = arith.constant 12 : index
    %995 = memref.load %arg2[%c12_963] : memref<20xf32, #tpu.memory_space<smem>>
    %c0_964 = arith.constant 0 : index
    %c18_965 = arith.constant 18 : index
    %c0_966 = arith.constant 0 : index
    %c42_967 = arith.constant 42 : index
    %996 = vector.load %arg8[%c0_964, %c18_965, %c0_966, %c42_967] : memref<1x20x5x128xf32, #tpu.memory_space<vmem>>, vector<1x1x3x86xf32>
    %997 = vector.shape_cast %996 : vector<1x1x3x86xf32> to vector<3x86xf32>
    %c0_968 = arith.constant 0 : index
    %c18_969 = arith.constant 18 : index
    %c1_970 = arith.constant 1 : index
    %c0_971 = arith.constant 0 : index
    %998 = vector.load %arg8[%c0_968, %c18_969, %c1_970, %c0_971] : memref<1x20x5x128xf32, #tpu.memory_space<vmem>>, vector<1x1x3x42xf32>
    %999 = vector.shape_cast %998 : vector<1x1x3x42xf32> to vector<3x42xf32>
    %1000 = tpu.concatenate %997, %999 in 1 : vector<3x86xf32>, vector<3x42xf32> -> vector<3x128xf32>
    %1001 = vector.broadcast %995 : f32 to vector<3x128xf32>
    %1002 = arith.mulf %1001, %1000 : vector<3x128xf32>
    %1003 = arith.addf %994, %1002 : vector<3x128xf32>
    %c13_972 = arith.constant 13 : index
    %1004 = memref.load %arg2[%c13_972] : memref<20xf32, #tpu.memory_space<smem>>
    %c0_973 = arith.constant 0 : index
    %c18_974 = arith.constant 18 : index
    %c0_975 = arith.constant 0 : index
    %c61_976 = arith.constant 61 : index
    %1005 = vector.load %arg8[%c0_973, %c18_974, %c0_975, %c61_976] : memref<1x20x5x128xf32, #tpu.memory_space<vmem>>, vector<1x1x3x67xf32>
    %1006 = vector.shape_cast %1005 : vector<1x1x3x67xf32> to vector<3x67xf32>
    %c0_977 = arith.constant 0 : index
    %c18_978 = arith.constant 18 : index
    %c1_979 = arith.constant 1 : index
    %c0_980 = arith.constant 0 : index
    %1007 = vector.load %arg8[%c0_977, %c18_978, %c1_979, %c0_980] : memref<1x20x5x128xf32, #tpu.memory_space<vmem>>, vector<1x1x3x61xf32>
    %1008 = vector.shape_cast %1007 : vector<1x1x3x61xf32> to vector<3x61xf32>
    %1009 = tpu.concatenate %1006, %1008 in 1 : vector<3x67xf32>, vector<3x61xf32> -> vector<3x128xf32>
    %1010 = vector.broadcast %1004 : f32 to vector<3x128xf32>
    %1011 = arith.mulf %1010, %1009 : vector<3x128xf32>
    %1012 = arith.addf %1003, %1011 : vector<3x128xf32>
    %c14_981 = arith.constant 14 : index
    %1013 = memref.load %arg2[%c14_981] : memref<20xf32, #tpu.memory_space<smem>>
    %c0_982 = arith.constant 0 : index
    %c18_983 = arith.constant 18 : index
    %c0_984 = arith.constant 0 : index
    %c80_985 = arith.constant 80 : index
    %1014 = vector.load %arg8[%c0_982, %c18_983, %c0_984, %c80_985] : memref<1x20x5x128xf32, #tpu.memory_space<vmem>>, vector<1x1x3x48xf32>
    %1015 = vector.shape_cast %1014 : vector<1x1x3x48xf32> to vector<3x48xf32>
    %c0_986 = arith.constant 0 : index
    %c18_987 = arith.constant 18 : index
    %c1_988 = arith.constant 1 : index
    %c0_989 = arith.constant 0 : index
    %1016 = vector.load %arg8[%c0_986, %c18_987, %c1_988, %c0_989] : memref<1x20x5x128xf32, #tpu.memory_space<vmem>>, vector<1x1x3x80xf32>
    %1017 = vector.shape_cast %1016 : vector<1x1x3x80xf32> to vector<3x80xf32>
    %1018 = tpu.concatenate %1015, %1017 in 1 : vector<3x48xf32>, vector<3x80xf32> -> vector<3x128xf32>
    %1019 = vector.broadcast %1013 : f32 to vector<3x128xf32>
    %1020 = arith.mulf %1019, %1018 : vector<3x128xf32>
    %1021 = arith.addf %1012, %1020 : vector<3x128xf32>
    %c18_990 = arith.constant 18 : index
    %c0_991 = arith.constant 0 : index
    %c0_992 = arith.constant 0 : index
    %1022 = vector.load %arg10[%c18_990, %c0_991, %c0_992] : memref<20x3x128xf32, #tpu.memory_space<vmem>>, vector<1x3x128xf32>
    %1023 = vector.shape_cast %1022 : vector<1x3x128xf32> to vector<3x128xf32>
    %1024 = vector.shape_cast %1021 : vector<3x128xf32> to vector<1x3x128xf32>
    tpu.vector_store %arg10[%c18_990, %c0_991, %c0_992], %1024 {strides = array<i32>} : memref<20x3x128xf32, #tpu.memory_space<vmem>>, vector<1x3x128xf32>,
    %c15_993 = arith.constant 15 : index
    %1025 = memref.load %arg2[%c15_993] : memref<20xf32, #tpu.memory_space<smem>>
    %c0_994 = arith.constant 0 : index
    %c19_995 = arith.constant 19 : index
    %c0_996 = arith.constant 0 : index
    %c4_997 = arith.constant 4 : index
    %1026 = vector.load %arg8[%c0_994, %c19_995, %c0_996, %c4_997] : memref<1x20x5x128xf32, #tpu.memory_space<vmem>>, vector<1x1x3x124xf32>
    %1027 = vector.shape_cast %1026 : vector<1x1x3x124xf32> to vector<3x124xf32>
    %c0_998 = arith.constant 0 : index
    %c19_999 = arith.constant 19 : index
    %c1_1000 = arith.constant 1 : index
    %c0_1001 = arith.constant 0 : index
    %1028 = vector.load %arg8[%c0_998, %c19_999, %c1_1000, %c0_1001] : memref<1x20x5x128xf32, #tpu.memory_space<vmem>>, vector<1x1x3x4xf32>
    %1029 = vector.shape_cast %1028 : vector<1x1x3x4xf32> to vector<3x4xf32>
    %1030 = tpu.concatenate %1027, %1029 in 1 : vector<3x124xf32>, vector<3x4xf32> -> vector<3x128xf32>
    %1031 = vector.broadcast %1025 : f32 to vector<3x128xf32>
    %1032 = arith.mulf %1031, %1030 : vector<3x128xf32>
    %c16_1002 = arith.constant 16 : index
    %1033 = memref.load %arg2[%c16_1002] : memref<20xf32, #tpu.memory_space<smem>>
    %c0_1003 = arith.constant 0 : index
    %c19_1004 = arith.constant 19 : index
    %c0_1005 = arith.constant 0 : index
    %c23_1006 = arith.constant 23 : index
    %1034 = vector.load %arg8[%c0_1003, %c19_1004, %c0_1005, %c23_1006] : memref<1x20x5x128xf32, #tpu.memory_space<vmem>>, vector<1x1x3x105xf32>
    %1035 = vector.shape_cast %1034 : vector<1x1x3x105xf32> to vector<3x105xf32>
    %c0_1007 = arith.constant 0 : index
    %c19_1008 = arith.constant 19 : index
    %c1_1009 = arith.constant 1 : index
    %c0_1010 = arith.constant 0 : index
    %1036 = vector.load %arg8[%c0_1007, %c19_1008, %c1_1009, %c0_1010] : memref<1x20x5x128xf32, #tpu.memory_space<vmem>>, vector<1x1x3x23xf32>
    %1037 = vector.shape_cast %1036 : vector<1x1x3x23xf32> to vector<3x23xf32>
    %1038 = tpu.concatenate %1035, %1037 in 1 : vector<3x105xf32>, vector<3x23xf32> -> vector<3x128xf32>
    %1039 = vector.broadcast %1033 : f32 to vector<3x128xf32>
    %1040 = arith.mulf %1039, %1038 : vector<3x128xf32>
    %1041 = arith.addf %1032, %1040 : vector<3x128xf32>
    %c17_1011 = arith.constant 17 : index
    %1042 = memref.load %arg2[%c17_1011] : memref<20xf32, #tpu.memory_space<smem>>
    %c0_1012 = arith.constant 0 : index
    %c19_1013 = arith.constant 19 : index
    %c0_1014 = arith.constant 0 : index
    %c42_1015 = arith.constant 42 : index
    %1043 = vector.load %arg8[%c0_1012, %c19_1013, %c0_1014, %c42_1015] : memref<1x20x5x128xf32, #tpu.memory_space<vmem>>, vector<1x1x3x86xf32>
    %1044 = vector.shape_cast %1043 : vector<1x1x3x86xf32> to vector<3x86xf32>
    %c0_1016 = arith.constant 0 : index
    %c19_1017 = arith.constant 19 : index
    %c1_1018 = arith.constant 1 : index
    %c0_1019 = arith.constant 0 : index
    %1045 = vector.load %arg8[%c0_1016, %c19_1017, %c1_1018, %c0_1019] : memref<1x20x5x128xf32, #tpu.memory_space<vmem>>, vector<1x1x3x42xf32>
    %1046 = vector.shape_cast %1045 : vector<1x1x3x42xf32> to vector<3x42xf32>
    %1047 = tpu.concatenate %1044, %1046 in 1 : vector<3x86xf32>, vector<3x42xf32> -> vector<3x128xf32>
    %1048 = vector.broadcast %1042 : f32 to vector<3x128xf32>
    %1049 = arith.mulf %1048, %1047 : vector<3x128xf32>
    %1050 = arith.addf %1041, %1049 : vector<3x128xf32>
    %c18_1020 = arith.constant 18 : index
    %1051 = memref.load %arg2[%c18_1020] : memref<20xf32, #tpu.memory_space<smem>>
    %c0_1021 = arith.constant 0 : index
    %c19_1022 = arith.constant 19 : index
    %c0_1023 = arith.constant 0 : index
    %c61_1024 = arith.constant 61 : index
    %1052 = vector.load %arg8[%c0_1021, %c19_1022, %c0_1023, %c61_1024] : memref<1x20x5x128xf32, #tpu.memory_space<vmem>>, vector<1x1x3x67xf32>
    %1053 = vector.shape_cast %1052 : vector<1x1x3x67xf32> to vector<3x67xf32>
    %c0_1025 = arith.constant 0 : index
    %c19_1026 = arith.constant 19 : index
    %c1_1027 = arith.constant 1 : index
    %c0_1028 = arith.constant 0 : index
    %1054 = vector.load %arg8[%c0_1025, %c19_1026, %c1_1027, %c0_1028] : memref<1x20x5x128xf32, #tpu.memory_space<vmem>>, vector<1x1x3x61xf32>
    %1055 = vector.shape_cast %1054 : vector<1x1x3x61xf32> to vector<3x61xf32>
    %1056 = tpu.concatenate %1053, %1055 in 1 : vector<3x67xf32>, vector<3x61xf32> -> vector<3x128xf32>
    %1057 = vector.broadcast %1051 : f32 to vector<3x128xf32>
    %1058 = arith.mulf %1057, %1056 : vector<3x128xf32>
    %1059 = arith.addf %1050, %1058 : vector<3x128xf32>
    %c19_1029 = arith.constant 19 : index
    %1060 = memref.load %arg2[%c19_1029] : memref<20xf32, #tpu.memory_space<smem>>
    %c0_1030 = arith.constant 0 : index
    %c19_1031 = arith.constant 19 : index
    %c0_1032 = arith.constant 0 : index
    %c80_1033 = arith.constant 80 : index
    %1061 = vector.load %arg8[%c0_1030, %c19_1031, %c0_1032, %c80_1033] : memref<1x20x5x128xf32, #tpu.memory_space<vmem>>, vector<1x1x3x48xf32>
    %1062 = vector.shape_cast %1061 : vector<1x1x3x48xf32> to vector<3x48xf32>
    %c0_1034 = arith.constant 0 : index
    %c19_1035 = arith.constant 19 : index
    %c1_1036 = arith.constant 1 : index
    %c0_1037 = arith.constant 0 : index
    %1063 = vector.load %arg8[%c0_1034, %c19_1035, %c1_1036, %c0_1037] : memref<1x20x5x128xf32, #tpu.memory_space<vmem>>, vector<1x1x3x80xf32>
    %1064 = vector.shape_cast %1063 : vector<1x1x3x80xf32> to vector<3x80xf32>
    %1065 = tpu.concatenate %1062, %1064 in 1 : vector<3x48xf32>, vector<3x80xf32> -> vector<3x128xf32>
    %1066 = vector.broadcast %1060 : f32 to vector<3x128xf32>
    %1067 = arith.mulf %1066, %1065 : vector<3x128xf32>
    %1068 = arith.addf %1059, %1067 : vector<3x128xf32>
    %c19_1038 = arith.constant 19 : index
    %c0_1039 = arith.constant 0 : index
    %c0_1040 = arith.constant 0 : index
    %1069 = vector.load %arg10[%c19_1038, %c0_1039, %c0_1040] : memref<20x3x128xf32, #tpu.memory_space<vmem>>, vector<1x3x128xf32>
    %1070 = vector.shape_cast %1069 : vector<1x3x128xf32> to vector<3x128xf32>
    %1071 = vector.shape_cast %1068 : vector<3x128xf32> to vector<1x3x128xf32>
    tpu.vector_store %arg10[%c19_1038, %c0_1039, %c0_1040], %1071 {strides = array<i32>} : memref<20x3x128xf32, #tpu.memory_space<vmem>>, vector<1x3x128xf32>,
    %c0_1041 = arith.constant 0 : index
    %1072 = memref.load %arg6[%c0_1041] : memref<16xf32, #tpu.memory_space<smem>>
    %c0_1042 = arith.constant 0 : index
    %c0_1043 = arith.constant 0 : index
    %c0_1044 = arith.constant 0 : index
    %1073 = vector.load %arg10[%c0_1042, %c0_1043, %c0_1044] : memref<20x3x128xf32, #tpu.memory_space<vmem>>, vector<1x3x128xf32>
    %1074 = vector.shape_cast %1073 : vector<1x3x128xf32> to vector<3x128xf32>
    %1075 = vector.broadcast %1072 : f32 to vector<3x128xf32>
    %1076 = arith.mulf %1075, %1074 : vector<3x128xf32>
    %c1_1045 = arith.constant 1 : index
    %1077 = memref.load %arg6[%c1_1045] : memref<16xf32, #tpu.memory_space<smem>>
    %c1_1046 = arith.constant 1 : index
    %c0_1047 = arith.constant 0 : index
    %c0_1048 = arith.constant 0 : index
    %1078 = vector.load %arg10[%c1_1046, %c0_1047, %c0_1048] : memref<20x3x128xf32, #tpu.memory_space<vmem>>, vector<1x3x128xf32>
    %1079 = vector.shape_cast %1078 : vector<1x3x128xf32> to vector<3x128xf32>
    %1080 = vector.broadcast %1077 : f32 to vector<3x128xf32>
    %1081 = arith.mulf %1080, %1079 : vector<3x128xf32>
    %1082 = arith.addf %1076, %1081 : vector<3x128xf32>
    %c2_1049 = arith.constant 2 : index
    %1083 = memref.load %arg6[%c2_1049] : memref<16xf32, #tpu.memory_space<smem>>
    %c2_1050 = arith.constant 2 : index
    %c0_1051 = arith.constant 0 : index
    %c0_1052 = arith.constant 0 : index
    %1084 = vector.load %arg10[%c2_1050, %c0_1051, %c0_1052] : memref<20x3x128xf32, #tpu.memory_space<vmem>>, vector<1x3x128xf32>
    %1085 = vector.shape_cast %1084 : vector<1x3x128xf32> to vector<3x128xf32>
    %1086 = vector.broadcast %1083 : f32 to vector<3x128xf32>
    %1087 = arith.mulf %1086, %1085 : vector<3x128xf32>
    %1088 = arith.addf %1082, %1087 : vector<3x128xf32>
    %c3_1053 = arith.constant 3 : index
    %1089 = memref.load %arg6[%c3_1053] : memref<16xf32, #tpu.memory_space<smem>>
    %c3_1054 = arith.constant 3 : index
    %c0_1055 = arith.constant 0 : index
    %c0_1056 = arith.constant 0 : index
    %1090 = vector.load %arg10[%c3_1054, %c0_1055, %c0_1056] : memref<20x3x128xf32, #tpu.memory_space<vmem>>, vector<1x3x128xf32>
    %1091 = vector.shape_cast %1090 : vector<1x3x128xf32> to vector<3x128xf32>
    %1092 = vector.broadcast %1089 : f32 to vector<3x128xf32>
    %1093 = arith.mulf %1092, %1091 : vector<3x128xf32>
    %1094 = arith.addf %1088, %1093 : vector<3x128xf32>
    %c0_1057 = arith.constant 0 : index
    %c0_1058 = arith.constant 0 : index
    %c0_1059 = arith.constant 0 : index
    %1095 = vector.load %arg11[%c0_1057, %c0_1058, %c0_1059] : memref<4x3x128xf32, #tpu.memory_space<vmem>>, vector<1x3x128xf32>
    %1096 = vector.shape_cast %1095 : vector<1x3x128xf32> to vector<3x128xf32>
    %1097 = vector.shape_cast %1094 : vector<3x128xf32> to vector<1x3x128xf32>
    tpu.vector_store %arg11[%c0_1057, %c0_1058, %c0_1059], %1097 {strides = array<i32>} : memref<4x3x128xf32, #tpu.memory_space<vmem>>, vector<1x3x128xf32>,
    %c4_1060 = arith.constant 4 : index
    %1098 = memref.load %arg6[%c4_1060] : memref<16xf32, #tpu.memory_space<smem>>
    %c0_1061 = arith.constant 0 : index
    %c0_1062 = arith.constant 0 : index
    %c0_1063 = arith.constant 0 : index
    %1099 = vector.load %arg10[%c0_1061, %c0_1062, %c0_1063] : memref<20x3x128xf32, #tpu.memory_space<vmem>>, vector<1x3x128xf32>
    %1100 = vector.shape_cast %1099 : vector<1x3x128xf32> to vector<3x128xf32>
    %1101 = vector.broadcast %1098 : f32 to vector<3x128xf32>
    %1102 = arith.mulf %1101, %1100 : vector<3x128xf32>
    %c5_1064 = arith.constant 5 : index
    %1103 = memref.load %arg6[%c5_1064] : memref<16xf32, #tpu.memory_space<smem>>
    %c1_1065 = arith.constant 1 : index
    %c0_1066 = arith.constant 0 : index
    %c0_1067 = arith.constant 0 : index
    %1104 = vector.load %arg10[%c1_1065, %c0_1066, %c0_1067] : memref<20x3x128xf32, #tpu.memory_space<vmem>>, vector<1x3x128xf32>
    %1105 = vector.shape_cast %1104 : vector<1x3x128xf32> to vector<3x128xf32>
    %1106 = vector.broadcast %1103 : f32 to vector<3x128xf32>
    %1107 = arith.mulf %1106, %1105 : vector<3x128xf32>
    %1108 = arith.addf %1102, %1107 : vector<3x128xf32>
    %c6_1068 = arith.constant 6 : index
    %1109 = memref.load %arg6[%c6_1068] : memref<16xf32, #tpu.memory_space<smem>>
    %c2_1069 = arith.constant 2 : index
    %c0_1070 = arith.constant 0 : index
    %c0_1071 = arith.constant 0 : index
    %1110 = vector.load %arg10[%c2_1069, %c0_1070, %c0_1071] : memref<20x3x128xf32, #tpu.memory_space<vmem>>, vector<1x3x128xf32>
    %1111 = vector.shape_cast %1110 : vector<1x3x128xf32> to vector<3x128xf32>
    %1112 = vector.broadcast %1109 : f32 to vector<3x128xf32>
    %1113 = arith.mulf %1112, %1111 : vector<3x128xf32>
    %1114 = arith.addf %1108, %1113 : vector<3x128xf32>
    %c7_1072 = arith.constant 7 : index
    %1115 = memref.load %arg6[%c7_1072] : memref<16xf32, #tpu.memory_space<smem>>
    %c3_1073 = arith.constant 3 : index
    %c0_1074 = arith.constant 0 : index
    %c0_1075 = arith.constant 0 : index
    %1116 = vector.load %arg10[%c3_1073, %c0_1074, %c0_1075] : memref<20x3x128xf32, #tpu.memory_space<vmem>>, vector<1x3x128xf32>
    %1117 = vector.shape_cast %1116 : vector<1x3x128xf32> to vector<3x128xf32>
    %1118 = vector.broadcast %1115 : f32 to vector<3x128xf32>
    %1119 = arith.mulf %1118, %1117 : vector<3x128xf32>
    %1120 = arith.addf %1114, %1119 : vector<3x128xf32>
    %c1_1076 = arith.constant 1 : index
    %c0_1077 = arith.constant 0 : index
    %c0_1078 = arith.constant 0 : index
    %1121 = vector.load %arg11[%c1_1076, %c0_1077, %c0_1078] : memref<4x3x128xf32, #tpu.memory_space<vmem>>, vector<1x3x128xf32>
    %1122 = vector.shape_cast %1121 : vector<1x3x128xf32> to vector<3x128xf32>
    %1123 = vector.shape_cast %1120 : vector<3x128xf32> to vector<1x3x128xf32>
    tpu.vector_store %arg11[%c1_1076, %c0_1077, %c0_1078], %1123 {strides = array<i32>} : memref<4x3x128xf32, #tpu.memory_space<vmem>>, vector<1x3x128xf32>,
    %c8_1079 = arith.constant 8 : index
    %1124 = memref.load %arg6[%c8_1079] : memref<16xf32, #tpu.memory_space<smem>>
    %c0_1080 = arith.constant 0 : index
    %c0_1081 = arith.constant 0 : index
    %c0_1082 = arith.constant 0 : index
    %1125 = vector.load %arg10[%c0_1080, %c0_1081, %c0_1082] : memref<20x3x128xf32, #tpu.memory_space<vmem>>, vector<1x3x128xf32>
    %1126 = vector.shape_cast %1125 : vector<1x3x128xf32> to vector<3x128xf32>
    %1127 = vector.broadcast %1124 : f32 to vector<3x128xf32>
    %1128 = arith.mulf %1127, %1126 : vector<3x128xf32>
    %c9_1083 = arith.constant 9 : index
    %1129 = memref.load %arg6[%c9_1083] : memref<16xf32, #tpu.memory_space<smem>>
    %c1_1084 = arith.constant 1 : index
    %c0_1085 = arith.constant 0 : index
    %c0_1086 = arith.constant 0 : index
    %1130 = vector.load %arg10[%c1_1084, %c0_1085, %c0_1086] : memref<20x3x128xf32, #tpu.memory_space<vmem>>, vector<1x3x128xf32>
    %1131 = vector.shape_cast %1130 : vector<1x3x128xf32> to vector<3x128xf32>
    %1132 = vector.broadcast %1129 : f32 to vector<3x128xf32>
    %1133 = arith.mulf %1132, %1131 : vector<3x128xf32>
    %1134 = arith.addf %1128, %1133 : vector<3x128xf32>
    %c10_1087 = arith.constant 10 : index
    %1135 = memref.load %arg6[%c10_1087] : memref<16xf32, #tpu.memory_space<smem>>
    %c2_1088 = arith.constant 2 : index
    %c0_1089 = arith.constant 0 : index
    %c0_1090 = arith.constant 0 : index
    %1136 = vector.load %arg10[%c2_1088, %c0_1089, %c0_1090] : memref<20x3x128xf32, #tpu.memory_space<vmem>>, vector<1x3x128xf32>
    %1137 = vector.shape_cast %1136 : vector<1x3x128xf32> to vector<3x128xf32>
    %1138 = vector.broadcast %1135 : f32 to vector<3x128xf32>
    %1139 = arith.mulf %1138, %1137 : vector<3x128xf32>
    %1140 = arith.addf %1134, %1139 : vector<3x128xf32>
    %c11_1091 = arith.constant 11 : index
    %1141 = memref.load %arg6[%c11_1091] : memref<16xf32, #tpu.memory_space<smem>>
    %c3_1092 = arith.constant 3 : index
    %c0_1093 = arith.constant 0 : index
    %c0_1094 = arith.constant 0 : index
    %1142 = vector.load %arg10[%c3_1092, %c0_1093, %c0_1094] : memref<20x3x128xf32, #tpu.memory_space<vmem>>, vector<1x3x128xf32>
    %1143 = vector.shape_cast %1142 : vector<1x3x128xf32> to vector<3x128xf32>
    %1144 = vector.broadcast %1141 : f32 to vector<3x128xf32>
    %1145 = arith.mulf %1144, %1143 : vector<3x128xf32>
    %1146 = arith.addf %1140, %1145 : vector<3x128xf32>
    %c2_1095 = arith.constant 2 : index
    %c0_1096 = arith.constant 0 : index
    %c0_1097 = arith.constant 0 : index
    %1147 = vector.load %arg11[%c2_1095, %c0_1096, %c0_1097] : memref<4x3x128xf32, #tpu.memory_space<vmem>>, vector<1x3x128xf32>
    %1148 = vector.shape_cast %1147 : vector<1x3x128xf32> to vector<3x128xf32>
    %1149 = vector.shape_cast %1146 : vector<3x128xf32> to vector<1x3x128xf32>
    tpu.vector_store %arg11[%c2_1095, %c0_1096, %c0_1097], %1149 {strides = array<i32>} : memref<4x3x128xf32, #tpu.memory_space<vmem>>, vector<1x3x128xf32>,
    %c12_1098 = arith.constant 12 : index
    %1150 = memref.load %arg6[%c12_1098] : memref<16xf32, #tpu.memory_space<smem>>
    %c0_1099 = arith.constant 0 : index
    %c0_1100 = arith.constant 0 : index
    %c0_1101 = arith.constant 0 : index
    %1151 = vector.load %arg10[%c0_1099, %c0_1100, %c0_1101] : memref<20x3x128xf32, #tpu.memory_space<vmem>>, vector<1x3x128xf32>
    %1152 = vector.shape_cast %1151 : vector<1x3x128xf32> to vector<3x128xf32>
    %1153 = vector.broadcast %1150 : f32 to vector<3x128xf32>
    %1154 = arith.mulf %1153, %1152 : vector<3x128xf32>
    %c13_1102 = arith.constant 13 : index
    %1155 = memref.load %arg6[%c13_1102] : memref<16xf32, #tpu.memory_space<smem>>
    %c1_1103 = arith.constant 1 : index
    %c0_1104 = arith.constant 0 : index
    %c0_1105 = arith.constant 0 : index
    %1156 = vector.load %arg10[%c1_1103, %c0_1104, %c0_1105] : memref<20x3x128xf32, #tpu.memory_space<vmem>>, vector<1x3x128xf32>
    %1157 = vector.shape_cast %1156 : vector<1x3x128xf32> to vector<3x128xf32>
    %1158 = vector.broadcast %1155 : f32 to vector<3x128xf32>
    %1159 = arith.mulf %1158, %1157 : vector<3x128xf32>
    %1160 = arith.addf %1154, %1159 : vector<3x128xf32>
    %c14_1106 = arith.constant 14 : index
    %1161 = memref.load %arg6[%c14_1106] : memref<16xf32, #tpu.memory_space<smem>>
    %c2_1107 = arith.constant 2 : index
    %c0_1108 = arith.constant 0 : index
    %c0_1109 = arith.constant 0 : index
    %1162 = vector.load %arg10[%c2_1107, %c0_1108, %c0_1109] : memref<20x3x128xf32, #tpu.memory_space<vmem>>, vector<1x3x128xf32>
    %1163 = vector.shape_cast %1162 : vector<1x3x128xf32> to vector<3x128xf32>
    %1164 = vector.broadcast %1161 : f32 to vector<3x128xf32>
    %1165 = arith.mulf %1164, %1163 : vector<3x128xf32>
    %1166 = arith.addf %1160, %1165 : vector<3x128xf32>
    %c15_1110 = arith.constant 15 : index
    %1167 = memref.load %arg6[%c15_1110] : memref<16xf32, #tpu.memory_space<smem>>
    %c3_1111 = arith.constant 3 : index
    %c0_1112 = arith.constant 0 : index
    %c0_1113 = arith.constant 0 : index
    %1168 = vector.load %arg10[%c3_1111, %c0_1112, %c0_1113] : memref<20x3x128xf32, #tpu.memory_space<vmem>>, vector<1x3x128xf32>
    %1169 = vector.shape_cast %1168 : vector<1x3x128xf32> to vector<3x128xf32>
    %1170 = vector.broadcast %1167 : f32 to vector<3x128xf32>
    %1171 = arith.mulf %1170, %1169 : vector<3x128xf32>
    %1172 = arith.addf %1166, %1171 : vector<3x128xf32>
    %c3_1114 = arith.constant 3 : index
    %c0_1115 = arith.constant 0 : index
    %c0_1116 = arith.constant 0 : index
    %1173 = vector.load %arg11[%c3_1114, %c0_1115, %c0_1116] : memref<4x3x128xf32, #tpu.memory_space<vmem>>, vector<1x3x128xf32>
    %1174 = vector.shape_cast %1173 : vector<1x3x128xf32> to vector<3x128xf32>
    %1175 = vector.shape_cast %1172 : vector<3x128xf32> to vector<1x3x128xf32>
    tpu.vector_store %arg11[%c3_1114, %c0_1115, %c0_1116], %1175 {strides = array<i32>} : memref<4x3x128xf32, #tpu.memory_space<vmem>>, vector<1x3x128xf32>,
    %c0_1117 = arith.constant 0 : index
    %c0_1118 = arith.constant 0 : index
    %c0_1119 = arith.constant 0 : index
    %1176 = vector.load %arg11[%c0_1117, %c0_1118, %c0_1119] : memref<4x3x128xf32, #tpu.memory_space<vmem>>, vector<1x3x128xf32>
    %1177 = vector.shape_cast %1176 : vector<1x3x128xf32> to vector<3x128xf32>
    %c0_1120 = arith.constant 0 : index
    %1178 = memref.load %arg7[%c0_1120] : memref<16xf32, #tpu.memory_space<smem>>
    %c4_1121 = arith.constant 4 : index
    %c0_1122 = arith.constant 0 : index
    %c0_1123 = arith.constant 0 : index
    %1179 = vector.load %arg10[%c4_1121, %c0_1122, %c0_1123] : memref<20x3x128xf32, #tpu.memory_space<vmem>>, vector<1x3x128xf32>
    %1180 = vector.shape_cast %1179 : vector<1x3x128xf32> to vector<3x128xf32>
    %1181 = vector.broadcast %1178 : f32 to vector<3x128xf32>
    %1182 = arith.mulf %1181, %1180 : vector<3x128xf32>
    %1183 = arith.addf %1177, %1182 : vector<3x128xf32>
    %c1_1124 = arith.constant 1 : index
    %1184 = memref.load %arg7[%c1_1124] : memref<16xf32, #tpu.memory_space<smem>>
    %c5_1125 = arith.constant 5 : index
    %c0_1126 = arith.constant 0 : index
    %c0_1127 = arith.constant 0 : index
    %1185 = vector.load %arg10[%c5_1125, %c0_1126, %c0_1127] : memref<20x3x128xf32, #tpu.memory_space<vmem>>, vector<1x3x128xf32>
    %1186 = vector.shape_cast %1185 : vector<1x3x128xf32> to vector<3x128xf32>
    %1187 = vector.broadcast %1184 : f32 to vector<3x128xf32>
    %1188 = arith.mulf %1187, %1186 : vector<3x128xf32>
    %1189 = arith.addf %1183, %1188 : vector<3x128xf32>
    %c2_1128 = arith.constant 2 : index
    %1190 = memref.load %arg7[%c2_1128] : memref<16xf32, #tpu.memory_space<smem>>
    %c6_1129 = arith.constant 6 : index
    %c0_1130 = arith.constant 0 : index
    %c0_1131 = arith.constant 0 : index
    %1191 = vector.load %arg10[%c6_1129, %c0_1130, %c0_1131] : memref<20x3x128xf32, #tpu.memory_space<vmem>>, vector<1x3x128xf32>
    %1192 = vector.shape_cast %1191 : vector<1x3x128xf32> to vector<3x128xf32>
    %1193 = vector.broadcast %1190 : f32 to vector<3x128xf32>
    %1194 = arith.mulf %1193, %1192 : vector<3x128xf32>
    %1195 = arith.addf %1189, %1194 : vector<3x128xf32>
    %c3_1132 = arith.constant 3 : index
    %1196 = memref.load %arg7[%c3_1132] : memref<16xf32, #tpu.memory_space<smem>>
    %c7_1133 = arith.constant 7 : index
    %c0_1134 = arith.constant 0 : index
    %c0_1135 = arith.constant 0 : index
    %1197 = vector.load %arg10[%c7_1133, %c0_1134, %c0_1135] : memref<20x3x128xf32, #tpu.memory_space<vmem>>, vector<1x3x128xf32>
    %1198 = vector.shape_cast %1197 : vector<1x3x128xf32> to vector<3x128xf32>
    %1199 = vector.broadcast %1196 : f32 to vector<3x128xf32>
    %1200 = arith.mulf %1199, %1198 : vector<3x128xf32>
    %1201 = arith.addf %1195, %1200 : vector<3x128xf32>
    %c0_1136 = arith.constant 0 : index
    %c8_1137 = arith.constant 8 : index
    %c0_1138 = arith.constant 0 : index
    %c0_1139 = arith.constant 0 : index
    %1202 = vector.load %arg9[%c0_1136, %c8_1137, %c0_1138, %c0_1139] : memref<1x24x3x128xf32, #tpu.memory_space<vmem>>, vector<1x1x3x128xf32>
    %1203 = vector.shape_cast %1202 : vector<1x1x3x128xf32> to vector<3x128xf32>
    %1204 = vector.shape_cast %1201 : vector<3x128xf32> to vector<1x1x3x128xf32>
    tpu.vector_store %arg9[%c0_1136, %c8_1137, %c0_1138, %c0_1139], %1204 {strides = array<i32>} : memref<1x24x3x128xf32, #tpu.memory_space<vmem>>, vector<1x1x3x128xf32>,
    %c1_1140 = arith.constant 1 : index
    %c0_1141 = arith.constant 0 : index
    %c0_1142 = arith.constant 0 : index
    %1205 = vector.load %arg11[%c1_1140, %c0_1141, %c0_1142] : memref<4x3x128xf32, #tpu.memory_space<vmem>>, vector<1x3x128xf32>
    %1206 = vector.shape_cast %1205 : vector<1x3x128xf32> to vector<3x128xf32>
    %c4_1143 = arith.constant 4 : index
    %1207 = memref.load %arg7[%c4_1143] : memref<16xf32, #tpu.memory_space<smem>>
    %c4_1144 = arith.constant 4 : index
    %c0_1145 = arith.constant 0 : index
    %c0_1146 = arith.constant 0 : index
    %1208 = vector.load %arg10[%c4_1144, %c0_1145, %c0_1146] : memref<20x3x128xf32, #tpu.memory_space<vmem>>, vector<1x3x128xf32>
    %1209 = vector.shape_cast %1208 : vector<1x3x128xf32> to vector<3x128xf32>
    %1210 = vector.broadcast %1207 : f32 to vector<3x128xf32>
    %1211 = arith.mulf %1210, %1209 : vector<3x128xf32>
    %1212 = arith.addf %1206, %1211 : vector<3x128xf32>
    %c5_1147 = arith.constant 5 : index
    %1213 = memref.load %arg7[%c5_1147] : memref<16xf32, #tpu.memory_space<smem>>
    %c5_1148 = arith.constant 5 : index
    %c0_1149 = arith.constant 0 : index
    %c0_1150 = arith.constant 0 : index
    %1214 = vector.load %arg10[%c5_1148, %c0_1149, %c0_1150] : memref<20x3x128xf32, #tpu.memory_space<vmem>>, vector<1x3x128xf32>
    %1215 = vector.shape_cast %1214 : vector<1x3x128xf32> to vector<3x128xf32>
    %1216 = vector.broadcast %1213 : f32 to vector<3x128xf32>
    %1217 = arith.mulf %1216, %1215 : vector<3x128xf32>
    %1218 = arith.addf %1212, %1217 : vector<3x128xf32>
    %c6_1151 = arith.constant 6 : index
    %1219 = memref.load %arg7[%c6_1151] : memref<16xf32, #tpu.memory_space<smem>>
    %c6_1152 = arith.constant 6 : index
    %c0_1153 = arith.constant 0 : index
    %c0_1154 = arith.constant 0 : index
    %1220 = vector.load %arg10[%c6_1152, %c0_1153, %c0_1154] : memref<20x3x128xf32, #tpu.memory_space<vmem>>, vector<1x3x128xf32>
    %1221 = vector.shape_cast %1220 : vector<1x3x128xf32> to vector<3x128xf32>
    %1222 = vector.broadcast %1219 : f32 to vector<3x128xf32>
    %1223 = arith.mulf %1222, %1221 : vector<3x128xf32>
    %1224 = arith.addf %1218, %1223 : vector<3x128xf32>
    %c7_1155 = arith.constant 7 : index
    %1225 = memref.load %arg7[%c7_1155] : memref<16xf32, #tpu.memory_space<smem>>
    %c7_1156 = arith.constant 7 : index
    %c0_1157 = arith.constant 0 : index
    %c0_1158 = arith.constant 0 : index
    %1226 = vector.load %arg10[%c7_1156, %c0_1157, %c0_1158] : memref<20x3x128xf32, #tpu.memory_space<vmem>>, vector<1x3x128xf32>
    %1227 = vector.shape_cast %1226 : vector<1x3x128xf32> to vector<3x128xf32>
    %1228 = vector.broadcast %1225 : f32 to vector<3x128xf32>
    %1229 = arith.mulf %1228, %1227 : vector<3x128xf32>
    %1230 = arith.addf %1224, %1229 : vector<3x128xf32>
    %c0_1159 = arith.constant 0 : index
    %c9_1160 = arith.constant 9 : index
    %c0_1161 = arith.constant 0 : index
    %c0_1162 = arith.constant 0 : index
    %1231 = vector.load %arg9[%c0_1159, %c9_1160, %c0_1161, %c0_1162] : memref<1x24x3x128xf32, #tpu.memory_space<vmem>>, vector<1x1x3x128xf32>
    %1232 = vector.shape_cast %1231 : vector<1x1x3x128xf32> to vector<3x128xf32>
    %1233 = vector.shape_cast %1230 : vector<3x128xf32> to vector<1x1x3x128xf32>
    tpu.vector_store %arg9[%c0_1159, %c9_1160, %c0_1161, %c0_1162], %1233 {strides = array<i32>} : memref<1x24x3x128xf32, #tpu.memory_space<vmem>>, vector<1x1x3x128xf32>,
    %c2_1163 = arith.constant 2 : index
    %c0_1164 = arith.constant 0 : index
    %c0_1165 = arith.constant 0 : index
    %1234 = vector.load %arg11[%c2_1163, %c0_1164, %c0_1165] : memref<4x3x128xf32, #tpu.memory_space<vmem>>, vector<1x3x128xf32>
    %1235 = vector.shape_cast %1234 : vector<1x3x128xf32> to vector<3x128xf32>
    %c8_1166 = arith.constant 8 : index
    %1236 = memref.load %arg7[%c8_1166] : memref<16xf32, #tpu.memory_space<smem>>
    %c4_1167 = arith.constant 4 : index
    %c0_1168 = arith.constant 0 : index
    %c0_1169 = arith.constant 0 : index
    %1237 = vector.load %arg10[%c4_1167, %c0_1168, %c0_1169] : memref<20x3x128xf32, #tpu.memory_space<vmem>>, vector<1x3x128xf32>
    %1238 = vector.shape_cast %1237 : vector<1x3x128xf32> to vector<3x128xf32>
    %1239 = vector.broadcast %1236 : f32 to vector<3x128xf32>
    %1240 = arith.mulf %1239, %1238 : vector<3x128xf32>
    %1241 = arith.addf %1235, %1240 : vector<3x128xf32>
    %c9_1170 = arith.constant 9 : index
    %1242 = memref.load %arg7[%c9_1170] : memref<16xf32, #tpu.memory_space<smem>>
    %c5_1171 = arith.constant 5 : index
    %c0_1172 = arith.constant 0 : index
    %c0_1173 = arith.constant 0 : index
    %1243 = vector.load %arg10[%c5_1171, %c0_1172, %c0_1173] : memref<20x3x128xf32, #tpu.memory_space<vmem>>, vector<1x3x128xf32>
    %1244 = vector.shape_cast %1243 : vector<1x3x128xf32> to vector<3x128xf32>
    %1245 = vector.broadcast %1242 : f32 to vector<3x128xf32>
    %1246 = arith.mulf %1245, %1244 : vector<3x128xf32>
    %1247 = arith.addf %1241, %1246 : vector<3x128xf32>
    %c10_1174 = arith.constant 10 : index
    %1248 = memref.load %arg7[%c10_1174] : memref<16xf32, #tpu.memory_space<smem>>
    %c6_1175 = arith.constant 6 : index
    %c0_1176 = arith.constant 0 : index
    %c0_1177 = arith.constant 0 : index
    %1249 = vector.load %arg10[%c6_1175, %c0_1176, %c0_1177] : memref<20x3x128xf32, #tpu.memory_space<vmem>>, vector<1x3x128xf32>
    %1250 = vector.shape_cast %1249 : vector<1x3x128xf32> to vector<3x128xf32>
    %1251 = vector.broadcast %1248 : f32 to vector<3x128xf32>
    %1252 = arith.mulf %1251, %1250 : vector<3x128xf32>
    %1253 = arith.addf %1247, %1252 : vector<3x128xf32>
    %c11_1178 = arith.constant 11 : index
    %1254 = memref.load %arg7[%c11_1178] : memref<16xf32, #tpu.memory_space<smem>>
    %c7_1179 = arith.constant 7 : index
    %c0_1180 = arith.constant 0 : index
    %c0_1181 = arith.constant 0 : index
    %1255 = vector.load %arg10[%c7_1179, %c0_1180, %c0_1181] : memref<20x3x128xf32, #tpu.memory_space<vmem>>, vector<1x3x128xf32>
    %1256 = vector.shape_cast %1255 : vector<1x3x128xf32> to vector<3x128xf32>
    %1257 = vector.broadcast %1254 : f32 to vector<3x128xf32>
    %1258 = arith.mulf %1257, %1256 : vector<3x128xf32>
    %1259 = arith.addf %1253, %1258 : vector<3x128xf32>
    %c0_1182 = arith.constant 0 : index
    %c10_1183 = arith.constant 10 : index
    %c0_1184 = arith.constant 0 : index
    %c0_1185 = arith.constant 0 : index
    %1260 = vector.load %arg9[%c0_1182, %c10_1183, %c0_1184, %c0_1185] : memref<1x24x3x128xf32, #tpu.memory_space<vmem>>, vector<1x1x3x128xf32>
    %1261 = vector.shape_cast %1260 : vector<1x1x3x128xf32> to vector<3x128xf32>
    %1262 = vector.shape_cast %1259 : vector<3x128xf32> to vector<1x1x3x128xf32>
    tpu.vector_store %arg9[%c0_1182, %c10_1183, %c0_1184, %c0_1185], %1262 {strides = array<i32>} : memref<1x24x3x128xf32, #tpu.memory_space<vmem>>, vector<1x1x3x128xf32>,
    %c3_1186 = arith.constant 3 : index
    %c0_1187 = arith.constant 0 : index
    %c0_1188 = arith.constant 0 : index
    %1263 = vector.load %arg11[%c3_1186, %c0_1187, %c0_1188] : memref<4x3x128xf32, #tpu.memory_space<vmem>>, vector<1x3x128xf32>
    %1264 = vector.shape_cast %1263 : vector<1x3x128xf32> to vector<3x128xf32>
    %c12_1189 = arith.constant 12 : index
    %1265 = memref.load %arg7[%c12_1189] : memref<16xf32, #tpu.memory_space<smem>>
    %c4_1190 = arith.constant 4 : index
    %c0_1191 = arith.constant 0 : index
    %c0_1192 = arith.constant 0 : index
    %1266 = vector.load %arg10[%c4_1190, %c0_1191, %c0_1192] : memref<20x3x128xf32, #tpu.memory_space<vmem>>, vector<1x3x128xf32>
    %1267 = vector.shape_cast %1266 : vector<1x3x128xf32> to vector<3x128xf32>
    %1268 = vector.broadcast %1265 : f32 to vector<3x128xf32>
    %1269 = arith.mulf %1268, %1267 : vector<3x128xf32>
    %1270 = arith.addf %1264, %1269 : vector<3x128xf32>
    %c13_1193 = arith.constant 13 : index
    %1271 = memref.load %arg7[%c13_1193] : memref<16xf32, #tpu.memory_space<smem>>
    %c5_1194 = arith.constant 5 : index
    %c0_1195 = arith.constant 0 : index
    %c0_1196 = arith.constant 0 : index
    %1272 = vector.load %arg10[%c5_1194, %c0_1195, %c0_1196] : memref<20x3x128xf32, #tpu.memory_space<vmem>>, vector<1x3x128xf32>
    %1273 = vector.shape_cast %1272 : vector<1x3x128xf32> to vector<3x128xf32>
    %1274 = vector.broadcast %1271 : f32 to vector<3x128xf32>
    %1275 = arith.mulf %1274, %1273 : vector<3x128xf32>
    %1276 = arith.addf %1270, %1275 : vector<3x128xf32>
    %c14_1197 = arith.constant 14 : index
    %1277 = memref.load %arg7[%c14_1197] : memref<16xf32, #tpu.memory_space<smem>>
    %c6_1198 = arith.constant 6 : index
    %c0_1199 = arith.constant 0 : index
    %c0_1200 = arith.constant 0 : index
    %1278 = vector.load %arg10[%c6_1198, %c0_1199, %c0_1200] : memref<20x3x128xf32, #tpu.memory_space<vmem>>, vector<1x3x128xf32>
    %1279 = vector.shape_cast %1278 : vector<1x3x128xf32> to vector<3x128xf32>
    %1280 = vector.broadcast %1277 : f32 to vector<3x128xf32>
    %1281 = arith.mulf %1280, %1279 : vector<3x128xf32>
    %1282 = arith.addf %1276, %1281 : vector<3x128xf32>
    %c15_1201 = arith.constant 15 : index
    %1283 = memref.load %arg7[%c15_1201] : memref<16xf32, #tpu.memory_space<smem>>
    %c7_1202 = arith.constant 7 : index
    %c0_1203 = arith.constant 0 : index
    %c0_1204 = arith.constant 0 : index
    %1284 = vector.load %arg10[%c7_1202, %c0_1203, %c0_1204] : memref<20x3x128xf32, #tpu.memory_space<vmem>>, vector<1x3x128xf32>
    %1285 = vector.shape_cast %1284 : vector<1x3x128xf32> to vector<3x128xf32>
    %1286 = vector.broadcast %1283 : f32 to vector<3x128xf32>
    %1287 = arith.mulf %1286, %1285 : vector<3x128xf32>
    %1288 = arith.addf %1282, %1287 : vector<3x128xf32>
    %c0_1205 = arith.constant 0 : index
    %c11_1206 = arith.constant 11 : index
    %c0_1207 = arith.constant 0 : index
    %c0_1208 = arith.constant 0 : index
    %1289 = vector.load %arg9[%c0_1205, %c11_1206, %c0_1207, %c0_1208] : memref<1x24x3x128xf32, #tpu.memory_space<vmem>>, vector<1x1x3x128xf32>
    %1290 = vector.shape_cast %1289 : vector<1x1x3x128xf32> to vector<3x128xf32>
    %1291 = vector.shape_cast %1288 : vector<3x128xf32> to vector<1x1x3x128xf32>
    tpu.vector_store %arg9[%c0_1205, %c11_1206, %c0_1207, %c0_1208], %1291 {strides = array<i32>} : memref<1x24x3x128xf32, #tpu.memory_space<vmem>>, vector<1x1x3x128xf32>,
    %c0_1209 = arith.constant 0 : index
    %c0_1210 = arith.constant 0 : index
    %c0_1211 = arith.constant 0 : index
    %1292 = vector.load %arg11[%c0_1209, %c0_1210, %c0_1211] : memref<4x3x128xf32, #tpu.memory_space<vmem>>, vector<1x3x128xf32>
    %1293 = vector.shape_cast %1292 : vector<1x3x128xf32> to vector<3x128xf32>
    %c0_1212 = arith.constant 0 : index
    %1294 = memref.load %arg7[%c0_1212] : memref<16xf32, #tpu.memory_space<smem>>
    %c8_1213 = arith.constant 8 : index
    %c0_1214 = arith.constant 0 : index
    %c0_1215 = arith.constant 0 : index
    %1295 = vector.load %arg10[%c8_1213, %c0_1214, %c0_1215] : memref<20x3x128xf32, #tpu.memory_space<vmem>>, vector<1x3x128xf32>
    %1296 = vector.shape_cast %1295 : vector<1x3x128xf32> to vector<3x128xf32>
    %1297 = vector.broadcast %1294 : f32 to vector<3x128xf32>
    %1298 = arith.mulf %1297, %1296 : vector<3x128xf32>
    %1299 = arith.addf %1293, %1298 : vector<3x128xf32>
    %c1_1216 = arith.constant 1 : index
    %1300 = memref.load %arg7[%c1_1216] : memref<16xf32, #tpu.memory_space<smem>>
    %c9_1217 = arith.constant 9 : index
    %c0_1218 = arith.constant 0 : index
    %c0_1219 = arith.constant 0 : index
    %1301 = vector.load %arg10[%c9_1217, %c0_1218, %c0_1219] : memref<20x3x128xf32, #tpu.memory_space<vmem>>, vector<1x3x128xf32>
    %1302 = vector.shape_cast %1301 : vector<1x3x128xf32> to vector<3x128xf32>
    %1303 = vector.broadcast %1300 : f32 to vector<3x128xf32>
    %1304 = arith.mulf %1303, %1302 : vector<3x128xf32>
    %1305 = arith.addf %1299, %1304 : vector<3x128xf32>
    %c2_1220 = arith.constant 2 : index
    %1306 = memref.load %arg7[%c2_1220] : memref<16xf32, #tpu.memory_space<smem>>
    %c10_1221 = arith.constant 10 : index
    %c0_1222 = arith.constant 0 : index
    %c0_1223 = arith.constant 0 : index
    %1307 = vector.load %arg10[%c10_1221, %c0_1222, %c0_1223] : memref<20x3x128xf32, #tpu.memory_space<vmem>>, vector<1x3x128xf32>
    %1308 = vector.shape_cast %1307 : vector<1x3x128xf32> to vector<3x128xf32>
    %1309 = vector.broadcast %1306 : f32 to vector<3x128xf32>
    %1310 = arith.mulf %1309, %1308 : vector<3x128xf32>
    %1311 = arith.addf %1305, %1310 : vector<3x128xf32>
    %c3_1224 = arith.constant 3 : index
    %1312 = memref.load %arg7[%c3_1224] : memref<16xf32, #tpu.memory_space<smem>>
    %c11_1225 = arith.constant 11 : index
    %c0_1226 = arith.constant 0 : index
    %c0_1227 = arith.constant 0 : index
    %1313 = vector.load %arg10[%c11_1225, %c0_1226, %c0_1227] : memref<20x3x128xf32, #tpu.memory_space<vmem>>, vector<1x3x128xf32>
    %1314 = vector.shape_cast %1313 : vector<1x3x128xf32> to vector<3x128xf32>
    %1315 = vector.broadcast %1312 : f32 to vector<3x128xf32>
    %1316 = arith.mulf %1315, %1314 : vector<3x128xf32>
    %1317 = arith.addf %1311, %1316 : vector<3x128xf32>
    %c0_1228 = arith.constant 0 : index
    %c12_1229 = arith.constant 12 : index
    %c0_1230 = arith.constant 0 : index
    %c0_1231 = arith.constant 0 : index
    %1318 = vector.load %arg9[%c0_1228, %c12_1229, %c0_1230, %c0_1231] : memref<1x24x3x128xf32, #tpu.memory_space<vmem>>, vector<1x1x3x128xf32>
    %1319 = vector.shape_cast %1318 : vector<1x1x3x128xf32> to vector<3x128xf32>
    %1320 = vector.shape_cast %1317 : vector<3x128xf32> to vector<1x1x3x128xf32>
    tpu.vector_store %arg9[%c0_1228, %c12_1229, %c0_1230, %c0_1231], %1320 {strides = array<i32>} : memref<1x24x3x128xf32, #tpu.memory_space<vmem>>, vector<1x1x3x128xf32>,
    %c1_1232 = arith.constant 1 : index
    %c0_1233 = arith.constant 0 : index
    %c0_1234 = arith.constant 0 : index
    %1321 = vector.load %arg11[%c1_1232, %c0_1233, %c0_1234] : memref<4x3x128xf32, #tpu.memory_space<vmem>>, vector<1x3x128xf32>
    %1322 = vector.shape_cast %1321 : vector<1x3x128xf32> to vector<3x128xf32>
    %c4_1235 = arith.constant 4 : index
    %1323 = memref.load %arg7[%c4_1235] : memref<16xf32, #tpu.memory_space<smem>>
    %c8_1236 = arith.constant 8 : index
    %c0_1237 = arith.constant 0 : index
    %c0_1238 = arith.constant 0 : index
    %1324 = vector.load %arg10[%c8_1236, %c0_1237, %c0_1238] : memref<20x3x128xf32, #tpu.memory_space<vmem>>, vector<1x3x128xf32>
    %1325 = vector.shape_cast %1324 : vector<1x3x128xf32> to vector<3x128xf32>
    %1326 = vector.broadcast %1323 : f32 to vector<3x128xf32>
    %1327 = arith.mulf %1326, %1325 : vector<3x128xf32>
    %1328 = arith.addf %1322, %1327 : vector<3x128xf32>
    %c5_1239 = arith.constant 5 : index
    %1329 = memref.load %arg7[%c5_1239] : memref<16xf32, #tpu.memory_space<smem>>
    %c9_1240 = arith.constant 9 : index
    %c0_1241 = arith.constant 0 : index
    %c0_1242 = arith.constant 0 : index
    %1330 = vector.load %arg10[%c9_1240, %c0_1241, %c0_1242] : memref<20x3x128xf32, #tpu.memory_space<vmem>>, vector<1x3x128xf32>
    %1331 = vector.shape_cast %1330 : vector<1x3x128xf32> to vector<3x128xf32>
    %1332 = vector.broadcast %1329 : f32 to vector<3x128xf32>
    %1333 = arith.mulf %1332, %1331 : vector<3x128xf32>
    %1334 = arith.addf %1328, %1333 : vector<3x128xf32>
    %c6_1243 = arith.constant 6 : index
    %1335 = memref.load %arg7[%c6_1243] : memref<16xf32, #tpu.memory_space<smem>>
    %c10_1244 = arith.constant 10 : index
    %c0_1245 = arith.constant 0 : index
    %c0_1246 = arith.constant 0 : index
    %1336 = vector.load %arg10[%c10_1244, %c0_1245, %c0_1246] : memref<20x3x128xf32, #tpu.memory_space<vmem>>, vector<1x3x128xf32>
    %1337 = vector.shape_cast %1336 : vector<1x3x128xf32> to vector<3x128xf32>
    %1338 = vector.broadcast %1335 : f32 to vector<3x128xf32>
    %1339 = arith.mulf %1338, %1337 : vector<3x128xf32>
    %1340 = arith.addf %1334, %1339 : vector<3x128xf32>
    %c7_1247 = arith.constant 7 : index
    %1341 = memref.load %arg7[%c7_1247] : memref<16xf32, #tpu.memory_space<smem>>
    %c11_1248 = arith.constant 11 : index
    %c0_1249 = arith.constant 0 : index
    %c0_1250 = arith.constant 0 : index
    %1342 = vector.load %arg10[%c11_1248, %c0_1249, %c0_1250] : memref<20x3x128xf32, #tpu.memory_space<vmem>>, vector<1x3x128xf32>
    %1343 = vector.shape_cast %1342 : vector<1x3x128xf32> to vector<3x128xf32>
    %1344 = vector.broadcast %1341 : f32 to vector<3x128xf32>
    %1345 = arith.mulf %1344, %1343 : vector<3x128xf32>
    %1346 = arith.addf %1340, %1345 : vector<3x128xf32>
    %c0_1251 = arith.constant 0 : index
    %c13_1252 = arith.constant 13 : index
    %c0_1253 = arith.constant 0 : index
    %c0_1254 = arith.constant 0 : index
    %1347 = vector.load %arg9[%c0_1251, %c13_1252, %c0_1253, %c0_1254] : memref<1x24x3x128xf32, #tpu.memory_space<vmem>>, vector<1x1x3x128xf32>
    %1348 = vector.shape_cast %1347 : vector<1x1x3x128xf32> to vector<3x128xf32>
    %1349 = vector.shape_cast %1346 : vector<3x128xf32> to vector<1x1x3x128xf32>
    tpu.vector_store %arg9[%c0_1251, %c13_1252, %c0_1253, %c0_1254], %1349 {strides = array<i32>} : memref<1x24x3x128xf32, #tpu.memory_space<vmem>>, vector<1x1x3x128xf32>,
    %c2_1255 = arith.constant 2 : index
    %c0_1256 = arith.constant 0 : index
    %c0_1257 = arith.constant 0 : index
    %1350 = vector.load %arg11[%c2_1255, %c0_1256, %c0_1257] : memref<4x3x128xf32, #tpu.memory_space<vmem>>, vector<1x3x128xf32>
    %1351 = vector.shape_cast %1350 : vector<1x3x128xf32> to vector<3x128xf32>
    %c8_1258 = arith.constant 8 : index
    %1352 = memref.load %arg7[%c8_1258] : memref<16xf32, #tpu.memory_space<smem>>
    %c8_1259 = arith.constant 8 : index
    %c0_1260 = arith.constant 0 : index
    %c0_1261 = arith.constant 0 : index
    %1353 = vector.load %arg10[%c8_1259, %c0_1260, %c0_1261] : memref<20x3x128xf32, #tpu.memory_space<vmem>>, vector<1x3x128xf32>
    %1354 = vector.shape_cast %1353 : vector<1x3x128xf32> to vector<3x128xf32>
    %1355 = vector.broadcast %1352 : f32 to vector<3x128xf32>
    %1356 = arith.mulf %1355, %1354 : vector<3x128xf32>
    %1357 = arith.addf %1351, %1356 : vector<3x128xf32>
    %c9_1262 = arith.constant 9 : index
    %1358 = memref.load %arg7[%c9_1262] : memref<16xf32, #tpu.memory_space<smem>>
    %c9_1263 = arith.constant 9 : index
    %c0_1264 = arith.constant 0 : index
    %c0_1265 = arith.constant 0 : index
    %1359 = vector.load %arg10[%c9_1263, %c0_1264, %c0_1265] : memref<20x3x128xf32, #tpu.memory_space<vmem>>, vector<1x3x128xf32>
    %1360 = vector.shape_cast %1359 : vector<1x3x128xf32> to vector<3x128xf32>
    %1361 = vector.broadcast %1358 : f32 to vector<3x128xf32>
    %1362 = arith.mulf %1361, %1360 : vector<3x128xf32>
    %1363 = arith.addf %1357, %1362 : vector<3x128xf32>
    %c10_1266 = arith.constant 10 : index
    %1364 = memref.load %arg7[%c10_1266] : memref<16xf32, #tpu.memory_space<smem>>
    %c10_1267 = arith.constant 10 : index
    %c0_1268 = arith.constant 0 : index
    %c0_1269 = arith.constant 0 : index
    %1365 = vector.load %arg10[%c10_1267, %c0_1268, %c0_1269] : memref<20x3x128xf32, #tpu.memory_space<vmem>>, vector<1x3x128xf32>
    %1366 = vector.shape_cast %1365 : vector<1x3x128xf32> to vector<3x128xf32>
    %1367 = vector.broadcast %1364 : f32 to vector<3x128xf32>
    %1368 = arith.mulf %1367, %1366 : vector<3x128xf32>
    %1369 = arith.addf %1363, %1368 : vector<3x128xf32>
    %c11_1270 = arith.constant 11 : index
    %1370 = memref.load %arg7[%c11_1270] : memref<16xf32, #tpu.memory_space<smem>>
    %c11_1271 = arith.constant 11 : index
    %c0_1272 = arith.constant 0 : index
    %c0_1273 = arith.constant 0 : index
    %1371 = vector.load %arg10[%c11_1271, %c0_1272, %c0_1273] : memref<20x3x128xf32, #tpu.memory_space<vmem>>, vector<1x3x128xf32>
    %1372 = vector.shape_cast %1371 : vector<1x3x128xf32> to vector<3x128xf32>
    %1373 = vector.broadcast %1370 : f32 to vector<3x128xf32>
    %1374 = arith.mulf %1373, %1372 : vector<3x128xf32>
    %1375 = arith.addf %1369, %1374 : vector<3x128xf32>
    %c0_1274 = arith.constant 0 : index
    %c14_1275 = arith.constant 14 : index
    %c0_1276 = arith.constant 0 : index
    %c0_1277 = arith.constant 0 : index
    %1376 = vector.load %arg9[%c0_1274, %c14_1275, %c0_1276, %c0_1277] : memref<1x24x3x128xf32, #tpu.memory_space<vmem>>, vector<1x1x3x128xf32>
    %1377 = vector.shape_cast %1376 : vector<1x1x3x128xf32> to vector<3x128xf32>
    %1378 = vector.shape_cast %1375 : vector<3x128xf32> to vector<1x1x3x128xf32>
    tpu.vector_store %arg9[%c0_1274, %c14_1275, %c0_1276, %c0_1277], %1378 {strides = array<i32>} : memref<1x24x3x128xf32, #tpu.memory_space<vmem>>, vector<1x1x3x128xf32>,
    %c3_1278 = arith.constant 3 : index
    %c0_1279 = arith.constant 0 : index
    %c0_1280 = arith.constant 0 : index
    %1379 = vector.load %arg11[%c3_1278, %c0_1279, %c0_1280] : memref<4x3x128xf32, #tpu.memory_space<vmem>>, vector<1x3x128xf32>
    %1380 = vector.shape_cast %1379 : vector<1x3x128xf32> to vector<3x128xf32>
    %c12_1281 = arith.constant 12 : index
    %1381 = memref.load %arg7[%c12_1281] : memref<16xf32, #tpu.memory_space<smem>>
    %c8_1282 = arith.constant 8 : index
    %c0_1283 = arith.constant 0 : index
    %c0_1284 = arith.constant 0 : index
    %1382 = vector.load %arg10[%c8_1282, %c0_1283, %c0_1284] : memref<20x3x128xf32, #tpu.memory_space<vmem>>, vector<1x3x128xf32>
    %1383 = vector.shape_cast %1382 : vector<1x3x128xf32> to vector<3x128xf32>
    %1384 = vector.broadcast %1381 : f32 to vector<3x128xf32>
    %1385 = arith.mulf %1384, %1383 : vector<3x128xf32>
    %1386 = arith.addf %1380, %1385 : vector<3x128xf32>
    %c13_1285 = arith.constant 13 : index
    %1387 = memref.load %arg7[%c13_1285] : memref<16xf32, #tpu.memory_space<smem>>
    %c9_1286 = arith.constant 9 : index
    %c0_1287 = arith.constant 0 : index
    %c0_1288 = arith.constant 0 : index
    %1388 = vector.load %arg10[%c9_1286, %c0_1287, %c0_1288] : memref<20x3x128xf32, #tpu.memory_space<vmem>>, vector<1x3x128xf32>
    %1389 = vector.shape_cast %1388 : vector<1x3x128xf32> to vector<3x128xf32>
    %1390 = vector.broadcast %1387 : f32 to vector<3x128xf32>
    %1391 = arith.mulf %1390, %1389 : vector<3x128xf32>
    %1392 = arith.addf %1386, %1391 : vector<3x128xf32>
    %c14_1289 = arith.constant 14 : index
    %1393 = memref.load %arg7[%c14_1289] : memref<16xf32, #tpu.memory_space<smem>>
    %c10_1290 = arith.constant 10 : index
    %c0_1291 = arith.constant 0 : index
    %c0_1292 = arith.constant 0 : index
    %1394 = vector.load %arg10[%c10_1290, %c0_1291, %c0_1292] : memref<20x3x128xf32, #tpu.memory_space<vmem>>, vector<1x3x128xf32>
    %1395 = vector.shape_cast %1394 : vector<1x3x128xf32> to vector<3x128xf32>
    %1396 = vector.broadcast %1393 : f32 to vector<3x128xf32>
    %1397 = arith.mulf %1396, %1395 : vector<3x128xf32>
    %1398 = arith.addf %1392, %1397 : vector<3x128xf32>
    %c15_1293 = arith.constant 15 : index
    %1399 = memref.load %arg7[%c15_1293] : memref<16xf32, #tpu.memory_space<smem>>
    %c11_1294 = arith.constant 11 : index
    %c0_1295 = arith.constant 0 : index
    %c0_1296 = arith.constant 0 : index
    %1400 = vector.load %arg10[%c11_1294, %c0_1295, %c0_1296] : memref<20x3x128xf32, #tpu.memory_space<vmem>>, vector<1x3x128xf32>
    %1401 = vector.shape_cast %1400 : vector<1x3x128xf32> to vector<3x128xf32>
    %1402 = vector.broadcast %1399 : f32 to vector<3x128xf32>
    %1403 = arith.mulf %1402, %1401 : vector<3x128xf32>
    %1404 = arith.addf %1398, %1403 : vector<3x128xf32>
    %c0_1297 = arith.constant 0 : index
    %c15_1298 = arith.constant 15 : index
    %c0_1299 = arith.constant 0 : index
    %c0_1300 = arith.constant 0 : index
    %1405 = vector.load %arg9[%c0_1297, %c15_1298, %c0_1299, %c0_1300] : memref<1x24x3x128xf32, #tpu.memory_space<vmem>>, vector<1x1x3x128xf32>
    %1406 = vector.shape_cast %1405 : vector<1x1x3x128xf32> to vector<3x128xf32>
    %1407 = vector.shape_cast %1404 : vector<3x128xf32> to vector<1x1x3x128xf32>
    tpu.vector_store %arg9[%c0_1297, %c15_1298, %c0_1299, %c0_1300], %1407 {strides = array<i32>} : memref<1x24x3x128xf32, #tpu.memory_space<vmem>>, vector<1x1x3x128xf32>,
    %c0_1301 = arith.constant 0 : index
    %c0_1302 = arith.constant 0 : index
    %c0_1303 = arith.constant 0 : index
    %1408 = vector.load %arg11[%c0_1301, %c0_1302, %c0_1303] : memref<4x3x128xf32, #tpu.memory_space<vmem>>, vector<1x3x128xf32>
    %1409 = vector.shape_cast %1408 : vector<1x3x128xf32> to vector<3x128xf32>
    %c0_1304 = arith.constant 0 : index
    %1410 = memref.load %arg7[%c0_1304] : memref<16xf32, #tpu.memory_space<smem>>
    %c12_1305 = arith.constant 12 : index
    %c0_1306 = arith.constant 0 : index
    %c0_1307 = arith.constant 0 : index
    %1411 = vector.load %arg10[%c12_1305, %c0_1306, %c0_1307] : memref<20x3x128xf32, #tpu.memory_space<vmem>>, vector<1x3x128xf32>
    %1412 = vector.shape_cast %1411 : vector<1x3x128xf32> to vector<3x128xf32>
    %1413 = vector.broadcast %1410 : f32 to vector<3x128xf32>
    %1414 = arith.mulf %1413, %1412 : vector<3x128xf32>
    %1415 = arith.addf %1409, %1414 : vector<3x128xf32>
    %c1_1308 = arith.constant 1 : index
    %1416 = memref.load %arg7[%c1_1308] : memref<16xf32, #tpu.memory_space<smem>>
    %c13_1309 = arith.constant 13 : index
    %c0_1310 = arith.constant 0 : index
    %c0_1311 = arith.constant 0 : index
    %1417 = vector.load %arg10[%c13_1309, %c0_1310, %c0_1311] : memref<20x3x128xf32, #tpu.memory_space<vmem>>, vector<1x3x128xf32>
    %1418 = vector.shape_cast %1417 : vector<1x3x128xf32> to vector<3x128xf32>
    %1419 = vector.broadcast %1416 : f32 to vector<3x128xf32>
    %1420 = arith.mulf %1419, %1418 : vector<3x128xf32>
    %1421 = arith.addf %1415, %1420 : vector<3x128xf32>
    %c2_1312 = arith.constant 2 : index
    %1422 = memref.load %arg7[%c2_1312] : memref<16xf32, #tpu.memory_space<smem>>
    %c14_1313 = arith.constant 14 : index
    %c0_1314 = arith.constant 0 : index
    %c0_1315 = arith.constant 0 : index
    %1423 = vector.load %arg10[%c14_1313, %c0_1314, %c0_1315] : memref<20x3x128xf32, #tpu.memory_space<vmem>>, vector<1x3x128xf32>
    %1424 = vector.shape_cast %1423 : vector<1x3x128xf32> to vector<3x128xf32>
    %1425 = vector.broadcast %1422 : f32 to vector<3x128xf32>
    %1426 = arith.mulf %1425, %1424 : vector<3x128xf32>
    %1427 = arith.addf %1421, %1426 : vector<3x128xf32>
    %c3_1316 = arith.constant 3 : index
    %1428 = memref.load %arg7[%c3_1316] : memref<16xf32, #tpu.memory_space<smem>>
    %c15_1317 = arith.constant 15 : index
    %c0_1318 = arith.constant 0 : index
    %c0_1319 = arith.constant 0 : index
    %1429 = vector.load %arg10[%c15_1317, %c0_1318, %c0_1319] : memref<20x3x128xf32, #tpu.memory_space<vmem>>, vector<1x3x128xf32>
    %1430 = vector.shape_cast %1429 : vector<1x3x128xf32> to vector<3x128xf32>
    %1431 = vector.broadcast %1428 : f32 to vector<3x128xf32>
    %1432 = arith.mulf %1431, %1430 : vector<3x128xf32>
    %1433 = arith.addf %1427, %1432 : vector<3x128xf32>
    %c0_1320 = arith.constant 0 : index
    %c16_1321 = arith.constant 16 : index
    %c0_1322 = arith.constant 0 : index
    %c0_1323 = arith.constant 0 : index
    %1434 = vector.load %arg9[%c0_1320, %c16_1321, %c0_1322, %c0_1323] : memref<1x24x3x128xf32, #tpu.memory_space<vmem>>, vector<1x1x3x128xf32>
    %1435 = vector.shape_cast %1434 : vector<1x1x3x128xf32> to vector<3x128xf32>
    %1436 = vector.shape_cast %1433 : vector<3x128xf32> to vector<1x1x3x128xf32>
    tpu.vector_store %arg9[%c0_1320, %c16_1321, %c0_1322, %c0_1323], %1436 {strides = array<i32>} : memref<1x24x3x128xf32, #tpu.memory_space<vmem>>, vector<1x1x3x128xf32>,
    %c1_1324 = arith.constant 1 : index
    %c0_1325 = arith.constant 0 : index
    %c0_1326 = arith.constant 0 : index
    %1437 = vector.load %arg11[%c1_1324, %c0_1325, %c0_1326] : memref<4x3x128xf32, #tpu.memory_space<vmem>>, vector<1x3x128xf32>
    %1438 = vector.shape_cast %1437 : vector<1x3x128xf32> to vector<3x128xf32>
    %c4_1327 = arith.constant 4 : index
    %1439 = memref.load %arg7[%c4_1327] : memref<16xf32, #tpu.memory_space<smem>>
    %c12_1328 = arith.constant 12 : index
    %c0_1329 = arith.constant 0 : index
    %c0_1330 = arith.constant 0 : index
    %1440 = vector.load %arg10[%c12_1328, %c0_1329, %c0_1330] : memref<20x3x128xf32, #tpu.memory_space<vmem>>, vector<1x3x128xf32>
    %1441 = vector.shape_cast %1440 : vector<1x3x128xf32> to vector<3x128xf32>
    %1442 = vector.broadcast %1439 : f32 to vector<3x128xf32>
    %1443 = arith.mulf %1442, %1441 : vector<3x128xf32>
    %1444 = arith.addf %1438, %1443 : vector<3x128xf32>
    %c5_1331 = arith.constant 5 : index
    %1445 = memref.load %arg7[%c5_1331] : memref<16xf32, #tpu.memory_space<smem>>
    %c13_1332 = arith.constant 13 : index
    %c0_1333 = arith.constant 0 : index
    %c0_1334 = arith.constant 0 : index
    %1446 = vector.load %arg10[%c13_1332, %c0_1333, %c0_1334] : memref<20x3x128xf32, #tpu.memory_space<vmem>>, vector<1x3x128xf32>
    %1447 = vector.shape_cast %1446 : vector<1x3x128xf32> to vector<3x128xf32>
    %1448 = vector.broadcast %1445 : f32 to vector<3x128xf32>
    %1449 = arith.mulf %1448, %1447 : vector<3x128xf32>
    %1450 = arith.addf %1444, %1449 : vector<3x128xf32>
    %c6_1335 = arith.constant 6 : index
    %1451 = memref.load %arg7[%c6_1335] : memref<16xf32, #tpu.memory_space<smem>>
    %c14_1336 = arith.constant 14 : index
    %c0_1337 = arith.constant 0 : index
    %c0_1338 = arith.constant 0 : index
    %1452 = vector.load %arg10[%c14_1336, %c0_1337, %c0_1338] : memref<20x3x128xf32, #tpu.memory_space<vmem>>, vector<1x3x128xf32>
    %1453 = vector.shape_cast %1452 : vector<1x3x128xf32> to vector<3x128xf32>
    %1454 = vector.broadcast %1451 : f32 to vector<3x128xf32>
    %1455 = arith.mulf %1454, %1453 : vector<3x128xf32>
    %1456 = arith.addf %1450, %1455 : vector<3x128xf32>
    %c7_1339 = arith.constant 7 : index
    %1457 = memref.load %arg7[%c7_1339] : memref<16xf32, #tpu.memory_space<smem>>
    %c15_1340 = arith.constant 15 : index
    %c0_1341 = arith.constant 0 : index
    %c0_1342 = arith.constant 0 : index
    %1458 = vector.load %arg10[%c15_1340, %c0_1341, %c0_1342] : memref<20x3x128xf32, #tpu.memory_space<vmem>>, vector<1x3x128xf32>
    %1459 = vector.shape_cast %1458 : vector<1x3x128xf32> to vector<3x128xf32>
    %1460 = vector.broadcast %1457 : f32 to vector<3x128xf32>
    %1461 = arith.mulf %1460, %1459 : vector<3x128xf32>
    %1462 = arith.addf %1456, %1461 : vector<3x128xf32>
    %c0_1343 = arith.constant 0 : index
    %c17_1344 = arith.constant 17 : index
    %c0_1345 = arith.constant 0 : index
    %c0_1346 = arith.constant 0 : index
    %1463 = vector.load %arg9[%c0_1343, %c17_1344, %c0_1345, %c0_1346] : memref<1x24x3x128xf32, #tpu.memory_space<vmem>>, vector<1x1x3x128xf32>
    %1464 = vector.shape_cast %1463 : vector<1x1x3x128xf32> to vector<3x128xf32>
    %1465 = vector.shape_cast %1462 : vector<3x128xf32> to vector<1x1x3x128xf32>
    tpu.vector_store %arg9[%c0_1343, %c17_1344, %c0_1345, %c0_1346], %1465 {strides = array<i32>} : memref<1x24x3x128xf32, #tpu.memory_space<vmem>>, vector<1x1x3x128xf32>,
    %c2_1347 = arith.constant 2 : index
    %c0_1348 = arith.constant 0 : index
    %c0_1349 = arith.constant 0 : index
    %1466 = vector.load %arg11[%c2_1347, %c0_1348, %c0_1349] : memref<4x3x128xf32, #tpu.memory_space<vmem>>, vector<1x3x128xf32>
    %1467 = vector.shape_cast %1466 : vector<1x3x128xf32> to vector<3x128xf32>
    %c8_1350 = arith.constant 8 : index
    %1468 = memref.load %arg7[%c8_1350] : memref<16xf32, #tpu.memory_space<smem>>
    %c12_1351 = arith.constant 12 : index
    %c0_1352 = arith.constant 0 : index
    %c0_1353 = arith.constant 0 : index
    %1469 = vector.load %arg10[%c12_1351, %c0_1352, %c0_1353] : memref<20x3x128xf32, #tpu.memory_space<vmem>>, vector<1x3x128xf32>
    %1470 = vector.shape_cast %1469 : vector<1x3x128xf32> to vector<3x128xf32>
    %1471 = vector.broadcast %1468 : f32 to vector<3x128xf32>
    %1472 = arith.mulf %1471, %1470 : vector<3x128xf32>
    %1473 = arith.addf %1467, %1472 : vector<3x128xf32>
    %c9_1354 = arith.constant 9 : index
    %1474 = memref.load %arg7[%c9_1354] : memref<16xf32, #tpu.memory_space<smem>>
    %c13_1355 = arith.constant 13 : index
    %c0_1356 = arith.constant 0 : index
    %c0_1357 = arith.constant 0 : index
    %1475 = vector.load %arg10[%c13_1355, %c0_1356, %c0_1357] : memref<20x3x128xf32, #tpu.memory_space<vmem>>, vector<1x3x128xf32>
    %1476 = vector.shape_cast %1475 : vector<1x3x128xf32> to vector<3x128xf32>
    %1477 = vector.broadcast %1474 : f32 to vector<3x128xf32>
    %1478 = arith.mulf %1477, %1476 : vector<3x128xf32>
    %1479 = arith.addf %1473, %1478 : vector<3x128xf32>
    %c10_1358 = arith.constant 10 : index
    %1480 = memref.load %arg7[%c10_1358] : memref<16xf32, #tpu.memory_space<smem>>
    %c14_1359 = arith.constant 14 : index
    %c0_1360 = arith.constant 0 : index
    %c0_1361 = arith.constant 0 : index
    %1481 = vector.load %arg10[%c14_1359, %c0_1360, %c0_1361] : memref<20x3x128xf32, #tpu.memory_space<vmem>>, vector<1x3x128xf32>
    %1482 = vector.shape_cast %1481 : vector<1x3x128xf32> to vector<3x128xf32>
    %1483 = vector.broadcast %1480 : f32 to vector<3x128xf32>
    %1484 = arith.mulf %1483, %1482 : vector<3x128xf32>
    %1485 = arith.addf %1479, %1484 : vector<3x128xf32>
    %c11_1362 = arith.constant 11 : index
    %1486 = memref.load %arg7[%c11_1362] : memref<16xf32, #tpu.memory_space<smem>>
    %c15_1363 = arith.constant 15 : index
    %c0_1364 = arith.constant 0 : index
    %c0_1365 = arith.constant 0 : index
    %1487 = vector.load %arg10[%c15_1363, %c0_1364, %c0_1365] : memref<20x3x128xf32, #tpu.memory_space<vmem>>, vector<1x3x128xf32>
    %1488 = vector.shape_cast %1487 : vector<1x3x128xf32> to vector<3x128xf32>
    %1489 = vector.broadcast %1486 : f32 to vector<3x128xf32>
    %1490 = arith.mulf %1489, %1488 : vector<3x128xf32>
    %1491 = arith.addf %1485, %1490 : vector<3x128xf32>
    %c0_1366 = arith.constant 0 : index
    %c18_1367 = arith.constant 18 : index
    %c0_1368 = arith.constant 0 : index
    %c0_1369 = arith.constant 0 : index
    %1492 = vector.load %arg9[%c0_1366, %c18_1367, %c0_1368, %c0_1369] : memref<1x24x3x128xf32, #tpu.memory_space<vmem>>, vector<1x1x3x128xf32>
    %1493 = vector.shape_cast %1492 : vector<1x1x3x128xf32> to vector<3x128xf32>
    %1494 = vector.shape_cast %1491 : vector<3x128xf32> to vector<1x1x3x128xf32>
    tpu.vector_store %arg9[%c0_1366, %c18_1367, %c0_1368, %c0_1369], %1494 {strides = array<i32>} : memref<1x24x3x128xf32, #tpu.memory_space<vmem>>, vector<1x1x3x128xf32>,
    %c3_1370 = arith.constant 3 : index
    %c0_1371 = arith.constant 0 : index
    %c0_1372 = arith.constant 0 : index
    %1495 = vector.load %arg11[%c3_1370, %c0_1371, %c0_1372] : memref<4x3x128xf32, #tpu.memory_space<vmem>>, vector<1x3x128xf32>
    %1496 = vector.shape_cast %1495 : vector<1x3x128xf32> to vector<3x128xf32>
    %c12_1373 = arith.constant 12 : index
    %1497 = memref.load %arg7[%c12_1373] : memref<16xf32, #tpu.memory_space<smem>>
    %c12_1374 = arith.constant 12 : index
    %c0_1375 = arith.constant 0 : index
    %c0_1376 = arith.constant 0 : index
    %1498 = vector.load %arg10[%c12_1374, %c0_1375, %c0_1376] : memref<20x3x128xf32, #tpu.memory_space<vmem>>, vector<1x3x128xf32>
    %1499 = vector.shape_cast %1498 : vector<1x3x128xf32> to vector<3x128xf32>
    %1500 = vector.broadcast %1497 : f32 to vector<3x128xf32>
    %1501 = arith.mulf %1500, %1499 : vector<3x128xf32>
    %1502 = arith.addf %1496, %1501 : vector<3x128xf32>
    %c13_1377 = arith.constant 13 : index
    %1503 = memref.load %arg7[%c13_1377] : memref<16xf32, #tpu.memory_space<smem>>
    %c13_1378 = arith.constant 13 : index
    %c0_1379 = arith.constant 0 : index
    %c0_1380 = arith.constant 0 : index
    %1504 = vector.load %arg10[%c13_1378, %c0_1379, %c0_1380] : memref<20x3x128xf32, #tpu.memory_space<vmem>>, vector<1x3x128xf32>
    %1505 = vector.shape_cast %1504 : vector<1x3x128xf32> to vector<3x128xf32>
    %1506 = vector.broadcast %1503 : f32 to vector<3x128xf32>
    %1507 = arith.mulf %1506, %1505 : vector<3x128xf32>
    %1508 = arith.addf %1502, %1507 : vector<3x128xf32>
    %c14_1381 = arith.constant 14 : index
    %1509 = memref.load %arg7[%c14_1381] : memref<16xf32, #tpu.memory_space<smem>>
    %c14_1382 = arith.constant 14 : index
    %c0_1383 = arith.constant 0 : index
    %c0_1384 = arith.constant 0 : index
    %1510 = vector.load %arg10[%c14_1382, %c0_1383, %c0_1384] : memref<20x3x128xf32, #tpu.memory_space<vmem>>, vector<1x3x128xf32>
    %1511 = vector.shape_cast %1510 : vector<1x3x128xf32> to vector<3x128xf32>
    %1512 = vector.broadcast %1509 : f32 to vector<3x128xf32>
    %1513 = arith.mulf %1512, %1511 : vector<3x128xf32>
    %1514 = arith.addf %1508, %1513 : vector<3x128xf32>
    %c15_1385 = arith.constant 15 : index
    %1515 = memref.load %arg7[%c15_1385] : memref<16xf32, #tpu.memory_space<smem>>
    %c15_1386 = arith.constant 15 : index
    %c0_1387 = arith.constant 0 : index
    %c0_1388 = arith.constant 0 : index
    %1516 = vector.load %arg10[%c15_1386, %c0_1387, %c0_1388] : memref<20x3x128xf32, #tpu.memory_space<vmem>>, vector<1x3x128xf32>
    %1517 = vector.shape_cast %1516 : vector<1x3x128xf32> to vector<3x128xf32>
    %1518 = vector.broadcast %1515 : f32 to vector<3x128xf32>
    %1519 = arith.mulf %1518, %1517 : vector<3x128xf32>
    %1520 = arith.addf %1514, %1519 : vector<3x128xf32>
    %c0_1389 = arith.constant 0 : index
    %c19_1390 = arith.constant 19 : index
    %c0_1391 = arith.constant 0 : index
    %c0_1392 = arith.constant 0 : index
    %1521 = vector.load %arg9[%c0_1389, %c19_1390, %c0_1391, %c0_1392] : memref<1x24x3x128xf32, #tpu.memory_space<vmem>>, vector<1x1x3x128xf32>
    %1522 = vector.shape_cast %1521 : vector<1x1x3x128xf32> to vector<3x128xf32>
    %1523 = vector.shape_cast %1520 : vector<3x128xf32> to vector<1x1x3x128xf32>
    tpu.vector_store %arg9[%c0_1389, %c19_1390, %c0_1391, %c0_1392], %1523 {strides = array<i32>} : memref<1x24x3x128xf32, #tpu.memory_space<vmem>>, vector<1x1x3x128xf32>,
    %c0_1393 = arith.constant 0 : index
    %c0_1394 = arith.constant 0 : index
    %c0_1395 = arith.constant 0 : index
    %1524 = vector.load %arg11[%c0_1393, %c0_1394, %c0_1395] : memref<4x3x128xf32, #tpu.memory_space<vmem>>, vector<1x3x128xf32>
    %1525 = vector.shape_cast %1524 : vector<1x3x128xf32> to vector<3x128xf32>
    %c0_1396 = arith.constant 0 : index
    %1526 = memref.load %arg7[%c0_1396] : memref<16xf32, #tpu.memory_space<smem>>
    %c16_1397 = arith.constant 16 : index
    %c0_1398 = arith.constant 0 : index
    %c0_1399 = arith.constant 0 : index
    %1527 = vector.load %arg10[%c16_1397, %c0_1398, %c0_1399] : memref<20x3x128xf32, #tpu.memory_space<vmem>>, vector<1x3x128xf32>
    %1528 = vector.shape_cast %1527 : vector<1x3x128xf32> to vector<3x128xf32>
    %1529 = vector.broadcast %1526 : f32 to vector<3x128xf32>
    %1530 = arith.mulf %1529, %1528 : vector<3x128xf32>
    %1531 = arith.addf %1525, %1530 : vector<3x128xf32>
    %c1_1400 = arith.constant 1 : index
    %1532 = memref.load %arg7[%c1_1400] : memref<16xf32, #tpu.memory_space<smem>>
    %c17_1401 = arith.constant 17 : index
    %c0_1402 = arith.constant 0 : index
    %c0_1403 = arith.constant 0 : index
    %1533 = vector.load %arg10[%c17_1401, %c0_1402, %c0_1403] : memref<20x3x128xf32, #tpu.memory_space<vmem>>, vector<1x3x128xf32>
    %1534 = vector.shape_cast %1533 : vector<1x3x128xf32> to vector<3x128xf32>
    %1535 = vector.broadcast %1532 : f32 to vector<3x128xf32>
    %1536 = arith.mulf %1535, %1534 : vector<3x128xf32>
    %1537 = arith.addf %1531, %1536 : vector<3x128xf32>
    %c2_1404 = arith.constant 2 : index
    %1538 = memref.load %arg7[%c2_1404] : memref<16xf32, #tpu.memory_space<smem>>
    %c18_1405 = arith.constant 18 : index
    %c0_1406 = arith.constant 0 : index
    %c0_1407 = arith.constant 0 : index
    %1539 = vector.load %arg10[%c18_1405, %c0_1406, %c0_1407] : memref<20x3x128xf32, #tpu.memory_space<vmem>>, vector<1x3x128xf32>
    %1540 = vector.shape_cast %1539 : vector<1x3x128xf32> to vector<3x128xf32>
    %1541 = vector.broadcast %1538 : f32 to vector<3x128xf32>
    %1542 = arith.mulf %1541, %1540 : vector<3x128xf32>
    %1543 = arith.addf %1537, %1542 : vector<3x128xf32>
    %c3_1408 = arith.constant 3 : index
    %1544 = memref.load %arg7[%c3_1408] : memref<16xf32, #tpu.memory_space<smem>>
    %c19_1409 = arith.constant 19 : index
    %c0_1410 = arith.constant 0 : index
    %c0_1411 = arith.constant 0 : index
    %1545 = vector.load %arg10[%c19_1409, %c0_1410, %c0_1411] : memref<20x3x128xf32, #tpu.memory_space<vmem>>, vector<1x3x128xf32>
    %1546 = vector.shape_cast %1545 : vector<1x3x128xf32> to vector<3x128xf32>
    %1547 = vector.broadcast %1544 : f32 to vector<3x128xf32>
    %1548 = arith.mulf %1547, %1546 : vector<3x128xf32>
    %1549 = arith.addf %1543, %1548 : vector<3x128xf32>
    %c0_1412 = arith.constant 0 : index
    %c20_1413 = arith.constant 20 : index
    %c0_1414 = arith.constant 0 : index
    %c0_1415 = arith.constant 0 : index
    %1550 = vector.load %arg9[%c0_1412, %c20_1413, %c0_1414, %c0_1415] : memref<1x24x3x128xf32, #tpu.memory_space<vmem>>, vector<1x1x3x128xf32>
    %1551 = vector.shape_cast %1550 : vector<1x1x3x128xf32> to vector<3x128xf32>
    %1552 = vector.shape_cast %1549 : vector<3x128xf32> to vector<1x1x3x128xf32>
    tpu.vector_store %arg9[%c0_1412, %c20_1413, %c0_1414, %c0_1415], %1552 {strides = array<i32>} : memref<1x24x3x128xf32, #tpu.memory_space<vmem>>, vector<1x1x3x128xf32>,
    %c1_1416 = arith.constant 1 : index
    %c0_1417 = arith.constant 0 : index
    %c0_1418 = arith.constant 0 : index
    %1553 = vector.load %arg11[%c1_1416, %c0_1417, %c0_1418] : memref<4x3x128xf32, #tpu.memory_space<vmem>>, vector<1x3x128xf32>
    %1554 = vector.shape_cast %1553 : vector<1x3x128xf32> to vector<3x128xf32>
    %c4_1419 = arith.constant 4 : index
    %1555 = memref.load %arg7[%c4_1419] : memref<16xf32, #tpu.memory_space<smem>>
    %c16_1420 = arith.constant 16 : index
    %c0_1421 = arith.constant 0 : index
    %c0_1422 = arith.constant 0 : index
    %1556 = vector.load %arg10[%c16_1420, %c0_1421, %c0_1422] : memref<20x3x128xf32, #tpu.memory_space<vmem>>, vector<1x3x128xf32>
    %1557 = vector.shape_cast %1556 : vector<1x3x128xf32> to vector<3x128xf32>
    %1558 = vector.broadcast %1555 : f32 to vector<3x128xf32>
    %1559 = arith.mulf %1558, %1557 : vector<3x128xf32>
    %1560 = arith.addf %1554, %1559 : vector<3x128xf32>
    %c5_1423 = arith.constant 5 : index
    %1561 = memref.load %arg7[%c5_1423] : memref<16xf32, #tpu.memory_space<smem>>
    %c17_1424 = arith.constant 17 : index
    %c0_1425 = arith.constant 0 : index
    %c0_1426 = arith.constant 0 : index
    %1562 = vector.load %arg10[%c17_1424, %c0_1425, %c0_1426] : memref<20x3x128xf32, #tpu.memory_space<vmem>>, vector<1x3x128xf32>
    %1563 = vector.shape_cast %1562 : vector<1x3x128xf32> to vector<3x128xf32>
    %1564 = vector.broadcast %1561 : f32 to vector<3x128xf32>
    %1565 = arith.mulf %1564, %1563 : vector<3x128xf32>
    %1566 = arith.addf %1560, %1565 : vector<3x128xf32>
    %c6_1427 = arith.constant 6 : index
    %1567 = memref.load %arg7[%c6_1427] : memref<16xf32, #tpu.memory_space<smem>>
    %c18_1428 = arith.constant 18 : index
    %c0_1429 = arith.constant 0 : index
    %c0_1430 = arith.constant 0 : index
    %1568 = vector.load %arg10[%c18_1428, %c0_1429, %c0_1430] : memref<20x3x128xf32, #tpu.memory_space<vmem>>, vector<1x3x128xf32>
    %1569 = vector.shape_cast %1568 : vector<1x3x128xf32> to vector<3x128xf32>
    %1570 = vector.broadcast %1567 : f32 to vector<3x128xf32>
    %1571 = arith.mulf %1570, %1569 : vector<3x128xf32>
    %1572 = arith.addf %1566, %1571 : vector<3x128xf32>
    %c7_1431 = arith.constant 7 : index
    %1573 = memref.load %arg7[%c7_1431] : memref<16xf32, #tpu.memory_space<smem>>
    %c19_1432 = arith.constant 19 : index
    %c0_1433 = arith.constant 0 : index
    %c0_1434 = arith.constant 0 : index
    %1574 = vector.load %arg10[%c19_1432, %c0_1433, %c0_1434] : memref<20x3x128xf32, #tpu.memory_space<vmem>>, vector<1x3x128xf32>
    %1575 = vector.shape_cast %1574 : vector<1x3x128xf32> to vector<3x128xf32>
    %1576 = vector.broadcast %1573 : f32 to vector<3x128xf32>
    %1577 = arith.mulf %1576, %1575 : vector<3x128xf32>
    %1578 = arith.addf %1572, %1577 : vector<3x128xf32>
    %c0_1435 = arith.constant 0 : index
    %c21_1436 = arith.constant 21 : index
    %c0_1437 = arith.constant 0 : index
    %c0_1438 = arith.constant 0 : index
    %1579 = vector.load %arg9[%c0_1435, %c21_1436, %c0_1437, %c0_1438] : memref<1x24x3x128xf32, #tpu.memory_space<vmem>>, vector<1x1x3x128xf32>
    %1580 = vector.shape_cast %1579 : vector<1x1x3x128xf32> to vector<3x128xf32>
    %1581 = vector.shape_cast %1578 : vector<3x128xf32> to vector<1x1x3x128xf32>
    tpu.vector_store %arg9[%c0_1435, %c21_1436, %c0_1437, %c0_1438], %1581 {strides = array<i32>} : memref<1x24x3x128xf32, #tpu.memory_space<vmem>>, vector<1x1x3x128xf32>,
    %c2_1439 = arith.constant 2 : index
    %c0_1440 = arith.constant 0 : index
    %c0_1441 = arith.constant 0 : index
    %1582 = vector.load %arg11[%c2_1439, %c0_1440, %c0_1441] : memref<4x3x128xf32, #tpu.memory_space<vmem>>, vector<1x3x128xf32>
    %1583 = vector.shape_cast %1582 : vector<1x3x128xf32> to vector<3x128xf32>
    %c8_1442 = arith.constant 8 : index
    %1584 = memref.load %arg7[%c8_1442] : memref<16xf32, #tpu.memory_space<smem>>
    %c16_1443 = arith.constant 16 : index
    %c0_1444 = arith.constant 0 : index
    %c0_1445 = arith.constant 0 : index
    %1585 = vector.load %arg10[%c16_1443, %c0_1444, %c0_1445] : memref<20x3x128xf32, #tpu.memory_space<vmem>>, vector<1x3x128xf32>
    %1586 = vector.shape_cast %1585 : vector<1x3x128xf32> to vector<3x128xf32>
    %1587 = vector.broadcast %1584 : f32 to vector<3x128xf32>
    %1588 = arith.mulf %1587, %1586 : vector<3x128xf32>
    %1589 = arith.addf %1583, %1588 : vector<3x128xf32>
    %c9_1446 = arith.constant 9 : index
    %1590 = memref.load %arg7[%c9_1446] : memref<16xf32, #tpu.memory_space<smem>>
    %c17_1447 = arith.constant 17 : index
    %c0_1448 = arith.constant 0 : index
    %c0_1449 = arith.constant 0 : index
    %1591 = vector.load %arg10[%c17_1447, %c0_1448, %c0_1449] : memref<20x3x128xf32, #tpu.memory_space<vmem>>, vector<1x3x128xf32>
    %1592 = vector.shape_cast %1591 : vector<1x3x128xf32> to vector<3x128xf32>
    %1593 = vector.broadcast %1590 : f32 to vector<3x128xf32>
    %1594 = arith.mulf %1593, %1592 : vector<3x128xf32>
    %1595 = arith.addf %1589, %1594 : vector<3x128xf32>
    %c10_1450 = arith.constant 10 : index
    %1596 = memref.load %arg7[%c10_1450] : memref<16xf32, #tpu.memory_space<smem>>
    %c18_1451 = arith.constant 18 : index
    %c0_1452 = arith.constant 0 : index
    %c0_1453 = arith.constant 0 : index
    %1597 = vector.load %arg10[%c18_1451, %c0_1452, %c0_1453] : memref<20x3x128xf32, #tpu.memory_space<vmem>>, vector<1x3x128xf32>
    %1598 = vector.shape_cast %1597 : vector<1x3x128xf32> to vector<3x128xf32>
    %1599 = vector.broadcast %1596 : f32 to vector<3x128xf32>
    %1600 = arith.mulf %1599, %1598 : vector<3x128xf32>
    %1601 = arith.addf %1595, %1600 : vector<3x128xf32>
    %c11_1454 = arith.constant 11 : index
    %1602 = memref.load %arg7[%c11_1454] : memref<16xf32, #tpu.memory_space<smem>>
    %c19_1455 = arith.constant 19 : index
    %c0_1456 = arith.constant 0 : index
    %c0_1457 = arith.constant 0 : index
    %1603 = vector.load %arg10[%c19_1455, %c0_1456, %c0_1457] : memref<20x3x128xf32, #tpu.memory_space<vmem>>, vector<1x3x128xf32>
    %1604 = vector.shape_cast %1603 : vector<1x3x128xf32> to vector<3x128xf32>
    %1605 = vector.broadcast %1602 : f32 to vector<3x128xf32>
    %1606 = arith.mulf %1605, %1604 : vector<3x128xf32>
    %1607 = arith.addf %1601, %1606 : vector<3x128xf32>
    %c0_1458 = arith.constant 0 : index
    %c22_1459 = arith.constant 22 : index
    %c0_1460 = arith.constant 0 : index
    %c0_1461 = arith.constant 0 : index
    %1608 = vector.load %arg9[%c0_1458, %c22_1459, %c0_1460, %c0_1461] : memref<1x24x3x128xf32, #tpu.memory_space<vmem>>, vector<1x1x3x128xf32>
    %1609 = vector.shape_cast %1608 : vector<1x1x3x128xf32> to vector<3x128xf32>
    %1610 = vector.shape_cast %1607 : vector<3x128xf32> to vector<1x1x3x128xf32>
    tpu.vector_store %arg9[%c0_1458, %c22_1459, %c0_1460, %c0_1461], %1610 {strides = array<i32>} : memref<1x24x3x128xf32, #tpu.memory_space<vmem>>, vector<1x1x3x128xf32>,
    %c3_1462 = arith.constant 3 : index
    %c0_1463 = arith.constant 0 : index
    %c0_1464 = arith.constant 0 : index
    %1611 = vector.load %arg11[%c3_1462, %c0_1463, %c0_1464] : memref<4x3x128xf32, #tpu.memory_space<vmem>>, vector<1x3x128xf32>
    %1612 = vector.shape_cast %1611 : vector<1x3x128xf32> to vector<3x128xf32>
    %c12_1465 = arith.constant 12 : index
    %1613 = memref.load %arg7[%c12_1465] : memref<16xf32, #tpu.memory_space<smem>>
    %c16_1466 = arith.constant 16 : index
    %c0_1467 = arith.constant 0 : index
    %c0_1468 = arith.constant 0 : index
    %1614 = vector.load %arg10[%c16_1466, %c0_1467, %c0_1468] : memref<20x3x128xf32, #tpu.memory_space<vmem>>, vector<1x3x128xf32>
    %1615 = vector.shape_cast %1614 : vector<1x3x128xf32> to vector<3x128xf32>
    %1616 = vector.broadcast %1613 : f32 to vector<3x128xf32>
    %1617 = arith.mulf %1616, %1615 : vector<3x128xf32>
    %1618 = arith.addf %1612, %1617 : vector<3x128xf32>
    %c13_1469 = arith.constant 13 : index
    %1619 = memref.load %arg7[%c13_1469] : memref<16xf32, #tpu.memory_space<smem>>
    %c17_1470 = arith.constant 17 : index
    %c0_1471 = arith.constant 0 : index
    %c0_1472 = arith.constant 0 : index
    %1620 = vector.load %arg10[%c17_1470, %c0_1471, %c0_1472] : memref<20x3x128xf32, #tpu.memory_space<vmem>>, vector<1x3x128xf32>
    %1621 = vector.shape_cast %1620 : vector<1x3x128xf32> to vector<3x128xf32>
    %1622 = vector.broadcast %1619 : f32 to vector<3x128xf32>
    %1623 = arith.mulf %1622, %1621 : vector<3x128xf32>
    %1624 = arith.addf %1618, %1623 : vector<3x128xf32>
    %c14_1473 = arith.constant 14 : index
    %1625 = memref.load %arg7[%c14_1473] : memref<16xf32, #tpu.memory_space<smem>>
    %c18_1474 = arith.constant 18 : index
    %c0_1475 = arith.constant 0 : index
    %c0_1476 = arith.constant 0 : index
    %1626 = vector.load %arg10[%c18_1474, %c0_1475, %c0_1476] : memref<20x3x128xf32, #tpu.memory_space<vmem>>, vector<1x3x128xf32>
    %1627 = vector.shape_cast %1626 : vector<1x3x128xf32> to vector<3x128xf32>
    %1628 = vector.broadcast %1625 : f32 to vector<3x128xf32>
    %1629 = arith.mulf %1628, %1627 : vector<3x128xf32>
    %1630 = arith.addf %1624, %1629 : vector<3x128xf32>
    %c15_1477 = arith.constant 15 : index
    %1631 = memref.load %arg7[%c15_1477] : memref<16xf32, #tpu.memory_space<smem>>
    %c19_1478 = arith.constant 19 : index
    %c0_1479 = arith.constant 0 : index
    %c0_1480 = arith.constant 0 : index
    %1632 = vector.load %arg10[%c19_1478, %c0_1479, %c0_1480] : memref<20x3x128xf32, #tpu.memory_space<vmem>>, vector<1x3x128xf32>
    %1633 = vector.shape_cast %1632 : vector<1x3x128xf32> to vector<3x128xf32>
    %1634 = vector.broadcast %1631 : f32 to vector<3x128xf32>
    %1635 = arith.mulf %1634, %1633 : vector<3x128xf32>
    %1636 = arith.addf %1630, %1635 : vector<3x128xf32>
    %c0_1481 = arith.constant 0 : index
    %c23_1482 = arith.constant 23 : index
    %c0_1483 = arith.constant 0 : index
    %c0_1484 = arith.constant 0 : index
    %1637 = vector.load %arg9[%c0_1481, %c23_1482, %c0_1483, %c0_1484] : memref<1x24x3x128xf32, #tpu.memory_space<vmem>>, vector<1x1x3x128xf32>
    %1638 = vector.shape_cast %1637 : vector<1x1x3x128xf32> to vector<3x128xf32>
    %1639 = vector.shape_cast %1636 : vector<3x128xf32> to vector<1x1x3x128xf32>
    tpu.vector_store %arg9[%c0_1481, %c23_1482, %c0_1483, %c0_1484], %1639 {strides = array<i32>} : memref<1x24x3x128xf32, #tpu.memory_space<vmem>>, vector<1x1x3x128xf32>,
    %c4_1485 = arith.constant 4 : index
    %c0_1486 = arith.constant 0 : index
    %c0_1487 = arith.constant 0 : index
    %1640 = vector.load %arg10[%c4_1485, %c0_1486, %c0_1487] : memref<20x3x128xf32, #tpu.memory_space<vmem>>, vector<1x3x128xf32>
    %1641 = vector.shape_cast %1640 : vector<1x3x128xf32> to vector<3x128xf32>
    %c8_1488 = arith.constant 8 : index
    %c0_1489 = arith.constant 0 : index
    %c0_1490 = arith.constant 0 : index
    %1642 = vector.load %arg10[%c8_1488, %c0_1489, %c0_1490] : memref<20x3x128xf32, #tpu.memory_space<vmem>>, vector<1x3x128xf32>
    %1643 = vector.shape_cast %1642 : vector<1x3x128xf32> to vector<3x128xf32>
    %1644 = arith.addf %1641, %1643 : vector<3x128xf32>
    %c4_1491 = arith.constant 4 : index
    %c0_1492 = arith.constant 0 : index
    %c0_1493 = arith.constant 0 : index
    %1645 = vector.load %arg10[%c4_1491, %c0_1492, %c0_1493] : memref<20x3x128xf32, #tpu.memory_space<vmem>>, vector<1x3x128xf32>
    %1646 = vector.shape_cast %1645 : vector<1x3x128xf32> to vector<3x128xf32>
    %1647 = vector.shape_cast %1644 : vector<3x128xf32> to vector<1x3x128xf32>
    tpu.vector_store %arg10[%c4_1491, %c0_1492, %c0_1493], %1647 {strides = array<i32>} : memref<20x3x128xf32, #tpu.memory_space<vmem>>, vector<1x3x128xf32>,
    %c12_1494 = arith.constant 12 : index
    %c0_1495 = arith.constant 0 : index
    %c0_1496 = arith.constant 0 : index
    %1648 = vector.load %arg10[%c12_1494, %c0_1495, %c0_1496] : memref<20x3x128xf32, #tpu.memory_space<vmem>>, vector<1x3x128xf32>
    %1649 = vector.shape_cast %1648 : vector<1x3x128xf32> to vector<3x128xf32>
    %c16_1497 = arith.constant 16 : index
    %c0_1498 = arith.constant 0 : index
    %c0_1499 = arith.constant 0 : index
    %1650 = vector.load %arg10[%c16_1497, %c0_1498, %c0_1499] : memref<20x3x128xf32, #tpu.memory_space<vmem>>, vector<1x3x128xf32>
    %1651 = vector.shape_cast %1650 : vector<1x3x128xf32> to vector<3x128xf32>
    %1652 = arith.addf %1649, %1651 : vector<3x128xf32>
    %c12_1500 = arith.constant 12 : index
    %c0_1501 = arith.constant 0 : index
    %c0_1502 = arith.constant 0 : index
    %1653 = vector.load %arg10[%c12_1500, %c0_1501, %c0_1502] : memref<20x3x128xf32, #tpu.memory_space<vmem>>, vector<1x3x128xf32>
    %1654 = vector.shape_cast %1653 : vector<1x3x128xf32> to vector<3x128xf32>
    %1655 = vector.shape_cast %1652 : vector<3x128xf32> to vector<1x3x128xf32>
    tpu.vector_store %arg10[%c12_1500, %c0_1501, %c0_1502], %1655 {strides = array<i32>} : memref<20x3x128xf32, #tpu.memory_space<vmem>>, vector<1x3x128xf32>,
    %c5_1503 = arith.constant 5 : index
    %c0_1504 = arith.constant 0 : index
    %c0_1505 = arith.constant 0 : index
    %1656 = vector.load %arg10[%c5_1503, %c0_1504, %c0_1505] : memref<20x3x128xf32, #tpu.memory_space<vmem>>, vector<1x3x128xf32>
    %1657 = vector.shape_cast %1656 : vector<1x3x128xf32> to vector<3x128xf32>
    %c9_1506 = arith.constant 9 : index
    %c0_1507 = arith.constant 0 : index
    %c0_1508 = arith.constant 0 : index
    %1658 = vector.load %arg10[%c9_1506, %c0_1507, %c0_1508] : memref<20x3x128xf32, #tpu.memory_space<vmem>>, vector<1x3x128xf32>
    %1659 = vector.shape_cast %1658 : vector<1x3x128xf32> to vector<3x128xf32>
    %1660 = arith.addf %1657, %1659 : vector<3x128xf32>
    %c5_1509 = arith.constant 5 : index
    %c0_1510 = arith.constant 0 : index
    %c0_1511 = arith.constant 0 : index
    %1661 = vector.load %arg10[%c5_1509, %c0_1510, %c0_1511] : memref<20x3x128xf32, #tpu.memory_space<vmem>>, vector<1x3x128xf32>
    %1662 = vector.shape_cast %1661 : vector<1x3x128xf32> to vector<3x128xf32>
    %1663 = vector.shape_cast %1660 : vector<3x128xf32> to vector<1x3x128xf32>
    tpu.vector_store %arg10[%c5_1509, %c0_1510, %c0_1511], %1663 {strides = array<i32>} : memref<20x3x128xf32, #tpu.memory_space<vmem>>, vector<1x3x128xf32>,
    %c13_1512 = arith.constant 13 : index
    %c0_1513 = arith.constant 0 : index
    %c0_1514 = arith.constant 0 : index
    %1664 = vector.load %arg10[%c13_1512, %c0_1513, %c0_1514] : memref<20x3x128xf32, #tpu.memory_space<vmem>>, vector<1x3x128xf32>
    %1665 = vector.shape_cast %1664 : vector<1x3x128xf32> to vector<3x128xf32>
    %c17_1515 = arith.constant 17 : index
    %c0_1516 = arith.constant 0 : index
    %c0_1517 = arith.constant 0 : index
    %1666 = vector.load %arg10[%c17_1515, %c0_1516, %c0_1517] : memref<20x3x128xf32, #tpu.memory_space<vmem>>, vector<1x3x128xf32>
    %1667 = vector.shape_cast %1666 : vector<1x3x128xf32> to vector<3x128xf32>
    %1668 = arith.addf %1665, %1667 : vector<3x128xf32>
    %c13_1518 = arith.constant 13 : index
    %c0_1519 = arith.constant 0 : index
    %c0_1520 = arith.constant 0 : index
    %1669 = vector.load %arg10[%c13_1518, %c0_1519, %c0_1520] : memref<20x3x128xf32, #tpu.memory_space<vmem>>, vector<1x3x128xf32>
    %1670 = vector.shape_cast %1669 : vector<1x3x128xf32> to vector<3x128xf32>
    %1671 = vector.shape_cast %1668 : vector<3x128xf32> to vector<1x3x128xf32>
    tpu.vector_store %arg10[%c13_1518, %c0_1519, %c0_1520], %1671 {strides = array<i32>} : memref<20x3x128xf32, #tpu.memory_space<vmem>>, vector<1x3x128xf32>,
    %c6_1521 = arith.constant 6 : index
    %c0_1522 = arith.constant 0 : index
    %c0_1523 = arith.constant 0 : index
    %1672 = vector.load %arg10[%c6_1521, %c0_1522, %c0_1523] : memref<20x3x128xf32, #tpu.memory_space<vmem>>, vector<1x3x128xf32>
    %1673 = vector.shape_cast %1672 : vector<1x3x128xf32> to vector<3x128xf32>
    %c10_1524 = arith.constant 10 : index
    %c0_1525 = arith.constant 0 : index
    %c0_1526 = arith.constant 0 : index
    %1674 = vector.load %arg10[%c10_1524, %c0_1525, %c0_1526] : memref<20x3x128xf32, #tpu.memory_space<vmem>>, vector<1x3x128xf32>
    %1675 = vector.shape_cast %1674 : vector<1x3x128xf32> to vector<3x128xf32>
    %1676 = arith.addf %1673, %1675 : vector<3x128xf32>
    %c6_1527 = arith.constant 6 : index
    %c0_1528 = arith.constant 0 : index
    %c0_1529 = arith.constant 0 : index
    %1677 = vector.load %arg10[%c6_1527, %c0_1528, %c0_1529] : memref<20x3x128xf32, #tpu.memory_space<vmem>>, vector<1x3x128xf32>
    %1678 = vector.shape_cast %1677 : vector<1x3x128xf32> to vector<3x128xf32>
    %1679 = vector.shape_cast %1676 : vector<3x128xf32> to vector<1x3x128xf32>
    tpu.vector_store %arg10[%c6_1527, %c0_1528, %c0_1529], %1679 {strides = array<i32>} : memref<20x3x128xf32, #tpu.memory_space<vmem>>, vector<1x3x128xf32>,
    %c14_1530 = arith.constant 14 : index
    %c0_1531 = arith.constant 0 : index
    %c0_1532 = arith.constant 0 : index
    %1680 = vector.load %arg10[%c14_1530, %c0_1531, %c0_1532] : memref<20x3x128xf32, #tpu.memory_space<vmem>>, vector<1x3x128xf32>
    %1681 = vector.shape_cast %1680 : vector<1x3x128xf32> to vector<3x128xf32>
    %c18_1533 = arith.constant 18 : index
    %c0_1534 = arith.constant 0 : index
    %c0_1535 = arith.constant 0 : index
    %1682 = vector.load %arg10[%c18_1533, %c0_1534, %c0_1535] : memref<20x3x128xf32, #tpu.memory_space<vmem>>, vector<1x3x128xf32>
    %1683 = vector.shape_cast %1682 : vector<1x3x128xf32> to vector<3x128xf32>
    %1684 = arith.addf %1681, %1683 : vector<3x128xf32>
    %c14_1536 = arith.constant 14 : index
    %c0_1537 = arith.constant 0 : index
    %c0_1538 = arith.constant 0 : index
    %1685 = vector.load %arg10[%c14_1536, %c0_1537, %c0_1538] : memref<20x3x128xf32, #tpu.memory_space<vmem>>, vector<1x3x128xf32>
    %1686 = vector.shape_cast %1685 : vector<1x3x128xf32> to vector<3x128xf32>
    %1687 = vector.shape_cast %1684 : vector<3x128xf32> to vector<1x3x128xf32>
    tpu.vector_store %arg10[%c14_1536, %c0_1537, %c0_1538], %1687 {strides = array<i32>} : memref<20x3x128xf32, #tpu.memory_space<vmem>>, vector<1x3x128xf32>,
    %c7_1539 = arith.constant 7 : index
    %c0_1540 = arith.constant 0 : index
    %c0_1541 = arith.constant 0 : index
    %1688 = vector.load %arg10[%c7_1539, %c0_1540, %c0_1541] : memref<20x3x128xf32, #tpu.memory_space<vmem>>, vector<1x3x128xf32>
    %1689 = vector.shape_cast %1688 : vector<1x3x128xf32> to vector<3x128xf32>
    %c11_1542 = arith.constant 11 : index
    %c0_1543 = arith.constant 0 : index
    %c0_1544 = arith.constant 0 : index
    %1690 = vector.load %arg10[%c11_1542, %c0_1543, %c0_1544] : memref<20x3x128xf32, #tpu.memory_space<vmem>>, vector<1x3x128xf32>
    %1691 = vector.shape_cast %1690 : vector<1x3x128xf32> to vector<3x128xf32>
    %1692 = arith.addf %1689, %1691 : vector<3x128xf32>
    %c7_1545 = arith.constant 7 : index
    %c0_1546 = arith.constant 0 : index
    %c0_1547 = arith.constant 0 : index
    %1693 = vector.load %arg10[%c7_1545, %c0_1546, %c0_1547] : memref<20x3x128xf32, #tpu.memory_space<vmem>>, vector<1x3x128xf32>
    %1694 = vector.shape_cast %1693 : vector<1x3x128xf32> to vector<3x128xf32>
    %1695 = vector.shape_cast %1692 : vector<3x128xf32> to vector<1x3x128xf32>
    tpu.vector_store %arg10[%c7_1545, %c0_1546, %c0_1547], %1695 {strides = array<i32>} : memref<20x3x128xf32, #tpu.memory_space<vmem>>, vector<1x3x128xf32>,
    %c15_1548 = arith.constant 15 : index
    %c0_1549 = arith.constant 0 : index
    %c0_1550 = arith.constant 0 : index
    %1696 = vector.load %arg10[%c15_1548, %c0_1549, %c0_1550] : memref<20x3x128xf32, #tpu.memory_space<vmem>>, vector<1x3x128xf32>
    %1697 = vector.shape_cast %1696 : vector<1x3x128xf32> to vector<3x128xf32>
    %c19_1551 = arith.constant 19 : index
    %c0_1552 = arith.constant 0 : index
    %c0_1553 = arith.constant 0 : index
    %1698 = vector.load %arg10[%c19_1551, %c0_1552, %c0_1553] : memref<20x3x128xf32, #tpu.memory_space<vmem>>, vector<1x3x128xf32>
    %1699 = vector.shape_cast %1698 : vector<1x3x128xf32> to vector<3x128xf32>
    %1700 = arith.addf %1697, %1699 : vector<3x128xf32>
    %c15_1554 = arith.constant 15 : index
    %c0_1555 = arith.constant 0 : index
    %c0_1556 = arith.constant 0 : index
    %1701 = vector.load %arg10[%c15_1554, %c0_1555, %c0_1556] : memref<20x3x128xf32, #tpu.memory_space<vmem>>, vector<1x3x128xf32>
    %1702 = vector.shape_cast %1701 : vector<1x3x128xf32> to vector<3x128xf32>
    %1703 = vector.shape_cast %1700 : vector<3x128xf32> to vector<1x3x128xf32>
    tpu.vector_store %arg10[%c15_1554, %c0_1555, %c0_1556], %1703 {strides = array<i32>} : memref<20x3x128xf32, #tpu.memory_space<vmem>>, vector<1x3x128xf32>,
    %c0_1557 = arith.constant 0 : index
    %1704 = memref.load %arg3[%c0_1557] : memref<32xf32, #tpu.memory_space<smem>>
    %c0_1558 = arith.constant 0 : index
    %c0_1559 = arith.constant 0 : index
    %c0_1560 = arith.constant 0 : index
    %1705 = vector.load %arg10[%c0_1558, %c0_1559, %c0_1560] : memref<20x3x128xf32, #tpu.memory_space<vmem>>, vector<1x3x128xf32>
    %1706 = vector.shape_cast %1705 : vector<1x3x128xf32> to vector<3x128xf32>
    %1707 = vector.broadcast %1704 : f32 to vector<3x128xf32>
    %1708 = arith.mulf %1707, %1706 : vector<3x128xf32>
    %c1_1561 = arith.constant 1 : index
    %1709 = memref.load %arg3[%c1_1561] : memref<32xf32, #tpu.memory_space<smem>>
    %c1_1562 = arith.constant 1 : index
    %c0_1563 = arith.constant 0 : index
    %c0_1564 = arith.constant 0 : index
    %1710 = vector.load %arg10[%c1_1562, %c0_1563, %c0_1564] : memref<20x3x128xf32, #tpu.memory_space<vmem>>, vector<1x3x128xf32>
    %1711 = vector.shape_cast %1710 : vector<1x3x128xf32> to vector<3x128xf32>
    %1712 = vector.broadcast %1709 : f32 to vector<3x128xf32>
    %1713 = arith.mulf %1712, %1711 : vector<3x128xf32>
    %1714 = arith.addf %1708, %1713 : vector<3x128xf32>
    %c2_1565 = arith.constant 2 : index
    %1715 = memref.load %arg3[%c2_1565] : memref<32xf32, #tpu.memory_space<smem>>
    %c2_1566 = arith.constant 2 : index
    %c0_1567 = arith.constant 0 : index
    %c0_1568 = arith.constant 0 : index
    %1716 = vector.load %arg10[%c2_1566, %c0_1567, %c0_1568] : memref<20x3x128xf32, #tpu.memory_space<vmem>>, vector<1x3x128xf32>
    %1717 = vector.shape_cast %1716 : vector<1x3x128xf32> to vector<3x128xf32>
    %1718 = vector.broadcast %1715 : f32 to vector<3x128xf32>
    %1719 = arith.mulf %1718, %1717 : vector<3x128xf32>
    %1720 = arith.addf %1714, %1719 : vector<3x128xf32>
    %c3_1569 = arith.constant 3 : index
    %1721 = memref.load %arg3[%c3_1569] : memref<32xf32, #tpu.memory_space<smem>>
    %c3_1570 = arith.constant 3 : index
    %c0_1571 = arith.constant 0 : index
    %c0_1572 = arith.constant 0 : index
    %1722 = vector.load %arg10[%c3_1570, %c0_1571, %c0_1572] : memref<20x3x128xf32, #tpu.memory_space<vmem>>, vector<1x3x128xf32>
    %1723 = vector.shape_cast %1722 : vector<1x3x128xf32> to vector<3x128xf32>
    %1724 = vector.broadcast %1721 : f32 to vector<3x128xf32>
    %1725 = arith.mulf %1724, %1723 : vector<3x128xf32>
    %1726 = arith.addf %1720, %1725 : vector<3x128xf32>
    %c0_1573 = arith.constant 0 : index
    %1727 = memref.load %arg4[%c0_1573] : memref<32xf32, #tpu.memory_space<smem>>
    %c4_1574 = arith.constant 4 : index
    %c0_1575 = arith.constant 0 : index
    %c0_1576 = arith.constant 0 : index
    %1728 = vector.load %arg10[%c4_1574, %c0_1575, %c0_1576] : memref<20x3x128xf32, #tpu.memory_space<vmem>>, vector<1x3x128xf32>
    %1729 = vector.shape_cast %1728 : vector<1x3x128xf32> to vector<3x128xf32>
    %1730 = vector.broadcast %1727 : f32 to vector<3x128xf32>
    %1731 = arith.mulf %1730, %1729 : vector<3x128xf32>
    %1732 = arith.addf %1726, %1731 : vector<3x128xf32>
    %c0_1577 = arith.constant 0 : index
    %1733 = memref.load %arg5[%c0_1577] : memref<32xf32, #tpu.memory_space<smem>>
    %c12_1578 = arith.constant 12 : index
    %c0_1579 = arith.constant 0 : index
    %c0_1580 = arith.constant 0 : index
    %1734 = vector.load %arg10[%c12_1578, %c0_1579, %c0_1580] : memref<20x3x128xf32, #tpu.memory_space<vmem>>, vector<1x3x128xf32>
    %1735 = vector.shape_cast %1734 : vector<1x3x128xf32> to vector<3x128xf32>
    %1736 = vector.broadcast %1733 : f32 to vector<3x128xf32>
    %1737 = arith.mulf %1736, %1735 : vector<3x128xf32>
    %1738 = arith.addf %1732, %1737 : vector<3x128xf32>
    %c1_1581 = arith.constant 1 : index
    %1739 = memref.load %arg4[%c1_1581] : memref<32xf32, #tpu.memory_space<smem>>
    %c5_1582 = arith.constant 5 : index
    %c0_1583 = arith.constant 0 : index
    %c0_1584 = arith.constant 0 : index
    %1740 = vector.load %arg10[%c5_1582, %c0_1583, %c0_1584] : memref<20x3x128xf32, #tpu.memory_space<vmem>>, vector<1x3x128xf32>
    %1741 = vector.shape_cast %1740 : vector<1x3x128xf32> to vector<3x128xf32>
    %1742 = vector.broadcast %1739 : f32 to vector<3x128xf32>
    %1743 = arith.mulf %1742, %1741 : vector<3x128xf32>
    %1744 = arith.addf %1738, %1743 : vector<3x128xf32>
    %c1_1585 = arith.constant 1 : index
    %1745 = memref.load %arg5[%c1_1585] : memref<32xf32, #tpu.memory_space<smem>>
    %c13_1586 = arith.constant 13 : index
    %c0_1587 = arith.constant 0 : index
    %c0_1588 = arith.constant 0 : index
    %1746 = vector.load %arg10[%c13_1586, %c0_1587, %c0_1588] : memref<20x3x128xf32, #tpu.memory_space<vmem>>, vector<1x3x128xf32>
    %1747 = vector.shape_cast %1746 : vector<1x3x128xf32> to vector<3x128xf32>
    %1748 = vector.broadcast %1745 : f32 to vector<3x128xf32>
    %1749 = arith.mulf %1748, %1747 : vector<3x128xf32>
    %1750 = arith.addf %1744, %1749 : vector<3x128xf32>
    %c2_1589 = arith.constant 2 : index
    %1751 = memref.load %arg4[%c2_1589] : memref<32xf32, #tpu.memory_space<smem>>
    %c6_1590 = arith.constant 6 : index
    %c0_1591 = arith.constant 0 : index
    %c0_1592 = arith.constant 0 : index
    %1752 = vector.load %arg10[%c6_1590, %c0_1591, %c0_1592] : memref<20x3x128xf32, #tpu.memory_space<vmem>>, vector<1x3x128xf32>
    %1753 = vector.shape_cast %1752 : vector<1x3x128xf32> to vector<3x128xf32>
    %1754 = vector.broadcast %1751 : f32 to vector<3x128xf32>
    %1755 = arith.mulf %1754, %1753 : vector<3x128xf32>
    %1756 = arith.addf %1750, %1755 : vector<3x128xf32>
    %c2_1593 = arith.constant 2 : index
    %1757 = memref.load %arg5[%c2_1593] : memref<32xf32, #tpu.memory_space<smem>>
    %c14_1594 = arith.constant 14 : index
    %c0_1595 = arith.constant 0 : index
    %c0_1596 = arith.constant 0 : index
    %1758 = vector.load %arg10[%c14_1594, %c0_1595, %c0_1596] : memref<20x3x128xf32, #tpu.memory_space<vmem>>, vector<1x3x128xf32>
    %1759 = vector.shape_cast %1758 : vector<1x3x128xf32> to vector<3x128xf32>
    %1760 = vector.broadcast %1757 : f32 to vector<3x128xf32>
    %1761 = arith.mulf %1760, %1759 : vector<3x128xf32>
    %1762 = arith.addf %1756, %1761 : vector<3x128xf32>
    %c3_1597 = arith.constant 3 : index
    %1763 = memref.load %arg4[%c3_1597] : memref<32xf32, #tpu.memory_space<smem>>
    %c7_1598 = arith.constant 7 : index
    %c0_1599 = arith.constant 0 : index
    %c0_1600 = arith.constant 0 : index
    %1764 = vector.load %arg10[%c7_1598, %c0_1599, %c0_1600] : memref<20x3x128xf32, #tpu.memory_space<vmem>>, vector<1x3x128xf32>
    %1765 = vector.shape_cast %1764 : vector<1x3x128xf32> to vector<3x128xf32>
    %1766 = vector.broadcast %1763 : f32 to vector<3x128xf32>
    %1767 = arith.mulf %1766, %1765 : vector<3x128xf32>
    %1768 = arith.addf %1762, %1767 : vector<3x128xf32>
    %c3_1601 = arith.constant 3 : index
    %1769 = memref.load %arg5[%c3_1601] : memref<32xf32, #tpu.memory_space<smem>>
    %c15_1602 = arith.constant 15 : index
    %c0_1603 = arith.constant 0 : index
    %c0_1604 = arith.constant 0 : index
    %1770 = vector.load %arg10[%c15_1602, %c0_1603, %c0_1604] : memref<20x3x128xf32, #tpu.memory_space<vmem>>, vector<1x3x128xf32>
    %1771 = vector.shape_cast %1770 : vector<1x3x128xf32> to vector<3x128xf32>
    %1772 = vector.broadcast %1769 : f32 to vector<3x128xf32>
    %1773 = arith.mulf %1772, %1771 : vector<3x128xf32>
    %1774 = arith.addf %1768, %1773 : vector<3x128xf32>
    %c0_1605 = arith.constant 0 : index
    %c0_1606 = arith.constant 0 : index
    %c0_1607 = arith.constant 0 : index
    %c0_1608 = arith.constant 0 : index
    %1775 = vector.load %arg9[%c0_1605, %c0_1606, %c0_1607, %c0_1608] : memref<1x24x3x128xf32, #tpu.memory_space<vmem>>, vector<1x1x3x128xf32>
    %1776 = vector.shape_cast %1775 : vector<1x1x3x128xf32> to vector<3x128xf32>
    %1777 = vector.shape_cast %1774 : vector<3x128xf32> to vector<1x1x3x128xf32>
    tpu.vector_store %arg9[%c0_1605, %c0_1606, %c0_1607, %c0_1608], %1777 {strides = array<i32>} : memref<1x24x3x128xf32, #tpu.memory_space<vmem>>, vector<1x1x3x128xf32>,
    %c4_1609 = arith.constant 4 : index
    %1778 = memref.load %arg3[%c4_1609] : memref<32xf32, #tpu.memory_space<smem>>
    %c0_1610 = arith.constant 0 : index
    %c0_1611 = arith.constant 0 : index
    %c0_1612 = arith.constant 0 : index
    %1779 = vector.load %arg10[%c0_1610, %c0_1611, %c0_1612] : memref<20x3x128xf32, #tpu.memory_space<vmem>>, vector<1x3x128xf32>
    %1780 = vector.shape_cast %1779 : vector<1x3x128xf32> to vector<3x128xf32>
    %1781 = vector.broadcast %1778 : f32 to vector<3x128xf32>
    %1782 = arith.mulf %1781, %1780 : vector<3x128xf32>
    %c5_1613 = arith.constant 5 : index
    %1783 = memref.load %arg3[%c5_1613] : memref<32xf32, #tpu.memory_space<smem>>
    %c1_1614 = arith.constant 1 : index
    %c0_1615 = arith.constant 0 : index
    %c0_1616 = arith.constant 0 : index
    %1784 = vector.load %arg10[%c1_1614, %c0_1615, %c0_1616] : memref<20x3x128xf32, #tpu.memory_space<vmem>>, vector<1x3x128xf32>
    %1785 = vector.shape_cast %1784 : vector<1x3x128xf32> to vector<3x128xf32>
    %1786 = vector.broadcast %1783 : f32 to vector<3x128xf32>
    %1787 = arith.mulf %1786, %1785 : vector<3x128xf32>
    %1788 = arith.addf %1782, %1787 : vector<3x128xf32>
    %c6_1617 = arith.constant 6 : index
    %1789 = memref.load %arg3[%c6_1617] : memref<32xf32, #tpu.memory_space<smem>>
    %c2_1618 = arith.constant 2 : index
    %c0_1619 = arith.constant 0 : index
    %c0_1620 = arith.constant 0 : index
    %1790 = vector.load %arg10[%c2_1618, %c0_1619, %c0_1620] : memref<20x3x128xf32, #tpu.memory_space<vmem>>, vector<1x3x128xf32>
    %1791 = vector.shape_cast %1790 : vector<1x3x128xf32> to vector<3x128xf32>
    %1792 = vector.broadcast %1789 : f32 to vector<3x128xf32>
    %1793 = arith.mulf %1792, %1791 : vector<3x128xf32>
    %1794 = arith.addf %1788, %1793 : vector<3x128xf32>
    %c7_1621 = arith.constant 7 : index
    %1795 = memref.load %arg3[%c7_1621] : memref<32xf32, #tpu.memory_space<smem>>
    %c3_1622 = arith.constant 3 : index
    %c0_1623 = arith.constant 0 : index
    %c0_1624 = arith.constant 0 : index
    %1796 = vector.load %arg10[%c3_1622, %c0_1623, %c0_1624] : memref<20x3x128xf32, #tpu.memory_space<vmem>>, vector<1x3x128xf32>
    %1797 = vector.shape_cast %1796 : vector<1x3x128xf32> to vector<3x128xf32>
    %1798 = vector.broadcast %1795 : f32 to vector<3x128xf32>
    %1799 = arith.mulf %1798, %1797 : vector<3x128xf32>
    %1800 = arith.addf %1794, %1799 : vector<3x128xf32>
    %c4_1625 = arith.constant 4 : index
    %1801 = memref.load %arg4[%c4_1625] : memref<32xf32, #tpu.memory_space<smem>>
    %c4_1626 = arith.constant 4 : index
    %c0_1627 = arith.constant 0 : index
    %c0_1628 = arith.constant 0 : index
    %1802 = vector.load %arg10[%c4_1626, %c0_1627, %c0_1628] : memref<20x3x128xf32, #tpu.memory_space<vmem>>, vector<1x3x128xf32>
    %1803 = vector.shape_cast %1802 : vector<1x3x128xf32> to vector<3x128xf32>
    %1804 = vector.broadcast %1801 : f32 to vector<3x128xf32>
    %1805 = arith.mulf %1804, %1803 : vector<3x128xf32>
    %1806 = arith.addf %1800, %1805 : vector<3x128xf32>
    %c4_1629 = arith.constant 4 : index
    %1807 = memref.load %arg5[%c4_1629] : memref<32xf32, #tpu.memory_space<smem>>
    %c12_1630 = arith.constant 12 : index
    %c0_1631 = arith.constant 0 : index
    %c0_1632 = arith.constant 0 : index
    %1808 = vector.load %arg10[%c12_1630, %c0_1631, %c0_1632] : memref<20x3x128xf32, #tpu.memory_space<vmem>>, vector<1x3x128xf32>
    %1809 = vector.shape_cast %1808 : vector<1x3x128xf32> to vector<3x128xf32>
    %1810 = vector.broadcast %1807 : f32 to vector<3x128xf32>
    %1811 = arith.mulf %1810, %1809 : vector<3x128xf32>
    %1812 = arith.addf %1806, %1811 : vector<3x128xf32>
    %c5_1633 = arith.constant 5 : index
    %1813 = memref.load %arg4[%c5_1633] : memref<32xf32, #tpu.memory_space<smem>>
    %c5_1634 = arith.constant 5 : index
    %c0_1635 = arith.constant 0 : index
    %c0_1636 = arith.constant 0 : index
    %1814 = vector.load %arg10[%c5_1634, %c0_1635, %c0_1636] : memref<20x3x128xf32, #tpu.memory_space<vmem>>, vector<1x3x128xf32>
    %1815 = vector.shape_cast %1814 : vector<1x3x128xf32> to vector<3x128xf32>
    %1816 = vector.broadcast %1813 : f32 to vector<3x128xf32>
    %1817 = arith.mulf %1816, %1815 : vector<3x128xf32>
    %1818 = arith.addf %1812, %1817 : vector<3x128xf32>
    %c5_1637 = arith.constant 5 : index
    %1819 = memref.load %arg5[%c5_1637] : memref<32xf32, #tpu.memory_space<smem>>
    %c13_1638 = arith.constant 13 : index
    %c0_1639 = arith.constant 0 : index
    %c0_1640 = arith.constant 0 : index
    %1820 = vector.load %arg10[%c13_1638, %c0_1639, %c0_1640] : memref<20x3x128xf32, #tpu.memory_space<vmem>>, vector<1x3x128xf32>
    %1821 = vector.shape_cast %1820 : vector<1x3x128xf32> to vector<3x128xf32>
    %1822 = vector.broadcast %1819 : f32 to vector<3x128xf32>
    %1823 = arith.mulf %1822, %1821 : vector<3x128xf32>
    %1824 = arith.addf %1818, %1823 : vector<3x128xf32>
    %c6_1641 = arith.constant 6 : index
    %1825 = memref.load %arg4[%c6_1641] : memref<32xf32, #tpu.memory_space<smem>>
    %c6_1642 = arith.constant 6 : index
    %c0_1643 = arith.constant 0 : index
    %c0_1644 = arith.constant 0 : index
    %1826 = vector.load %arg10[%c6_1642, %c0_1643, %c0_1644] : memref<20x3x128xf32, #tpu.memory_space<vmem>>, vector<1x3x128xf32>
    %1827 = vector.shape_cast %1826 : vector<1x3x128xf32> to vector<3x128xf32>
    %1828 = vector.broadcast %1825 : f32 to vector<3x128xf32>
    %1829 = arith.mulf %1828, %1827 : vector<3x128xf32>
    %1830 = arith.addf %1824, %1829 : vector<3x128xf32>
    %c6_1645 = arith.constant 6 : index
    %1831 = memref.load %arg5[%c6_1645] : memref<32xf32, #tpu.memory_space<smem>>
    %c14_1646 = arith.constant 14 : index
    %c0_1647 = arith.constant 0 : index
    %c0_1648 = arith.constant 0 : index
    %1832 = vector.load %arg10[%c14_1646, %c0_1647, %c0_1648] : memref<20x3x128xf32, #tpu.memory_space<vmem>>, vector<1x3x128xf32>
    %1833 = vector.shape_cast %1832 : vector<1x3x128xf32> to vector<3x128xf32>
    %1834 = vector.broadcast %1831 : f32 to vector<3x128xf32>
    %1835 = arith.mulf %1834, %1833 : vector<3x128xf32>
    %1836 = arith.addf %1830, %1835 : vector<3x128xf32>
    %c7_1649 = arith.constant 7 : index
    %1837 = memref.load %arg4[%c7_1649] : memref<32xf32, #tpu.memory_space<smem>>
    %c7_1650 = arith.constant 7 : index
    %c0_1651 = arith.constant 0 : index
    %c0_1652 = arith.constant 0 : index
    %1838 = vector.load %arg10[%c7_1650, %c0_1651, %c0_1652] : memref<20x3x128xf32, #tpu.memory_space<vmem>>, vector<1x3x128xf32>
    %1839 = vector.shape_cast %1838 : vector<1x3x128xf32> to vector<3x128xf32>
    %1840 = vector.broadcast %1837 : f32 to vector<3x128xf32>
    %1841 = arith.mulf %1840, %1839 : vector<3x128xf32>
    %1842 = arith.addf %1836, %1841 : vector<3x128xf32>
    %c7_1653 = arith.constant 7 : index
    %1843 = memref.load %arg5[%c7_1653] : memref<32xf32, #tpu.memory_space<smem>>
    %c15_1654 = arith.constant 15 : index
    %c0_1655 = arith.constant 0 : index
    %c0_1656 = arith.constant 0 : index
    %1844 = vector.load %arg10[%c15_1654, %c0_1655, %c0_1656] : memref<20x3x128xf32, #tpu.memory_space<vmem>>, vector<1x3x128xf32>
    %1845 = vector.shape_cast %1844 : vector<1x3x128xf32> to vector<3x128xf32>
    %1846 = vector.broadcast %1843 : f32 to vector<3x128xf32>
    %1847 = arith.mulf %1846, %1845 : vector<3x128xf32>
    %1848 = arith.addf %1842, %1847 : vector<3x128xf32>
    %c0_1657 = arith.constant 0 : index
    %c1_1658 = arith.constant 1 : index
    %c0_1659 = arith.constant 0 : index
    %c0_1660 = arith.constant 0 : index
    %1849 = vector.load %arg9[%c0_1657, %c1_1658, %c0_1659, %c0_1660] : memref<1x24x3x128xf32, #tpu.memory_space<vmem>>, vector<1x1x3x128xf32>
    %1850 = vector.shape_cast %1849 : vector<1x1x3x128xf32> to vector<3x128xf32>
    %1851 = vector.shape_cast %1848 : vector<3x128xf32> to vector<1x1x3x128xf32>
    tpu.vector_store %arg9[%c0_1657, %c1_1658, %c0_1659, %c0_1660], %1851 {strides = array<i32>} : memref<1x24x3x128xf32, #tpu.memory_space<vmem>>, vector<1x1x3x128xf32>,
    %c8_1661 = arith.constant 8 : index
    %1852 = memref.load %arg3[%c8_1661] : memref<32xf32, #tpu.memory_space<smem>>
    %c0_1662 = arith.constant 0 : index
    %c0_1663 = arith.constant 0 : index
    %c0_1664 = arith.constant 0 : index
    %1853 = vector.load %arg10[%c0_1662, %c0_1663, %c0_1664] : memref<20x3x128xf32, #tpu.memory_space<vmem>>, vector<1x3x128xf32>
    %1854 = vector.shape_cast %1853 : vector<1x3x128xf32> to vector<3x128xf32>
    %1855 = vector.broadcast %1852 : f32 to vector<3x128xf32>
    %1856 = arith.mulf %1855, %1854 : vector<3x128xf32>
    %c9_1665 = arith.constant 9 : index
    %1857 = memref.load %arg3[%c9_1665] : memref<32xf32, #tpu.memory_space<smem>>
    %c1_1666 = arith.constant 1 : index
    %c0_1667 = arith.constant 0 : index
    %c0_1668 = arith.constant 0 : index
    %1858 = vector.load %arg10[%c1_1666, %c0_1667, %c0_1668] : memref<20x3x128xf32, #tpu.memory_space<vmem>>, vector<1x3x128xf32>
    %1859 = vector.shape_cast %1858 : vector<1x3x128xf32> to vector<3x128xf32>
    %1860 = vector.broadcast %1857 : f32 to vector<3x128xf32>
    %1861 = arith.mulf %1860, %1859 : vector<3x128xf32>
    %1862 = arith.addf %1856, %1861 : vector<3x128xf32>
    %c10_1669 = arith.constant 10 : index
    %1863 = memref.load %arg3[%c10_1669] : memref<32xf32, #tpu.memory_space<smem>>
    %c2_1670 = arith.constant 2 : index
    %c0_1671 = arith.constant 0 : index
    %c0_1672 = arith.constant 0 : index
    %1864 = vector.load %arg10[%c2_1670, %c0_1671, %c0_1672] : memref<20x3x128xf32, #tpu.memory_space<vmem>>, vector<1x3x128xf32>
    %1865 = vector.shape_cast %1864 : vector<1x3x128xf32> to vector<3x128xf32>
    %1866 = vector.broadcast %1863 : f32 to vector<3x128xf32>
    %1867 = arith.mulf %1866, %1865 : vector<3x128xf32>
    %1868 = arith.addf %1862, %1867 : vector<3x128xf32>
    %c11_1673 = arith.constant 11 : index
    %1869 = memref.load %arg3[%c11_1673] : memref<32xf32, #tpu.memory_space<smem>>
    %c3_1674 = arith.constant 3 : index
    %c0_1675 = arith.constant 0 : index
    %c0_1676 = arith.constant 0 : index
    %1870 = vector.load %arg10[%c3_1674, %c0_1675, %c0_1676] : memref<20x3x128xf32, #tpu.memory_space<vmem>>, vector<1x3x128xf32>
    %1871 = vector.shape_cast %1870 : vector<1x3x128xf32> to vector<3x128xf32>
    %1872 = vector.broadcast %1869 : f32 to vector<3x128xf32>
    %1873 = arith.mulf %1872, %1871 : vector<3x128xf32>
    %1874 = arith.addf %1868, %1873 : vector<3x128xf32>
    %c8_1677 = arith.constant 8 : index
    %1875 = memref.load %arg4[%c8_1677] : memref<32xf32, #tpu.memory_space<smem>>
    %c4_1678 = arith.constant 4 : index
    %c0_1679 = arith.constant 0 : index
    %c0_1680 = arith.constant 0 : index
    %1876 = vector.load %arg10[%c4_1678, %c0_1679, %c0_1680] : memref<20x3x128xf32, #tpu.memory_space<vmem>>, vector<1x3x128xf32>
    %1877 = vector.shape_cast %1876 : vector<1x3x128xf32> to vector<3x128xf32>
    %1878 = vector.broadcast %1875 : f32 to vector<3x128xf32>
    %1879 = arith.mulf %1878, %1877 : vector<3x128xf32>
    %1880 = arith.addf %1874, %1879 : vector<3x128xf32>
    %c8_1681 = arith.constant 8 : index
    %1881 = memref.load %arg5[%c8_1681] : memref<32xf32, #tpu.memory_space<smem>>
    %c12_1682 = arith.constant 12 : index
    %c0_1683 = arith.constant 0 : index
    %c0_1684 = arith.constant 0 : index
    %1882 = vector.load %arg10[%c12_1682, %c0_1683, %c0_1684] : memref<20x3x128xf32, #tpu.memory_space<vmem>>, vector<1x3x128xf32>
    %1883 = vector.shape_cast %1882 : vector<1x3x128xf32> to vector<3x128xf32>
    %1884 = vector.broadcast %1881 : f32 to vector<3x128xf32>
    %1885 = arith.mulf %1884, %1883 : vector<3x128xf32>
    %1886 = arith.addf %1880, %1885 : vector<3x128xf32>
    %c9_1685 = arith.constant 9 : index
    %1887 = memref.load %arg4[%c9_1685] : memref<32xf32, #tpu.memory_space<smem>>
    %c5_1686 = arith.constant 5 : index
    %c0_1687 = arith.constant 0 : index
    %c0_1688 = arith.constant 0 : index
    %1888 = vector.load %arg10[%c5_1686, %c0_1687, %c0_1688] : memref<20x3x128xf32, #tpu.memory_space<vmem>>, vector<1x3x128xf32>
    %1889 = vector.shape_cast %1888 : vector<1x3x128xf32> to vector<3x128xf32>
    %1890 = vector.broadcast %1887 : f32 to vector<3x128xf32>
    %1891 = arith.mulf %1890, %1889 : vector<3x128xf32>
    %1892 = arith.addf %1886, %1891 : vector<3x128xf32>
    %c9_1689 = arith.constant 9 : index
    %1893 = memref.load %arg5[%c9_1689] : memref<32xf32, #tpu.memory_space<smem>>
    %c13_1690 = arith.constant 13 : index
    %c0_1691 = arith.constant 0 : index
    %c0_1692 = arith.constant 0 : index
    %1894 = vector.load %arg10[%c13_1690, %c0_1691, %c0_1692] : memref<20x3x128xf32, #tpu.memory_space<vmem>>, vector<1x3x128xf32>
    %1895 = vector.shape_cast %1894 : vector<1x3x128xf32> to vector<3x128xf32>
    %1896 = vector.broadcast %1893 : f32 to vector<3x128xf32>
    %1897 = arith.mulf %1896, %1895 : vector<3x128xf32>
    %1898 = arith.addf %1892, %1897 : vector<3x128xf32>
    %c10_1693 = arith.constant 10 : index
    %1899 = memref.load %arg4[%c10_1693] : memref<32xf32, #tpu.memory_space<smem>>
    %c6_1694 = arith.constant 6 : index
    %c0_1695 = arith.constant 0 : index
    %c0_1696 = arith.constant 0 : index
    %1900 = vector.load %arg10[%c6_1694, %c0_1695, %c0_1696] : memref<20x3x128xf32, #tpu.memory_space<vmem>>, vector<1x3x128xf32>
    %1901 = vector.shape_cast %1900 : vector<1x3x128xf32> to vector<3x128xf32>
    %1902 = vector.broadcast %1899 : f32 to vector<3x128xf32>
    %1903 = arith.mulf %1902, %1901 : vector<3x128xf32>
    %1904 = arith.addf %1898, %1903 : vector<3x128xf32>
    %c10_1697 = arith.constant 10 : index
    %1905 = memref.load %arg5[%c10_1697] : memref<32xf32, #tpu.memory_space<smem>>
    %c14_1698 = arith.constant 14 : index
    %c0_1699 = arith.constant 0 : index
    %c0_1700 = arith.constant 0 : index
    %1906 = vector.load %arg10[%c14_1698, %c0_1699, %c0_1700] : memref<20x3x128xf32, #tpu.memory_space<vmem>>, vector<1x3x128xf32>
    %1907 = vector.shape_cast %1906 : vector<1x3x128xf32> to vector<3x128xf32>
    %1908 = vector.broadcast %1905 : f32 to vector<3x128xf32>
    %1909 = arith.mulf %1908, %1907 : vector<3x128xf32>
    %1910 = arith.addf %1904, %1909 : vector<3x128xf32>
    %c11_1701 = arith.constant 11 : index
    %1911 = memref.load %arg4[%c11_1701] : memref<32xf32, #tpu.memory_space<smem>>
    %c7_1702 = arith.constant 7 : index
    %c0_1703 = arith.constant 0 : index
    %c0_1704 = arith.constant 0 : index
    %1912 = vector.load %arg10[%c7_1702, %c0_1703, %c0_1704] : memref<20x3x128xf32, #tpu.memory_space<vmem>>, vector<1x3x128xf32>
    %1913 = vector.shape_cast %1912 : vector<1x3x128xf32> to vector<3x128xf32>
    %1914 = vector.broadcast %1911 : f32 to vector<3x128xf32>
    %1915 = arith.mulf %1914, %1913 : vector<3x128xf32>
    %1916 = arith.addf %1910, %1915 : vector<3x128xf32>
    %c11_1705 = arith.constant 11 : index
    %1917 = memref.load %arg5[%c11_1705] : memref<32xf32, #tpu.memory_space<smem>>
    %c15_1706 = arith.constant 15 : index
    %c0_1707 = arith.constant 0 : index
    %c0_1708 = arith.constant 0 : index
    %1918 = vector.load %arg10[%c15_1706, %c0_1707, %c0_1708] : memref<20x3x128xf32, #tpu.memory_space<vmem>>, vector<1x3x128xf32>
    %1919 = vector.shape_cast %1918 : vector<1x3x128xf32> to vector<3x128xf32>
    %1920 = vector.broadcast %1917 : f32 to vector<3x128xf32>
    %1921 = arith.mulf %1920, %1919 : vector<3x128xf32>
    %1922 = arith.addf %1916, %1921 : vector<3x128xf32>
    %c0_1709 = arith.constant 0 : index
    %c2_1710 = arith.constant 2 : index
    %c0_1711 = arith.constant 0 : index
    %c0_1712 = arith.constant 0 : index
    %1923 = vector.load %arg9[%c0_1709, %c2_1710, %c0_1711, %c0_1712] : memref<1x24x3x128xf32, #tpu.memory_space<vmem>>, vector<1x1x3x128xf32>
    %1924 = vector.shape_cast %1923 : vector<1x1x3x128xf32> to vector<3x128xf32>
    %1925 = vector.shape_cast %1922 : vector<3x128xf32> to vector<1x1x3x128xf32>
    tpu.vector_store %arg9[%c0_1709, %c2_1710, %c0_1711, %c0_1712], %1925 {strides = array<i32>} : memref<1x24x3x128xf32, #tpu.memory_space<vmem>>, vector<1x1x3x128xf32>,
    %c12_1713 = arith.constant 12 : index
    %1926 = memref.load %arg3[%c12_1713] : memref<32xf32, #tpu.memory_space<smem>>
    %c0_1714 = arith.constant 0 : index
    %c0_1715 = arith.constant 0 : index
    %c0_1716 = arith.constant 0 : index
    %1927 = vector.load %arg10[%c0_1714, %c0_1715, %c0_1716] : memref<20x3x128xf32, #tpu.memory_space<vmem>>, vector<1x3x128xf32>
    %1928 = vector.shape_cast %1927 : vector<1x3x128xf32> to vector<3x128xf32>
    %1929 = vector.broadcast %1926 : f32 to vector<3x128xf32>
    %1930 = arith.mulf %1929, %1928 : vector<3x128xf32>
    %c13_1717 = arith.constant 13 : index
    %1931 = memref.load %arg3[%c13_1717] : memref<32xf32, #tpu.memory_space<smem>>
    %c1_1718 = arith.constant 1 : index
    %c0_1719 = arith.constant 0 : index
    %c0_1720 = arith.constant 0 : index
    %1932 = vector.load %arg10[%c1_1718, %c0_1719, %c0_1720] : memref<20x3x128xf32, #tpu.memory_space<vmem>>, vector<1x3x128xf32>
    %1933 = vector.shape_cast %1932 : vector<1x3x128xf32> to vector<3x128xf32>
    %1934 = vector.broadcast %1931 : f32 to vector<3x128xf32>
    %1935 = arith.mulf %1934, %1933 : vector<3x128xf32>
    %1936 = arith.addf %1930, %1935 : vector<3x128xf32>
    %c14_1721 = arith.constant 14 : index
    %1937 = memref.load %arg3[%c14_1721] : memref<32xf32, #tpu.memory_space<smem>>
    %c2_1722 = arith.constant 2 : index
    %c0_1723 = arith.constant 0 : index
    %c0_1724 = arith.constant 0 : index
    %1938 = vector.load %arg10[%c2_1722, %c0_1723, %c0_1724] : memref<20x3x128xf32, #tpu.memory_space<vmem>>, vector<1x3x128xf32>
    %1939 = vector.shape_cast %1938 : vector<1x3x128xf32> to vector<3x128xf32>
    %1940 = vector.broadcast %1937 : f32 to vector<3x128xf32>
    %1941 = arith.mulf %1940, %1939 : vector<3x128xf32>
    %1942 = arith.addf %1936, %1941 : vector<3x128xf32>
    %c15_1725 = arith.constant 15 : index
    %1943 = memref.load %arg3[%c15_1725] : memref<32xf32, #tpu.memory_space<smem>>
    %c3_1726 = arith.constant 3 : index
    %c0_1727 = arith.constant 0 : index
    %c0_1728 = arith.constant 0 : index
    %1944 = vector.load %arg10[%c3_1726, %c0_1727, %c0_1728] : memref<20x3x128xf32, #tpu.memory_space<vmem>>, vector<1x3x128xf32>
    %1945 = vector.shape_cast %1944 : vector<1x3x128xf32> to vector<3x128xf32>
    %1946 = vector.broadcast %1943 : f32 to vector<3x128xf32>
    %1947 = arith.mulf %1946, %1945 : vector<3x128xf32>
    %1948 = arith.addf %1942, %1947 : vector<3x128xf32>
    %c12_1729 = arith.constant 12 : index
    %1949 = memref.load %arg4[%c12_1729] : memref<32xf32, #tpu.memory_space<smem>>
    %c4_1730 = arith.constant 4 : index
    %c0_1731 = arith.constant 0 : index
    %c0_1732 = arith.constant 0 : index
    %1950 = vector.load %arg10[%c4_1730, %c0_1731, %c0_1732] : memref<20x3x128xf32, #tpu.memory_space<vmem>>, vector<1x3x128xf32>
    %1951 = vector.shape_cast %1950 : vector<1x3x128xf32> to vector<3x128xf32>
    %1952 = vector.broadcast %1949 : f32 to vector<3x128xf32>
    %1953 = arith.mulf %1952, %1951 : vector<3x128xf32>
    %1954 = arith.addf %1948, %1953 : vector<3x128xf32>
    %c12_1733 = arith.constant 12 : index
    %1955 = memref.load %arg5[%c12_1733] : memref<32xf32, #tpu.memory_space<smem>>
    %c12_1734 = arith.constant 12 : index
    %c0_1735 = arith.constant 0 : index
    %c0_1736 = arith.constant 0 : index
    %1956 = vector.load %arg10[%c12_1734, %c0_1735, %c0_1736] : memref<20x3x128xf32, #tpu.memory_space<vmem>>, vector<1x3x128xf32>
    %1957 = vector.shape_cast %1956 : vector<1x3x128xf32> to vector<3x128xf32>
    %1958 = vector.broadcast %1955 : f32 to vector<3x128xf32>
    %1959 = arith.mulf %1958, %1957 : vector<3x128xf32>
    %1960 = arith.addf %1954, %1959 : vector<3x128xf32>
    %c13_1737 = arith.constant 13 : index
    %1961 = memref.load %arg4[%c13_1737] : memref<32xf32, #tpu.memory_space<smem>>
    %c5_1738 = arith.constant 5 : index
    %c0_1739 = arith.constant 0 : index
    %c0_1740 = arith.constant 0 : index
    %1962 = vector.load %arg10[%c5_1738, %c0_1739, %c0_1740] : memref<20x3x128xf32, #tpu.memory_space<vmem>>, vector<1x3x128xf32>
    %1963 = vector.shape_cast %1962 : vector<1x3x128xf32> to vector<3x128xf32>
    %1964 = vector.broadcast %1961 : f32 to vector<3x128xf32>
    %1965 = arith.mulf %1964, %1963 : vector<3x128xf32>
    %1966 = arith.addf %1960, %1965 : vector<3x128xf32>
    %c13_1741 = arith.constant 13 : index
    %1967 = memref.load %arg5[%c13_1741] : memref<32xf32, #tpu.memory_space<smem>>
    %c13_1742 = arith.constant 13 : index
    %c0_1743 = arith.constant 0 : index
    %c0_1744 = arith.constant 0 : index
    %1968 = vector.load %arg10[%c13_1742, %c0_1743, %c0_1744] : memref<20x3x128xf32, #tpu.memory_space<vmem>>, vector<1x3x128xf32>
    %1969 = vector.shape_cast %1968 : vector<1x3x128xf32> to vector<3x128xf32>
    %1970 = vector.broadcast %1967 : f32 to vector<3x128xf32>
    %1971 = arith.mulf %1970, %1969 : vector<3x128xf32>
    %1972 = arith.addf %1966, %1971 : vector<3x128xf32>
    %c14_1745 = arith.constant 14 : index
    %1973 = memref.load %arg4[%c14_1745] : memref<32xf32, #tpu.memory_space<smem>>
    %c6_1746 = arith.constant 6 : index
    %c0_1747 = arith.constant 0 : index
    %c0_1748 = arith.constant 0 : index
    %1974 = vector.load %arg10[%c6_1746, %c0_1747, %c0_1748] : memref<20x3x128xf32, #tpu.memory_space<vmem>>, vector<1x3x128xf32>
    %1975 = vector.shape_cast %1974 : vector<1x3x128xf32> to vector<3x128xf32>
    %1976 = vector.broadcast %1973 : f32 to vector<3x128xf32>
    %1977 = arith.mulf %1976, %1975 : vector<3x128xf32>
    %1978 = arith.addf %1972, %1977 : vector<3x128xf32>
    %c14_1749 = arith.constant 14 : index
    %1979 = memref.load %arg5[%c14_1749] : memref<32xf32, #tpu.memory_space<smem>>
    %c14_1750 = arith.constant 14 : index
    %c0_1751 = arith.constant 0 : index
    %c0_1752 = arith.constant 0 : index
    %1980 = vector.load %arg10[%c14_1750, %c0_1751, %c0_1752] : memref<20x3x128xf32, #tpu.memory_space<vmem>>, vector<1x3x128xf32>
    %1981 = vector.shape_cast %1980 : vector<1x3x128xf32> to vector<3x128xf32>
    %1982 = vector.broadcast %1979 : f32 to vector<3x128xf32>
    %1983 = arith.mulf %1982, %1981 : vector<3x128xf32>
    %1984 = arith.addf %1978, %1983 : vector<3x128xf32>
    %c15_1753 = arith.constant 15 : index
    %1985 = memref.load %arg4[%c15_1753] : memref<32xf32, #tpu.memory_space<smem>>
    %c7_1754 = arith.constant 7 : index
    %c0_1755 = arith.constant 0 : index
    %c0_1756 = arith.constant 0 : index
    %1986 = vector.load %arg10[%c7_1754, %c0_1755, %c0_1756] : memref<20x3x128xf32, #tpu.memory_space<vmem>>, vector<1x3x128xf32>
    %1987 = vector.shape_cast %1986 : vector<1x3x128xf32> to vector<3x128xf32>
    %1988 = vector.broadcast %1985 : f32 to vector<3x128xf32>
    %1989 = arith.mulf %1988, %1987 : vector<3x128xf32>
    %1990 = arith.addf %1984, %1989 : vector<3x128xf32>
    %c15_1757 = arith.constant 15 : index
    %1991 = memref.load %arg5[%c15_1757] : memref<32xf32, #tpu.memory_space<smem>>
    %c15_1758 = arith.constant 15 : index
    %c0_1759 = arith.constant 0 : index
    %c0_1760 = arith.constant 0 : index
    %1992 = vector.load %arg10[%c15_1758, %c0_1759, %c0_1760] : memref<20x3x128xf32, #tpu.memory_space<vmem>>, vector<1x3x128xf32>
    %1993 = vector.shape_cast %1992 : vector<1x3x128xf32> to vector<3x128xf32>
    %1994 = vector.broadcast %1991 : f32 to vector<3x128xf32>
    %1995 = arith.mulf %1994, %1993 : vector<3x128xf32>
    %1996 = arith.addf %1990, %1995 : vector<3x128xf32>
    %c0_1761 = arith.constant 0 : index
    %c3_1762 = arith.constant 3 : index
    %c0_1763 = arith.constant 0 : index
    %c0_1764 = arith.constant 0 : index
    %1997 = vector.load %arg9[%c0_1761, %c3_1762, %c0_1763, %c0_1764] : memref<1x24x3x128xf32, #tpu.memory_space<vmem>>, vector<1x1x3x128xf32>
    %1998 = vector.shape_cast %1997 : vector<1x1x3x128xf32> to vector<3x128xf32>
    %1999 = vector.shape_cast %1996 : vector<3x128xf32> to vector<1x1x3x128xf32>
    tpu.vector_store %arg9[%c0_1761, %c3_1762, %c0_1763, %c0_1764], %1999 {strides = array<i32>} : memref<1x24x3x128xf32, #tpu.memory_space<vmem>>, vector<1x1x3x128xf32>,
    %c16_1765 = arith.constant 16 : index
    %2000 = memref.load %arg3[%c16_1765] : memref<32xf32, #tpu.memory_space<smem>>
    %c0_1766 = arith.constant 0 : index
    %c0_1767 = arith.constant 0 : index
    %c0_1768 = arith.constant 0 : index
    %2001 = vector.load %arg10[%c0_1766, %c0_1767, %c0_1768] : memref<20x3x128xf32, #tpu.memory_space<vmem>>, vector<1x3x128xf32>
    %2002 = vector.shape_cast %2001 : vector<1x3x128xf32> to vector<3x128xf32>
    %2003 = vector.broadcast %2000 : f32 to vector<3x128xf32>
    %2004 = arith.mulf %2003, %2002 : vector<3x128xf32>
    %c17_1769 = arith.constant 17 : index
    %2005 = memref.load %arg3[%c17_1769] : memref<32xf32, #tpu.memory_space<smem>>
    %c1_1770 = arith.constant 1 : index
    %c0_1771 = arith.constant 0 : index
    %c0_1772 = arith.constant 0 : index
    %2006 = vector.load %arg10[%c1_1770, %c0_1771, %c0_1772] : memref<20x3x128xf32, #tpu.memory_space<vmem>>, vector<1x3x128xf32>
    %2007 = vector.shape_cast %2006 : vector<1x3x128xf32> to vector<3x128xf32>
    %2008 = vector.broadcast %2005 : f32 to vector<3x128xf32>
    %2009 = arith.mulf %2008, %2007 : vector<3x128xf32>
    %2010 = arith.addf %2004, %2009 : vector<3x128xf32>
    %c18_1773 = arith.constant 18 : index
    %2011 = memref.load %arg3[%c18_1773] : memref<32xf32, #tpu.memory_space<smem>>
    %c2_1774 = arith.constant 2 : index
    %c0_1775 = arith.constant 0 : index
    %c0_1776 = arith.constant 0 : index
    %2012 = vector.load %arg10[%c2_1774, %c0_1775, %c0_1776] : memref<20x3x128xf32, #tpu.memory_space<vmem>>, vector<1x3x128xf32>
    %2013 = vector.shape_cast %2012 : vector<1x3x128xf32> to vector<3x128xf32>
    %2014 = vector.broadcast %2011 : f32 to vector<3x128xf32>
    %2015 = arith.mulf %2014, %2013 : vector<3x128xf32>
    %2016 = arith.addf %2010, %2015 : vector<3x128xf32>
    %c19_1777 = arith.constant 19 : index
    %2017 = memref.load %arg3[%c19_1777] : memref<32xf32, #tpu.memory_space<smem>>
    %c3_1778 = arith.constant 3 : index
    %c0_1779 = arith.constant 0 : index
    %c0_1780 = arith.constant 0 : index
    %2018 = vector.load %arg10[%c3_1778, %c0_1779, %c0_1780] : memref<20x3x128xf32, #tpu.memory_space<vmem>>, vector<1x3x128xf32>
    %2019 = vector.shape_cast %2018 : vector<1x3x128xf32> to vector<3x128xf32>
    %2020 = vector.broadcast %2017 : f32 to vector<3x128xf32>
    %2021 = arith.mulf %2020, %2019 : vector<3x128xf32>
    %2022 = arith.addf %2016, %2021 : vector<3x128xf32>
    %c16_1781 = arith.constant 16 : index
    %2023 = memref.load %arg4[%c16_1781] : memref<32xf32, #tpu.memory_space<smem>>
    %c4_1782 = arith.constant 4 : index
    %c0_1783 = arith.constant 0 : index
    %c0_1784 = arith.constant 0 : index
    %2024 = vector.load %arg10[%c4_1782, %c0_1783, %c0_1784] : memref<20x3x128xf32, #tpu.memory_space<vmem>>, vector<1x3x128xf32>
    %2025 = vector.shape_cast %2024 : vector<1x3x128xf32> to vector<3x128xf32>
    %2026 = vector.broadcast %2023 : f32 to vector<3x128xf32>
    %2027 = arith.mulf %2026, %2025 : vector<3x128xf32>
    %2028 = arith.addf %2022, %2027 : vector<3x128xf32>
    %c16_1785 = arith.constant 16 : index
    %2029 = memref.load %arg5[%c16_1785] : memref<32xf32, #tpu.memory_space<smem>>
    %c12_1786 = arith.constant 12 : index
    %c0_1787 = arith.constant 0 : index
    %c0_1788 = arith.constant 0 : index
    %2030 = vector.load %arg10[%c12_1786, %c0_1787, %c0_1788] : memref<20x3x128xf32, #tpu.memory_space<vmem>>, vector<1x3x128xf32>
    %2031 = vector.shape_cast %2030 : vector<1x3x128xf32> to vector<3x128xf32>
    %2032 = vector.broadcast %2029 : f32 to vector<3x128xf32>
    %2033 = arith.mulf %2032, %2031 : vector<3x128xf32>
    %2034 = arith.addf %2028, %2033 : vector<3x128xf32>
    %c17_1789 = arith.constant 17 : index
    %2035 = memref.load %arg4[%c17_1789] : memref<32xf32, #tpu.memory_space<smem>>
    %c5_1790 = arith.constant 5 : index
    %c0_1791 = arith.constant 0 : index
    %c0_1792 = arith.constant 0 : index
    %2036 = vector.load %arg10[%c5_1790, %c0_1791, %c0_1792] : memref<20x3x128xf32, #tpu.memory_space<vmem>>, vector<1x3x128xf32>
    %2037 = vector.shape_cast %2036 : vector<1x3x128xf32> to vector<3x128xf32>
    %2038 = vector.broadcast %2035 : f32 to vector<3x128xf32>
    %2039 = arith.mulf %2038, %2037 : vector<3x128xf32>
    %2040 = arith.addf %2034, %2039 : vector<3x128xf32>
    %c17_1793 = arith.constant 17 : index
    %2041 = memref.load %arg5[%c17_1793] : memref<32xf32, #tpu.memory_space<smem>>
    %c13_1794 = arith.constant 13 : index
    %c0_1795 = arith.constant 0 : index
    %c0_1796 = arith.constant 0 : index
    %2042 = vector.load %arg10[%c13_1794, %c0_1795, %c0_1796] : memref<20x3x128xf32, #tpu.memory_space<vmem>>, vector<1x3x128xf32>
    %2043 = vector.shape_cast %2042 : vector<1x3x128xf32> to vector<3x128xf32>
    %2044 = vector.broadcast %2041 : f32 to vector<3x128xf32>
    %2045 = arith.mulf %2044, %2043 : vector<3x128xf32>
    %2046 = arith.addf %2040, %2045 : vector<3x128xf32>
    %c18_1797 = arith.constant 18 : index
    %2047 = memref.load %arg4[%c18_1797] : memref<32xf32, #tpu.memory_space<smem>>
    %c6_1798 = arith.constant 6 : index
    %c0_1799 = arith.constant 0 : index
    %c0_1800 = arith.constant 0 : index
    %2048 = vector.load %arg10[%c6_1798, %c0_1799, %c0_1800] : memref<20x3x128xf32, #tpu.memory_space<vmem>>, vector<1x3x128xf32>
    %2049 = vector.shape_cast %2048 : vector<1x3x128xf32> to vector<3x128xf32>
    %2050 = vector.broadcast %2047 : f32 to vector<3x128xf32>
    %2051 = arith.mulf %2050, %2049 : vector<3x128xf32>
    %2052 = arith.addf %2046, %2051 : vector<3x128xf32>
    %c18_1801 = arith.constant 18 : index
    %2053 = memref.load %arg5[%c18_1801] : memref<32xf32, #tpu.memory_space<smem>>
    %c14_1802 = arith.constant 14 : index
    %c0_1803 = arith.constant 0 : index
    %c0_1804 = arith.constant 0 : index
    %2054 = vector.load %arg10[%c14_1802, %c0_1803, %c0_1804] : memref<20x3x128xf32, #tpu.memory_space<vmem>>, vector<1x3x128xf32>
    %2055 = vector.shape_cast %2054 : vector<1x3x128xf32> to vector<3x128xf32>
    %2056 = vector.broadcast %2053 : f32 to vector<3x128xf32>
    %2057 = arith.mulf %2056, %2055 : vector<3x128xf32>
    %2058 = arith.addf %2052, %2057 : vector<3x128xf32>
    %c19_1805 = arith.constant 19 : index
    %2059 = memref.load %arg4[%c19_1805] : memref<32xf32, #tpu.memory_space<smem>>
    %c7_1806 = arith.constant 7 : index
    %c0_1807 = arith.constant 0 : index
    %c0_1808 = arith.constant 0 : index
    %2060 = vector.load %arg10[%c7_1806, %c0_1807, %c0_1808] : memref<20x3x128xf32, #tpu.memory_space<vmem>>, vector<1x3x128xf32>
    %2061 = vector.shape_cast %2060 : vector<1x3x128xf32> to vector<3x128xf32>
    %2062 = vector.broadcast %2059 : f32 to vector<3x128xf32>
    %2063 = arith.mulf %2062, %2061 : vector<3x128xf32>
    %2064 = arith.addf %2058, %2063 : vector<3x128xf32>
    %c19_1809 = arith.constant 19 : index
    %2065 = memref.load %arg5[%c19_1809] : memref<32xf32, #tpu.memory_space<smem>>
    %c15_1810 = arith.constant 15 : index
    %c0_1811 = arith.constant 0 : index
    %c0_1812 = arith.constant 0 : index
    %2066 = vector.load %arg10[%c15_1810, %c0_1811, %c0_1812] : memref<20x3x128xf32, #tpu.memory_space<vmem>>, vector<1x3x128xf32>
    %2067 = vector.shape_cast %2066 : vector<1x3x128xf32> to vector<3x128xf32>
    %2068 = vector.broadcast %2065 : f32 to vector<3x128xf32>
    %2069 = arith.mulf %2068, %2067 : vector<3x128xf32>
    %2070 = arith.addf %2064, %2069 : vector<3x128xf32>
    %c0_1813 = arith.constant 0 : index
    %c4_1814 = arith.constant 4 : index
    %c0_1815 = arith.constant 0 : index
    %c0_1816 = arith.constant 0 : index
    %2071 = vector.load %arg9[%c0_1813, %c4_1814, %c0_1815, %c0_1816] : memref<1x24x3x128xf32, #tpu.memory_space<vmem>>, vector<1x1x3x128xf32>
    %2072 = vector.shape_cast %2071 : vector<1x1x3x128xf32> to vector<3x128xf32>
    %2073 = vector.shape_cast %2070 : vector<3x128xf32> to vector<1x1x3x128xf32>
    tpu.vector_store %arg9[%c0_1813, %c4_1814, %c0_1815, %c0_1816], %2073 {strides = array<i32>} : memref<1x24x3x128xf32, #tpu.memory_space<vmem>>, vector<1x1x3x128xf32>,
    %c20_1817 = arith.constant 20 : index
    %2074 = memref.load %arg3[%c20_1817] : memref<32xf32, #tpu.memory_space<smem>>
    %c0_1818 = arith.constant 0 : index
    %c0_1819 = arith.constant 0 : index
    %c0_1820 = arith.constant 0 : index
    %2075 = vector.load %arg10[%c0_1818, %c0_1819, %c0_1820] : memref<20x3x128xf32, #tpu.memory_space<vmem>>, vector<1x3x128xf32>
    %2076 = vector.shape_cast %2075 : vector<1x3x128xf32> to vector<3x128xf32>
    %2077 = vector.broadcast %2074 : f32 to vector<3x128xf32>
    %2078 = arith.mulf %2077, %2076 : vector<3x128xf32>
    %c21_1821 = arith.constant 21 : index
    %2079 = memref.load %arg3[%c21_1821] : memref<32xf32, #tpu.memory_space<smem>>
    %c1_1822 = arith.constant 1 : index
    %c0_1823 = arith.constant 0 : index
    %c0_1824 = arith.constant 0 : index
    %2080 = vector.load %arg10[%c1_1822, %c0_1823, %c0_1824] : memref<20x3x128xf32, #tpu.memory_space<vmem>>, vector<1x3x128xf32>
    %2081 = vector.shape_cast %2080 : vector<1x3x128xf32> to vector<3x128xf32>
    %2082 = vector.broadcast %2079 : f32 to vector<3x128xf32>
    %2083 = arith.mulf %2082, %2081 : vector<3x128xf32>
    %2084 = arith.addf %2078, %2083 : vector<3x128xf32>
    %c22_1825 = arith.constant 22 : index
    %2085 = memref.load %arg3[%c22_1825] : memref<32xf32, #tpu.memory_space<smem>>
    %c2_1826 = arith.constant 2 : index
    %c0_1827 = arith.constant 0 : index
    %c0_1828 = arith.constant 0 : index
    %2086 = vector.load %arg10[%c2_1826, %c0_1827, %c0_1828] : memref<20x3x128xf32, #tpu.memory_space<vmem>>, vector<1x3x128xf32>
    %2087 = vector.shape_cast %2086 : vector<1x3x128xf32> to vector<3x128xf32>
    %2088 = vector.broadcast %2085 : f32 to vector<3x128xf32>
    %2089 = arith.mulf %2088, %2087 : vector<3x128xf32>
    %2090 = arith.addf %2084, %2089 : vector<3x128xf32>
    %c23_1829 = arith.constant 23 : index
    %2091 = memref.load %arg3[%c23_1829] : memref<32xf32, #tpu.memory_space<smem>>
    %c3_1830 = arith.constant 3 : index
    %c0_1831 = arith.constant 0 : index
    %c0_1832 = arith.constant 0 : index
    %2092 = vector.load %arg10[%c3_1830, %c0_1831, %c0_1832] : memref<20x3x128xf32, #tpu.memory_space<vmem>>, vector<1x3x128xf32>
    %2093 = vector.shape_cast %2092 : vector<1x3x128xf32> to vector<3x128xf32>
    %2094 = vector.broadcast %2091 : f32 to vector<3x128xf32>
    %2095 = arith.mulf %2094, %2093 : vector<3x128xf32>
    %2096 = arith.addf %2090, %2095 : vector<3x128xf32>
    %c20_1833 = arith.constant 20 : index
    %2097 = memref.load %arg4[%c20_1833] : memref<32xf32, #tpu.memory_space<smem>>
    %c4_1834 = arith.constant 4 : index
    %c0_1835 = arith.constant 0 : index
    %c0_1836 = arith.constant 0 : index
    %2098 = vector.load %arg10[%c4_1834, %c0_1835, %c0_1836] : memref<20x3x128xf32, #tpu.memory_space<vmem>>, vector<1x3x128xf32>
    %2099 = vector.shape_cast %2098 : vector<1x3x128xf32> to vector<3x128xf32>
    %2100 = vector.broadcast %2097 : f32 to vector<3x128xf32>
    %2101 = arith.mulf %2100, %2099 : vector<3x128xf32>
    %2102 = arith.addf %2096, %2101 : vector<3x128xf32>
    %c20_1837 = arith.constant 20 : index
    %2103 = memref.load %arg5[%c20_1837] : memref<32xf32, #tpu.memory_space<smem>>
    %c12_1838 = arith.constant 12 : index
    %c0_1839 = arith.constant 0 : index
    %c0_1840 = arith.constant 0 : index
    %2104 = vector.load %arg10[%c12_1838, %c0_1839, %c0_1840] : memref<20x3x128xf32, #tpu.memory_space<vmem>>, vector<1x3x128xf32>
    %2105 = vector.shape_cast %2104 : vector<1x3x128xf32> to vector<3x128xf32>
    %2106 = vector.broadcast %2103 : f32 to vector<3x128xf32>
    %2107 = arith.mulf %2106, %2105 : vector<3x128xf32>
    %2108 = arith.addf %2102, %2107 : vector<3x128xf32>
    %c21_1841 = arith.constant 21 : index
    %2109 = memref.load %arg4[%c21_1841] : memref<32xf32, #tpu.memory_space<smem>>
    %c5_1842 = arith.constant 5 : index
    %c0_1843 = arith.constant 0 : index
    %c0_1844 = arith.constant 0 : index
    %2110 = vector.load %arg10[%c5_1842, %c0_1843, %c0_1844] : memref<20x3x128xf32, #tpu.memory_space<vmem>>, vector<1x3x128xf32>
    %2111 = vector.shape_cast %2110 : vector<1x3x128xf32> to vector<3x128xf32>
    %2112 = vector.broadcast %2109 : f32 to vector<3x128xf32>
    %2113 = arith.mulf %2112, %2111 : vector<3x128xf32>
    %2114 = arith.addf %2108, %2113 : vector<3x128xf32>
    %c21_1845 = arith.constant 21 : index
    %2115 = memref.load %arg5[%c21_1845] : memref<32xf32, #tpu.memory_space<smem>>
    %c13_1846 = arith.constant 13 : index
    %c0_1847 = arith.constant 0 : index
    %c0_1848 = arith.constant 0 : index
    %2116 = vector.load %arg10[%c13_1846, %c0_1847, %c0_1848] : memref<20x3x128xf32, #tpu.memory_space<vmem>>, vector<1x3x128xf32>
    %2117 = vector.shape_cast %2116 : vector<1x3x128xf32> to vector<3x128xf32>
    %2118 = vector.broadcast %2115 : f32 to vector<3x128xf32>
    %2119 = arith.mulf %2118, %2117 : vector<3x128xf32>
    %2120 = arith.addf %2114, %2119 : vector<3x128xf32>
    %c22_1849 = arith.constant 22 : index
    %2121 = memref.load %arg4[%c22_1849] : memref<32xf32, #tpu.memory_space<smem>>
    %c6_1850 = arith.constant 6 : index
    %c0_1851 = arith.constant 0 : index
    %c0_1852 = arith.constant 0 : index
    %2122 = vector.load %arg10[%c6_1850, %c0_1851, %c0_1852] : memref<20x3x128xf32, #tpu.memory_space<vmem>>, vector<1x3x128xf32>
    %2123 = vector.shape_cast %2122 : vector<1x3x128xf32> to vector<3x128xf32>
    %2124 = vector.broadcast %2121 : f32 to vector<3x128xf32>
    %2125 = arith.mulf %2124, %2123 : vector<3x128xf32>
    %2126 = arith.addf %2120, %2125 : vector<3x128xf32>
    %c22_1853 = arith.constant 22 : index
    %2127 = memref.load %arg5[%c22_1853] : memref<32xf32, #tpu.memory_space<smem>>
    %c14_1854 = arith.constant 14 : index
    %c0_1855 = arith.constant 0 : index
    %c0_1856 = arith.constant 0 : index
    %2128 = vector.load %arg10[%c14_1854, %c0_1855, %c0_1856] : memref<20x3x128xf32, #tpu.memory_space<vmem>>, vector<1x3x128xf32>
    %2129 = vector.shape_cast %2128 : vector<1x3x128xf32> to vector<3x128xf32>
    %2130 = vector.broadcast %2127 : f32 to vector<3x128xf32>
    %2131 = arith.mulf %2130, %2129 : vector<3x128xf32>
    %2132 = arith.addf %2126, %2131 : vector<3x128xf32>
    %c23_1857 = arith.constant 23 : index
    %2133 = memref.load %arg4[%c23_1857] : memref<32xf32, #tpu.memory_space<smem>>
    %c7_1858 = arith.constant 7 : index
    %c0_1859 = arith.constant 0 : index
    %c0_1860 = arith.constant 0 : index
    %2134 = vector.load %arg10[%c7_1858, %c0_1859, %c0_1860] : memref<20x3x128xf32, #tpu.memory_space<vmem>>, vector<1x3x128xf32>
    %2135 = vector.shape_cast %2134 : vector<1x3x128xf32> to vector<3x128xf32>
    %2136 = vector.broadcast %2133 : f32 to vector<3x128xf32>
    %2137 = arith.mulf %2136, %2135 : vector<3x128xf32>
    %2138 = arith.addf %2132, %2137 : vector<3x128xf32>
    %c23_1861 = arith.constant 23 : index
    %2139 = memref.load %arg5[%c23_1861] : memref<32xf32, #tpu.memory_space<smem>>
    %c15_1862 = arith.constant 15 : index
    %c0_1863 = arith.constant 0 : index
    %c0_1864 = arith.constant 0 : index
    %2140 = vector.load %arg10[%c15_1862, %c0_1863, %c0_1864] : memref<20x3x128xf32, #tpu.memory_space<vmem>>, vector<1x3x128xf32>
    %2141 = vector.shape_cast %2140 : vector<1x3x128xf32> to vector<3x128xf32>
    %2142 = vector.broadcast %2139 : f32 to vector<3x128xf32>
    %2143 = arith.mulf %2142, %2141 : vector<3x128xf32>
    %2144 = arith.addf %2138, %2143 : vector<3x128xf32>
    %c0_1865 = arith.constant 0 : index
    %c5_1866 = arith.constant 5 : index
    %c0_1867 = arith.constant 0 : index
    %c0_1868 = arith.constant 0 : index
    %2145 = vector.load %arg9[%c0_1865, %c5_1866, %c0_1867, %c0_1868] : memref<1x24x3x128xf32, #tpu.memory_space<vmem>>, vector<1x1x3x128xf32>
    %2146 = vector.shape_cast %2145 : vector<1x1x3x128xf32> to vector<3x128xf32>
    %2147 = vector.shape_cast %2144 : vector<3x128xf32> to vector<1x1x3x128xf32>
    tpu.vector_store %arg9[%c0_1865, %c5_1866, %c0_1867, %c0_1868], %2147 {strides = array<i32>} : memref<1x24x3x128xf32, #tpu.memory_space<vmem>>, vector<1x1x3x128xf32>,
    %c24_1869 = arith.constant 24 : index
    %2148 = memref.load %arg3[%c24_1869] : memref<32xf32, #tpu.memory_space<smem>>
    %c0_1870 = arith.constant 0 : index
    %c0_1871 = arith.constant 0 : index
    %c0_1872 = arith.constant 0 : index
    %2149 = vector.load %arg10[%c0_1870, %c0_1871, %c0_1872] : memref<20x3x128xf32, #tpu.memory_space<vmem>>, vector<1x3x128xf32>
    %2150 = vector.shape_cast %2149 : vector<1x3x128xf32> to vector<3x128xf32>
    %2151 = vector.broadcast %2148 : f32 to vector<3x128xf32>
    %2152 = arith.mulf %2151, %2150 : vector<3x128xf32>
    %c25_1873 = arith.constant 25 : index
    %2153 = memref.load %arg3[%c25_1873] : memref<32xf32, #tpu.memory_space<smem>>
    %c1_1874 = arith.constant 1 : index
    %c0_1875 = arith.constant 0 : index
    %c0_1876 = arith.constant 0 : index
    %2154 = vector.load %arg10[%c1_1874, %c0_1875, %c0_1876] : memref<20x3x128xf32, #tpu.memory_space<vmem>>, vector<1x3x128xf32>
    %2155 = vector.shape_cast %2154 : vector<1x3x128xf32> to vector<3x128xf32>
    %2156 = vector.broadcast %2153 : f32 to vector<3x128xf32>
    %2157 = arith.mulf %2156, %2155 : vector<3x128xf32>
    %2158 = arith.addf %2152, %2157 : vector<3x128xf32>
    %c26_1877 = arith.constant 26 : index
    %2159 = memref.load %arg3[%c26_1877] : memref<32xf32, #tpu.memory_space<smem>>
    %c2_1878 = arith.constant 2 : index
    %c0_1879 = arith.constant 0 : index
    %c0_1880 = arith.constant 0 : index
    %2160 = vector.load %arg10[%c2_1878, %c0_1879, %c0_1880] : memref<20x3x128xf32, #tpu.memory_space<vmem>>, vector<1x3x128xf32>
    %2161 = vector.shape_cast %2160 : vector<1x3x128xf32> to vector<3x128xf32>
    %2162 = vector.broadcast %2159 : f32 to vector<3x128xf32>
    %2163 = arith.mulf %2162, %2161 : vector<3x128xf32>
    %2164 = arith.addf %2158, %2163 : vector<3x128xf32>
    %c27_1881 = arith.constant 27 : index
    %2165 = memref.load %arg3[%c27_1881] : memref<32xf32, #tpu.memory_space<smem>>
    %c3_1882 = arith.constant 3 : index
    %c0_1883 = arith.constant 0 : index
    %c0_1884 = arith.constant 0 : index
    %2166 = vector.load %arg10[%c3_1882, %c0_1883, %c0_1884] : memref<20x3x128xf32, #tpu.memory_space<vmem>>, vector<1x3x128xf32>
    %2167 = vector.shape_cast %2166 : vector<1x3x128xf32> to vector<3x128xf32>
    %2168 = vector.broadcast %2165 : f32 to vector<3x128xf32>
    %2169 = arith.mulf %2168, %2167 : vector<3x128xf32>
    %2170 = arith.addf %2164, %2169 : vector<3x128xf32>
    %c24_1885 = arith.constant 24 : index
    %2171 = memref.load %arg4[%c24_1885] : memref<32xf32, #tpu.memory_space<smem>>
    %c4_1886 = arith.constant 4 : index
    %c0_1887 = arith.constant 0 : index
    %c0_1888 = arith.constant 0 : index
    %2172 = vector.load %arg10[%c4_1886, %c0_1887, %c0_1888] : memref<20x3x128xf32, #tpu.memory_space<vmem>>, vector<1x3x128xf32>
    %2173 = vector.shape_cast %2172 : vector<1x3x128xf32> to vector<3x128xf32>
    %2174 = vector.broadcast %2171 : f32 to vector<3x128xf32>
    %2175 = arith.mulf %2174, %2173 : vector<3x128xf32>
    %2176 = arith.addf %2170, %2175 : vector<3x128xf32>
    %c24_1889 = arith.constant 24 : index
    %2177 = memref.load %arg5[%c24_1889] : memref<32xf32, #tpu.memory_space<smem>>
    %c12_1890 = arith.constant 12 : index
    %c0_1891 = arith.constant 0 : index
    %c0_1892 = arith.constant 0 : index
    %2178 = vector.load %arg10[%c12_1890, %c0_1891, %c0_1892] : memref<20x3x128xf32, #tpu.memory_space<vmem>>, vector<1x3x128xf32>
    %2179 = vector.shape_cast %2178 : vector<1x3x128xf32> to vector<3x128xf32>
    %2180 = vector.broadcast %2177 : f32 to vector<3x128xf32>
    %2181 = arith.mulf %2180, %2179 : vector<3x128xf32>
    %2182 = arith.addf %2176, %2181 : vector<3x128xf32>
    %c25_1893 = arith.constant 25 : index
    %2183 = memref.load %arg4[%c25_1893] : memref<32xf32, #tpu.memory_space<smem>>
    %c5_1894 = arith.constant 5 : index
    %c0_1895 = arith.constant 0 : index
    %c0_1896 = arith.constant 0 : index
    %2184 = vector.load %arg10[%c5_1894, %c0_1895, %c0_1896] : memref<20x3x128xf32, #tpu.memory_space<vmem>>, vector<1x3x128xf32>
    %2185 = vector.shape_cast %2184 : vector<1x3x128xf32> to vector<3x128xf32>
    %2186 = vector.broadcast %2183 : f32 to vector<3x128xf32>
    %2187 = arith.mulf %2186, %2185 : vector<3x128xf32>
    %2188 = arith.addf %2182, %2187 : vector<3x128xf32>
    %c25_1897 = arith.constant 25 : index
    %2189 = memref.load %arg5[%c25_1897] : memref<32xf32, #tpu.memory_space<smem>>
    %c13_1898 = arith.constant 13 : index
    %c0_1899 = arith.constant 0 : index
    %c0_1900 = arith.constant 0 : index
    %2190 = vector.load %arg10[%c13_1898, %c0_1899, %c0_1900] : memref<20x3x128xf32, #tpu.memory_space<vmem>>, vector<1x3x128xf32>
    %2191 = vector.shape_cast %2190 : vector<1x3x128xf32> to vector<3x128xf32>
    %2192 = vector.broadcast %2189 : f32 to vector<3x128xf32>
    %2193 = arith.mulf %2192, %2191 : vector<3x128xf32>
    %2194 = arith.addf %2188, %2193 : vector<3x128xf32>
    %c26_1901 = arith.constant 26 : index
    %2195 = memref.load %arg4[%c26_1901] : memref<32xf32, #tpu.memory_space<smem>>
    %c6_1902 = arith.constant 6 : index
    %c0_1903 = arith.constant 0 : index
    %c0_1904 = arith.constant 0 : index
    %2196 = vector.load %arg10[%c6_1902, %c0_1903, %c0_1904] : memref<20x3x128xf32, #tpu.memory_space<vmem>>, vector<1x3x128xf32>
    %2197 = vector.shape_cast %2196 : vector<1x3x128xf32> to vector<3x128xf32>
    %2198 = vector.broadcast %2195 : f32 to vector<3x128xf32>
    %2199 = arith.mulf %2198, %2197 : vector<3x128xf32>
    %2200 = arith.addf %2194, %2199 : vector<3x128xf32>
    %c26_1905 = arith.constant 26 : index
    %2201 = memref.load %arg5[%c26_1905] : memref<32xf32, #tpu.memory_space<smem>>
    %c14_1906 = arith.constant 14 : index
    %c0_1907 = arith.constant 0 : index
    %c0_1908 = arith.constant 0 : index
    %2202 = vector.load %arg10[%c14_1906, %c0_1907, %c0_1908] : memref<20x3x128xf32, #tpu.memory_space<vmem>>, vector<1x3x128xf32>
    %2203 = vector.shape_cast %2202 : vector<1x3x128xf32> to vector<3x128xf32>
    %2204 = vector.broadcast %2201 : f32 to vector<3x128xf32>
    %2205 = arith.mulf %2204, %2203 : vector<3x128xf32>
    %2206 = arith.addf %2200, %2205 : vector<3x128xf32>
    %c27_1909 = arith.constant 27 : index
    %2207 = memref.load %arg4[%c27_1909] : memref<32xf32, #tpu.memory_space<smem>>
    %c7_1910 = arith.constant 7 : index
    %c0_1911 = arith.constant 0 : index
    %c0_1912 = arith.constant 0 : index
    %2208 = vector.load %arg10[%c7_1910, %c0_1911, %c0_1912] : memref<20x3x128xf32, #tpu.memory_space<vmem>>, vector<1x3x128xf32>
    %2209 = vector.shape_cast %2208 : vector<1x3x128xf32> to vector<3x128xf32>
    %2210 = vector.broadcast %2207 : f32 to vector<3x128xf32>
    %2211 = arith.mulf %2210, %2209 : vector<3x128xf32>
    %2212 = arith.addf %2206, %2211 : vector<3x128xf32>
    %c27_1913 = arith.constant 27 : index
    %2213 = memref.load %arg5[%c27_1913] : memref<32xf32, #tpu.memory_space<smem>>
    %c15_1914 = arith.constant 15 : index
    %c0_1915 = arith.constant 0 : index
    %c0_1916 = arith.constant 0 : index
    %2214 = vector.load %arg10[%c15_1914, %c0_1915, %c0_1916] : memref<20x3x128xf32, #tpu.memory_space<vmem>>, vector<1x3x128xf32>
    %2215 = vector.shape_cast %2214 : vector<1x3x128xf32> to vector<3x128xf32>
    %2216 = vector.broadcast %2213 : f32 to vector<3x128xf32>
    %2217 = arith.mulf %2216, %2215 : vector<3x128xf32>
    %2218 = arith.addf %2212, %2217 : vector<3x128xf32>
    %c0_1917 = arith.constant 0 : index
    %c6_1918 = arith.constant 6 : index
    %c0_1919 = arith.constant 0 : index
    %c0_1920 = arith.constant 0 : index
    %2219 = vector.load %arg9[%c0_1917, %c6_1918, %c0_1919, %c0_1920] : memref<1x24x3x128xf32, #tpu.memory_space<vmem>>, vector<1x1x3x128xf32>
    %2220 = vector.shape_cast %2219 : vector<1x1x3x128xf32> to vector<3x128xf32>
    %2221 = vector.shape_cast %2218 : vector<3x128xf32> to vector<1x1x3x128xf32>
    tpu.vector_store %arg9[%c0_1917, %c6_1918, %c0_1919, %c0_1920], %2221 {strides = array<i32>} : memref<1x24x3x128xf32, #tpu.memory_space<vmem>>, vector<1x1x3x128xf32>,
    %c28_1921 = arith.constant 28 : index
    %2222 = memref.load %arg3[%c28_1921] : memref<32xf32, #tpu.memory_space<smem>>
    %c0_1922 = arith.constant 0 : index
    %c0_1923 = arith.constant 0 : index
    %c0_1924 = arith.constant 0 : index
    %2223 = vector.load %arg10[%c0_1922, %c0_1923, %c0_1924] : memref<20x3x128xf32, #tpu.memory_space<vmem>>, vector<1x3x128xf32>
    %2224 = vector.shape_cast %2223 : vector<1x3x128xf32> to vector<3x128xf32>
    %2225 = vector.broadcast %2222 : f32 to vector<3x128xf32>
    %2226 = arith.mulf %2225, %2224 : vector<3x128xf32>
    %c29_1925 = arith.constant 29 : index
    %2227 = memref.load %arg3[%c29_1925] : memref<32xf32, #tpu.memory_space<smem>>
    %c1_1926 = arith.constant 1 : index
    %c0_1927 = arith.constant 0 : index
    %c0_1928 = arith.constant 0 : index
    %2228 = vector.load %arg10[%c1_1926, %c0_1927, %c0_1928] : memref<20x3x128xf32, #tpu.memory_space<vmem>>, vector<1x3x128xf32>
    %2229 = vector.shape_cast %2228 : vector<1x3x128xf32> to vector<3x128xf32>
    %2230 = vector.broadcast %2227 : f32 to vector<3x128xf32>
    %2231 = arith.mulf %2230, %2229 : vector<3x128xf32>
    %2232 = arith.addf %2226, %2231 : vector<3x128xf32>
    %c30_1929 = arith.constant 30 : index
    %2233 = memref.load %arg3[%c30_1929] : memref<32xf32, #tpu.memory_space<smem>>
    %c2_1930 = arith.constant 2 : index
    %c0_1931 = arith.constant 0 : index
    %c0_1932 = arith.constant 0 : index
    %2234 = vector.load %arg10[%c2_1930, %c0_1931, %c0_1932] : memref<20x3x128xf32, #tpu.memory_space<vmem>>, vector<1x3x128xf32>
    %2235 = vector.shape_cast %2234 : vector<1x3x128xf32> to vector<3x128xf32>
    %2236 = vector.broadcast %2233 : f32 to vector<3x128xf32>
    %2237 = arith.mulf %2236, %2235 : vector<3x128xf32>
    %2238 = arith.addf %2232, %2237 : vector<3x128xf32>
    %c31_1933 = arith.constant 31 : index
    %2239 = memref.load %arg3[%c31_1933] : memref<32xf32, #tpu.memory_space<smem>>
    %c3_1934 = arith.constant 3 : index
    %c0_1935 = arith.constant 0 : index
    %c0_1936 = arith.constant 0 : index
    %2240 = vector.load %arg10[%c3_1934, %c0_1935, %c0_1936] : memref<20x3x128xf32, #tpu.memory_space<vmem>>, vector<1x3x128xf32>
    %2241 = vector.shape_cast %2240 : vector<1x3x128xf32> to vector<3x128xf32>
    %2242 = vector.broadcast %2239 : f32 to vector<3x128xf32>
    %2243 = arith.mulf %2242, %2241 : vector<3x128xf32>
    %2244 = arith.addf %2238, %2243 : vector<3x128xf32>
    %c28_1937 = arith.constant 28 : index
    %2245 = memref.load %arg4[%c28_1937] : memref<32xf32, #tpu.memory_space<smem>>
    %c4_1938 = arith.constant 4 : index
    %c0_1939 = arith.constant 0 : index
    %c0_1940 = arith.constant 0 : index
    %2246 = vector.load %arg10[%c4_1938, %c0_1939, %c0_1940] : memref<20x3x128xf32, #tpu.memory_space<vmem>>, vector<1x3x128xf32>
    %2247 = vector.shape_cast %2246 : vector<1x3x128xf32> to vector<3x128xf32>
    %2248 = vector.broadcast %2245 : f32 to vector<3x128xf32>
    %2249 = arith.mulf %2248, %2247 : vector<3x128xf32>
    %2250 = arith.addf %2244, %2249 : vector<3x128xf32>
    %c28_1941 = arith.constant 28 : index
    %2251 = memref.load %arg5[%c28_1941] : memref<32xf32, #tpu.memory_space<smem>>
    %c12_1942 = arith.constant 12 : index
    %c0_1943 = arith.constant 0 : index
    %c0_1944 = arith.constant 0 : index
    %2252 = vector.load %arg10[%c12_1942, %c0_1943, %c0_1944] : memref<20x3x128xf32, #tpu.memory_space<vmem>>, vector<1x3x128xf32>
    %2253 = vector.shape_cast %2252 : vector<1x3x128xf32> to vector<3x128xf32>
    %2254 = vector.broadcast %2251 : f32 to vector<3x128xf32>
    %2255 = arith.mulf %2254, %2253 : vector<3x128xf32>
    %2256 = arith.addf %2250, %2255 : vector<3x128xf32>
    %c29_1945 = arith.constant 29 : index
    %2257 = memref.load %arg4[%c29_1945] : memref<32xf32, #tpu.memory_space<smem>>
    %c5_1946 = arith.constant 5 : index
    %c0_1947 = arith.constant 0 : index
    %c0_1948 = arith.constant 0 : index
    %2258 = vector.load %arg10[%c5_1946, %c0_1947, %c0_1948] : memref<20x3x128xf32, #tpu.memory_space<vmem>>, vector<1x3x128xf32>
    %2259 = vector.shape_cast %2258 : vector<1x3x128xf32> to vector<3x128xf32>
    %2260 = vector.broadcast %2257 : f32 to vector<3x128xf32>
    %2261 = arith.mulf %2260, %2259 : vector<3x128xf32>
    %2262 = arith.addf %2256, %2261 : vector<3x128xf32>
    %c29_1949 = arith.constant 29 : index
    %2263 = memref.load %arg5[%c29_1949] : memref<32xf32, #tpu.memory_space<smem>>
    %c13_1950 = arith.constant 13 : index
    %c0_1951 = arith.constant 0 : index
    %c0_1952 = arith.constant 0 : index
    %2264 = vector.load %arg10[%c13_1950, %c0_1951, %c0_1952] : memref<20x3x128xf32, #tpu.memory_space<vmem>>, vector<1x3x128xf32>
    %2265 = vector.shape_cast %2264 : vector<1x3x128xf32> to vector<3x128xf32>
    %2266 = vector.broadcast %2263 : f32 to vector<3x128xf32>
    %2267 = arith.mulf %2266, %2265 : vector<3x128xf32>
    %2268 = arith.addf %2262, %2267 : vector<3x128xf32>
    %c30_1953 = arith.constant 30 : index
    %2269 = memref.load %arg4[%c30_1953] : memref<32xf32, #tpu.memory_space<smem>>
    %c6_1954 = arith.constant 6 : index
    %c0_1955 = arith.constant 0 : index
    %c0_1956 = arith.constant 0 : index
    %2270 = vector.load %arg10[%c6_1954, %c0_1955, %c0_1956] : memref<20x3x128xf32, #tpu.memory_space<vmem>>, vector<1x3x128xf32>
    %2271 = vector.shape_cast %2270 : vector<1x3x128xf32> to vector<3x128xf32>
    %2272 = vector.broadcast %2269 : f32 to vector<3x128xf32>
    %2273 = arith.mulf %2272, %2271 : vector<3x128xf32>
    %2274 = arith.addf %2268, %2273 : vector<3x128xf32>
    %c30_1957 = arith.constant 30 : index
    %2275 = memref.load %arg5[%c30_1957] : memref<32xf32, #tpu.memory_space<smem>>
    %c14_1958 = arith.constant 14 : index
    %c0_1959 = arith.constant 0 : index
    %c0_1960 = arith.constant 0 : index
    %2276 = vector.load %arg10[%c14_1958, %c0_1959, %c0_1960] : memref<20x3x128xf32, #tpu.memory_space<vmem>>, vector<1x3x128xf32>
    %2277 = vector.shape_cast %2276 : vector<1x3x128xf32> to vector<3x128xf32>
    %2278 = vector.broadcast %2275 : f32 to vector<3x128xf32>
    %2279 = arith.mulf %2278, %2277 : vector<3x128xf32>
    %2280 = arith.addf %2274, %2279 : vector<3x128xf32>
    %c31_1961 = arith.constant 31 : index
    %2281 = memref.load %arg4[%c31_1961] : memref<32xf32, #tpu.memory_space<smem>>
    %c7_1962 = arith.constant 7 : index
    %c0_1963 = arith.constant 0 : index
    %c0_1964 = arith.constant 0 : index
    %2282 = vector.load %arg10[%c7_1962, %c0_1963, %c0_1964] : memref<20x3x128xf32, #tpu.memory_space<vmem>>, vector<1x3x128xf32>
    %2283 = vector.shape_cast %2282 : vector<1x3x128xf32> to vector<3x128xf32>
    %2284 = vector.broadcast %2281 : f32 to vector<3x128xf32>
    %2285 = arith.mulf %2284, %2283 : vector<3x128xf32>
    %2286 = arith.addf %2280, %2285 : vector<3x128xf32>
    %c31_1965 = arith.constant 31 : index
    %2287 = memref.load %arg5[%c31_1965] : memref<32xf32, #tpu.memory_space<smem>>
    %c15_1966 = arith.constant 15 : index
    %c0_1967 = arith.constant 0 : index
    %c0_1968 = arith.constant 0 : index
    %2288 = vector.load %arg10[%c15_1966, %c0_1967, %c0_1968] : memref<20x3x128xf32, #tpu.memory_space<vmem>>, vector<1x3x128xf32>
    %2289 = vector.shape_cast %2288 : vector<1x3x128xf32> to vector<3x128xf32>
    %2290 = vector.broadcast %2287 : f32 to vector<3x128xf32>
    %2291 = arith.mulf %2290, %2289 : vector<3x128xf32>
    %2292 = arith.addf %2286, %2291 : vector<3x128xf32>
    %c0_1969 = arith.constant 0 : index
    %c7_1970 = arith.constant 7 : index
    %c0_1971 = arith.constant 0 : index
    %c0_1972 = arith.constant 0 : index
    %2293 = vector.load %arg9[%c0_1969, %c7_1970, %c0_1971, %c0_1972] : memref<1x24x3x128xf32, #tpu.memory_space<vmem>>, vector<1x1x3x128xf32>
    %2294 = vector.shape_cast %2293 : vector<1x1x3x128xf32> to vector<3x128xf32>
    %2295 = vector.shape_cast %2292 : vector<3x128xf32> to vector<1x1x3x128xf32>
    tpu.vector_store %arg9[%c0_1969, %c7_1970, %c0_1971, %c0_1972], %2295 {strides = array<i32>} : memref<1x24x3x128xf32, #tpu.memory_space<vmem>>, vector<1x1x3x128xf32>,
    return
  }
  func.func @transform_0(%arg0: i32) -> i32 {
    %c0_i32 = arith.constant 0 : i32
    %c0_i32_0 = arith.constant 0 : i32
    return %c0_i32 : i32
  }
  func.func @transform_1(%arg0: i32) -> i32 {
    %c0_i32 = arith.constant 0 : i32
    %c0_i32_0 = arith.constant 0 : i32
    return %c0_i32 : i32
  }
  func.func @transform_2(%arg0: i32) -> i32 {
    %c0_i32 = arith.constant 0 : i32
    %c0_i32_0 = arith.constant 0 : i32
    return %c0_i32 : i32
  }
  func.func @transform_3(%arg0: i32) -> i32 {
    %c0_i32 = arith.constant 0 : i32
    %c0_i32_0 = arith.constant 0 : i32
    return %c0_i32 : i32
  }
  func.func @transform_4(%arg0: i32) -> i32 {
    %c0_i32 = arith.constant 0 : i32
    %c0_i32_0 = arith.constant 0 : i32
    return %c0_i32 : i32
  }
  func.func @transform_5(%arg0: i32) -> i32 {
    %c0_i32 = arith.constant 0 : i32
    %c0_i32_0 = arith.constant 0 : i32
    return %c0_i32 : i32
  }
  func.func @transform_6(%arg0: i32) -> i32 {
    %c0_i32 = arith.constant 0 : i32
    %c0_i32_0 = arith.constant 0 : i32
    return %c0_i32 : i32
  }
  func.func @transform_7(%arg0: i32) -> (i32, i32, i32, i32) {
    %c0_i32 = arith.constant 0 : i32
    %c0_i32_0 = arith.constant 0 : i32
    %c0_i32_1 = arith.constant 0 : i32
    %c0_i32_2 = arith.constant 0 : i32
    return %arg0, %c0_i32, %c0_i32_0, %c0_i32_1 : i32, i32, i32, i32
  }
  func.func @transform_8(%arg0: i32) -> (i32, i32, i32, i32) {
    %c0_i32 = arith.constant 0 : i32
    %c0_i32_0 = arith.constant 0 : i32
    %c0_i32_1 = arith.constant 0 : i32
    %c0_i32_2 = arith.constant 0 : i32
    return %arg0, %c0_i32, %c0_i32_0, %c0_i32_1 : i32, i32, i32, i32
  }
}

</mosaic_0001>

<bundles_post_ra>
// kernel: tpu_custom_call.1
= control target key start
LH: loop header
LB: loop body
LE: loop exit
PB: predicated region body
PF: predicated region fallthrough
CT: control target
= control target key end

     0   :  { %s5391_s0 = inlined_call_operand.vmem [shape: f32[36], index: 0, kind: input, shape index: {}]   ;;  %s5392_s1 = inlined_call_operand.vmem [shape: f32[20], index: 1, kind: input, shape index: {}]   ;;  %s5393_s2 = inlined_call_operand.vmem [shape: f32[32], index: 2, kind: input, shape index: {}]   ;;  %s5394_s3 = inlined_call_operand.vmem [shape: f32[32], index: 3, kind: input, shape index: {}]   ;;  %s5395_s4 = inlined_call_operand.vmem [shape: f32[32], index: 4, kind: input, shape index: {}]   ;;  %s5396_s5 = inlined_call_operand.vmem [shape: f32[16], index: 5, kind: input, shape index: {}]   ;;  %s5397_s6 = inlined_call_operand.vmem [shape: f32[16], index: 6, kind: input, shape index: {}]   ;;  %s5398_s7 = inlined_call_operand.vmem [shape: f32[2,20,5,128], index: 7, kind: input, shape index: {}]   ;;  %s5399_s8 = inlined_call_operand.vmem [shape: f32[2,24,3,128], index: 8, kind: output, shape index: {}]  }
   0x1   :  { %5485 = sst [smem:[#allocation63_spill]] %s5391_s0 }
   0x2   :  { %5486 = sst [smem:[#allocation64_spill]] %s5392_s1 }
   0x3   :  { %5487 = sst [smem:[#allocation65_spill]] %s5393_s2 }
   0x4   :  { %5488 = sst [smem:[#allocation66_spill]] %s5394_s3 }
   0x5   :  { %5489 = sst [smem:[#allocation67_spill]] %s5395_s4 }
   0x6   :  { %5490 = sst [smem:[#allocation68_spill]] %s5396_s5 }
   0x7   :  { %5491 = sst [smem:[#allocation69_spill]] %s5397_s6 }
   0x8   :  { %5492 = sst [smem:[#allocation70_spill]] %s5398_s7 }
   0x9   :  { %5493 = sst [smem:[#allocation71_spill]] %s5399_s8 }
   0xa   :  { %13 = vsyncpa [#allocation5], 0 }
   0xb   :  { %14 = vsyncpa [#allocation7], 0 }
   0xc   :  { %15 = vsyncpa [#allocation10], 0 }
   0xd   :  { %16 = vsyncpa [#allocation13], 0  ;;  %s3528_s27 = smov 0  }
   0xe LB: > { %5494 = sst [smem:[#allocation19_spill]] %s3458_s27  ;;  %s3537_s9 = sadd.s32 4294967295, %s3458_s27   ;;  %s3458_s27 = sphi %s3528_s27, %s22_s27  }
   0xf   : > { %s5495_s1 = sld [smem:[#allocation64_spill]]  ;;  %p2873_p0 = scmp.ge.s32.totalorder %s3458_s27, 1 }
  0x10   : > { %p226_p1 = scmp.lt.s32.totalorder %s3458_s27, 3  ;;  %p3286_p2 = scmp.eq.s32.totalorder %s3537_s9, 0 }
  0x11   : > { %s5497_s3 = sld [smem:[#allocation66_spill]]  ;;  %s3460_s24 = smov [#allocation6]  }
  0x12   : > { %p3542_p3 = pnand %p2873_p0, %p226_p1  ;;  %s5498_s5 = sld [smem:[#allocation68_spill]] }
  0x13   : > { %s5500_s0 = sld [smem:[#allocation63_spill]]  ;;  %s3461_s25 = smov [#allocation9]  }
  0x14   : > { %p3264_p4 = pneg %p3542_p3  ;;  %s5501_s2 = sld [smem:[#allocation65_spill]] }
  0x15   : > { %s248_s30 = sshll.u32 %s5495_s1, 4  ;;  %s3462_s26 = smov [#allocation12]   ;;  %s249_s30 = int_to_ptr.vmem [resolvable:$true] %s248_s30 }
  0x16   : > { %p3556_p5 = pnand %p3286_p2, %p3264_p4  ;;  %s3463_s28 = smov [#allocation4]  }
  0x17   : > { %s268_s13 = sshll.u32 %s5497_s3, 4  ;;  %s3464_s29 = smov [#allocation8]   ;;  %s269_s13 = int_to_ptr.vmem [resolvable:$true] %s268_s13 }
  0x18   : > { %s288_s16 = sshll.u32 %s5498_s5, 4  ;;  %s5502_s4 = sld [smem:[#allocation67_spill]]  ;;  %s289_s16 = int_to_ptr.vmem [resolvable:$true] %s288_s16 }
  0x19   : > { %s238_s20 = sshll.u32 %s5500_s0, 4  ;;  %s5503_s6 = sld [smem:[#allocation69_spill]]  ;;  %s239_s20 = int_to_ptr.vmem [resolvable:$true] %s238_s20 }
  0x1a   : > { %s258_s23 = sshll.u32 %s5501_s2, 4  ;;  %s259_s23 = int_to_ptr.vmem [resolvable:$true] %s258_s23 }
  0x1b   : > { %3270 = dma.vmem_to_smem (!%p3556_p5), %s249_s30, 16, %s3460_s24, [#allocation7]  }
  0x1c   : > { %3276 = dma.vmem_to_smem (!%p3556_p5), %s269_s13, 16, %s3461_s25, [#allocation10]  }
  0x1d   : > { %3282 = dma.vmem_to_smem (!%p3556_p5), %s289_s16, 16, %s3462_s26, [#allocation13]  }
  0x1e   : > { %3267 = dma.vmem_to_smem (!%p3556_p5), %s239_s20, 16, %s3463_s28, [#allocation5]  }
  0x1f   : > { %3273 = dma.vmem_to_smem (!%p3556_p5), %s259_s23, 16, %s3464_s29, [#allocation7]  }
  0x20   : > { %s278_s14 = sshll.u32 %s5502_s4, 4  ;;  %s298_s18 = sshll.u32 %s5503_s6, 4  ;;  %s279_s14 = int_to_ptr.vmem [resolvable:$true] %s278_s14  ;;  %s299_s18 = int_to_ptr.vmem [resolvable:$true] %s298_s18 }
  0x21   : > { %s3465_s13 = smov [#allocation11]   ;;  %s3466_s16 = smov [#allocation14]  }
  0x22   : > { %3279 = dma.vmem_to_smem (!%p3556_p5), %s279_s14, 16, %s3465_s13, [#allocation10]  }
  0x23   : > { %3285 = dma.vmem_to_smem (!%p3556_p5), %s299_s18, 16, %s3466_s16, [#allocation13]  }
  0x24   : > { %319 = sbr.rel (%p3542_p3) target bundleno = 805 (0x325), region = 52 }
  0x29   : > { %3441 = dma.done.wait (%p3286_p2), [#allocation5], 16  }
  0x2a   : > { %3443 = vsyncadd (%p3286_p2), [#allocation5], 4294967280 }
  0x2b   : > { %3445 = dma.done.wait (%p3286_p2), [#allocation7], 32  }
  0x2c   : > { %3447 = vsyncadd (%p3286_p2), [#allocation7], 4294967264 }
  0x2d   : > { %3449 = dma.done.wait (%p3286_p2), [#allocation10], 32  }
  0x2e   : > { %3451 = vsyncadd (%p3286_p2), [#allocation10], 4294967264 }
  0x2f   : > { %3453 = dma.done.wait (%p3286_p2), [#allocation13], 32  }
  0x30   : > { %3455 = vsyncadd (%p3286_p2), [#allocation13], 4294967264 }
  0x31   : > { %356 = sfence }
  0x32   : > { %p385_p6 = scmp.lt.s32.totalorder %s3537_s9, 1  ;;  %s5504_s7 = sld [smem:[#allocation70_spill]]  ;;  %vm417_vm0 = vcmask 867328   ;;  %vm406_vm1 = vcmask 875520   ;;  %vm429_vm2 = vcmask 859136   ;;  %vm441_vm3 = vcmask 711680  }
  0x33   : > { %s3467_s21 = smov 106   ;;  %s5406_s22 = smov 107   ;;  %vm453_vm4 = vcmask 703488   ;;  %vm465_vm5 = vcmask 695296   ;;  %vm477_vm6 = vcmask 547840   ;;  %vm501_vm7 = vcmask 531456  }
  0x34   : > { %s5666_s9 = smov (!%p385_p6, %s3537_s9), 1  ;;  %s5402_s23 = smov 105   ;;  %vm489_vm8 = vcmask 539648   ;;  %vm834_vm9 = vcmask 719872   ;;  %vm878_vm10 = vcmask 687104   ;;  %vm1080_vm11 = vcmask 1031168  }
  0x35   : > { %s3234_s10 = smul.u32 160, %s5666_s9  ;;  %s3470_s24 = smov 87   ;;  %vm1124_vm12 = vcmask 375808   ;;  %vm1362_vm13 = vcmask 359424   ;;  %vm1543_vm14 = vcmask 1014784   ;;  %vm1587_vm15 = vcmask 392192  }
  0x36   : > { %s5410_s25 = smov 86   ;;  %s3472_s26 = smov 85  }
  0x37   : > { %s5400_s28 = smov 67   ;;  %s3474_s29 = smov 66  }
  0x38   : > { %s3612_s20 = scalar_lea.vmem %s5504_s7, %s3234_s10  ;;  %s5404_s11 = smov 65  }
  0x39   : > { %v396_v0 = vld [vmem:[%s3612_s20] sm:$0x7]  ;;  %v2902_v2 = vld [vmem:[%s3612_s20 + $0x9] sm:$0x7]  ;;  %v2913_v5 = vld [vmem:[%s3612_s20 + $0x11] sm:$0x7] }
  0x3a   : > { %411 = vrot.lane.b32.xlu1 %v396_v0, %s3467_s21  ;;  %399 = vrot.lane.b32.xlu0 %v396_v0, %s5406_s22  ;;  %v397_v1 = vld [vmem:[%s3612_s20 + $0x1] sm:$0x7]  ;;  %v2901_v3 = vld [vmem:[%s3612_s20 + $0x8] sm:$0x7]  ;;  %s2892_s12 = sld [smem:[#allocation4 + $0x1]]  ;;  %s5517_s6 = smov 46  }
  0x3b   : > { %423 = vrot.lane.b32.xlu2 %v396_v0, %s5402_s23  ;;  %v2912_v6 = vld [vmem:[%s3612_s20 + $0x10] sm:$0x7]  ;;  %s395_s14 = sld [smem:[#allocation4]]  ;;  %v3694_v31 = vld [vmem:[%s3612_s20 + $0x19] sm:$0x7]  ;;  %s5519_s27 = smov 107  }
  0x3c   : > { %s3677_s30 = sld [smem:[#allocation4 + $0x2]]  ;;  %v3697_v32 = vld [vmem:[%s3612_s20 + $0x18] sm:$0x7] }
  0x3d   : > { %s2894_s15 = sld [smem:[#allocation4 + $0x3]] }
  0x3e   : > { %s3681_s18 = sld [smem:[#allocation4 + $0x4]] }
  0x3f   : > { %s3688_s13 = sld [smem:[#allocation4 + $0x5]] }
  0x40   : > { %v419_v18 = vstv %s2892_s12  ;;  %s2897_s16 = sld [smem:[#allocation4 + $0x6]] }
  0x41   : > { %v408_v20 = vstv %s395_s14  ;;  %s3705_s10 = sld [smem:[#allocation4 + $0x7]] }
  0x42   : > { %414 = vrot.lane.b32.xlu1 %v397_v1, %s3467_s21  ;;  %403 = vrot.lane.b32.xlu0 %v397_v1, %s5406_s22  ;;  %v431_v27 = vstv %s3677_s30  ;;  %s2899_s17 = sld [smem:[#allocation4 + $0x8]] }
  0x43   : > { %426 = vrot.lane.b32.xlu2 %v397_v1, %s5402_s23  ;;  %v443_v29 = vstv %s2894_s15  ;;  %s2903_s19 = sld [smem:[#allocation4 + $0xa]] }
  0x44   : > { %v455_v34 = vstv %s3681_s18  ;;  %s2900_s12 = sld [smem:[#allocation4 + $0x9]] }
  0x45   : > { %v467_v44 = vstv %s3688_s13  ;;  %s2904_s14 = sld [smem:[#allocation4 + $0xb]] }
  0x46   : > { %v479_v46 = vstv %s2897_s16  ;;  %s2905_s30 = sld [smem:[#allocation4 + $0xc]]  ;;  %s3476_s16 = smov 88  }
  0x47   : > { %v491_v51 = vstv %s3705_s10  ;;  %s2906_s15 = sld [smem:[#allocation4 + $0xd]] }
  0x48   : > { %v503_v55 = vstv %s2899_s17  ;;  %s2907_s18 = sld [smem:[#allocation4 + $0xe]] }
  0x49   : > { %s2908_s13 = sld [smem:[#allocation4 + $0xf]] }
  0x4a   : > { %438 = vrot.lane.b32.xlu1 %v397_v1, %s3470_s24  ;;  %435 = vrot.lane.b32.xlu0 %v396_v0, %s3470_s24  ;;  %s2909_s10 = sld [smem:[#allocation4 + $0x10]] }
  0x4b   : > { %447 = vrot.lane.b32.xlu2 %v396_v0, %s5410_s25  ;;  %s2910_s17 = sld [smem:[#allocation4 + $0x11]] }
  0x4c   : > { %s4093_s0 = sld [smem:[#allocation6 + $0xf]] }
  0x4d   : > { %s4100_s1 = sld [smem:[#allocation14 + $0x4]] }
  0x4e   : > { %s4102_s2 = sld [smem:[#allocation6 + $0x11]] }
  0x4f   : > { %s4104_s3 = sld [smem:[#allocation6 + $0x12]] }
  0x50   : > { %s4106_s4 = sld [smem:[#allocation14 + $0x8]] }
  0x51   : > { %s4108_s5 = sld [smem:[#allocation14 + $0xc]] }
  0x52   : > { %459 = vrot.lane.b32.xlu1 %v396_v0, %s3472_s26  ;;  %450 = vrot.lane.b32.xlu0 %v397_v1, %s5410_s25  ;;  %5513 = sst [smem:[#allocation26_spill]] %s4093_s0 }
  0x53   : > { %462 = vrot.lane.b32.xlu2 %v397_v1, %s3472_s26  ;;  %s4121_s7 = sld [smem:[#allocation6 + $0x13]] }
  0x54   : > { %5514 = sst [smem:[#allocation27_spill]] %s4102_s2 }
  0x55   : > { %5515 = sst [smem:[#allocation28_spill]] %s4104_s3 }
  0x56   : > { %5516 = sst [smem:[#allocation29_spill]] %s4106_s4 }
  0x57   : > { %s5526_s8 = sld [smem:[#allocation71_spill]] }
  0x59   : > { %5518 = sst [smem:[#allocation30_spill]] %s4121_s7 }
  0x5a   : > { %474 = vrot.lane.b32.xlu1 %v397_v1, %s5400_s28  ;;  %471 = vrot.lane.b32.xlu0 %v396_v0, %s5400_s28 }
  0x5b   : > { %483 = vrot.lane.b32.xlu2 %v396_v0, %s3474_s29 }
  0x62   : > { %495 = vrot.lane.b32.xlu1 %v396_v0, %s5404_s11  ;;  %486 = vrot.lane.b32.xlu0 %v397_v1, %s3474_s29 }
  0x63   : > { %498 = vrot.lane.b32.xlu2 %v397_v1, %s5404_s11 }
  0x6a   : > { %516 = vrot.lane.b32.xlu1 %v2902_v2, %s5406_s22  ;;  %512 = vrot.lane.b32.xlu0 %v2901_v3, %s5406_s22 }
  0x6b   : > { %523 = vrot.lane.b32.xlu2 %v2901_v3, %s3467_s21 }
  0x72   : > { %534 = vrot.lane.b32.xlu1 %v2901_v3, %s5402_s23  ;;  %526 = vrot.lane.b32.xlu0 %v2902_v2, %s3467_s21 }
  0x73   : > { %537 = vrot.lane.b32.xlu2 %v2902_v2, %s5402_s23 }
  0x7a   : > { %548 = vrot.lane.b32.xlu1 %v2902_v2, %s3470_s24  ;;  %545 = vrot.lane.b32.xlu0 %v2901_v3, %s3470_s24 }
  0x7b   : > { %556 = vrot.lane.b32.xlu2 %v2901_v3, %s5410_s25 }
  0x82   : > { %567 = vrot.lane.b32.xlu1 %v2901_v3, %s3472_s26  ;;  %559 = vrot.lane.b32.xlu0 %v2902_v2, %s5410_s25 }
  0x83   : > { %570 = vrot.lane.b32.xlu2 %v2902_v2, %s3472_s26 }
  0x8a   : > { %581 = vrot.lane.b32.xlu1 %v2902_v2, %s5400_s28  ;;  %578 = vrot.lane.b32.xlu0 %v2901_v3, %s5400_s28 }
  0x8b   : > { %589 = vrot.lane.b32.xlu2 %v2901_v3, %s3474_s29 }
  0x92   : > { %600 = vrot.lane.b32.xlu1 %v2901_v3, %s5404_s11  ;;  %592 = vrot.lane.b32.xlu0 %v2902_v2, %s3474_s29 }
  0x93   : > { %603 = vrot.lane.b32.xlu2 %v2902_v2, %s5404_s11 }
  0x95   : > { %v424_v4 = vpop.permute.xlu2 %423 }
  0x9a   : > { %621 = vrot.lane.b32.xlu1 %v2913_v5, %s5406_s22  ;;  %617 = vrot.lane.b32.xlu0 %v2912_v6, %s5406_s22 }
  0x9b   : > { %628 = vrot.lane.b32.xlu2 %v2912_v6, %s3467_s21 }
  0x9d   : > { %v427_v7 = vpop.permute.xlu2 %426 }
  0x9e   : > { %v430_v28 = vsel %vm429_vm2, %v424_v4, %v427_v7 }
  0x9f   : > { %v432_v36 = vmul.f32 %v431_v27, %v430_v28 }
  0xa2   : > { %639 = vrot.lane.b32.xlu1 %v2912_v6, %s5402_s23  ;;  %631 = vrot.lane.b32.xlu0 %v2913_v5, %s3467_s21 }
  0xa3   : > { %642 = vrot.lane.b32.xlu2 %v2913_v5, %s5402_s23 }
  0xa5   : > { %v448_v8 = vpop.permute.xlu2 %447 }
  0xaa   : > { %653 = vrot.lane.b32.xlu1 %v2913_v5, %s3470_s24  ;;  %650 = vrot.lane.b32.xlu0 %v2912_v6, %s3470_s24 }
  0xab   : > { %661 = vrot.lane.b32.xlu2 %v2912_v6, %s5410_s25 }
  0xac   : > { %v412_v9 = vpop.permute.xlu1 %411  ;;  %v400_v10 = vpop.permute.xlu0 %399 }
  0xad   : > { %v3665_v11 = vpop.permute.xlu2 %462 }
  0xb2   : > { %672 = vrot.lane.b32.xlu1 %v2912_v6, %s3472_s26  ;;  %664 = vrot.lane.b32.xlu0 %v2913_v5, %s5410_s25 }
  0xb3   : > { %675 = vrot.lane.b32.xlu2 %v2913_v5, %s3472_s26 }
  0xb4   : > { %v415_v12 = vpop.permute.xlu1 %414  ;;  %v404_v13 = vpop.permute.xlu0 %403 }
  0xb5   : > { %v3670_v14 = vpop.permute.xlu2 %483  ;;  %v418_v19 = vsel %vm417_vm0, %v412_v9, %v415_v12  ;;  %v407_v21 = vsel %vm406_vm1, %v400_v10, %v404_v13  ;;  %v530_v9 = vstv %s2903_s19  ;;  %s3477_s19 = smov 84  }
  0xb6   : > { %v420_v22 = vmul.f32 %v419_v18, %v418_v19  ;;  %v409_v23 = vmul.f32 %v408_v20, %v407_v21  ;;  %v541_v18 = vstv %s2904_s14  ;;  %v552_v20 = vstv %s2905_s30  ;;  %s2911_s14 = sld [smem:[#allocation4 + $0x12]] }
  0xb7   : > { %s2915_s30 = sld [smem:[#allocation4 + $0x14]] }
  0xb8   : > { %v421_v33 = vadd.f32 %v420_v22, %v409_v23  ;;  %v2934_v22 = vld [vmem:[%s3612_s20 + $0x21] sm:$0x7] }
  0xb9   : > { %v2933_v23 = vld [vmem:[%s3612_s20 + $0x20] sm:$0x7] }
  0xba   : > { %686 = vrot.lane.b32.xlu1 %v2913_v5, %s5400_s28  ;;  %683 = vrot.lane.b32.xlu0 %v2912_v6, %s5400_s28  ;;  %v433_v38 = vadd.f32 %v432_v36, %v421_v33 }
  0xbb   : > { %694 = vrot.lane.b32.xlu2 %v2912_v6, %s3474_s29 }
  0xbc   : > { %v439_v15 = vpop.permute.xlu1 %438  ;;  %v436_v16 = vpop.permute.xlu0 %435 }
  0xbd   : > { %v3675_v17 = vpop.permute.xlu2 %498  ;;  %v442_v30 = vsel %vm441_vm3, %v436_v16, %v439_v15 }
  0xbe   : > { %v444_v37 = vmul.f32 %v443_v29, %v442_v30 }
  0xc0   : > { %v445_v43 = vadd.f32 %v444_v37, %v433_v38  ;;  %v585_v37 = vstv %s2908_s13  ;;  %s2918_s13 = sld [smem:[#allocation4 + $0x17]] }
  0xc2   : > { %705 = vrot.lane.b32.xlu1 %v2912_v6, %s5404_s11  ;;  %697 = vrot.lane.b32.xlu0 %v2913_v5, %s3474_s29 }
  0xc3   : > { %708 = vrot.lane.b32.xlu2 %v2913_v5, %s5404_s11 }
  0xc4   : > { %v460_v24 = vpop.permute.xlu1 %459  ;;  %v451_v25 = vpop.permute.xlu0 %450 }
  0xc5   : > { %v3686_v26 = vpop.permute.xlu2 %523  ;;  %v454_v35 = vsel %vm453_vm4, %v448_v8, %v451_v25  ;;  %v466_v45 = vsel %vm465_vm5, %v460_v24, %v3665_v11  ;;  %v520_v11 = vstv %s2900_s12  ;;  %v563_v25 = vstv %s2906_s15  ;;  %s2914_s12 = sld [smem:[#allocation4 + $0x13]] }
  0xc6   : > { %v456_v39 = vmul.f32 %v455_v34, %v454_v35  ;;  %v468_v49 = vmul.f32 %v467_v44, %v466_v45  ;;  %v574_v35 = vstv %s2907_s18  ;;  %s2916_s15 = sld [smem:[#allocation4 + $0x15]] }
  0xc7   : > { %s2917_s18 = sld [smem:[#allocation4 + $0x16]] }
  0xc8   : > { %v457_v48 = vadd.f32 %v456_v39, %v445_v43 }
  0xca   : > { %726 = vrot.lane.b32.xlu1 %v3694_v31, %s5406_s22  ;;  %722 = vrot.lane.b32.xlu0 %v3697_v32, %s5406_s22  ;;  %v469_v52 = vadd.f32 %v468_v49, %v457_v48  ;;  %s3912_s22 = sld [smem:[#allocation12 + $0x7]] }
  0xcb   : > { %733 = vrot.lane.b32.xlu2 %v3697_v32, %s3467_s21 }
  0xcc   : > { %v475_v40 = vpop.permute.xlu1 %474  ;;  %v472_v41 = vpop.permute.xlu0 %471 }
  0xcd   : > { %v3709_v42 = vpop.permute.xlu2 %537  ;;  %v478_v47 = vsel %vm477_vm6, %v472_v41, %v475_v40 }
  0xce   : > { %v480_v50 = vmul.f32 %v479_v46, %v478_v47  ;;  %v607_v46 = vstv %s2910_s17  ;;  %s2920_s17 = sld [smem:[#allocation4 + $0x19]] }
  0xd0   : > { %v481_v59 = vadd.f32 %v480_v50, %v469_v52 }
  0xd2   : > { %744 = vrot.lane.b32.xlu1 %v3697_v32, %s5402_s23  ;;  %736 = vrot.lane.b32.xlu0 %v3694_v31, %s3467_s21 }
  0xd3   : > { %747 = vrot.lane.b32.xlu2 %v3694_v31, %s5402_s23  ;;  %s5408_s23 = smov 126  }
  0xd4   : > { %v496_v53 = vpop.permute.xlu1 %495  ;;  %v487_v54 = vpop.permute.xlu0 %486 }
  0xd5   : > { %v502_v56 = vsel %vm501_vm7, %v496_v53, %v3675_v17  ;;  %v490_v57 = vsel %vm489_vm8, %v3670_v14, %v487_v54  ;;  %v557_v58 = vpop.permute.xlu2 %556 }
  0xd6   : > { %v492_v60 = vmul.f32 %v491_v51, %v490_v57  ;;  %v504_v61 = vmul.f32 %v503_v55, %v502_v56 }
  0xd8   : > { %v493_v62 = vadd.f32 %v492_v60, %v481_v59  ;;  %v2941_v59 = vld [vmem:[%s3612_s20 + $0x29] sm:$0x7] }
  0xda   : > { %v505_v63 = vadd.f32 %v504_v61, %v493_v62  ;;  %758 = vrot.lane.b32.xlu1 %v3694_v31, %s3470_s24  ;;  %755 = vrot.lane.b32.xlu0 %v3697_v32, %s3470_s24 }
  0xdb   : > { %766 = vrot.lane.b32.xlu2 %v3697_v32, %s5410_s25 }
  0xdc   : > { %506 = vst [vmem:[#allocation2] sm:$0x7] %v505_v63  ;;  %v517_v0 = vpop.permute.xlu1 %516  ;;  %v513_v1 = vpop.permute.xlu0 %512 }
  0xdd   : > { %v571_v2 = vpop.permute.xlu2 %570  ;;  %v519_v12 = vsel %vm406_vm1, %v513_v1, %v517_v0 }
  0xde   : > { %v521_v17 = vmul.f32 %v520_v11, %v519_v12  ;;  %v646_v11 = vstv %s2915_s30  ;;  %s2922_s30 = sld [smem:[#allocation4 + $0x1b]] }
  0xe2   : > { %777 = vrot.lane.b32.xlu1 %v3697_v32, %s3472_s26  ;;  %769 = vrot.lane.b32.xlu0 %v3694_v31, %s5410_s25 }
  0xe3   : > { %780 = vrot.lane.b32.xlu2 %v3694_v31, %s3472_s26 }
  0xe4   : > { %v535_v3 = vpop.permute.xlu1 %534  ;;  %v527_v4 = vpop.permute.xlu0 %526 }
  0xe5   : > { %v3738_v5 = vpop.permute.xlu2 %589  ;;  %v529_v10 = vsel %vm417_vm0, %v3686_v26, %v527_v4  ;;  %v540_v19 = vsel %vm429_vm2, %v535_v3, %v3709_v42  ;;  %v596_v42 = vstv %s2909_s10  ;;  %v625_v4 = vstv %s2911_s14  ;;  %s2919_s10 = sld [smem:[#allocation4 + $0x18]] }
  0xe6   : > { %v531_v13 = vmul.f32 %v530_v9, %v529_v10  ;;  %v542_v27 = vmul.f32 %v541_v18, %v540_v19  ;;  %s2925_s14 = sld [smem:[#allocation4 + $0x1c]] }
  0xe8   : > { %v532_v24 = vadd.f32 %v531_v13, %v521_v17  ;;  %v657_v13 = vstv %s2916_s15  ;;  %s2926_s15 = sld [smem:[#allocation4 + $0x1d]] }
  0xea   : > { %791 = vrot.lane.b32.xlu1 %v3694_v31, %s5400_s28  ;;  %788 = vrot.lane.b32.xlu0 %v3697_v32, %s5400_s28  ;;  %v543_v29 = vadd.f32 %v542_v27, %v532_v24  ;;  %v679_v27 = vstv %s2918_s13  ;;  %s2928_s13 = sld [smem:[#allocation4 + $0x1f]] }
  0xeb   : > { %799 = vrot.lane.b32.xlu2 %v3697_v32, %s3474_s29  ;;  %s3883_s28 = sld [smem:[#allocation12 + $0xd]] }
  0xec   : > { %v549_v6 = vpop.permute.xlu1 %548  ;;  %v546_v7 = vpop.permute.xlu0 %545 }
  0xed   : > { %v604_v8 = vpop.permute.xlu2 %603  ;;  %v551_v21 = vsel %vm441_vm3, %v546_v7, %v549_v6 }
  0xee   : > { %v553_v28 = vmul.f32 %v552_v20, %v551_v21  ;;  %v2947_v20 = vld [vmem:[%s3612_s20 + $0x30] sm:$0x7] }
  0xf0   : > { %v554_v34 = vadd.f32 %v553_v28, %v543_v29  ;;  %v690_v29 = vstv %s2919_s10  ;;  %s3849_s10 = sld [smem:[#allocation4 + $0x21]] }
  0xf2   : > { %810 = vrot.lane.b32.xlu1 %v3697_v32, %s5404_s11  ;;  %802 = vrot.lane.b32.xlu0 %v3694_v31, %s3474_s29 }
  0xf3   : > { %813 = vrot.lane.b32.xlu2 %v3694_v31, %s5404_s11  ;;  %s3899_s11 = sld [smem:[#allocation12 + $0xa]] }
  0xf4   : > { %v568_v14 = vpop.permute.xlu1 %567  ;;  %v560_v15 = vpop.permute.xlu0 %559 }
  0xf5   : > { %v3755_v16 = vpop.permute.xlu2 %628  ;;  %v562_v26 = vsel %vm453_vm4, %v557_v58, %v560_v15  ;;  %v573_v36 = vsel %vm465_vm5, %v568_v14, %v571_v2  ;;  %v2940_v58 = vld [vmem:[%s3612_s20 + $0x28] sm:$0x7]  ;;  %v635_v2 = vstv %s2914_s12  ;;  %s2921_s12 = sld [smem:[#allocation4 + $0x1a]] }
  0xf6   : > { %v564_v30 = vmul.f32 %v563_v25, %v562_v26  ;;  %v575_v40 = vmul.f32 %v574_v35, %v573_v36  ;;  %v701_v35 = vstv %s2920_s17  ;;  %s3854_s17 = sld [smem:[#allocation12 + $0x4]] }
  0xf8   : > { %v565_v39 = vadd.f32 %v564_v30, %v554_v34 }
  0xfa   : > { %831 = vrot.lane.b32.xlu1 %v2934_v22, %s3476_s16  ;;  %827 = vrot.lane.b32.xlu0 %v2933_v23, %s3476_s16  ;;  %v576_v43 = vadd.f32 %v575_v40, %v565_v39 }
  0xfb   : > { %839 = vrot.lane.b32.xlu2 %v2933_v23, %s3470_s24  ;;  %v712_v39 = vstv %s2921_s12  ;;  %s3859_s12 = sld [smem:[#allocation4 + $0x22]] }
  0xfc   : > { %v582_v31 = vpop.permute.xlu1 %581  ;;  %v579_v32 = vpop.permute.xlu0 %578 }
  0xfd   : > { %v3766_v33 = vpop.permute.xlu2 %642  ;;  %v584_v38 = vsel %vm477_vm6, %v579_v32, %v582_v31  ;;  %v2948_v32 = vld [vmem:[%s3612_s20 + $0x31] sm:$0x7] }
  0xfe   : > { %v586_v41 = vmul.f32 %v585_v37, %v584_v38 }
 0x100   : > { %v587_v50 = vadd.f32 %v586_v41, %v576_v43 }
 0x102   : > { %850 = vrot.lane.b32.xlu1 %v2933_v23, %s5410_s25  ;;  %842 = vrot.lane.b32.xlu0 %v2934_v22, %s3470_s24 }
 0x103   : > { %853 = vrot.lane.b32.xlu2 %v2934_v22, %s5410_s25 }
 0x104   : > { %v601_v44 = vpop.permute.xlu1 %600  ;;  %v593_v45 = vpop.permute.xlu0 %592 }
 0x105   : > { %v606_v47 = vsel %vm501_vm7, %v601_v44, %v604_v8  ;;  %v595_v48 = vsel %vm489_vm8, %v3738_v5, %v593_v45  ;;  %v662_v49 = vpop.permute.xlu2 %661 }
 0x106   : > { %v597_v51 = vmul.f32 %v596_v42, %v595_v48  ;;  %v608_v52 = vmul.f32 %v607_v46, %v606_v47 }
 0x108   : > { %v598_v53 = vadd.f32 %v597_v51, %v587_v50 }
 0x10a   : > { %v609_v54 = vadd.f32 %v608_v52, %v598_v53  ;;  %864 = vrot.lane.b32.xlu1 %v2934_v22, %s3472_s26  ;;  %861 = vrot.lane.b32.xlu0 %v2933_v23, %s3472_s26 }
 0x10b   : > { %872 = vrot.lane.b32.xlu2 %v2933_v23, %s3477_s19 }
 0x10c   : > { %611 = vst [vmem:[#allocation2 + $0x4] sm:$0x7] %v609_v54  ;;  %v622_v55 = vpop.permute.xlu1 %621  ;;  %v618_v56 = vpop.permute.xlu0 %617  ;;  %v3825_v54 = vld [vmem:[%s3612_s20 + $0x39] sm:$0x7] }
 0x10d   : > { %v676_v57 = vpop.permute.xlu2 %675  ;;  %v624_v5 = vsel %vm406_vm1, %v618_v56, %v622_v55  ;;  %v2954_v55 = vld [vmem:[%s3612_s20 + $0x38] sm:$0x7] }
 0x10e   : > { %v626_v10 = vmul.f32 %v625_v4, %v624_v5  ;;  %v751_v4 = vstv %s2926_s15  ;;  %s3868_s15 = sld [smem:[#allocation12 + $0xc]] }
 0x112   : > { %890 = vrot.lane.b32.xlu1 %v2940_v58, %s3476_s16  ;;  %875 = vrot.lane.b32.xlu0 %v2934_v22, %s3477_s19 }
 0x113   : > { %894 = vrot.lane.b32.xlu2 %v2941_v59, %s3476_s16 }
 0x114   : > { %v640_v60 = vpop.permute.xlu1 %639  ;;  %v632_v61 = vpop.permute.xlu0 %631 }
 0x115   : > { %v3784_v62 = vpop.permute.xlu2 %694  ;;  %v634_v3 = vsel %vm417_vm0, %v3755_v16, %v632_v61  ;;  %v645_v12 = vsel %vm429_vm2, %v640_v60, %v3766_v33  ;;  %v668_v16 = vstv %s2917_s18  ;;  %s2927_s18 = sld [smem:[#allocation4 + $0x1e]]  ;;  %v730_v61 = vstv %s2922_s30 }
 0x116   : > { %v636_v6 = vmul.f32 %v635_v2, %v634_v3  ;;  %v647_v18 = vmul.f32 %v646_v11, %v645_v12  ;;  %s3864_s30 = sld [smem:[#allocation4 + $0x23]] }
 0x118   : > { %v637_v15 = vadd.f32 %v636_v6, %v626_v10 }
 0x11a   : > { %904 = vrot.lane.b32.xlu1 %v2941_v59, %s3470_s24  ;;  %901 = vrot.lane.b32.xlu0 %v2940_v58, %s3470_s24  ;;  %v648_v21 = vadd.f32 %v647_v18, %v637_v15 }
 0x11b   : > { %912 = vrot.lane.b32.xlu2 %v2940_v58, %s5410_s25  ;;  %v762_v6 = vstv %s2927_s18  ;;  %s3879_s18 = sld [smem:[#allocation12 + $0x5]] }
 0x11c   : > { %v654_v63 = vpop.permute.xlu1 %653  ;;  %v651_v0 = vpop.permute.xlu0 %650 }
 0x11d   : > { %v709_v1 = vpop.permute.xlu2 %708  ;;  %v656_v14 = vsel %vm441_vm3, %v651_v0, %v654_v63 }
 0x11e   : > { %v658_v19 = vmul.f32 %v657_v13, %v656_v14 }
 0x120   : > { %v659_v26 = vadd.f32 %v658_v19, %v648_v21  ;;  %v795_v21 = vstv %s3849_s10  ;;  %s3897_s10 = sld [smem:[#allocation12 + $0x6]] }
 0x122   : > { %923 = vrot.lane.b32.xlu1 %v2940_v58, %s3472_s26  ;;  %915 = vrot.lane.b32.xlu0 %v2941_v59, %s5410_s25 }
 0x123   : > { %926 = vrot.lane.b32.xlu2 %v2941_v59, %s3472_s26 }
 0x124   : > { %v673_v7 = vpop.permute.xlu1 %672  ;;  %v665_v8 = vpop.permute.xlu0 %664 }
 0x125   : > { %v3795_v9 = vpop.permute.xlu2 %733  ;;  %v667_v17 = vsel %vm453_vm4, %v662_v49, %v665_v8  ;;  %v678_v28 = vsel %vm465_vm5, %v673_v7, %v676_v57 }
 0x126   : > { %v669_v22 = vmul.f32 %v668_v16, %v667_v17  ;;  %v680_v33 = vmul.f32 %v679_v27, %v678_v28  ;;  %v3888_v27 = vld [vmem:[%s3612_s20 + $0x41] sm:$0x7]  ;;  %v806_v28 = vstv %s3859_s12  ;;  %s3910_s12 = sld [smem:[#allocation12 + $0x3]] }
 0x128   : > { %v670_v31 = vadd.f32 %v669_v22, %v659_v26 }
 0x12a   : > { %937 = vrot.lane.b32.xlu1 %v2941_v59, %s3477_s19  ;;  %934 = vrot.lane.b32.xlu0 %v2940_v58, %s3477_s19  ;;  %v681_v36 = vadd.f32 %v680_v33, %v670_v31  ;;  %v740_v59 = vstv %s2925_s14  ;;  %s3862_s14 = sld [smem:[#allocation12 + $0x8]] }
 0x12b   : > { %951 = vrot.lane.b32.xlu2 %v2947_v20, %s3476_s16 }
 0x12c   : > { %v687_v23 = vpop.permute.xlu1 %686  ;;  %v684_v24 = vpop.permute.xlu0 %683 }
 0x12d   : > { %v3805_v25 = vpop.permute.xlu2 %747  ;;  %v689_v30 = vsel %vm477_vm6, %v684_v24, %v687_v23  ;;  %v3877_v23 = vld [vmem:[%s3612_s20 + $0x40] sm:$0x7] }
 0x12e   : > { %v691_v34 = vmul.f32 %v690_v29, %v689_v30 }
 0x130   : > { %v692_v43 = vadd.f32 %v691_v34, %v681_v36 }
 0x132   : > { %962 = vrot.lane.b32.xlu1 %v2947_v20, %s3470_s24  ;;  %955 = vrot.lane.b32.xlu0 %v2948_v32, %s3476_s16 }
 0x133   : > { %965 = vrot.lane.b32.xlu2 %v2948_v32, %s3470_s24 }
 0x134   : > { %v706_v37 = vpop.permute.xlu1 %705  ;;  %v698_v38 = vpop.permute.xlu0 %697 }
 0x135   : > { %v711_v40 = vsel %vm501_vm7, %v706_v37, %v709_v1  ;;  %v700_v41 = vsel %vm489_vm8, %v3784_v62, %v698_v38  ;;  %v767_v42 = vpop.permute.xlu2 %766 }
 0x136   : > { %v702_v44 = vmul.f32 %v701_v35, %v700_v41  ;;  %v713_v45 = vmul.f32 %v712_v39, %v711_v40  ;;  %v1803_v41 = vstv %s3879_s18  ;;  %s4001_s18 = sld [smem:[#allocation6 + $0x7]] }
 0x138   : > { %v703_v46 = vadd.f32 %v702_v44, %v692_v43  ;;  %v1802_v43 = vld [vmem:[#allocation2 + $0x4] sm:$0x7] }
 0x13a   : > { %v714_v47 = vadd.f32 %v713_v45, %v703_v46  ;;  %976 = vrot.lane.b32.xlu1 %v2948_v32, %s5410_s25  ;;  %973 = vrot.lane.b32.xlu0 %v2947_v20, %s5410_s25  ;;  %v1799_v45 = vstv %s3854_s17  ;;  %v1820_v46 = vstv %s3862_s14  ;;  %s3968_s17 = sld [smem:[#allocation6 + $0x4]]  ;;  %s5505_s14 = smov 126  }
 0x13b   : > { %984 = vrot.lane.b32.xlu2 %v2947_v20, %s3472_s26 }
 0x13c   : > { %716 = vst [vmem:[#allocation2 + $0x8] sm:$0x7] %v714_v47  ;;  %v727_v48 = vpop.permute.xlu1 %726  ;;  %v723_v49 = vpop.permute.xlu0 %722  ;;  %v1778_v47 = vld [vmem:[#allocation2] sm:$0x7] }
 0x13d   : > { %v781_v50 = vpop.permute.xlu2 %780  ;;  %v729_v62 = vsel %vm406_vm1, %v723_v49, %v727_v48  ;;  %v1798_v48 = vld [vmem:[#allocation2] sm:$0x7] }
 0x13e   : > { %v731_v3 = vmul.f32 %v730_v61, %v729_v62 }
 0x142   : > { %995 = vrot.lane.b32.xlu1 %v2947_v20, %s3477_s19  ;;  %987 = vrot.lane.b32.xlu0 %v2948_v32, %s3472_s26 }
 0x143   : > { %998 = vrot.lane.b32.xlu2 %v2948_v32, %s3477_s19  ;;  %v817_v32 = vstv %s3864_s30  ;;  %s3916_s30 = sld [smem:[#allocation12 + $0xb]] }
 0x144   : > { %v745_v51 = vpop.permute.xlu1 %744  ;;  %v737_v52 = vpop.permute.xlu0 %736 }
 0x145   : > { %v3822_v53 = vpop.permute.xlu2 %799  ;;  %v739_v60 = vsel %vm417_vm0, %v3795_v9, %v737_v52  ;;  %v750_v5 = vsel %vm429_vm2, %v745_v51, %v3805_v25  ;;  %v773_v9 = vstv %s2928_s13  ;;  %s3881_s13 = sld [smem:[#allocation12 + $0x9]]  ;;  %v1845_v52 = vstv %s3883_s28 }
 0x146   : > { %v741_v63 = vmul.f32 %v740_v59, %v739_v60  ;;  %v752_v11 = vmul.f32 %v751_v4, %v750_v5  ;;  %v1787_v59 = vld [vmem:[#allocation2 + $0x8] sm:$0x7]  ;;  %s3941_s28 = sld [smem:[#allocation6 + $0x1]] }
 0x147   : > { %v1807_v60 = vld [vmem:[#allocation2 + $0x8] sm:$0x7] }
 0x148   : > { %v742_v8 = vadd.f32 %v741_v63, %v731_v3  ;;  %v1841_v63 = vstv %s3868_s15  ;;  %v1828_v3 = vld [vmem:[#allocation2 + $0x8] sm:$0x7]  ;;  %s3995_s15 = sld [smem:[#allocation6 + $0x6]] }
 0x14a   : > { %1016 = vrot.lane.b32.xlu1 %v3825_v54, %s3476_s16  ;;  %1012 = vrot.lane.b32.xlu0 %v2954_v55, %s3476_s16  ;;  %s3844_s16 = sld [smem:[#allocation4 + $0x20]]  ;;  %v753_v13 = vadd.f32 %v752_v11, %v742_v8 }
 0x14b   : > { %1023 = vrot.lane.b32.xlu2 %v2954_v55, %s3470_s24  ;;  %v1824_v51 = vstv %s3881_s13  ;;  %s4006_s13 = sld [smem:[#allocation6 + $0x8]] }
 0x14c   : > { %v759_v56 = vpop.permute.xlu1 %758  ;;  %v756_v57 = vpop.permute.xlu0 %755 }
 0x14d   : > { %v3832_v58 = vpop.permute.xlu2 %813  ;;  %v761_v7 = vsel %vm441_vm3, %v756_v57, %v759_v56  ;;  %v1804_v56 = vmul.f32 %v1803_v41, %v1802_v43 }
 0x14e   : > { %v763_v12 = vmul.f32 %v762_v6, %v761_v7  ;;  %v1800_v6 = vmul.f32 %v1799_v45, %v1798_v48  ;;  %v846_v48 = vstv %s3941_s28  ;;  %s4531_s28 = sld [smem:[#allocation6 + $0xa]] }
 0x150   : > { %v764_v18 = vadd.f32 %v763_v12, %v753_v13  ;;  %v784_v19 = vstv %s3844_s16  ;;  %s3890_s16 = sld [smem:[#allocation12 + $0x2]] }
 0x152   : > { %1034 = vrot.lane.b32.xlu1 %v2954_v55, %s5410_s25  ;;  %1026 = vrot.lane.b32.xlu0 %v3825_v54, %s3470_s24  ;;  %s3851_s24 = sld [smem:[#allocation12]] }
 0x153   : > { %1037 = vrot.lane.b32.xlu2 %v3825_v54, %s5410_s25 }
 0x154   : > { %v778_v0 = vpop.permute.xlu1 %777  ;;  %v770_v1 = vpop.permute.xlu0 %769 }
 0x155   : > { %v3842_v2 = vpop.permute.xlu2 %839  ;;  %v772_v10 = vsel %vm453_vm4, %v767_v42, %v770_v1  ;;  %v783_v20 = vsel %vm465_vm5, %v778_v0, %v781_v50  ;;  %v1782_v42 = vld [vmem:[#allocation2 + $0x4] sm:$0x7]  ;;  %v1819_v50 = vld [vmem:[#allocation2] sm:$0x7]  ;;  %v1829_v1 = vstv %s3899_s11  ;;  %s3944_s11 = sld [smem:[#allocation6]] }
 0x156   : > { %v774_v14 = vmul.f32 %v773_v9, %v772_v10  ;;  %v785_v25 = vmul.f32 %v784_v19, %v783_v20  ;;  %v1788_v57 = vstv %s3890_s16  ;;  %v1840_v0 = vld [vmem:[#allocation2] sm:$0x7]  ;;  %v1849_v9 = vld [vmem:[#allocation2 + $0x8] sm:$0x7]  ;;  %v1821_v10 = vmul.f32 %v1820_v46, %v1819_v50  ;;  %s4014_s16 = sld [smem:[#allocation6 + $0x9]] }
 0x157   : > { %v1789_v12 = vmul.f32 %v1788_v57, %v1787_v59  ;;  %v1793_v20 = vstv %s3910_s12  ;;  %s4045_s12 = sld [smem:[#allocation6 + $0xc]] }
 0x158   : > { %v775_v24 = vadd.f32 %v774_v14, %v764_v18  ;;  %v1779_v44 = vstv %s3851_s24  ;;  %v1842_v14 = vmul.f32 %v1841_v63, %v1840_v0  ;;  %v1830_v18 = vmul.f32 %v1829_v1, %v1828_v3  ;;  %s5412_s24 = smov 46  }
 0x159   : > { %v1780_v5 = vmul.f32 %v1779_v44, %v1778_v47  ;;  %v880_v63 = vstv %s3968_s17  ;;  %s4555_s17 = sld [smem:[#allocation6 + $0xe]] }
 0x15a   : > { %1048 = vrot.lane.b32.xlu1 %v3825_v54, %s3472_s26  ;;  %1045 = vrot.lane.b32.xlu0 %v2954_v55, %s3472_s26  ;;  %s3870_s26 = sld [smem:[#allocation12 + $0x1]]  ;;  %v786_v29 = vadd.f32 %v785_v25, %v775_v24 }
 0x15b   : > { %1056 = vrot.lane.b32.xlu2 %v2954_v55, %s3477_s19  ;;  %v836_v50 = vstv %s3944_s11  ;;  %s4535_s11 = sld [smem:[#allocation6 + $0xb]] }
 0x15c   : > { %v792_v15 = vpop.permute.xlu1 %791  ;;  %v789_v16 = vpop.permute.xlu0 %788 }
 0x15d   : > { %v3866_v17 = vpop.permute.xlu2 %853  ;;  %v794_v22 = vsel %vm477_vm6, %v789_v16, %v792_v15  ;;  %v1805_v16 = vadd.f32 %v1804_v56, %v1800_v6  ;;  %5508 = sst [smem:[#allocation22_spill]] %s4045_s12 }
 0x15e   : > { %v796_v26 = vmul.f32 %v795_v21, %v794_v22  ;;  %v1813_v21 = vstv %s3912_s22  ;;  %v1834_v22 = vstv %s3916_s30  ;;  %s3954_s22 = sld [smem:[#allocation6 + $0x2]] }
 0x15f   : > { %s4049_s30 = sld [smem:[#allocation6 + $0xd]] }
 0x160   : > { %v797_v36 = vadd.f32 %v796_v26, %v786_v29  ;;  %v1783_v40 = vstv %s3870_s26  ;;  %s3997_s26 = sld [smem:[#allocation6 + $0x5]] }
 0x161   : > { %v1784_v55 = vmul.f32 %v1783_v40, %v1782_v42  ;;  %5550 = sst [smem:[#allocation22_spill]] %s4531_s28 }
 0x162   : > { %1073 = vrot.lane.b32.xlu1 %v3877_v23, %s5408_s23  ;;  %1059 = vrot.lane.b32.xlu0 %v3825_v54, %s3477_s19  ;;  %s3908_s19 = sld [smem:[#allocation12 + $0xe]]  ;;  %v1844_v54 = vld [vmem:[#allocation2 + $0x4] sm:$0x7] }
 0x163   : > { %1077 = vrot.lane.b32.xlu2 %v3888_v27, %s5408_s23  ;;  %s3921_s23 = sld [smem:[#allocation12 + $0xf]]  ;;  %v1846_v11 = vmul.f32 %v1845_v52, %v1844_v54  ;;  %v1785_v15 = vadd.f32 %v1784_v55, %v1780_v5  ;;  %v2967_v52 = vld [vmem:[%s3612_s20 + $0x48] sm:$0x7] }
 0x164   : > { %v811_v30 = vpop.permute.xlu1 %810  ;;  %v803_v31 = vpop.permute.xlu0 %802  ;;  %v857_v57 = vstv %s3954_s22  ;;  %s4551_s22 = sld [smem:[#allocation6 + $0xd]] }
 0x165   : > { %v816_v33 = vsel %vm501_vm7, %v811_v30, %v3832_v58  ;;  %v805_v34 = vsel %vm489_vm8, %v3822_v53, %v803_v31  ;;  %v3906_v35 = vpop.permute.xlu2 %872  ;;  %v1823_v53 = vld [vmem:[#allocation2 + $0x4] sm:$0x7]  ;;  %v1808_v58 = vstv %s3897_s10  ;;  %v1847_v26 = vadd.f32 %v1846_v11, %v1842_v14  ;;  %s4041_s10 = sld [smem:[#allocation6 + $0xb]] }
 0x166   : > { %v807_v37 = vmul.f32 %v806_v28, %v805_v34  ;;  %v818_v38 = vmul.f32 %v817_v32, %v816_v33  ;;  %v1825_v7 = vmul.f32 %v1824_v51, %v1823_v53  ;;  %v1809_v13 = vmul.f32 %v1808_v58, %v1807_v60  ;;  %v2968_v60 = vld [vmem:[%s3612_s20 + $0x49] sm:$0x7]  ;;  %5509 = sst [smem:[#allocation23_spill]] %s4049_s30 }
 0x167   : > { %v1790_v28 = vadd.f32 %v1789_v12, %v1785_v15  ;;  %v908_v11 = vstv %s3995_s15  ;;  %5551 = sst [smem:[#allocation23_spill]] %s4535_s11 }
 0x168   : > { %v808_v39 = vadd.f32 %v807_v37, %v797_v36  ;;  %v1850_v8 = vstv %s3908_s19  ;;  %v1826_v24 = vadd.f32 %v1825_v7, %v1821_v10  ;;  %v1810_v29 = vadd.f32 %v1809_v13, %v1805_v16  ;;  %s4043_s19 = sld [smem:[#allocation6 + $0xa]] }
 0x169   : > { %v1851_v19 = vmul.f32 %v1850_v8, %v1849_v9  ;;  %v1855_v25 = vstv %s3921_s23  ;;  %s3956_s23 = sld [smem:[#allocation6 + $0x3]]  ;;  %v898_v13 = vstv %s3997_s26  ;;  %v919_v16 = vstv %s4001_s18  ;;  %s5537_s26 = smov 67  }
 0x16a   : > { %v819_v49 = vadd.f32 %v818_v38, %v808_v39  ;;  %1088 = vrot.lane.b32.xlu1 %v3888_v27, %s3467_s21  ;;  %1085 = vrot.lane.b32.xlu0 %v3877_v23, %s3467_s21  ;;  %v1831_v33 = vadd.f32 %v1830_v18, %v1826_v24  ;;  %5554 = sst [smem:[#allocation26_spill]] %s4555_s17 }
 0x16b   : > { %1096 = vrot.lane.b32.xlu2 %v3877_v23, %s5410_s25  ;;  %v1852_v41 = vadd.f32 %v1851_v19, %v1847_v26  ;;  %5506 = sst [smem:[#allocation20_spill]] %s4041_s10 }
 0x16c   : > { %821 = vst [vmem:[#allocation2 + $0xc] sm:$0x7] %v819_v49  ;;  %v832_v61 = vpop.permute.xlu1 %831  ;;  %v828_v62 = vpop.permute.xlu0 %827  ;;  %s4594_s15 = sld [smem:[#allocation6 + $0x11]] }
 0x16d   : > { %v3935_v4 = vpop.permute.xlu2 %894  ;;  %v835_v51 = vsel %vm834_vm9, %v828_v62, %v832_v61  ;;  %s4596_s18 = sld [smem:[#allocation6 + $0x12]] }
 0x16e   : > { %v837_v56 = vmul.f32 %v836_v50, %v835_v51  ;;  %5507 = sst [smem:[#allocation21_spill]] %s4043_s19  ;;  %v959_v51 = vstv %s4043_s19 }
 0x16f   : > { %v868_v58 = vstv %s3956_s23  ;;  %s4159_s19 = sld [smem:[#allocation14 + $0xe]]  ;;  %s5534_s23 = smov 105  }
 0x172   : > { %1107 = vrot.lane.b32.xlu1 %v3877_v23, %s3474_s29  ;;  %1099 = vrot.lane.b32.xlu0 %v3888_v27, %s5410_s25  ;;  %5558 = sst [smem:[#allocation29_spill]] %s4594_s15 }
 0x173   : > { %v1792_v30 = vld [vmem:[#allocation2 + $0xc] sm:$0x7]  ;;  %1110 = vrot.lane.b32.xlu2 %v3888_v27, %s3474_s29 }
 0x174   : > { %v1812_v31 = vld [vmem:[#allocation2 + $0xc] sm:$0x7]  ;;  %v1794_v34 = vmul.f32 %v1793_v20, %v1792_v30  ;;  %v851_v39 = vpop.permute.xlu1 %850  ;;  %v843_v40 = vpop.permute.xlu0 %842 }
 0x175   : > { %v1833_v32 = vld [vmem:[#allocation2 + $0xc] sm:$0x7]  ;;  %v1814_v36 = vmul.f32 %v1813_v21, %v1812_v31  ;;  %v3952_v43 = vpop.permute.xlu2 %912  ;;  %v845_v49 = vsel %vm441_vm3, %v3842_v2, %v843_v40  ;;  %5521 = sst [smem:[#allocation32_spill]] %s4159_s19 }
 0x176   : > { %v1835_v37 = vmul.f32 %v1834_v22, %v1833_v32  ;;  %v1854_v38 = vld [vmem:[#allocation2 + $0xc] sm:$0x7]  ;;  %v1795_v44 = vadd.f32 %v1794_v34, %v1790_v28  ;;  %v847_v2 = vmul.f32 %v846_v48, %v845_v49  ;;  %v930_v28 = vstv %s4006_s13  ;;  %s4600_s13 = sld [smem:[#allocation14 + $0x4]] }
 0x177   : > { %v1856_v42 = vmul.f32 %v1855_v25, %v1854_v38  ;;  %v1815_v45 = vadd.f32 %v1814_v36, %v1810_v29  ;;  %v2974_v25 = vld [vmem:[%s3612_s20 + $0x50] sm:$0x7]  ;;  %v941_v32 = vstv %s4014_s16  ;;  %s3482_s16 = smov 48  }
 0x178   : > { %v1836_v46 = vadd.f32 %v1835_v37, %v1831_v33  ;;  %1796 = vst [vmem:[#allocation3] sm:$0x7] %v1795_v44  ;;  %v848_v59 = vadd.f32 %v847_v2, %v837_v56  ;;  %v980_v2 = vstv %s4045_s12  ;;  %s4137_s12 = sld [smem:[#allocation14 + $0x2]] }
 0x179   : > { %v1857_v47 = vadd.f32 %v1856_v42, %v1852_v41  ;;  %1817 = vst [vmem:[#allocation3 + $0x4] sm:$0x7] %v1815_v45 }
 0x17a   : > { %1838 = vst [vmem:[#allocation3 + $0x8] sm:$0x7] %v1836_v46  ;;  %1121 = vrot.lane.b32.xlu1 %v3888_v27, %s5412_s24  ;;  %1118 = vrot.lane.b32.xlu0 %v3877_v23, %s5412_s24  ;;  %v856_v27 = vsel %vm453_vm4, %v851_v39, %v3866_v17 }
 0x17b   : > { %1859 = vst [vmem:[#allocation3 + $0xc] sm:$0x7] %v1857_v47  ;;  %1136 = vrot.lane.b32.xlu2 %v2967_v52, %s5505_s14  ;;  %v858_v61 = vmul.f32 %v857_v57, %v856_v27  ;;  %v969_v47 = vstv %s4041_s10  ;;  %s4178_s10 = sld [smem:[#allocation14 + $0xb]] }
 0x17c   : > { %v865_v53 = vpop.permute.xlu1 %864  ;;  %v862_v54 = vpop.permute.xlu0 %861  ;;  %5560 = sst [smem:[#allocation32_spill]] %s4600_s13 }
 0x17d   : > { %v927_v55 = vpop.permute.xlu2 %926  ;;  %v867_v23 = vsel %vm465_vm5, %v862_v54, %v865_v53  ;;  %v859_v0 = vadd.f32 %v858_v61, %v848_v59  ;;  %v2981_v54 = vld [vmem:[%s3612_s20 + $0x58] sm:$0x7] }
 0x17e   : > { %v869_v62 = vmul.f32 %v868_v58, %v867_v23  ;;  %v2982_v23 = vld [vmem:[%s3612_s20 + $0x59] sm:$0x7] }
 0x180   : > { %v870_v6 = vadd.f32 %v869_v62, %v859_v0 }
 0x182   : > { %1147 = vrot.lane.b32.xlu1 %v2967_v52, %s3467_s21  ;;  %1140 = vrot.lane.b32.xlu0 %v2968_v60, %s5505_s14 }
 0x183   : > { %1150 = vrot.lane.b32.xlu2 %v2968_v60, %s3467_s21 }
 0x184   : > { %v891_v1 = vpop.permute.xlu1 %890  ;;  %v876_v3 = vpop.permute.xlu0 %875 }
 0x185   : > { %v879_v17 = vsel %vm878_vm10, %v3906_v35, %v876_v3  ;;  %v3991_v5 = vpop.permute.xlu2 %951  ;;  %v897_v14 = vsel %vm834_vm9, %v891_v1, %v3935_v4  ;;  %v2975_v4 = vld [vmem:[%s3612_s20 + $0x51] sm:$0x7] }
 0x186   : > { %v881_v7 = vmul.f32 %v880_v63, %v879_v17  ;;  %v899_v22 = vmul.f32 %v898_v13, %v897_v14 }
 0x188   : > { %v882_v8 = vadd.f32 %v881_v7, %v870_v6 }
 0x18a   : > { %884 = vst [vmem:[#allocation2 + $0x10] sm:$0x7] %v882_v8  ;;  %1161 = vrot.lane.b32.xlu1 %v2968_v60, %s5410_s25  ;;  %1158 = vrot.lane.b32.xlu0 %v2967_v52, %s5410_s25 }
 0x18b   : > { %1169 = vrot.lane.b32.xlu2 %v2967_v52, %s3474_s29 }
 0x18c   : > { %v905_v9 = vpop.permute.xlu1 %904  ;;  %v902_v35 = vpop.permute.xlu0 %901 }
 0x18d   : > { %v966_v10 = vpop.permute.xlu2 %965  ;;  %v907_v12 = vsel %vm441_vm3, %v902_v35, %v905_v9 }
 0x18e   : > { %v909_v18 = vmul.f32 %v908_v11, %v907_v12 }
 0x190   : > { %v910_v26 = vadd.f32 %v909_v18, %v899_v22  ;;  %v1020_v22 = vstv %s4093_s0  ;;  %s4149_s0 = sld [smem:[#allocation14 + $0xa]] }
 0x192   : > { %1180 = vrot.lane.b32.xlu1 %v2967_v52, %s5412_s24  ;;  %1172 = vrot.lane.b32.xlu0 %v2968_v60, %s3474_s29 }
 0x193   : > { %1183 = vrot.lane.b32.xlu2 %v2968_v60, %s5412_s24  ;;  %v991_v60 = vstv %s4049_s30  ;;  %s4133_s30 = sld [smem:[#allocation14 + $0xd]] }
 0x194   : > { %v924_v15 = vpop.permute.xlu1 %923  ;;  %v916_v19 = vpop.permute.xlu0 %915 }
 0x195   : > { %v985_v20 = vpop.permute.xlu2 %984  ;;  %v918_v21 = vsel %vm453_vm4, %v3952_v43, %v916_v19  ;;  %v929_v29 = vsel %vm465_vm5, %v924_v15, %v927_v55 }
 0x196   : > { %v920_v24 = vmul.f32 %v919_v16, %v918_v21  ;;  %v931_v33 = vmul.f32 %v930_v28, %v929_v29  ;;  %v4117_v21 = vld [vmem:[%s3612_s20 + $0x60] sm:$0x7] }
 0x198   : > { %v921_v30 = vadd.f32 %v920_v24, %v910_v26 }
 0x19a   : > { %1201 = vrot.lane.b32.xlu1 %v2975_v4, %s5505_s14  ;;  %1197 = vrot.lane.b32.xlu0 %v2974_v25, %s5505_s14  ;;  %v932_v38 = vadd.f32 %v931_v33, %v921_v30 }
 0x19b   : > { %1208 = vrot.lane.b32.xlu2 %v2974_v25, %s3467_s21 }
 0x19c   : > { %v938_v31 = vpop.permute.xlu1 %937  ;;  %v935_v34 = vpop.permute.xlu0 %934 }
 0x19d   : > { %v999_v36 = vpop.permute.xlu2 %998  ;;  %v940_v37 = vsel %vm878_vm10, %v935_v34, %v938_v31  ;;  %v1041_v31 = vstv %s4102_s2  ;;  %v1052_v34 = vstv %s4104_s3  ;;  %s4167_s3 = sld [smem:[#allocation14 + $0x3]] }
 0x19e   : > { %v942_v39 = vmul.f32 %v941_v32, %v940_v37  ;;  %v4145_v37 = vld [vmem:[%s3612_s20 + $0x61] sm:$0x7]  ;;  %s4171_s2 = sld [smem:[#allocation14 + $0x7]] }
 0x1a0   : > { %v943_v40 = vadd.f32 %v942_v39, %v932_v38 }
 0x1a2   : > { %945 = vst [vmem:[#allocation2 + $0x14] sm:$0x7] %v943_v40  ;;  %1219 = vrot.lane.b32.xlu1 %v2974_v25, %s5410_s25  ;;  %1211 = vrot.lane.b32.xlu0 %v2975_v4, %s3467_s21 }
 0x1a3   : > { %1222 = vrot.lane.b32.xlu2 %v2975_v4, %s5410_s25  ;;  %s4059_s25 = sld [smem:[#allocation6 + $0xe]] }
 0x1a4   : > { %v963_v41 = vpop.permute.xlu1 %962  ;;  %v956_v42 = vpop.permute.xlu0 %955  ;;  %5522 = sst [smem:[#allocation33_spill]] %s4167_s3 }
 0x1a5   : > { %v1024_v43 = vpop.permute.xlu2 %1023  ;;  %v968_v49 = vsel %vm441_vm3, %v963_v41, %v966_v10  ;;  %v958_v52 = vsel %vm834_vm9, %v3991_v5, %v956_v42  ;;  %v1063_v42 = vstv %s4121_s7  ;;  %5523 = sst [smem:[#allocation34_spill]] %s4171_s2 }
 0x1a6   : > { %v970_v55 = vmul.f32 %v969_v47, %v968_v49  ;;  %v960_v56 = vmul.f32 %v959_v51, %v958_v52  ;;  %v1886_v49 = vstv %s4100_s1  ;;  %v1909_v52 = vstv %s4106_s4  ;;  %s4192_s7 = sld [smem:[#allocation14 + $0xf]]  ;;  %s5524_s4 = smov 65  }
 0x1a7   : > { %s4621_s1 = sld [smem:[#allocation14 + $0x5]] }
 0x1a8   : > { %v971_v61 = vadd.f32 %v970_v55, %v960_v56 }
 0x1a9   : > { %5510 = sst [smem:[#allocation24_spill]] %s4059_s25  ;;  %v1002_v1 = vstv %s4059_s25 }
 0x1aa   : > { %1233 = vrot.lane.b32.xlu1 %v2975_v4, %s3474_s29  ;;  %1230 = vrot.lane.b32.xlu0 %v2974_v25, %s3474_s29  ;;  %s4125_s25 = sld [smem:[#allocation14 + $0x5]] }
 0x1ab   : > { %1241 = vrot.lane.b32.xlu2 %v2974_v25, %s5412_s24 }
 0x1ac   : > { %v977_v44 = vpop.permute.xlu1 %976  ;;  %v974_v45 = vpop.permute.xlu0 %973 }
 0x1ad   : > { %v4052_v46 = vpop.permute.xlu2 %1037  ;;  %v979_v53 = vsel %vm453_vm4, %v974_v45, %v977_v44  ;;  %v1862_v44 = vld [vmem:[#allocation2 + $0x10] sm:$0x7]  ;;  %5565 = sst [smem:[#allocation38_spill]] %s4621_s1 }
 0x1ae   : > { %v981_v27 = vmul.f32 %v980_v2, %v979_v53  ;;  %v1885_v53 = vld [vmem:[#allocation2 + $0x10] sm:$0x7] }
 0x1b0   : > { %v982_v5 = vadd.f32 %v981_v27, %v971_v61  ;;  %5520 = sst [smem:[#allocation31_spill]] %s4125_s25  ;;  %v1932_v27 = vstv %s4108_s5 }
 0x1b1   : > { %5559 = sst [smem:[#allocation31_spill]] %s4596_s18 }
 0x1b2   : > { %1258 = vrot.lane.b32.xlu1 %v2981_v54, %s5505_s14  ;;  %1244 = vrot.lane.b32.xlu0 %v2975_v4, %s5412_s24  ;;  %s4089_s24 = sld [smem:[#allocation6 + $0x10]] }
 0x1b3   : > { %1262 = vrot.lane.b32.xlu2 %v2982_v23, %s5505_s14  ;;  %s5511_s14 = smov 86   ;;  %s4623_s5 = sld [smem:[#allocation14 + $0x9]] }
 0x1b4   : > { %v996_v59 = vpop.permute.xlu1 %995  ;;  %v988_v62 = vpop.permute.xlu0 %987 }
 0x1b5   : > { %v4075_v0 = vpop.permute.xlu2 %1056  ;;  %v1001_v3 = vsel %vm878_vm10, %v996_v59, %v999_v36  ;;  %v990_v17 = vsel %vm465_vm5, %v985_v20, %v988_v62 }
 0x1b6   : > { %v992_v6 = vmul.f32 %v991_v60, %v990_v17  ;;  %v1003_v7 = vmul.f32 %v1002_v1, %v1001_v3  ;;  %v1891_v17 = vstv %s4125_s25  ;;  %s5427_s25 = smov 44  }
 0x1b8   : > { %v993_v8 = vadd.f32 %v992_v6, %v982_v5  ;;  %5512 = sst [smem:[#allocation25_spill]] %s4089_s24  ;;  %v1030_v19 = vstv %s4089_s24  ;;  %v1890_v6 = vld [vmem:[#allocation2 + $0x14] sm:$0x7] }
 0x1b9   : > { %s4147_s24 = sld [smem:[#allocation14 + $0x6]] }
 0x1ba   : > { %v1004_v9 = vadd.f32 %v1003_v7, %v993_v8  ;;  %1272 = vrot.lane.b32.xlu1 %v2982_v23, %s3467_s21  ;;  %1269 = vrot.lane.b32.xlu0 %v2981_v54, %s3467_s21  ;;  %s4096_s21 = sld [smem:[#allocation14]]  ;;  %v1913_v7 = vld [vmem:[#allocation2 + $0x14] sm:$0x7]  ;;  %v1887_v8 = vmul.f32 %v1886_v49, %v1885_v53 }
 0x1bb   : > { %1280 = vrot.lane.b32.xlu2 %v2981_v54, %s5511_s14  ;;  %5553 = sst [smem:[#allocation25_spill]] %s4551_s22 }
 0x1bc   : > { %v1017_v35 = vpop.permute.xlu1 %1016  ;;  %1006 = vst [vmem:[#allocation2 + $0x18] sm:$0x7] %v1004_v9  ;;  %v1013_v10 = vpop.permute.xlu0 %1012  ;;  %5566 = sst [smem:[#allocation39_spill]] %s4623_s5 }
 0x1bd   : > { %v4087_v12 = vpop.permute.xlu2 %1077  ;;  %v1019_v24 = vsel %vm834_vm9, %v1013_v10, %v1017_v35  ;;  %v5429_v35 = vstv %s4133_s30 }
 0x1be   : > { %v1021_v30 = vmul.f32 %v1020_v22, %v1019_v24  ;;  %v5430_v24 = vstv %s4137_s12 }
 0x1c2   : > { %1291 = vrot.lane.b32.xlu1 %v2981_v54, %s3474_s29  ;;  %1283 = vrot.lane.b32.xlu0 %v2982_v23, %s5511_s14 }
 0x1c3   : > { %1294 = vrot.lane.b32.xlu2 %v2982_v23, %s3474_s29  ;;  %s4112_s29 = sld [smem:[#allocation14 + $0x1]] }
 0x1c4   : > { %v1035_v14 = vpop.permute.xlu1 %1034  ;;  %v1027_v15 = vpop.permute.xlu0 %1026 }
 0x1c5   : > { %v4098_v18 = vpop.permute.xlu2 %1096  ;;  %v1029_v20 = vsel %vm441_vm3, %v1024_v43, %v1027_v15  ;;  %v1040_v33 = vsel %vm453_vm4, %v1035_v14, %v4052_v46  ;;  %v1863_v43 = vstv %s4096_s21  ;;  %v1860_v14 = vld [vmem:[#allocation3] sm:$0x7]  ;;  %s4625_s21 = sld [smem:[#allocation14 + $0xd]] }
 0x1c6   : > { %v1031_v25 = vmul.f32 %v1030_v19, %v1029_v20  ;;  %v1042_v39 = vmul.f32 %v1041_v31, %v1040_v33  ;;  %v1864_v62 = vmul.f32 %v1863_v43, %v1862_v44  ;;  %v1936_v20 = vld [vmem:[#allocation2 + $0x14] sm:$0x7]  ;;  %v1892_v33 = vmul.f32 %v1891_v17, %v1890_v6  ;;  %v1906_v44 = vld [vmem:[#allocation3 + $0x8] sm:$0x7] }
 0x1c8   : > { %v1032_v38 = vadd.f32 %v1031_v25, %v1021_v30  ;;  %v5431_v25 = vstv %s4149_s0 }
 0x1c9   : > { %v1868_v3 = vstv %s4112_s29  ;;  %s4499_s29 = sld [smem:[#allocation6 + $0x8]] }
 0x1ca   : > { %1305 = vrot.lane.b32.xlu1 %v2982_v23, %s5517_s6  ;;  %1302 = vrot.lane.b32.xlu0 %v2981_v54, %s5517_s6  ;;  %s4131_s6 = sld [smem:[#allocation14 + $0x9]]  ;;  %v1043_v45 = vadd.f32 %v1042_v39, %v1032_v38  ;;  %v1908_v54 = vld [vmem:[#allocation2 + $0x10] sm:$0x7]  ;;  %v1895_v38 = vld [vmem:[#allocation2 + $0x18] sm:$0x7] }
 0x1cb   : > { %1322 = vrot.lane.b32.xlu2 %v4117_v21, %s5519_s27  ;;  %v1931_v23 = vld [vmem:[#allocation2 + $0x10] sm:$0x7]  ;;  %v1910_v9 = vmul.f32 %v1909_v52, %v1908_v54  ;;  %v1918_v39 = vld [vmem:[#allocation2 + $0x18] sm:$0x7]  ;;  %5567 = sst [smem:[#allocation40_spill]] %s4625_s21 }
 0x1cc   : > { %v1049_v4 = vpop.permute.xlu1 %1048  ;;  %v1046_v26 = vpop.permute.xlu0 %1045  ;;  %v1933_v15 = vmul.f32 %v1932_v27, %v1931_v23  ;;  %v1942_v23 = vstv %s4159_s19  ;;  %s4602_s19 = sld [smem:[#allocation14 + $0x8]] }
 0x1cd   : > { %v4129_v29 = vpop.permute.xlu2 %1110  ;;  %v1051_v36 = vsel %vm465_vm5, %v1046_v26, %v1049_v4  ;;  %v1896_v4 = vstv %s4147_s24  ;;  %v1872_v26 = vld [vmem:[#allocation2 + $0x18] sm:$0x7]  ;;  %v1911_v54 = vadd.f32 %v1910_v9, %v1906_v44  ;;  %v1878_v44 = vstv %s4167_s3  ;;  %s4428_s24 = sld [smem:[#allocation6 + $0x3]] }
 0x1ce   : > { %v1053_v40 = vmul.f32 %v1052_v34, %v1051_v36  ;;  %v1897_v6 = vmul.f32 %v1896_v4, %v1895_v38  ;;  %s4614_s3 = sld [smem:[#allocation14 + $0x1]] }
 0x1cf   : > { %5548 = sst [smem:[#allocation20_spill]] %s4499_s29 }
 0x1d0   : > { %v1054_v59 = vadd.f32 %v1053_v40, %v1043_v45  ;;  %v1914_v5 = vstv %s4131_s6  ;;  %v1883_v40 = vld [vmem:[#allocation3 + $0x4] sm:$0x7]  ;;  %v1865_v45 = vadd.f32 %v1864_v62, %v1860_v14  ;;  %v1874_v62 = vmul.f32 %v5430_v24, %v1872_v26  ;;  %v4229_v24 = vld [vmem:[%s3612_s20 + $0x68] sm:$0x7]  ;;  %s4505_s6 = sld [smem:[#allocation6 + $0x9]] }
 0x1d1   : > { %v1915_v36 = vmul.f32 %v1914_v5, %v1913_v7  ;;  %v1888_v53 = vadd.f32 %v1887_v8, %v1883_v40  ;;  %v1920_v7 = vmul.f32 %v5431_v25, %v1918_v39  ;;  %v1924_v26 = vstv %s4178_s10  ;;  %s4485_s10 = sld [smem:[#allocation6 + $0x6]] }
 0x1d2   : > { %1334 = vrot.lane.b32.xlu1 %v4117_v21, %s5511_s14  ;;  %1326 = vrot.lane.b32.xlu0 %v4145_v37, %s5519_s27  ;;  %v1947_v39 = vstv %s4192_s7  ;;  %s4480_s7 = sld [smem:[#allocation6 + $0x5]] }
 0x1d3   : > { %1337 = vrot.lane.b32.xlu2 %v4145_v37, %s5511_s14  ;;  %v1893_v14 = vadd.f32 %v1892_v33, %v1888_v53  ;;  %5561 = sst [smem:[#allocation33_spill]] %s4602_s19 }
 0x1d4   : > { %v4161_v41 = vpop.permute.xlu1 %1073  ;;  %v1060_v46 = vpop.permute.xlu0 %1059  ;;  %5564 = sst [smem:[#allocation37_spill]] %s4614_s3 }
 0x1d5   : > { %v1062_v55 = vsel %vm878_vm10, %v4075_v0, %v1060_v46  ;;  %v4175_v56 = vpop.permute.xlu2 %1136  ;;  %v1867_v0 = vld [vmem:[#allocation2 + $0x14] sm:$0x7] }
 0x1d6   : > { %v1064_v61 = vmul.f32 %v1063_v42, %v1062_v55  ;;  %v1869_v30 = vmul.f32 %v1868_v3, %v1867_v0  ;;  %v1938_v55 = vmul.f32 %v5429_v35, %v1936_v20  ;;  %v1929_v0 = vld [vmem:[#allocation3 + $0xc] sm:$0x7]  ;;  %v1916_v20 = vadd.f32 %v1915_v36, %v1911_v54  ;;  %5549 = sst [smem:[#allocation21_spill]] %s4505_s6 }
 0x1d7   : > { %v1934_v9 = vadd.f32 %v1933_v15, %v1929_v0  ;;  %v1901_v35 = vstv %s4171_s2  ;;  %v1898_v15 = vadd.f32 %v1897_v6, %v1893_v14 }
 0x1d8   : > { %v1065_v10 = vadd.f32 %v1064_v61, %v1054_v59  ;;  %v1941_v59 = vld [vmem:[#allocation2 + $0x18] sm:$0x7] }
 0x1d9   : > { %v1943_v40 = vmul.f32 %v1942_v23, %v1941_v59  ;;  %v1939_v38 = vadd.f32 %v1938_v55, %v1934_v9 }
 0x1da   : > { %1067 = vst [vmem:[#allocation2 + $0x1c] sm:$0x7] %v1065_v10  ;;  %1348 = vrot.lane.b32.xlu1 %v4145_v37, %s5524_s4  ;;  %1345 = vrot.lane.b32.xlu0 %v4117_v21, %s5524_s4  ;;  %v1870_v10 = vadd.f32 %v1869_v30, %v1865_v45  ;;  %v1921_v30 = vadd.f32 %v1920_v7, %v1916_v20 }
 0x1db   : > { %1356 = vrot.lane.b32.xlu2 %v4117_v21, %s5427_s25  ;;  %s3235_s25 = smul.u32 96, %s5666_s9  ;;  %s5525_s9 = smov 44  }
 0x1dc   : > { %v1089_v46 = vpop.permute.xlu1 %1088  ;;  %v1086_v61 = vpop.permute.xlu0 %1085  ;;  %v1875_v25 = vadd.f32 %v1874_v62, %v1870_v10  ;;  %v2996_v62 = vld [vmem:[%s3612_s20 + $0x69] sm:$0x7] }
 0x1dd   : > { %v4220_v8 = vpop.permute.xlu2 %1150  ;;  %v1091_v53 = vsel %vm417_vm0, %v1086_v61, %v1089_v46  ;;  %v1081_v46 = vsel %vm1080_vm11, %v4161_v41, %v4087_v12  ;;  %s4250_s2 = scalar_lea.vmem %s5526_s8, %s3235_s25  ;;  %v1944_v61 = vadd.f32 %v1943_v40, %v1939_v38  ;;  %s4398_s25 = sld [smem:[#allocation6 + $0x1]] }
 0x1de   : > { %5527 = sst [smem:[#allocation35_spill]] %s4250_s2  ;;  %v1093_v12 = vmul.f32 %v1091_v53, %v846_v48  ;;  %v1083_v40 = vmul.f32 %v1081_v46, %v836_v50  ;;  %v2228_v46 = vld [vmem:[#allocation2 + $0x10] sm:$0x7] }
 0x1df   : > { %s4634_s8 = sld [smem:[#allocation14 + $0x6]] }
 0x1e1   : > { %v1877_v33 = vld [vmem:[#allocation2 + $0x1c] sm:$0x7] }
 0x1e2   : > { %v1900_v36 = vld [vmem:[#allocation2 + $0x1c] sm:$0x7]  ;;  %v1879_v54 = vmul.f32 %v1878_v44, %v1877_v33  ;;  %1377 = vrot.lane.b32.xlu1 %v4229_v24, %s5519_s27  ;;  %1359 = vrot.lane.b32.xlu0 %v4145_v37, %s5525_s9 }
 0x1e3   : > { %v1923_v45 = vld [vmem:[#allocation2 + $0x1c] sm:$0x7]  ;;  %v1902_v59 = vmul.f32 %v1901_v35, %v1900_v36  ;;  %1381 = vrot.lane.b32.xlu2 %v2996_v62, %s5519_s27 }
 0x1e4   : > { %v1925_v0 = vmul.f32 %v1924_v26, %v1923_v45  ;;  %v1946_v55 = vld [vmem:[#allocation2 + $0x1c] sm:$0x7]  ;;  %v1108_v7 = vpop.permute.xlu1 %1107  ;;  %v1880_v37 = vadd.f32 %v1879_v54, %v1875_v25  ;;  %v1100_v41 = vpop.permute.xlu0 %1099  ;;  %v1094_v25 = vadd.f32 %v1093_v12, %v1083_v40 }
 0x1e5   : > { %v1948_v6 = vmul.f32 %v1947_v39, %v1946_v55  ;;  %v1903_v9 = vadd.f32 %v1902_v59, %v1898_v15  ;;  %v1102_v20 = vsel %vm453_vm4, %v4098_v18, %v1100_v41  ;;  %v1170_v33 = vpop.permute.xlu2 %1169  ;;  %v1113_v48 = vsel %vm489_vm8, %v1108_v7, %v4129_v29  ;;  %v4285_v55 = vld [vmem:[%s3612_s20 + $0x70] sm:$0x7]  ;;  %5569 = sst [smem:[#allocation42_spill]] %s4634_s8 }
 0x1e6   : > { %v1926_v10 = vadd.f32 %v1925_v0, %v1921_v30  ;;  %3059 = vst [vmem:[%s4250_s2 + $0x20] sm:$0x7] %v1880_v37  ;;  %v1104_v38 = vmul.f32 %v1102_v20, %v857_v57  ;;  %v1115_v50 = vmul.f32 %v1113_v48, %v868_v58  ;;  %v3003_v0 = vld [vmem:[%s3612_s20 + $0x71] sm:$0x7] }
 0x1e7   : > { %v1949_v14 = vadd.f32 %v1948_v6, %v1944_v61  ;;  %3064 = vst [vmem:[%s4250_s2 + $0x24] sm:$0x7] %v1903_v9 }
 0x1e8   : > { %3069 = vst [vmem:[%s4250_s2 + $0x28] sm:$0x7] %v1926_v10  ;;  %v1105_v15 = vadd.f32 %v1104_v38, %v1094_v25 }
 0x1e9   : > { %3074 = vst [vmem:[%s4250_s2 + $0x2c] sm:$0x7] %v1949_v14 }
 0x1ea   : > { %1392 = vrot.lane.b32.xlu1 %v2996_v62, %s5511_s14  ;;  %1389 = vrot.lane.b32.xlu0 %v4229_v24, %s5511_s14  ;;  %v1116_v29 = vadd.f32 %v1115_v50, %v1105_v15  ;;  %v4317_v50 = vld [vmem:[%s3612_s20 + $0x78] sm:$0x7] }
 0x1eb   : > { %1400 = vrot.lane.b32.xlu2 %v4229_v24, %s5524_s4 }
 0x1ec   : > { %v1122_v57 = vpop.permute.xlu1 %1121  ;;  %v1119_v18 = vpop.permute.xlu0 %1118 }
 0x1ed   : > { %v1125_v30 = vsel %vm1124_vm12, %v1119_v18, %v1122_v57  ;;  %v1184_v36 = vpop.permute.xlu2 %1183 }
 0x1ee   : > { %v1127_v45 = vmul.f32 %v1125_v30, %v880_v63  ;;  %v3010_v30 = vld [vmem:[%s3612_s20 + $0x79] sm:$0x7] }
 0x1f0   : > { %v1128_v53 = vadd.f32 %v1127_v45, %v1116_v29 }
 0x1f2   : > { %1130 = vst [vmem:[#allocation2 + $0x20] sm:$0x7] %v1128_v53  ;;  %1411 = vrot.lane.b32.xlu1 %v4229_v24, %s5525_s9  ;;  %1403 = vrot.lane.b32.xlu0 %v2996_v62, %s5524_s4 }
 0x1f3   : > { %1414 = vrot.lane.b32.xlu2 %v2996_v62, %s5525_s9 }
 0x1f4   : > { %v1148_v54 = vpop.permute.xlu1 %1147  ;;  %v1141_v58 = vpop.permute.xlu0 %1140 }
 0x1f5   : > { %v1209_v59 = vpop.permute.xlu2 %1208  ;;  %v1153_v7 = vsel %vm417_vm0, %v1148_v54, %v4220_v8  ;;  %v1143_v37 = vsel %vm1080_vm11, %v4175_v56, %v1141_v58 }
 0x1f6   : > { %v1155_v12 = vmul.f32 %v1153_v7, %v908_v11  ;;  %v1145_v41 = vmul.f32 %v1143_v37, %v898_v13  ;;  %v3014_v7 = vld [vmem:[%s3612_s20 + $0x80] sm:$0x7] }
 0x1f8   : > { %v1156_v56 = vadd.f32 %v1155_v12, %v1145_v41 }
 0x1f9   : > { %v2229_v63 = vld [vmem:[#allocation2 + $0x20] sm:$0x7] }
 0x1fa   : > { %1435 = vrot.lane.b32.xlu1 %v3003_v0, %s5519_s27  ;;  %1431 = vrot.lane.b32.xlu0 %v4285_v55, %s5519_s27  ;;  %v2230_v61 = vadd.f32 %v2229_v63, %v2228_v46 }
 0x1fb   : > { %1443 = vrot.lane.b32.xlu2 %v4285_v55, %s5511_s14 }
 0x1fc   : > { %v1162_v62 = vpop.permute.xlu1 %1161  ;;  %v1159_v6 = vpop.permute.xlu0 %1158  ;;  %2231 = vst [vmem:[#allocation2 + $0x10] sm:$0x7] %v2230_v61 }
 0x1fd   : > { %v1223_v9 = vpop.permute.xlu2 %1222  ;;  %v1164_v10 = vsel %vm453_vm4, %v1159_v6, %v1162_v62 }
 0x1fe   : > { %v1166_v14 = vmul.f32 %v1164_v10, %v919_v16 }
 0x200   : > { %v1167_v13 = vadd.f32 %v1166_v14, %v1156_v56 }
 0x202   : > { %1454 = vrot.lane.b32.xlu1 %v4285_v55, %s5524_s4  ;;  %1446 = vrot.lane.b32.xlu0 %v3003_v0, %s5511_s14 }
 0x203   : > { %1457 = vrot.lane.b32.xlu2 %v3003_v0, %s5524_s4 }
 0x204   : > { %v1181_v8 = vpop.permute.xlu1 %1180  ;;  %v1173_v20 = vpop.permute.xlu0 %1172 }
 0x205   : > { %v1186_v40 = vsel %vm1124_vm12, %v1181_v8, %v1184_v36  ;;  %v1175_v11 = vsel %vm489_vm8, %v1170_v33, %v1173_v20  ;;  %v1242_v38 = vpop.permute.xlu2 %1241 }
 0x206   : > { %v1177_v16 = vmul.f32 %v1175_v11, %v930_v28  ;;  %v1188_v25 = vmul.f32 %v1186_v40, %v941_v32  ;;  %v2236_v28 = vld [vmem:[#allocation2 + $0x14] sm:$0x7] }
 0x208   : > { %v1178_v48 = vadd.f32 %v1177_v16, %v1167_v13  ;;  %v2244_v13 = vld [vmem:[#allocation2 + $0x18] sm:$0x7] }
 0x20a   : > { %v1189_v15 = vadd.f32 %v1188_v25, %v1178_v48  ;;  %1468 = vrot.lane.b32.xlu1 %v3003_v0, %s5525_s9  ;;  %1465 = vrot.lane.b32.xlu0 %v4285_v55, %s5525_s9 }
 0x20b   : > { %1485 = vrot.lane.b32.xlu2 %v4317_v50, %s5519_s27 }
 0x20c   : > { %1191 = vst [vmem:[#allocation2 + $0x24] sm:$0x7] %v1189_v15  ;;  %v1202_v33 = vpop.permute.xlu1 %1201  ;;  %v1198_v57 = vpop.permute.xlu0 %1197 }
 0x20d   : > { %v1263_v18 = vpop.permute.xlu2 %1262  ;;  %v1204_v58 = vsel %vm1080_vm11, %v1198_v57, %v1202_v33 }
 0x20e   : > { %v1206_v62 = vmul.f32 %v1204_v58, %v959_v51 }
 0x212   : > { %1497 = vrot.lane.b32.xlu1 %v4317_v50, %s5511_s14  ;;  %1489 = vrot.lane.b32.xlu0 %v3010_v30, %s5519_s27  ;;  %s4543_s27 = sld [smem:[#allocation6 + $0xc]] }
 0x213   : > { %1500 = vrot.lane.b32.xlu2 %v3010_v30, %s5511_s14  ;;  %v2237_v32 = vld [vmem:[#allocation2 + $0x24] sm:$0x7] }
 0x214   : > { %v1220_v36 = vpop.permute.xlu1 %1219  ;;  %v1212_v29 = vpop.permute.xlu0 %1211  ;;  %v2238_v45 = vadd.f32 %v2237_v32, %v2236_v28 }
 0x215   : > { %v1281_v53 = vpop.permute.xlu2 %1280  ;;  %v1214_v54 = vsel %vm417_vm0, %v1209_v59, %v1212_v29  ;;  %v1225_v59 = vsel %vm453_vm4, %v1220_v36, %v1223_v9 }
 0x216   : > { %2239 = vst [vmem:[#allocation2 + $0x14] sm:$0x7] %v2238_v45  ;;  %v1216_v0 = vmul.f32 %v1214_v54, %v969_v47  ;;  %v1227_v10 = vmul.f32 %v1225_v59, %v980_v2  ;;  %v3015_v47 = vld [vmem:[%s3612_s20 + $0x81] sm:$0x7]  ;;  %v4388_v59 = vld [vmem:[%s3612_s20 + $0x89] sm:$0x7] }
 0x217   : > { %v1977_v54 = vld [vmem:[#allocation2 + $0x20] sm:$0x7] }
 0x218   : > { %v1217_v37 = vadd.f32 %v1216_v0, %v1206_v62  ;;  %v2023_v62 = vld [vmem:[#allocation2 + $0x20] sm:$0x7]  ;;  %5552 = sst [smem:[#allocation24_spill]] %s4543_s27 }
 0x21a   : > { %1511 = vrot.lane.b32.xlu1 %v3010_v30, %s5524_s4  ;;  %1508 = vrot.lane.b32.xlu0 %v4317_v50, %s5524_s4  ;;  %s3481_s4 = smov 124   ;;  %v1228_v51 = vadd.f32 %v1227_v10, %v1217_v37  ;;  %v1982_v37 = vld [vmem:[#allocation2 + $0x24] sm:$0x7] }
 0x21b   : > { %1519 = vrot.lane.b32.xlu2 %v4317_v50, %s5525_s9  ;;  %v2005_v10 = vld [vmem:[#allocation2 + $0x24] sm:$0x7] }
 0x21c   : > { %v1234_v46 = vpop.permute.xlu1 %1233  ;;  %v1231_v63 = vpop.permute.xlu0 %1230 }
 0x21d   : > { %v1295_v61 = vpop.permute.xlu2 %1294  ;;  %v1236_v6 = vsel %vm489_vm8, %v1231_v63, %v1234_v46  ;;  %v2000_v46 = vld [vmem:[#allocation2 + $0x20] sm:$0x7] }
 0x21e   : > { %v1238_v12 = vmul.f32 %v1236_v6, %v991_v60  ;;  %v1979_v6 = vmul.f32 %v1977_v54, %v1886_v49  ;;  %v1952_v49 = vld [vmem:[#allocation3] sm:$0x7] }
 0x220   : > { %v1239_v8 = vadd.f32 %v1238_v12, %v1228_v51  ;;  %v2028_v51 = vld [vmem:[#allocation2 + $0x24] sm:$0x7] }
 0x222   : > { %1536 = vrot.lane.b32.xlu1 %v3014_v7, %s3481_s4  ;;  %1522 = vrot.lane.b32.xlu0 %v3010_v30, %s5525_s9  ;;  %s4390_s9 = sld [smem:[#allocation6]] }
 0x223   : > { %1540 = vrot.lane.b32.xlu2 %v3015_v47, %s3481_s4 }
 0x224   : > { %v1259_v41 = vpop.permute.xlu1 %1258  ;;  %v1245_v9 = vpop.permute.xlu0 %1244 }
 0x225   : > { %v1247_v14 = vsel %vm1124_vm12, %v1242_v38, %v1245_v9  ;;  %v4349_v56 = vpop.permute.xlu2 %1322 }
 0x226   : > { %v1249_v2 = vmul.f32 %v1247_v14, %v1002_v1  ;;  %v1265_v1 = vsel %vm1080_vm11, %v1259_v41, %v1263_v18  ;;  %v2025_v41 = vmul.f32 %v2023_v62, %v1932_v27  ;;  %v2007_v27 = vmul.f32 %v2005_v10, %v1914_v5 }
 0x227   : > { %v1267_v28 = vmul.f32 %v1265_v1, %v1020_v22 }
 0x228   : > { %v1250_v20 = vadd.f32 %v1249_v2, %v1239_v8  ;;  %v1984_v8 = vmul.f32 %v1982_v37, %v1891_v17  ;;  %v1998_v2 = vld [vmem:[#allocation3 + $0x8] sm:$0x7] }
 0x22a   : > { %1252 = vst [vmem:[#allocation2 + $0x28] sm:$0x7] %v1250_v20  ;;  %1551 = vrot.lane.b32.xlu1 %v3015_v47, %s5534_s23  ;;  %1548 = vrot.lane.b32.xlu0 %v3014_v7, %s5534_s23 }
 0x22b   : > { %1559 = vrot.lane.b32.xlu2 %v3014_v7, %s5511_s14 }
 0x22c   : > { %v1273_v60 = vpop.permute.xlu1 %1272  ;;  %v1270_v40 = vpop.permute.xlu0 %1269 }
 0x22d   : > { %v4356_v11 = vpop.permute.xlu2 %1337  ;;  %v1275_v38 = vsel %vm417_vm0, %v1270_v40, %v1273_v60  ;;  %v5543_v40 = vstv %s4133_s30  ;;  %s4426_s30 = sld [smem:[#allocation6 + $0x2]] }
 0x22e   : > { %v1277_v48 = vmul.f32 %v1275_v38, %v1030_v19  ;;  %v4376_v19 = vld [vmem:[%s3612_s20 + $0x88] sm:$0x7]  ;;  %v2030_v38 = vmul.f32 %v2028_v51, %v5543_v40 }
 0x230   : > { %v1278_v36 = vadd.f32 %v1277_v48, %v1267_v28 }
 0x231   : > { %v2245_v16 = vld [vmem:[#allocation2 + $0x28] sm:$0x7] }
 0x232   : > { %1570 = vrot.lane.b32.xlu1 %v3014_v7, %s5537_s26  ;;  %1562 = vrot.lane.b32.xlu0 %v3015_v47, %s5511_s14  ;;  %v2246_v25 = vadd.f32 %v2245_v16, %v2244_v13  ;;  %v1987_v9 = vld [vmem:[#allocation2 + $0x28] sm:$0x7] }
 0x233   : > { %1573 = vrot.lane.b32.xlu2 %v3015_v47, %s5537_s26  ;;  %v2033_v13 = vld [vmem:[#allocation2 + $0x28] sm:$0x7]  ;;  %v1989_v17 = vmul.f32 %v1987_v9, %v1896_v4 }
 0x234   : > { %v1292_v15 = vpop.permute.xlu1 %1291  ;;  %v1284_v33 = vpop.permute.xlu0 %1283  ;;  %2247 = vst [vmem:[#allocation2 + $0x18] sm:$0x7] %v2246_v25  ;;  %v2021_v25 = vld [vmem:[#allocation3 + $0xc] sm:$0x7] }
 0x235   : > { %v1286_v57 = vsel %vm453_vm4, %v1281_v53, %v1284_v33  ;;  %v4366_v30 = vpop.permute.xlu2 %1356  ;;  %v1297_v18 = vsel %vm489_vm8, %v1292_v15, %v1295_v61  ;;  %v1954_v53 = vld [vmem:[#allocation2 + $0x20] sm:$0x7]  ;;  %v5544_v15 = vstv %s4137_s12  ;;  %v5545_v33 = vstv %s4149_s0  ;;  %s4448_s0 = sld [smem:[#allocation6 + $0x4]] }
 0x236   : > { %v1288_v32 = vmul.f32 %v1286_v57, %v1041_v31  ;;  %v1299_v22 = vmul.f32 %v1297_v18, %v1052_v34  ;;  %v1956_v34 = vmul.f32 %v1954_v53, %v1863_v43  ;;  %v2010_v43 = vld [vmem:[#allocation2 + $0x28] sm:$0x7]  ;;  %v2026_v28 = vadd.f32 %v2025_v41, %v2021_v25  ;;  %s4491_s12 = sld [smem:[#allocation6 + $0x7]] }
 0x237   : > { %v2012_v5 = vmul.f32 %v2010_v43, %v5545_v33  ;;  %v4458_v43 = vld [vmem:[%s3612_s20 + $0x90] sm:$0x7]  ;;  %v1385_v33 = vstv %s4485_s10  ;;  %s4894_s10 = sld [smem:[#allocation9 + $0x19]] }
 0x238   : > { %v1289_v29 = vadd.f32 %v1288_v32, %v1278_v36  ;;  %v1957_v20 = vadd.f32 %v1956_v34, %v1952_v49  ;;  %v1341_v49 = vstv %s4426_s30  ;;  %s4751_s30 = sld [smem:[#allocation8 + $0x9]] }
 0x23a   : > { %1584 = vrot.lane.b32.xlu1 %v3015_v47, %s3482_s16  ;;  %1581 = vrot.lane.b32.xlu0 %v3014_v7, %s3482_s16  ;;  %v1300_v63 = vadd.f32 %v1299_v22, %v1289_v29  ;;  %v1959_v7 = vld [vmem:[#allocation2 + $0x24] sm:$0x7]  ;;  %v2002_v47 = vmul.f32 %v2000_v46, %v1909_v52  ;;  %v1975_v52 = vld [vmem:[#allocation3 + $0x4] sm:$0x7]  ;;  %v2035_v29 = vmul.f32 %v2033_v13, %v1942_v23  ;;  %v1317_v46 = vstv %s4390_s9  ;;  %s4749_s9 = sld [smem:[#allocation8 + $0x5]] }
 0x23b   : > { %1599 = vrot.lane.b32.xlu2 %v4376_v19, %s3481_s4  ;;  %v1961_v14 = vmul.f32 %v1959_v7, %v1868_v3  ;;  %v1980_v60 = vadd.f32 %v1979_v6, %v1975_v52  ;;  %v2031_v22 = vadd.f32 %v2030_v38, %v2026_v28  ;;  %v1330_v7 = vstv %s4398_s25  ;;  %s4738_s25 = sld [smem:[#allocation8 + $0x18]] }
 0x23c   : > { %v1306_v31 = vpop.permute.xlu1 %1305  ;;  %v1303_v45 = vpop.permute.xlu0 %1302  ;;  %v2003_v48 = vadd.f32 %v2002_v47, %v1998_v2  ;;  %v1364_v40 = vstv %s4448_s0  ;;  %v1396_v28 = vstv %s4491_s12  ;;  %s4782_s0 = sld [smem:[#allocation8 + $0x12]] }
 0x23d   : > { %v1308_v58 = vsel %vm1124_vm12, %v1303_v45, %v1306_v31  ;;  %v4383_v0 = vpop.permute.xlu2 %1381  ;;  %v1962_v32 = vadd.f32 %v1961_v14, %v1957_v20  ;;  %v1985_v36 = vadd.f32 %v1984_v8, %v1980_v60  ;;  %v2036_v37 = vadd.f32 %v2035_v29, %v2031_v22 }
 0x23e   : > { %v1310_v61 = vmul.f32 %v1308_v58, %v1063_v42  ;;  %v1964_v42 = vld [vmem:[#allocation2 + $0x28] sm:$0x7]  ;;  %v2008_v18 = vadd.f32 %v2007_v27, %v2003_v48  ;;  %v1352_v14 = vstv %s4428_s24  ;;  %v1407_v29 = vstv %s4499_s29  ;;  %s4770_s24 = sld [smem:[#allocation8 + $0x2]] }
 0x23f   : > { %v1966_v3 = vmul.f32 %v1964_v42, %v5544_v15  ;;  %v1990_v31 = vadd.f32 %v1989_v17, %v1985_v36  ;;  %v1372_v17 = vstv %s4480_s7  ;;  %s4798_s29 = sld [smem:[#allocation8 + $0xf]] }
 0x240   : > { %v1311_v12 = vadd.f32 %v1310_v61, %v1300_v63  ;;  %v2013_v45 = vadd.f32 %v2012_v5, %v2008_v18  ;;  %v2252_v63 = vld [vmem:[#allocation2 + $0x1c] sm:$0x7] }
 0x241   : > { %v1967_v4 = vadd.f32 %v1966_v3, %v1962_v32 }
 0x242   : > { %1313 = vst [vmem:[#allocation2 + $0x2c] sm:$0x7] %v1311_v12  ;;  %1610 = vrot.lane.b32.xlu1 %v4376_v19, %s5534_s23  ;;  %1603 = vrot.lane.b32.xlu0 %v4388_v59, %s3481_s4 }
 0x243   : > { %1613 = vrot.lane.b32.xlu2 %v4388_v59, %s5534_s23 }
 0x244   : > { %v1335_v16 = vpop.permute.xlu1 %1334  ;;  %v1327_v1 = vpop.permute.xlu0 %1326 }
 0x245   : > { %v4422_v57 = vpop.permute.xlu2 %1400  ;;  %v1340_v52 = vsel %vm453_vm4, %v1335_v16, %v4356_v11  ;;  %5582 = sst [smem:[#allocation55_spill]] %s4798_s29 }
 0x246   : > { %v1342_v2 = vmul.f32 %v1341_v49, %v1340_v52  ;;  %s4814_s29 = sld [smem:[#allocation9 + $0x4]] }
 0x249   : > { %v1969_v53 = vld [vmem:[#allocation2 + $0x2c] sm:$0x7] }
 0x24a   : > { %v1992_v54 = vld [vmem:[#allocation2 + $0x2c] sm:$0x7]  ;;  %v1971_v61 = vmul.f32 %v1969_v53, %v1878_v44  ;;  %1624 = vrot.lane.b32.xlu1 %v4388_v59, %s5511_s14  ;;  %1621 = vrot.lane.b32.xlu0 %v4376_v19, %s5511_s14 }
 0x24b   : > { %v2015_v58 = vld [vmem:[#allocation2 + $0x2c] sm:$0x7]  ;;  %v1994_v62 = vmul.f32 %v1992_v54, %v1901_v35  ;;  %v1329_v35 = vsel %vm406_vm1, %v4349_v56, %v1327_v1  ;;  %1632 = vrot.lane.b32.xlu2 %v4376_v19, %s5537_s26  ;;  %v1318_v56 = vmul.f32 %v4117_v21, %v1317_v46  ;;  %v4472_v21 = vld [vmem:[%s3612_s20 + $0x91] sm:$0x7] }
 0x24c   : > { %v2017_v23 = vmul.f32 %v2015_v58, %v1924_v26  ;;  %v2038_v34 = vld [vmem:[#allocation2 + $0x2c] sm:$0x7]  ;;  %v1972_v26 = vadd.f32 %v1971_v61, %v1967_v4  ;;  %v1349_v51 = vpop.permute.xlu1 %1348  ;;  %v1346_v42 = vpop.permute.xlu0 %1345  ;;  %v1331_v9 = vmul.f32 %v1330_v7, %v1329_v35  ;;  %5584 = sst [smem:[#allocation57_spill]] %s4814_s29 }
 0x24d   : > { %v2253_v6 = vld [vmem:[#allocation2 + $0x2c] sm:$0x7]  ;;  %v2040_v10 = vmul.f32 %v2038_v34, %v1947_v39  ;;  %v1995_v12 = vadd.f32 %v1994_v62, %v1990_v31  ;;  %v1415_v39 = vpop.permute.xlu2 %1414  ;;  %v1351_v8 = vsel %vm501_vm7, %v1346_v42, %v1349_v51  ;;  %s4829_s29 = sld [smem:[#allocation9 + $0x10]] }
 0x24e   : > { %v2254_v44 = vadd.f32 %v2253_v6, %v2252_v63  ;;  %v2018_v47 = vadd.f32 %v2017_v23, %v2013_v45  ;;  %3078 = vst [vmem:[%s4250_s2 + $0x30] sm:$0x7] %v1972_v26  ;;  %v1332_v27 = vadd.f32 %v1331_v9, %v1318_v56  ;;  %v1353_v11 = vmul.f32 %v1352_v14, %v1351_v8  ;;  %v3036_v6 = vld [vmem:[%s3612_s20 + $0x99] sm:$0x7] }
 0x24f   : > { %v2041_v41 = vadd.f32 %v2040_v10, %v2036_v37  ;;  %3083 = vst [vmem:[%s4250_s2 + $0x34] sm:$0x7] %v1995_v12  ;;  %v1418_v45 = vstv %s4505_s6  ;;  %v1426_v37 = vstv %s4531_s28  ;;  %v1439_v10 = vstv %s4535_s11  ;;  %s4790_s28 = sld [smem:[#allocation8 + $0x3]] }
 0x250   : > { %2255 = vst [vmem:[#allocation2 + $0x1c] sm:$0x7] %v2254_v44  ;;  %v1343_v13 = vadd.f32 %v1342_v2, %v1332_v27  ;;  %v1427_v35 = vmul.f32 %v4285_v55, %v1426_v37  ;;  %v1461_v9 = vstv %s4551_s22  ;;  %v1472_v55 = vstv %s4555_s17  ;;  %s4649_s17 = sld [smem:[#allocation14 + $0x3]] }
 0x251   : > { %3088 = vst [vmem:[%s4250_s2 + $0x38] sm:$0x7] %v2018_v47  ;;  %v1450_v47 = vstv %s4543_s27  ;;  %s4669_s22 = sld [smem:[#allocation14 + $0xf]] }
 0x252   : > { %3093 = vst [vmem:[%s4250_s2 + $0x3c] sm:$0x7] %v2041_v41  ;;  %1660 = vrot.lane.b32.xlu1 %v4458_v43, %s3481_s4  ;;  %1635 = vrot.lane.b32.xlu0 %v4388_v59, %s5537_s26  ;;  %v1354_v1 = vadd.f32 %v1353_v11, %v1343_v13  ;;  %s4788_s27 = sld [smem:[#allocation8 + $0x1e]] }
 0x253   : > { %1664 = vrot.lane.b32.xlu2 %v4472_v21, %s3481_s4  ;;  %s4794_s11 = sld [smem:[#allocation8 + $0x7]] }
 0x254   : > { %v1378_v20 = vpop.permute.xlu1 %1377  ;;  %v1360_v60 = vpop.permute.xlu0 %1359  ;;  %s4796_s6 = sld [smem:[#allocation8 + $0xb]] }
 0x255   : > { %v4483_v38 = vpop.permute.xlu2 %1443  ;;  %v1363_v16 = vsel %vm1362_vm13, %v4366_v30, %v1360_v60  ;;  %v1384_v5 = vsel %vm406_vm1, %v1378_v20, %v4383_v0  ;;  %5579 = sst [smem:[#allocation52_spill]] %s4790_s28 }
 0x256   : > { %v1365_v25 = vmul.f32 %v1364_v40, %v1363_v16  ;;  %v1386_v36 = vmul.f32 %v1385_v33, %v1384_v5  ;;  %5572 = sst [smem:[#allocation45_spill]] %s4649_s17 }
 0x257   : > { %5575 = sst [smem:[#allocation48_spill]] %s4669_s22 }
 0x258   : > { %v1366_v48 = vadd.f32 %v1365_v25, %v1354_v1  ;;  %5578 = sst [smem:[#allocation51_spill]] %s4788_s27 }
 0x259   : > { %5580 = sst [smem:[#allocation53_spill]] %s4794_s11 }
 0x25a   : > { %1674 = vrot.lane.b32.xlu1 %v4472_v21, %s5534_s23  ;;  %1671 = vrot.lane.b32.xlu0 %v4458_v43, %s5534_s23  ;;  %1368 = vst [vmem:[#allocation2 + $0x30] sm:$0x7] %v1366_v48  ;;  %5581 = sst [smem:[#allocation54_spill]] %s4796_s6 }
 0x25b   : > { %1643 = vrot.lane.b32.xlu2 %v4376_v19, %s3482_s16  ;;  %v1373_v19 = vmul.f32 %v4229_v24, %v1372_v17  ;;  %s4804_s27 = sld [smem:[#allocation8 + $0x13]] }
 0x25c   : > { %v1393_v30 = vpop.permute.xlu1 %1392  ;;  %v1390_v15 = vpop.permute.xlu0 %1389  ;;  %s4806_s28 = sld [smem:[#allocation8 + $0x17]] }
 0x25d   : > { %v1458_v3 = vpop.permute.xlu2 %1457  ;;  %v1395_v32 = vsel %vm453_vm4, %v1390_v15, %v1393_v30  ;;  %v1387_v4 = vadd.f32 %v1386_v36, %v1373_v19  ;;  %v5483_v19 = vstv %s4594_s15  ;;  %s4658_s15 = sld [smem:[#allocation14 + $0xb]] }
 0x25e   : > { %v1397_v0 = vmul.f32 %v1396_v28, %v1395_v32  ;;  %s4808_s11 = sld [smem:[#allocation8 + $0x1b]] }
 0x25f   : > { %s4812_s6 = sld [smem:[#allocation9]] }
 0x260   : > { %v1398_v54 = vadd.f32 %v1397_v0, %v1387_v4  ;;  %v5478_v0 = vstv %s4596_s18  ;;  %s4653_s18 = sld [smem:[#allocation14 + $0x7]] }
 0x261   : > { %s5590_s12 = sld [smem:[#allocation52_spill]] }
 0x262   : > { %1682 = vrot.lane.b32.xlu1 %v4458_v43, %s5511_s14  ;;  %1646 = vrot.lane.b32.xlu0 %v4388_v59, %s3482_s16 }
 0x263   : > { %1685 = vrot.lane.b32.xlu2 %v4472_v21, %s5511_s14  ;;  %5574 = sst [smem:[#allocation47_spill]] %s4658_s15 }
 0x264   : > { %v1412_v18 = vpop.permute.xlu1 %1411  ;;  %v1404_v22 = vpop.permute.xlu0 %1403  ;;  %5583 = sst [smem:[#allocation56_spill]] %s4808_s11 }
 0x265   : > { %v1406_v24 = vsel %vm501_vm7, %v4422_v57, %v1404_v22  ;;  %v4525_v31 = vpop.permute.xlu2 %1485  ;;  %v1417_v53 = vsel %vm1362_vm13, %v1412_v18, %v1415_v39  ;;  %v3035_v57 = vld [vmem:[%s3612_s20 + $0x98] sm:$0x7]  ;;  %s4585_s20 = sld [smem:[#allocation6 + $0xf]] }
 0x266   : > { %v1408_v59 = vmul.f32 %v1407_v29, %v1406_v24  ;;  %v1419_v58 = vmul.f32 %v1418_v45, %v1417_v53  ;;  %5573 = sst [smem:[#allocation46_spill]] %s4653_s18 }
 0x267   : > { %s4824_s11 = sld [smem:[#allocation9 + $0xc]] }
 0x268   : > { %v1409_v63 = vadd.f32 %v1408_v59, %v1398_v54 }
 0x26a   : > { %1696 = vrot.lane.b32.xlu1 %v4472_v21, %s5537_s26  ;;  %1693 = vrot.lane.b32.xlu0 %v4458_v43, %s5537_s26  ;;  %v1420_v61 = vadd.f32 %v1419_v58, %v1409_v63  ;;  %v5481_v63 = vstv %s4600_s13  ;;  %s4784_s13 = sld [smem:[#allocation8 + $0x16]] }
 0x26b   : > { %1721 = vrot.lane.b32.xlu2 %v3035_v57, %s3481_s4  ;;  %5555 = sst [smem:[#allocation27_spill]] %s4585_s20  ;;  %v5484_v25 = vstv %s4585_s20 }
 0x26c   : > { %v1436_v62 = vpop.permute.xlu1 %1435  ;;  %v1432_v23 = vpop.permute.xlu0 %1431  ;;  %1422 = vst [vmem:[#allocation2 + $0x34] sm:$0x7] %v1420_v61  ;;  %v1481_v15 = vmul.f32 %v4317_v50, %v5484_v25  ;;  %s4638_s20 = sld [smem:[#allocation14 + $0xa]]  ;;  %v2069_v61 = vld [vmem:[#allocation2 + $0x30] sm:$0x7] }
 0x26d   : > { %v4545_v34 = vpop.permute.xlu2 %1500  ;;  %v1438_v44 = vsel %vm406_vm1, %v1432_v23, %v1436_v62  ;;  %v5480_v23 = vstv %s4602_s19  ;;  %s4776_s19 = sld [smem:[#allocation8 + $0xe]]  ;;  %v2726_v25 = vld [vmem:[#allocation2 + $0x18] sm:$0x7] }
 0x26e   : > { %v1440_v26 = vmul.f32 %v1439_v10, %v1438_v44 }
 0x270   : > { %v1441_v56 = vadd.f32 %v1440_v26, %v1427_v35  ;;  %v2115_v26 = vld [vmem:[#allocation2 + $0x30] sm:$0x7]  ;;  %5576 = sst [smem:[#allocation49_spill]] %s4784_s13 }
 0x271   : > { %s4818_s13 = sld [smem:[#allocation9 + $0x8]] }
 0x272   : > { %1732 = vrot.lane.b32.xlu1 %v3035_v57, %s5534_s23  ;;  %1725 = vrot.lane.b32.xlu0 %v3036_v6, %s3481_s4  ;;  %s4587_s4 = sld [smem:[#allocation6 + $0x10]] }
 0x273   : > { %1735 = vrot.lane.b32.xlu2 %v3036_v6, %s5534_s23  ;;  %s4592_s23 = sld [smem:[#allocation14]] }
 0x274   : > { %v1455_v12 = vpop.permute.xlu1 %1454  ;;  %v1447_v51 = vpop.permute.xlu0 %1446  ;;  %5570 = sst [smem:[#allocation43_spill]] %s4638_s20 }
 0x275   : > { %v4564_v42 = vpop.permute.xlu2 %1519  ;;  %v1449_v41 = vsel %vm453_vm4, %v4483_v38, %v1447_v51  ;;  %v1460_v52 = vsel %vm501_vm7, %v1455_v12, %v1458_v3  ;;  %v5476_v12 = vstv %s4614_s3  ;;  %v5475_v51 = vstv %s4621_s1  ;;  %s4764_s1 = sld [smem:[#allocation8 + $0x19]] }
 0x276   : > { %v1451_v39 = vmul.f32 %v1450_v47, %v1449_v41  ;;  %v1462_v27 = vmul.f32 %v1461_v9, %v1460_v52  ;;  %v2074_v41 = vld [vmem:[#allocation2 + $0x34] sm:$0x7]  ;;  %s4768_s3 = sld [smem:[#allocation8 + $0x1d]] }
 0x277   : > { %5585 = sst [smem:[#allocation58_spill]] %s4818_s13 }
 0x278   : > { %v1452_v8 = vadd.f32 %v1451_v39, %v1441_v56  ;;  %5556 = sst [smem:[#allocation28_spill]] %s4587_s4  ;;  %v1493_v48 = vstv %s4587_s4  ;;  %v2071_v56 = vmul.f32 %v5481_v63, %v2069_v61 }
 0x279   : > { %5557 = sst [smem:[#allocation30_spill]] %s4592_s23  ;;  %v5482_v58 = vstv %s4592_s23 }
 0x27a   : > { %1707 = vrot.lane.b32.xlu1 %v4472_v21, %s3482_s16  ;;  %1704 = vrot.lane.b32.xlu0 %v4458_v43, %s3482_s16  ;;  %v1463_v38 = vadd.f32 %v1462_v27, %v1452_v8  ;;  %s4644_s4 = sld [smem:[#allocation14 + $0xe]]  ;;  %v5441_v27 = vstv %s4623_s5 }
 0x27b   : > { %1743 = vrot.lane.b32.xlu2 %v3035_v57, %s5511_s14  ;;  %s4702_s5 = sld [smem:[#allocation8]] }
 0x27c   : > { %v1469_v2 = vpop.permute.xlu1 %1468  ;;  %v1466_v11 = vpop.permute.xlu0 %1465  ;;  %s4786_s23 = sld [smem:[#allocation8 + $0x1a]] }
 0x27d   : > { %v1471_v20 = vsel %vm1362_vm13, %v1466_v11, %v1469_v2  ;;  %v4581_v60 = vpop.permute.xlu2 %1540  ;;  %v5474_v2 = vstv %s4625_s21  ;;  %v2097_v11 = vld [vmem:[#allocation2 + $0x34] sm:$0x7]  ;;  %s4757_s21 = sld [smem:[#allocation8 + $0x11]] }
 0x27e   : > { %v1473_v13 = vmul.f32 %v1472_v55, %v1471_v20  ;;  %v2120_v20 = vld [vmem:[#allocation2 + $0x34] sm:$0x7]  ;;  %s4835_s13 = sld [smem:[#allocation9 + $0x14]] }
 0x27f   : > { %s5586_s7 = sld [smem:[#allocation49_spill]] }
 0x280   : > { %v1474_v16 = vadd.f32 %v1473_v13, %v1463_v38  ;;  %5571 = sst [smem:[#allocation44_spill]] %s4644_s4 }
 0x282   : > { %1476 = vst [vmem:[#allocation2 + $0x38] sm:$0x7] %v1474_v16  ;;  %1754 = vrot.lane.b32.xlu1 %v3035_v57, %s5537_s26  ;;  %1746 = vrot.lane.b32.xlu0 %v3036_v6, %s5511_s14  ;;  %s4608_s14 = sld [smem:[#allocation14 + $0xc]] }
 0x283   : > { %1757 = vrot.lane.b32.xlu2 %v3036_v6, %s5537_s26  ;;  %s4612_s26 = sld [smem:[#allocation6 + $0x13]] }
 0x284   : > { %v1498_v43 = vpop.permute.xlu1 %1497  ;;  %v1490_v21 = vpop.permute.xlu0 %1489  ;;  %5577 = sst [smem:[#allocation50_spill]] %s4786_s23 }
 0x285   : > { %v4598_v1 = vpop.permute.xlu2 %1559  ;;  %v1492_v30 = vsel %vm406_vm1, %v4525_v31, %v1490_v21  ;;  %v1503_v36 = vsel %vm453_vm4, %v1498_v43, %v4545_v34  ;;  %v2092_v34 = vld [vmem:[#allocation2 + $0x30] sm:$0x7]  ;;  %v2076_v43 = vmul.f32 %v5475_v51, %v2074_v41  ;;  %v5472_v21 = vstv %s4634_s8  ;;  %s4721_s8 = sld [smem:[#allocation8 + $0xc]]  ;;  %v2687_v51 = vld [vmem:[#allocation2] sm:$0x7] }
 0x286   : > { %v1494_v3 = vmul.f32 %v1493_v48, %v1492_v30  ;;  %v1505_v4 = vmul.f32 %v5483_v19, %v1503_v36  ;;  %v2094_v8 = vmul.f32 %v5480_v23, %v2092_v34  ;;  %v2113_v34 = vld [vmem:[#allocation3 + $0xc] sm:$0x7]  ;;  %s4810_s23 = sld [smem:[#allocation8 + $0x1f]] }
 0x288   : > { %5562 = sst [smem:[#allocation34_spill]] %s4608_s14  ;;  %v1495_v18 = vadd.f32 %v1494_v3, %v1481_v15  ;;  %v5479_v35 = vstv %s4608_s14  ;;  %v2044_v3 = vld [vmem:[#allocation3] sm:$0x7] }
 0x289   : > { %5563 = sst [smem:[#allocation36_spill]] %s4612_s26  ;;  %v5477_v31 = vstv %s4612_s26  ;;  %v2117_v13 = vmul.f32 %v5479_v35, %v2115_v26  ;;  %v2056_v30 = vld [vmem:[#allocation2 + $0x38] sm:$0x7]  ;;  %v2691_v35 = vld [vmem:[#allocation2 + $0x4] sm:$0x7] }
 0x28a   : > { %1768 = vrot.lane.b32.xlu1 %v3036_v6, %s3482_s16  ;;  %1765 = vrot.lane.b32.xlu0 %v3035_v57, %s3482_s16  ;;  %s4632_s16 = sld [smem:[#allocation14 + $0x2]]  ;;  %v1506_v53 = vadd.f32 %v1505_v4, %v1495_v18  ;;  %v2046_v57 = vld [vmem:[#allocation2 + $0x30] sm:$0x7]  ;;  %v2079_v15 = vld [vmem:[#allocation2 + $0x38] sm:$0x7] }
 0x28b   : > { %v2048_v39 = vmul.f32 %v5482_v58, %v2046_v57  ;;  %v2102_v36 = vld [vmem:[#allocation2 + $0x38] sm:$0x7]  ;;  %v2118_v41 = vadd.f32 %v2117_v13, %v2113_v34  ;;  %s4772_s26 = sld [smem:[#allocation8 + $0x6]] }
 0x28c   : > { %v1512_v5 = vpop.permute.xlu1 %1511  ;;  %v1509_v32 = vpop.permute.xlu0 %1508  ;;  %v2090_v18 = vld [vmem:[#allocation3 + $0x8] sm:$0x7]  ;;  %s4774_s14 = sld [smem:[#allocation8 + $0xa]] }
 0x28d   : > { %v1514_v50 = vsel %vm501_vm7, %v1509_v32, %v1512_v5  ;;  %v4636_v22 = vpop.permute.xlu2 %1573  ;;  %v2067_v5 = vld [vmem:[#allocation3 + $0x4] sm:$0x7]  ;;  %v5471_v32 = vstv %s4638_s20  ;;  %v2049_v4 = vadd.f32 %v2048_v39, %v2044_v3  ;;  %v2125_v57 = vld [vmem:[#allocation2 + $0x38] sm:$0x7]  ;;  %v5469_v3 = vstv %s4649_s17  ;;  %s4714_s20 = sld [smem:[#allocation8 + $0x8]] }
 0x28e   : > { %v1516_v24 = vmul.f32 %v5478_v0, %v1514_v50  ;;  %s4744_s17 = sld [smem:[#allocation8 + $0x1]] }
 0x290   : > { %5568 = sst [smem:[#allocation41_spill]] %s4632_s16  ;;  %v1517_v6 = vadd.f32 %v1516_v24, %v1506_v53  ;;  %v5473_v38 = vstv %s4632_s16  ;;  %v2072_v24 = vadd.f32 %v2071_v56, %v2067_v5  ;;  %v2099_v53 = vmul.f32 %v5441_v27, %v2097_v11 }
 0x291   : > { %v2058_v26 = vmul.f32 %v5473_v38, %v2056_v30  ;;  %v5468_v5 = vstv %s4653_s18  ;;  %v5467_v27 = vstv %s4658_s15  ;;  %s4725_s15 = sld [smem:[#allocation8 + $0x10]] }
 0x292   : > { %v2077_v56 = vadd.f32 %v2076_v43, %v2072_v24  ;;  %s4741_s18 = sld [smem:[#allocation8 + $0x1c]] }
 0x293   : > { %s4753_s16 = sld [smem:[#allocation8 + $0xd]] }
 0x294   : > { %v4647_v54 = vpop.permute.xlu1 %1536  ;;  %v1523_v59 = vpop.permute.xlu0 %1522 }
 0x295   : > { %v1525_v62 = vsel %vm1362_vm13, %v4564_v42, %v1523_v59  ;;  %v2051_v42 = vld [vmem:[#allocation2 + $0x34] sm:$0x7]  ;;  %v4684_v50 = vpop.permute.xlu2 %1599  ;;  %v5470_v59 = vstv %s4644_s4  ;;  %s4706_s4 = sld [smem:[#allocation8 + $0x4]] }
 0x296   : > { %v1527_v44 = vmul.f32 %v5477_v31, %v1525_v62  ;;  %v2053_v16 = vmul.f32 %v5476_v12, %v2051_v42  ;;  %v2081_v42 = vmul.f32 %v5472_v21, %v2079_v15  ;;  %v2127_v11 = vmul.f32 %v5470_v59, %v2125_v57 }
 0x297   : > { %v2631_v12 = vstv %s4764_s1  ;;  %v2692_v31 = vstv %s4768_s3  ;;  %s5588_s1 = sld [smem:[#allocation50_spill]] }
 0x298   : > { %v1528_v52 = vadd.f32 %v1527_v44, %v1517_v6  ;;  %v2095_v6 = vadd.f32 %v2094_v8, %v2090_v18  ;;  %v2122_v44 = vmul.f32 %v5474_v2, %v2120_v20  ;;  %v2054_v39 = vadd.f32 %v2053_v16, %v2049_v4  ;;  %v2569_v2 = vld [vmem:[#allocation2 + $0x4] sm:$0x7]  ;;  %s4935_s3 = sld [smem:[#allocation9 + $0x16]] }
 0x299   : > { %v5466_v20 = vstv %s4669_s22  ;;  %v2082_v16 = vadd.f32 %v2081_v42, %v2077_v56  ;;  %s4731_s22 = sld [smem:[#allocation8 + $0x14]] }
 0x29a   : > { %1530 = vst [vmem:[#allocation2 + $0x3c] sm:$0x7] %v1528_v52  ;;  %v2104_v52 = vmul.f32 %v5471_v32, %v2102_v36  ;;  %v2100_v8 = vadd.f32 %v2099_v53, %v2095_v6  ;;  %v2123_v30 = vadd.f32 %v2122_v44, %v2118_v41  ;;  %v2059_v13 = vadd.f32 %v2058_v26, %v2054_v39  ;;  %v2626_v32 = vld [vmem:[#allocation2] sm:$0x7] }
 0x29b   : > { %v1544_v44 = vsel %vm1543_vm14, %v4647_v54, %v4581_v60 }
 0x29c   : > { %v1552_v61 = vpop.permute.xlu1 %1551  ;;  %v1549_v62 = vpop.permute.xlu0 %1548  ;;  %v2105_v4 = vadd.f32 %v2104_v52, %v2100_v8  ;;  %v2128_v6 = vadd.f32 %v2127_v11, %v2123_v30  ;;  %v1546_v11 = vmul.f32 %v1544_v44, %v1317_v46  ;;  %v2261_v44 = vld [vmem:[#allocation2] sm:$0x7] }
 0x29d   : > { %v1554_v18 = vsel %vm429_vm2, %v1549_v62, %v1552_v61  ;;  %v4729_v54 = vpop.permute.xlu2 %1613 }
 0x29e   : > { %v1556_v41 = vmul.f32 %v1554_v18, %v1330_v7 }
 0x2a0   : > { %v1557_v7 = vadd.f32 %v1556_v41, %v1546_v11  ;;  %v2383_v41 = vstv %s4714_s20  ;;  %v2566_v11 = vstv %s4731_s22  ;;  %s4841_s20 = sld [smem:[#allocation9 + $0x18]] }
 0x2a1   : > { %v2061_v43 = vld [vmem:[#allocation2 + $0x3c] sm:$0x7]  ;;  %s4848_s22 = sld [smem:[#allocation9 + $0x1]] }
 0x2a2   : > { %v2084_v15 = vld [vmem:[#allocation2 + $0x3c] sm:$0x7]  ;;  %v2063_v24 = vmul.f32 %v5469_v3, %v2061_v43 }
 0x2a3   : > { %v2107_v36 = vld [vmem:[#allocation2 + $0x3c] sm:$0x7]  ;;  %v2086_v57 = vmul.f32 %v5468_v5, %v2084_v15  ;;  %v2508_v5 = vld [vmem:[#allocation2 + $0x4] sm:$0x7] }
 0x2a4   : > { %v2109_v53 = vmul.f32 %v5467_v27, %v2107_v36  ;;  %v2130_v34 = vld [vmem:[#allocation2 + $0x3c] sm:$0x7]  ;;  %v2064_v62 = vadd.f32 %v2063_v24, %v2059_v13  ;;  %v1571_v39 = vpop.permute.xlu1 %1570  ;;  %v1563_v56 = vpop.permute.xlu0 %1562  ;;  %v2447_v27 = vld [vmem:[#allocation2 + $0x4] sm:$0x7] }
 0x2a5   : > { %v2132_v61 = vmul.f32 %v5466_v20, %v2130_v34  ;;  %v2087_v26 = vadd.f32 %v2086_v57, %v2082_v16  ;;  %v1565_v60 = vsel %vm453_vm4, %v4598_v1, %v1563_v56  ;;  %v1576_v1 = vsel %vm477_vm6, %v1571_v39, %v4636_v22  ;;  %v4766_v15 = vpop.permute.xlu2 %1632  ;;  %v2321_v39 = vld [vmem:[#allocation2] sm:$0x7] }
 0x2a6   : > { %v2110_v42 = vadd.f32 %v2109_v53, %v2105_v4  ;;  %3097 = vst [vmem:[%s4250_s2 + $0x40] sm:$0x7] %v2064_v62  ;;  %v1567_v8 = vmul.f32 %v1565_v60, %v1341_v49  ;;  %v1578_v49 = vmul.f32 %v1576_v1, %v1352_v14  ;;  %v2232_v4 = vld [vmem:[#allocation2 + $0x30] sm:$0x7]  ;;  %v2382_v56 = vld [vmem:[#allocation2] sm:$0x7]  ;;  %v2505_v60 = vstv %s4725_s15 }
 0x2a7   : > { %v2133_v52 = vadd.f32 %v2132_v61, %v2128_v6  ;;  %3102 = vst [vmem:[%s4250_s2 + $0x44] sm:$0x7] %v2087_v26  ;;  %v2262_v26 = vstv %s4702_s5  ;;  %v2265_v1 = vld [vmem:[#allocation2 + $0x4] sm:$0x7]  ;;  %v2509_v20 = vstv %s4757_s21  ;;  %v2384_v3 = vmul.f32 %v2383_v41, %v2382_v56  ;;  %s4875_s15 = sld [smem:[#allocation9 + $0x11]] }
 0x2a8   : > { %3107 = vst [vmem:[%s4250_s2 + $0x48] sm:$0x7] %v2110_v42  ;;  %v1568_v46 = vadd.f32 %v1567_v8, %v1557_v7  ;;  %v2322_v42 = vstv %s4706_s4  ;;  %v2443_v8 = vld [vmem:[#allocation2] sm:$0x7]  ;;  %v2266_v7 = vstv %s4744_s17  ;;  %s4852_s17 = sld [smem:[#allocation9 + $0x5]]  ;;  %v2510_v0 = vmul.f32 %v2509_v20, %v2508_v5 }
 0x2a9   : > { %3112 = vst [vmem:[%s4250_s2 + $0x4c] sm:$0x7] %v2133_v52  ;;  %s4760_s2 = sld [smem:[#allocation8 + $0x15]]  ;;  %v2444_v52 = vstv %s4721_s8  ;;  %v2267_v38 = vmul.f32 %v2266_v7, %v2265_v1 }
 0x2aa   : > { %v1579_v43 = vadd.f32 %v1578_v49, %v1568_v46  ;;  %v2627_v46 = vstv %s4738_s25  ;;  %v2688_v49 = vstv %s4741_s18  ;;  %s4845_s8 = sld [smem:[#allocation9 + $0x1c]]  ;;  %v2445_v59 = vmul.f32 %v2444_v52, %v2443_v8 }
 0x2ab   : > { %v2628_v7 = vmul.f32 %v2627_v46, %v2626_v32  ;;  %s4866_s4 = sld [smem:[#allocation9 + $0xd]]  ;;  %v2689_v5 = vmul.f32 %v2688_v49, %v2687_v51  ;;  %v2513_v46 = vld [vmem:[#allocation2 + $0x8] sm:$0x7] }
 0x2ac   : > { %v1585_v30 = vpop.permute.xlu1 %1584  ;;  %v1582_v13 = vpop.permute.xlu0 %1581  ;;  %s4883_s18 = sld [smem:[#allocation9 + $0x15]] }
 0x2ad   : > { %v1588_v16 = vsel %vm1587_vm15, %v1582_v13, %v1585_v30  ;;  %v2504_v30 = vld [vmem:[#allocation2] sm:$0x7]  ;;  %s5589_s5 = sld [smem:[#allocation51_spill]] }
 0x2ae   : > { %v1590_v22 = vmul.f32 %v1588_v16, %v1364_v40  ;;  %v4792_v40 = vpop.permute.xlu2 %1664  ;;  %v2565_v13 = vld [vmem:[#allocation2] sm:$0x7]  ;;  %v2326_v16 = vstv %s4749_s9  ;;  %v2506_v52 = vmul.f32 %v2505_v60, %v2504_v30  ;;  %s4902_s21 = sld [smem:[#allocation9 + $0x1d]]  ;;  %v2392_v60 = vstv %s4774_s14 }
 0x2af   : > { %v2570_v21 = vstv %s4760_s2  ;;  %s4860_s2 = sld [smem:[#allocation9 + $0x9]]  ;;  %v2567_v8 = vmul.f32 %v2566_v11, %v2565_v13  ;;  %v2452_v11 = vld [vmem:[#allocation2 + $0x8] sm:$0x7]  ;;  %v2575_v30 = vstv %s5586_s7 }
 0x2b0   : > { %v1591_v36 = vadd.f32 %v1590_v22, %v1579_v43  ;;  %v2387_v43 = vstv %s4751_s30  ;;  %v2325_v22 = vld [vmem:[#allocation2 + $0x4] sm:$0x7]  ;;  %v2571_v1 = vmul.f32 %v2570_v21, %v2569_v2  ;;  %v2693_v21 = vmul.f32 %v2692_v31, %v2691_v35  ;;  %v2574_v13 = vld [vmem:[#allocation2 + $0x8] sm:$0x7]  ;;  %s5591_s25 = sld [smem:[#allocation53_spill]] }
 0x2b1   : > { %v2331_v35 = vstv %s4772_s26  ;;  %s4914_s26 = sld [smem:[#allocation9 + $0x6]] }
 0x2b2   : > { %1593 = vst [vmem:[#allocation2 + $0x40] sm:$0x7] %v1591_v36  ;;  %v2386_v36 = vld [vmem:[#allocation2 + $0x4] sm:$0x7]  ;;  %v4911_v49 = vadd.f32 %v2693_v21, %v2689_v5  ;;  %s4920_s14 = sld [smem:[#allocation9 + $0xa]] }
 0x2b3   : > { %s5593_s9 = sld [smem:[#allocation55_spill]] }
 0x2b4   : > { %v4778_v14 = vpop.permute.xlu1 %1610  ;;  %v4780_v18 = vpop.permute.xlu0 %1603  ;;  %s4922_s30 = sld [smem:[#allocation9 + $0xe]] }
 0x2b5   : > { %v1616_v41 = vsel %vm429_vm2, %v4778_v14, %v4729_v54  ;;  %v1606_v56 = vsel %vm1543_vm14, %v4684_v50, %v4780_v18  ;;  %v4889_v18 = vadd.f32 %v2510_v0, %v2506_v52  ;;  %s4929_s7 = sld [smem:[#allocation9 + $0x12]] }
 0x2b6   : > { %v4816_v6 = vpop.permute.xlu2 %1643  ;;  %v1618_v32 = vmul.f32 %v1616_v41, %v1385_v33  ;;  %v1608_v51 = vmul.f32 %v1606_v56, %v1372_v17  ;;  %v4896_v17 = vadd.f32 %v2571_v1, %v2567_v8  ;;  %v2271_v33 = vstv %s4770_s24  ;;  %v2275_v41 = vld [vmem:[#allocation2 + $0xc] sm:$0x7]  ;;  %s4986_s24 = sld [smem:[#allocation9 + $0x17]] }
 0x2b7   : > { %v2335_v56 = vld [vmem:[#allocation2 + $0xc] sm:$0x7]  ;;  %v2336_v1 = vstv %s5591_s25  ;;  %s4964_s25 = sld [smem:[#allocation9 + $0xf]] }
 0x2b8   : > { %v2337_v23 = vmul.f32 %v2336_v1, %v2335_v56  ;;  %v2463_v1 = vstv %s4824_s11  ;;  %s5020_s11 = sld [smem:[#allocation11 + $0x4]] }
 0x2b9   : > { %v2233_v24 = vld [vmem:[#allocation2 + $0x40] sm:$0x7] }
 0x2ba   : > { %v2234_v57 = vadd.f32 %v2233_v24, %v2232_v4  ;;  %v2263_v4 = vmul.f32 %v2262_v26, %v2261_v44  ;;  %v2323_v24 = vmul.f32 %v2322_v42, %v2321_v39  ;;  %v2327_v44 = vmul.f32 %v2326_v16, %v2325_v22  ;;  %v2630_v42 = vld [vmem:[#allocation2 + $0x4] sm:$0x7] }
 0x2bb   : > { %v2388_v26 = vmul.f32 %v2387_v43, %v2386_v36  ;;  %v2632_v54 = vmul.f32 %v2631_v12, %v2630_v42  ;;  %v1619_v43 = vadd.f32 %v1618_v32, %v1608_v51  ;;  %v2636_v22 = vstv %s5588_s1  ;;  %s4942_s1 = sld [smem:[#allocation9 + $0x1a]] }
 0x2bc   : > { %v4800_v53 = vpop.permute.xlu1 %1624  ;;  %v4802_v34 = vpop.permute.xlu0 %1621  ;;  %2235 = vst [vmem:[#allocation2 + $0x30] sm:$0x7] %v2234_v57  ;;  %v2448_v57 = vstv %s4753_s16  ;;  %v4868_v20 = vadd.f32 %v2267_v38, %v2263_v4  ;;  %v4877_v2 = vadd.f32 %v2327_v44, %v2323_v24  ;;  %s4909_s16 = sld [smem:[#allocation9 + $0x2]]  ;;  %v2697_v36 = vstv %s5589_s5  ;;  %v2696_v44 = vld [vmem:[#allocation2 + $0x8] sm:$0x7] }
 0x2bd   : > { %v2449_v39 = vmul.f32 %v2448_v57, %v2447_v27  ;;  %v1627_v50 = vsel %vm453_vm4, %v4802_v34, %v4800_v53  ;;  %v4885_v12 = vadd.f32 %v2388_v26, %v2384_v3  ;;  %v2270_v53 = vld [vmem:[#allocation2 + $0x8] sm:$0x7]  ;;  %v4904_v0 = vadd.f32 %v2632_v54, %v2628_v7  ;;  %v2396_v54 = vld [vmem:[#allocation2 + $0xc] sm:$0x7]  ;;  %s4948_s5 = sld [smem:[#allocation9 + $0x3]] }
 0x2be   : > { %v4873_v14 = vpop.permute.xlu2 %1685  ;;  %v2330_v34 = vld [vmem:[#allocation2 + $0x8] sm:$0x7]  ;;  %v2272_v4 = vmul.f32 %v2271_v33, %v2270_v53  ;;  %v2276_v7 = vstv %s5590_s12  ;;  %v2458_v32 = vstv %s5593_s9  ;;  %v2519_v51 = vstv %s4804_s27  ;;  %v2518_v53 = vld [vmem:[#allocation2 + $0xc] sm:$0x7]  ;;  %s4946_s27 = sld [smem:[#allocation9 + $0x1e]] }
 0x2bf   : > { %v4887_v38 = vadd.f32 %v2449_v39, %v2445_v59  ;;  %v2391_v3 = vld [vmem:[#allocation2 + $0x8] sm:$0x7]  ;;  %v1629_v59 = vmul.f32 %v1627_v50, %v1396_v28  ;;  %v2332_v24 = vmul.f32 %v2331_v35, %v2330_v34  ;;  %v2457_v50 = vld [vmem:[#allocation2 + $0xc] sm:$0x7]  ;;  %v2576_v34 = vmul.f32 %v2575_v30, %v2574_v13  ;;  %s5596_s12 = sld [smem:[#allocation57_spill]] }
 0x2c0   : > { %v2635_v57 = vld [vmem:[#allocation2 + $0x8] sm:$0x7]  ;;  %v2393_v26 = vmul.f32 %v2392_v60, %v2391_v3  ;;  %v2580_v3 = vstv %s4806_s28  ;;  %v2702_v60 = vstv %s4810_s23  ;;  %v2273_v30 = vadd.f32 %v2272_v4, %v4868_v20  ;;  %s4951_s28 = sld [smem:[#allocation9 + $0x7]] }
 0x2c1   : > { %s4957_s23 = sld [smem:[#allocation9 + $0xb]] }
 0x2c2   : > { %s4978_s9 = sld [smem:[#allocation9 + $0x13]] }
 0x2c4   : > { %v4820_v61 = vpop.permute.xlu1 %1660  ;;  %v4822_v62 = vpop.permute.xlu0 %1635 }
 0x2c5   : > { %v1638_v31 = vsel %vm477_vm6, %v4766_v15, %v4822_v62  ;;  %v2453_v15 = vstv %s4776_s19  ;;  %v2514_v62 = vstv %s4782_s0  ;;  %s5592_s19 = sld [smem:[#allocation54_spill]] }
 0x2c6   : > { %v1640_v28 = vmul.f32 %v1638_v31, %v1407_v29  ;;  %v2454_v42 = vmul.f32 %v2453_v15, %v2452_v11  ;;  %v2515_v39 = vmul.f32 %v2514_v62, %v2513_v46  ;;  %v1630_v29 = vadd.f32 %v1629_v59, %v1619_v43  ;;  %s5595_s0 = sld [smem:[#allocation56_spill]]  ;;  %v2579_v31 = vld [vmem:[#allocation2 + $0xc] sm:$0x7]  ;;  %v4944_v11 = vpop.permute.xlu2 %1721 }
 0x2c7   : > { %v2640_v15 = vld [vmem:[#allocation2 + $0xc] sm:$0x7]  ;;  %v2698_v46 = vmul.f32 %v2697_v36, %v2696_v44  ;;  %v2277_v43 = vmul.f32 %v2276_v7, %v2275_v41  ;;  %v2581_v13 = vmul.f32 %v2580_v3, %v2579_v31  ;;  %v2394_v36 = vadd.f32 %v2393_v26, %v4885_v12 }
 0x2c8   : > { %v1641_v33 = vadd.f32 %v1640_v28, %v1630_v29  ;;  %v2701_v62 = vld [vmem:[#allocation2 + $0xc] sm:$0x7]  ;;  %v2459_v29 = vmul.f32 %v2458_v32, %v2457_v50  ;;  %v2516_v44 = vadd.f32 %v2515_v39, %v4889_v18  ;;  %v2577_v41 = vadd.f32 %v2576_v34, %v4896_v17  ;;  %v2401_v50 = vld [vmem:[#allocation2 + $0x10] sm:$0x7] }
 0x2c9   : > { %v2703_v63 = vmul.f32 %v2702_v60, %v2701_v62  ;;  %v2699_v4 = vadd.f32 %v2698_v46, %v4911_v49  ;;  %v4962_v56 = vadd.f32 %v2277_v43, %v2273_v30  ;;  %v2341_v39 = vstv %s5596_s12  ;;  %v2462_v32 = vld [vmem:[#allocation2 + $0x10] sm:$0x7]  ;;  %v2240_v46 = vld [vmem:[#allocation2 + $0x34] sm:$0x7]  ;;  %s5054_s12 = sld [smem:[#allocation11 + $0x10]] }
 0x2ca   : > { %v4980_v49 = vadd.f32 %v2581_v13, %v2577_v41  ;;  %v2707_v31 = vstv %s4845_s8  ;;  %v2645_v34 = vld [vmem:[#allocation2 + $0x10] sm:$0x7]  ;;  %v2351_v3 = vstv %s4852_s17  ;;  %v2473_v60 = vstv %s4866_s4  ;;  %s5040_s8 = sld [smem:[#allocation11 + $0xc]] }
 0x2cb   : > { %v2397_v5 = vstv %s5592_s19  ;;  %s5597_s19 = sld [smem:[#allocation58_spill]]  ;;  %v4984_v26 = vadd.f32 %v2703_v63, %v2699_v4  ;;  %v2291_v63 = vstv %s4848_s22  ;;  %v2301_v30 = vstv %s4909_s16 }
 0x2cc   : > { %v4862_v16 = vpop.permute.xlu1 %1674  ;;  %v4864_v27 = vpop.permute.xlu0 %1671  ;;  %v2641_v59 = vstv %s5595_s0  ;;  %v2398_v28 = vmul.f32 %v2397_v5, %v2396_v54  ;;  %s4989_s0 = sld [smem:[#allocation9 + $0x1b]]  ;;  %v2524_v5 = vstv %s4829_s29  ;;  %v2340_v54 = vld [vmem:[#allocation2 + $0x10] sm:$0x7] }
 0x2cd   : > { %s5009_s29 = sld [smem:[#allocation9 + $0x1f]]  ;;  %v2342_v13 = vmul.f32 %v2341_v39, %v2340_v54  ;;  %v2544_v54 = vstv %s4929_s7 }
 0x2ce   : > { %v4972_v18 = vadd.f32 %v2398_v28, %v2394_v36  ;;  %v5003_v62 = vpop.permute.xlu2 %1735  ;;  %v2656_v28 = vstv %s4894_s10  ;;  %v2361_v36 = vstv %s4914_s26  ;;  %s5109_s17 = sld [smem:[#allocation11 + $0x9]] }
 0x2cf   : > { %s5157_s4 = sld [smem:[#allocation11 + $0x15]] }
 0x2d0   : > { %5600 = sst [smem:[#allocation20_spill]] %s5040_s8 }
 0x2d1   : > { %v2402_v7 = vstv %s5597_s19  ;;  %s5061_s8 = sld [smem:[#allocation11 + $0x14]] }
 0x2d2   : > { %s5179_s10 = sld [smem:[#allocation11 + $0x19]] }
 0x2d3   : > { %s5612_s26 = sld [smem:[#allocation20_spill]] }
 0x2d4   : > { %v4924_v52 = vpop.permute.xlu1 %1682  ;;  %v1647_v8 = vpop.permute.xlu0 %1646  ;;  %s5207_s7 = sld [smem:[#allocation11 + $0x6]] }
 0x2d5   : > { %v1649_v21 = vsel %vm1587_vm15, %v4816_v6, %v1647_v8  ;;  %v2637_v6 = vmul.f32 %v2636_v22, %v2635_v57  ;;  %v2333_v22 = vadd.f32 %v2332_v24, %v4877_v2  ;;  %v2455_v57 = vadd.f32 %v2454_v42, %v4887_v38  ;;  %v2280_v42 = vld [vmem:[#allocation2 + $0x10] sm:$0x7]  ;;  %s5248_s19 = sld [smem:[#allocation11 + $0x1a]] }
 0x2d6   : > { %v1651_v35 = vmul.f32 %v1649_v21, %v1418_v45  ;;  %v2520_v45 = vmul.f32 %v2519_v51, %v2518_v53  ;;  %v2642_v21 = vmul.f32 %v2641_v59, %v2640_v15  ;;  %v2585_v51 = vstv %s4835_s13  ;;  %s5072_s13 = sld [smem:[#allocation11 + $0x18]] }
 0x2d7   : > { %v2638_v20 = vadd.f32 %v2637_v6, %v4904_v0  ;;  %v4970_v38 = vadd.f32 %v2337_v23, %v2333_v22  ;;  %v4974_v17 = vadd.f32 %v2459_v29, %v2455_v57  ;;  %v2281_v23 = vstv %s4812_s6  ;;  %v2706_v6 = vld [vmem:[#allocation2 + $0x10] sm:$0x7]  ;;  %s5013_s6 = sld [smem:[#allocation11]] }
 0x2d8   : > { %v1652_v8 = vadd.f32 %v1651_v35, %v1641_v33  ;;  %v4976_v0 = vadd.f32 %v2520_v45, %v2516_v44  ;;  %v2646_v53 = vstv %s4841_s20  ;;  %v2523_v33 = vld [vmem:[#allocation2 + $0x10] sm:$0x7]  ;;  %v2412_v59 = vstv %s4860_s2  ;;  %s5028_s20 = sld [smem:[#allocation11 + $0x8]] }
 0x2d9   : > { %v4982_v24 = vadd.f32 %v2642_v21, %v2638_v20  ;;  %v2584_v35 = vld [vmem:[#allocation2 + $0x10] sm:$0x7]  ;;  %v2534_v15 = vstv %s4875_s15  ;;  %v2282_v43 = vmul.f32 %v2281_v23, %v2280_v42  ;;  %v2717_v29 = vstv %s4902_s21  ;;  %s5151_s2 = sld [smem:[#allocation11 + $0x11]] }
 0x2da   : > { %1654 = vst [vmem:[#allocation2 + $0x44] sm:$0x7] %v1652_v8  ;;  %v2595_v8 = vstv %s4883_s18  ;;  %v2403_v21 = vmul.f32 %v2402_v7, %v2401_v50  ;;  %v2422_v57 = vstv %s4920_s14  ;;  %v2464_v44 = vmul.f32 %v2463_v1, %v2462_v32  ;;  %s5607_s18 = sld [smem:[#allocation27_spill]] }
 0x2db   : > { %v2525_v41 = vmul.f32 %v2524_v5, %v2523_v33  ;;  %v2483_v23 = vstv %s4922_s30  ;;  %v2586_v42 = vmul.f32 %v2585_v51, %v2584_v35  ;;  %v2647_v39 = vmul.f32 %v2646_v53, %v2645_v34  ;;  %v2533_v35 = vld [vmem:[#allocation2 + $0x14] sm:$0x7]  ;;  %s5191_s21 = sld [smem:[#allocation11 + $0x1d]] }
 0x2dc   : > { %v4966_v2 = vpop.permute.xlu1 %1696  ;;  %v4968_v12 = vpop.permute.xlu0 %1693  ;;  %v2708_v7 = vmul.f32 %v2707_v31, %v2706_v6  ;;  %v2605_v50 = vstv %s4935_s3  ;;  %v1677_v1 = vsel %vm429_vm2, %v4864_v27, %v4862_v16  ;;  %v2727_v5 = vstv %s4946_s27  ;;  %v2290_v27 = vld [vmem:[#allocation2 + $0x14] sm:$0x7]  ;;  %5603 = sst [smem:[#allocation50_spill]] %s5072_s13 }
 0x2dd   : > { %v5032_v32 = vadd.f32 %v2282_v43, %v4962_v56  ;;  %v5035_v33 = vadd.f32 %v2342_v13, %v4970_v38  ;;  %v5038_v51 = vadd.f32 %v2403_v21, %v4972_v18  ;;  %v1667_v53 = vsel %vm1543_vm14, %v4820_v61, %v4792_v40  ;;  %v2350_v56 = vld [vmem:[#allocation2 + $0x14] sm:$0x7]  ;;  %v2360_v13 = vld [vmem:[#allocation2 + $0x18] sm:$0x7]  ;;  %s5201_s14 = sld [smem:[#allocation11 + $0x2]] }
 0x2de   : > { %5599 = sst [smem:[#allocation49_spill]] %s5028_s20  ;;  %v1688_v16 = vsel %vm453_vm4, %v4924_v52, %v4873_v14  ;;  %v5049_v38 = vadd.f32 %v2464_v44, %v4974_v17  ;;  %v5052_v18 = vadd.f32 %v2525_v41, %v4976_v0  ;;  %v1679_v31 = vmul.f32 %v1677_v1, %v1439_v10  ;;  %v2411_v40 = vld [vmem:[#allocation2 + $0x14] sm:$0x7]  ;;  %v5085_v41 = vpop.permute.xlu2 %1743 }
 0x2df   : > { %v2472_v61 = vld [vmem:[#allocation2 + $0x14] sm:$0x7]  ;;  %v5059_v14 = vadd.f32 %v2586_v42, %v4980_v49  ;;  %v5064_v17 = vadd.f32 %v2647_v39, %v4982_v24  ;;  %v5067_v0 = vadd.f32 %v2708_v7, %v4984_v26  ;;  %v2311_v10 = vstv %s4948_s5  ;;  %v2300_v24 = vld [vmem:[#allocation2 + $0x18] sm:$0x7]  ;;  %s5083_s5 = sld [smem:[#allocation11 + $0x1c]] }
 0x2e0   : > { %v2594_v52 = vld [vmem:[#allocation2 + $0x14] sm:$0x7]  ;;  %v2371_v34 = vstv %s4951_s28  ;;  %v2432_v6 = vstv %s4957_s23  ;;  %v2493_v21 = vstv %s4964_s25  ;;  %v2554_v26 = vstv %s4978_s9  ;;  %v2421_v42 = vld [vmem:[#allocation2 + $0x18] sm:$0x7]  ;;  %s5094_s25 = sld [smem:[#allocation11 + $0x1]] }
 0x2e1   : > { %v2241_v45 = vld [vmem:[#allocation2 + $0x44] sm:$0x7]  ;;  %v2655_v49 = vld [vmem:[#allocation2 + $0x14] sm:$0x7]  ;;  %v1690_v44 = vmul.f32 %v1688_v16, %v1450_v47  ;;  %v2482_v39 = vld [vmem:[#allocation2 + $0x18] sm:$0x7]  ;;  %v2615_v7 = vstv %s4986_s24  ;;  %v2676_v1 = vstv %s4989_s0  ;;  %v5098_v19 = vmul.f32 %v2351_v3, %v2350_v56 }
 0x2e2   : > { %v2242_v22 = vadd.f32 %v2241_v45, %v2240_v46  ;;  %v2666_v46 = vstv %s4942_s1  ;;  %v2716_v43 = vld [vmem:[#allocation2 + $0x14] sm:$0x7]  ;;  %v1699_v45 = vsel %vm477_vm6, %v4968_v12, %v4966_v2  ;;  %v5092_v12 = vmul.f32 %v2291_v63, %v2290_v27  ;;  %v2604_v16 = vld [vmem:[#allocation2 + $0x18] sm:$0x7]  ;;  %s5100_s9 = sld [smem:[#allocation11 + $0x5]] }
 0x2e3   : > { %v1701_v63 = vmul.f32 %v1699_v45, %v1461_v9  ;;  %v2665_v2 = vld [vmem:[#allocation2 + $0x18] sm:$0x7]  ;;  %v5113_v3 = vmul.f32 %v2473_v60, %v2472_v61  ;;  %v5117_v56 = vmul.f32 %v2534_v15, %v2533_v35  ;;  %v5121_v9 = vmul.f32 %v2595_v8, %v2594_v52  ;;  %v2310_v45 = vld [vmem:[#allocation2 + $0x1c] sm:$0x7]  ;;  %s5123_s24 = sld [smem:[#allocation11 + $0xd]] }
 0x2e4   : > { %v5015_v20 = vpop.permute.xlu1 %1732  ;;  %v5017_v4 = vpop.permute.xlu0 %1725  ;;  %2243 = vst [vmem:[#allocation2 + $0x34] sm:$0x7] %v2242_v22  ;;  %v1669_v22 = vmul.f32 %v1667_v53, %v1426_v37  ;;  %v2543_v53 = vld [vmem:[#allocation2 + $0x18] sm:$0x7]  ;;  %v5137_v15 = vmul.f32 %v2301_v30, %v2300_v24  ;;  %v5141_v8 = vmul.f32 %v2361_v36, %v2360_v13  ;;  %v2431_v61 = vld [vmem:[#allocation2 + $0x1c] sm:$0x7]  ;;  %v5167_v52 = vmul.f32 %v2605_v50, %v2604_v16 }
 0x2e5   : > { %v2553_v30 = vld [vmem:[#allocation2 + $0x1c] sm:$0x7]  ;;  %s5610_s16 = sld [smem:[#allocation49_spill]] }
 0x2e6   : > { %v1680_v58 = vadd.f32 %v1679_v31, %v1669_v22  ;;  %v5107_v31 = vmul.f32 %v2412_v59, %v2411_v40  ;;  %v2370_v22 = vld [vmem:[#allocation2 + $0x1c] sm:$0x7]  ;;  %v5127_v59 = vmul.f32 %v2656_v28, %v2655_v49  ;;  %v5131_v40 = vmul.f32 %v2717_v29, %v2716_v43  ;;  %s5614_s30 = sld [smem:[#allocation29_spill]] }
 0x2e7   : > { %v5149_v28 = vmul.f32 %v2483_v23, %v2482_v39  ;;  %v2492_v29 = vld [vmem:[#allocation2 + $0x1c] sm:$0x7]  ;;  %v1728_v23 = vsel %vm1543_vm14, %v4944_v11, %v5017_v4  ;;  %v5175_v49 = vmul.f32 %v2727_v5, %v2726_v25  ;;  %v5177_v43 = vmul.f32 %v2311_v10, %v2310_v45  ;;  %s5616_s3 = sld [smem:[#allocation50_spill]]  ;;  %v2406_v39 = vld [vmem:[#allocation2 + $0x30] sm:$0x7] }
 0x2e8   : > { %v2614_v35 = vld [vmem:[#allocation2 + $0x1c] sm:$0x7]  ;;  %v5187_v11 = vmul.f32 %v2432_v6, %v2431_v61  ;;  %v5193_v25 = vmul.f32 %v2554_v26, %v2553_v30  ;;  %v5613_v5 = vstv %s5607_s18  ;;  %v2346_v26 = vstv %s5020_s11  ;;  %v2467_v45 = vld [vmem:[#allocation2 + $0x30] sm:$0x7]  ;;  %s5618_s1 = sld [smem:[#allocation30_spill]] }
 0x2e9   : > { %v2675_v24 = vld [vmem:[#allocation2 + $0x1c] sm:$0x7]  ;;  %v5195_v50 = vmul.f32 %v2615_v7, %v2614_v35  ;;  %v1730_v10 = vmul.f32 %v1728_v23, %v5613_v5  ;;  %v2589_v35 = vld [vmem:[#allocation2 + $0x30] sm:$0x7]  ;;  %s5619_s27 = sld [smem:[#allocation32_spill]]  ;;  %v2539_v30 = vstv %s5151_s2 }
 0x2ea   : > { %5609 = vst [vmem:[#allocation60_spill] sm:$0xff] %v5193_v25  ;;  %v5203_v13 = vmul.f32 %v2676_v1, %v2675_v24  ;;  %v2468_v1 = vstv %s5612_s26  ;;  %v2161_v24 = vld [vmem:[#allocation2 + $0x40] sm:$0x7]  ;;  %s5620_s28 = sld [smem:[#allocation33_spill]] }
 0x2eb   : > { %5611 = vst [vmem:[#allocation61_spill] sm:$0xff] %v5195_v50  ;;  %v2407_v7 = vstv %s5610_s16  ;;  %v2207_v5 = vld [vmem:[#allocation2 + $0x40] sm:$0x7]  ;;  %s5621_s23 = sld [smem:[#allocation34_spill]] }
 0x2ec   : > { %v1708_v37 = vpop.permute.xlu1 %1707  ;;  %v1705_v47 = vpop.permute.xlu0 %1704  ;;  %5615 = vst [vmem:[#allocation62_spill] sm:$0xff] %v5203_v13  ;;  %s5622_s0 = sld [smem:[#allocation31_spill]] }
 0x2ed   : > { %v1710_v27 = vsel %vm1587_vm15, %v1705_v47, %v1708_v37  ;;  %v1691_v37 = vadd.f32 %v1690_v44, %v1680_v58  ;;  %v5145_v58 = vmul.f32 %v2422_v57, %v2421_v42  ;;  %v1738_v57 = vsel %vm429_vm2, %v5015_v20, %v5003_v62  ;;  %v2285_v44 = vld [vmem:[#allocation2 + $0x30] sm:$0x7]  ;;  %v1758_v47 = vpop.permute.xlu2 %1757  ;;  %s5229_s11 = sld [smem:[#allocation11 + $0xe]] }
 0x2ee   : > { %v1712_v60 = vmul.f32 %v1710_v27, %v1472_v55  ;;  %v5155_v55 = vmul.f32 %v2544_v54, %v2543_v53  ;;  %v5171_v54 = vmul.f32 %v2666_v46, %v2665_v2  ;;  %v5183_v62 = vmul.f32 %v2371_v34, %v2370_v22  ;;  %v2345_v42 = vld [vmem:[#allocation2 + $0x30] sm:$0x7]  ;;  %s5627_s20 = sld [smem:[#allocation36_spill]] }
 0x2ef   : > { %v1702_v36 = vadd.f32 %v1701_v63, %v1691_v37  ;;  %v5189_v20 = vmul.f32 %v2493_v21, %v2492_v29  ;;  %v1740_v46 = vmul.f32 %v1738_v57, %v1493_v48  ;;  %v2286_v21 = vstv %s5013_s6  ;;  %v2138_v63 = vld [vmem:[#allocation2 + $0x40] sm:$0x7]  ;;  %v2528_v22 = vld [vmem:[#allocation2 + $0x30] sm:$0x7]  ;;  %s5227_s6 = sld [smem:[#allocation11 + $0xa]] }
 0x2f0   : > { %v2529_v2 = vstv %s5054_s12  ;;  %v5617_v53 = vstv %s5614_s30  ;;  %v2590_v37 = vstv %s5061_s8  ;;  %v2711_v57 = vld [vmem:[#allocation2 + $0x30] sm:$0x7]  ;;  %v5623_v61 = vstv %s5618_s1  ;;  %s5237_s8 = sld [smem:[#allocation11 + $0x12]] }
 0x2f1   : > { %5608 = vst [vmem:[#allocation59_spill] sm:$0xff] %v5189_v20  ;;  %v1713_v4 = vadd.f32 %v1712_v60, %v1702_v36  ;;  %v2651_v60 = vstv %s5616_s3  ;;  %v2650_v36 = vld [vmem:[#allocation2 + $0x30] sm:$0x7]  ;;  %v1741_v23 = vadd.f32 %v1740_v46, %v1730_v10  ;;  %v2140_v13 = vmul.f32 %v2138_v63, %v5623_v61  ;;  %s5244_s12 = sld [smem:[#allocation11 + $0x16]] }
 0x2f2   : > { %v2469_v29 = vmul.f32 %v2468_v1, %v2467_v45  ;;  %v2530_v46 = vmul.f32 %v2529_v2, %v2528_v22  ;;  %v2591_v10 = vmul.f32 %v2590_v37, %v2589_v35  ;;  %v2652_v25 = vmul.f32 %v2651_v60, %v2650_v36  ;;  %v2136_v36 = vld [vmem:[#allocation3] sm:$0x7]  ;;  %s5259_s13 = sld [smem:[#allocation11 + $0x1e]] }
 0x2f3   : > { %1715 = vst [vmem:[#allocation2 + $0x48] sm:$0x7] %v1713_v4  ;;  %v2184_v4 = vld [vmem:[#allocation2 + $0x40] sm:$0x7]  ;;  %s5632_s22 = sld [smem:[#allocation38_spill]] }
 0x2f4   : > { %v1755_v34 = vpop.permute.xlu1 %1754  ;;  %v1747_v6 = vpop.permute.xlu0 %1746  ;;  %v5629_v35 = vstv %s5627_s20  ;;  %s5635_s15 = sld [smem:[#allocation40_spill]] }
 0x2f5   : > { %v1749_v48 = vsel %vm453_vm4, %v5085_v41, %v1747_v6  ;;  %v2712_v41 = vstv %s5083_s5  ;;  %v2287_v6 = vmul.f32 %v2286_v21, %v2285_v44  ;;  %v1760_v27 = vsel %vm477_vm6, %v1755_v34, %v1758_v47  ;;  %s5630_s5 = sld [smem:[#allocation37_spill]] }
 0x2f6   : > { %v1751_v16 = vmul.f32 %v1749_v48, %v5617_v53  ;;  %v2347_v48 = vmul.f32 %v2346_v26, %v2345_v42  ;;  %v2408_v53 = vmul.f32 %v2407_v7, %v2406_v39  ;;  %v2713_v20 = vmul.f32 %v2712_v41, %v2711_v57  ;;  %v2182_v57 = vld [vmem:[#allocation3 + $0x8] sm:$0x7]  ;;  %s5640_s18 = sld [smem:[#allocation42_spill]] }
 0x2f7   : > { %v5624_v21 = vstv %s5619_s27  ;;  %v5625_v26 = vstv %s5620_s28  ;;  %v5626_v39 = vstv %s5621_s23  ;;  %v5628_v34 = vstv %s5622_s0  ;;  %s5645_s16 = sld [smem:[#allocation44_spill]] }
 0x2f8   : > { %v1752_v50 = vadd.f32 %v1751_v16, %v1741_v23  ;;  %v2163_v44 = vmul.f32 %v2161_v24, %v5624_v21  ;;  %v2186_v42 = vmul.f32 %v2184_v4, %v5625_v26  ;;  %v2209_v7 = vmul.f32 %v2207_v5, %v5626_v39  ;;  %v2248_v16 = vld [vmem:[#allocation2 + $0x38] sm:$0x7]  ;;  %v2205_v5 = vld [vmem:[#allocation3 + $0xc] sm:$0x7]  ;;  %s5300_s26 = sld [smem:[#allocation11 + $0x7]] }
 0x2f9   : > { %v1762_v1 = vmul.f32 %v1760_v27, %v5628_v34  ;;  %v2288_v2 = vadd.f32 %v2287_v6, %v5032_v32  ;;  %v2348_v45 = vadd.f32 %v2347_v48, %v5035_v33  ;;  %v2409_v22 = vadd.f32 %v2408_v53, %v5038_v51  ;;  %v2159_v33 = vld [vmem:[#allocation3 + $0x4] sm:$0x7]  ;;  %s5303_s30 = sld [smem:[#allocation11 + $0xb]] }
 0x2fa   : > { %v2249_v37 = vld [vmem:[#allocation2 + $0x48] sm:$0x7]  ;;  %v2470_v41 = vadd.f32 %v2469_v29, %v5049_v38  ;;  %v2531_v51 = vadd.f32 %v2530_v46, %v5052_v18  ;;  %v2592_v23 = vadd.f32 %v2591_v10, %v5059_v14  ;;  %v2653_v24 = vadd.f32 %v2652_v25, %v5064_v17  ;;  %v2295_v18 = vld [vmem:[#allocation2 + $0x34] sm:$0x7]  ;;  %v2143_v46 = vld [vmem:[#allocation2 + $0x44] sm:$0x7] }
 0x2fb   : > { %v2250_v27 = vadd.f32 %v2249_v37, %v2248_v16  ;;  %v1763_v61 = vadd.f32 %v1762_v1, %v1752_v50  ;;  %v2714_v4 = vadd.f32 %v2713_v20, %v5067_v0  ;;  %v2600_v6 = vstv %s5157_s4  ;;  %v2355_v14 = vld [vmem:[#allocation2 + $0x34] sm:$0x7]  ;;  %s5634_s4 = sld [smem:[#allocation39_spill]] }
 0x2fc   : > { %v1769_v47 = vpop.permute.xlu1 %1768  ;;  %v1766_v63 = vpop.permute.xlu0 %1765  ;;  %v2661_v38 = vstv %s5179_s10  ;;  %v2722_v29 = vstv %s5191_s21  ;;  %v2141_v48 = vadd.f32 %v2140_v13, %v2136_v36  ;;  %v2164_v53 = vadd.f32 %v2163_v44, %v2159_v33  ;;  %v2477_v34 = vld [vmem:[#allocation2 + $0x34] sm:$0x7]  ;;  %v2148_v36 = vld [vmem:[#allocation2 + $0x48] sm:$0x7]  ;;  %s5642_s10 = sld [smem:[#allocation43_spill]] }
 0x2fd   : > { %v1771_v60 = vsel %vm1587_vm15, %v1766_v63, %v1769_v47  ;;  %2251 = vst [vmem:[#allocation2 + $0x38] sm:$0x7] %v2250_v27  ;;  %v2187_v21 = vadd.f32 %v2186_v42, %v2182_v57  ;;  %v2210_v26 = vadd.f32 %v2209_v7, %v2205_v5  ;;  %v2293_v17 = vadd.f32 %v5092_v12, %v2288_v2  ;;  %v2166_v12 = vld [vmem:[#allocation2 + $0x44] sm:$0x7]  ;;  %v2660_v63 = vld [vmem:[#allocation2 + $0x34] sm:$0x7] }
 0x2fe   : > { %v1773_v32 = vmul.f32 %v1771_v60, %v5629_v35  ;;  %v2353_v0 = vadd.f32 %v5098_v19, %v2348_v45  ;;  %v2414_v20 = vadd.f32 %v5107_v31, %v2409_v22  ;;  %v2475_v25 = vadd.f32 %v5113_v3, %v2470_v41  ;;  %v2189_v31 = vld [vmem:[#allocation2 + $0x44] sm:$0x7]  ;;  %v2171_v33 = vld [vmem:[#allocation2 + $0x48] sm:$0x7]  ;;  %s5650_s2 = sld [smem:[#allocation45_spill]] }
 0x2ff   : > { %v2536_v13 = vadd.f32 %v5117_v56, %v2531_v51  ;;  %v2597_v10 = vadd.f32 %v5121_v9, %v2592_v23  ;;  %v5268_v44 = vadd.f32 %v5127_v59, %v2653_v24  ;;  %v5271_v19 = vadd.f32 %v5131_v40, %v2714_v4  ;;  %v2212_v3 = vld [vmem:[#allocation2 + $0x44] sm:$0x7]  ;;  %v2416_v9 = vld [vmem:[#allocation2 + $0x34] sm:$0x7]  ;;  %v2194_v57 = vld [vmem:[#allocation2 + $0x48] sm:$0x7] }
 0x300   : > { %v1774_v50 = vadd.f32 %v1773_v32, %v1763_v61  ;;  %v5631_v42 = vstv %s5094_s25  ;;  %v5633_v56 = vstv %s5100_s9  ;;  %v2538_v59 = vld [vmem:[#allocation2 + $0x34] sm:$0x7]  ;;  %v2306_v1 = vstv %s5201_s14  ;;  %s5283_s25 = sld [smem:[#allocation11 + $0x3]] }
 0x301   : > { %v2297_v39 = vmul.f32 %v5631_v42, %v2295_v18  ;;  %v2357_v7 = vmul.f32 %v5633_v56, %v2355_v14  ;;  %v2366_v47 = vstv %s5207_s7  ;;  %v2599_v40 = vld [vmem:[#allocation2 + $0x34] sm:$0x7]  ;;  %v2427_v16 = vstv %s5227_s6  ;;  %s5639_s9 = sld [smem:[#allocation41_spill]]  ;;  %v2217_v14 = vld [vmem:[#allocation2 + $0x48] sm:$0x7] }
 0x302   : > { %1776 = vst [vmem:[#allocation2 + $0x4c] sm:$0x7] %v1774_v50  ;;  %v2488_v2 = vstv %s5229_s11  ;;  %v2549_v45 = vstv %s5237_s8  ;;  %v2610_v22 = vstv %s5244_s12  ;;  %v5636_v37 = vstv %s5630_s5  ;;  %s5651_s3 = sld [smem:[#allocation46_spill]] }
 0x303   : > { %v2145_v60 = vmul.f32 %v2143_v46, %v5636_v37  ;;  %v5637_v41 = vstv %s5632_s22  ;;  %v5638_v61 = vstv %s5634_s4  ;;  %v2671_v32 = vstv %s5248_s19  ;;  %v2721_v37 = vld [vmem:[#allocation2 + $0x34] sm:$0x7]  ;;  %s5652_s1 = sld [smem:[#allocation47_spill]] }
 0x304   : > { %v2168_v27 = vmul.f32 %v2166_v12, %v5637_v41  ;;  %v2191_v35 = vmul.f32 %v2189_v31, %v5638_v61  ;;  %v5641_v51 = vstv %s5635_s15  ;;  %v5643_v24 = vstv %s5109_s17  ;;  %s5311_s17 = sld [smem:[#allocation11 + $0xf]] }
 0x305   : > { %v2214_v23 = vmul.f32 %v2212_v3, %v5641_v51  ;;  %v2418_v4 = vmul.f32 %v5643_v24, %v2416_v9  ;;  %v5644_v5 = vstv %s5123_s24  ;;  %v2540_v18 = vmul.f32 %v2539_v30, %v2538_v59  ;;  %s5315_s24 = sld [smem:[#allocation11 + $0x13]] }
 0x306   : > { %v2479_v50 = vmul.f32 %v5644_v5, %v2477_v34  ;;  %v2298_v46 = vadd.f32 %v2297_v39, %v2293_v17  ;;  %v2358_v12 = vadd.f32 %v2357_v7, %v2353_v0  ;;  %v2601_v31 = vmul.f32 %v2600_v6, %v2599_v40  ;;  %v2305_v6 = vld [vmem:[#allocation2 + $0x38] sm:$0x7]  ;;  %s5653_s27 = sld [smem:[#allocation48_spill]] }
 0x307   : > { %v2732_v42 = vstv %s5259_s13  ;;  %v2662_v56 = vmul.f32 %v2661_v38, %v2660_v63  ;;  %v5646_v41 = vstv %s5639_s9  ;;  %v5647_v61 = vstv %s5640_s18  ;;  %s5322_s28 = sld [smem:[#allocation11 + $0x17]] }
 0x308   : > { %v2150_v3 = vmul.f32 %v2148_v36, %v5646_v41  ;;  %v2173_v9 = vmul.f32 %v2171_v33, %v5647_v61  ;;  %v5648_v51 = vstv %s5642_s10  ;;  %v2146_v30 = vadd.f32 %v2145_v60, %v2141_v48  ;;  %s5324_s21 = sld [smem:[#allocation11 + $0x1b]]  ;;  %v2670_v61 = vld [vmem:[#allocation2 + $0x38] sm:$0x7] }
 0x309   : > { %v2196_v34 = vmul.f32 %v2194_v57, %v5648_v51  ;;  %v2169_v59 = vadd.f32 %v2168_v27, %v2164_v53  ;;  %v2192_v24 = vadd.f32 %v2191_v35, %v2187_v21  ;;  %v5649_v17 = vstv %s5645_s16  ;;  %v2153_v63 = vld [vmem:[#allocation2 + $0x4c] sm:$0x7]  ;;  %v2365_v21 = vld [vmem:[#allocation2 + $0x38] sm:$0x7]  ;;  %s5336_s23 = sld [smem:[#allocation11 + $0x1f]] }
 0x30a   : > { %v2219_v0 = vmul.f32 %v2217_v14, %v5649_v17  ;;  %v2215_v39 = vadd.f32 %v2214_v23, %v2210_v26  ;;  %v2419_v38 = vadd.f32 %v2418_v4, %v2414_v20  ;;  %v2480_v7 = vadd.f32 %v2479_v50, %v2475_v25  ;;  %v2176_v36 = vld [vmem:[#allocation2 + $0x4c] sm:$0x7]  ;;  %v2487_v35 = vld [vmem:[#allocation2 + $0x38] sm:$0x7]  ;;  %s5658_s0 = sld [smem:[#allocation35_spill]] }
 0x30b   : > { %v2541_v40 = vadd.f32 %v2540_v18, %v2536_v13  ;;  %v2199_v33 = vld [vmem:[#allocation2 + $0x4c] sm:$0x7]  ;;  %v2303_v57 = vadd.f32 %v5137_v15, %v2298_v46  ;;  %v2363_v5 = vadd.f32 %v5141_v8, %v2358_v12  ;;  %v2602_v48 = vadd.f32 %v2601_v31, %v2597_v10  ;;  %v2426_v15 = vld [vmem:[#allocation2 + $0x38] sm:$0x7]  ;;  %v2256_v8 = vld [vmem:[#allocation2 + $0x3c] sm:$0x7] }
 0x30c   : > { %v2723_v53 = vmul.f32 %v2722_v29, %v2721_v37  ;;  %v2222_v60 = vld [vmem:[#allocation2 + $0x4c] sm:$0x7]  ;;  %v2663_v20 = vadd.f32 %v2662_v56, %v5268_v44  ;;  %v2151_v25 = vadd.f32 %v2150_v3, %v2146_v30  ;;  %v2174_v13 = vadd.f32 %v2173_v9, %v2169_v59  ;;  %v2548_v12 = vld [vmem:[#allocation2 + $0x38] sm:$0x7] }
 0x30d   : > { %v2257_v26 = vld [vmem:[#allocation2 + $0x4c] sm:$0x7]  ;;  %v2197_v27 = vadd.f32 %v2196_v34, %v2192_v24  ;;  %v2220_v10 = vadd.f32 %v2219_v0, %v2215_v39  ;;  %v5654_v29 = vstv %s5650_s2  ;;  %v5655_v4 = vstv %s5651_s3  ;;  %v2609_v3 = vld [vmem:[#allocation2 + $0x38] sm:$0x7] }
 0x30e   : > { %v2155_v23 = vmul.f32 %v2153_v63, %v5654_v29  ;;  %v2178_v50 = vmul.f32 %v2176_v36, %v5655_v4  ;;  %v5656_v18 = vstv %s5652_s1  ;;  %v2307_v14 = vmul.f32 %v2306_v1, %v2305_v6  ;;  %v2731_v59 = vld [vmem:[#allocation2 + $0x38] sm:$0x7]  ;;  %v5660_v4 = vld [vmem:[#allocation60_spill] sm:$0xff] }
 0x30f   : > { %v2201_v44 = vmul.f32 %v2199_v33, %v5656_v18  ;;  %v2367_v46 = vmul.f32 %v2366_v47, %v2365_v21  ;;  %v5657_v31 = vstv %s5653_s27  ;;  %v2258_v37 = vadd.f32 %v2257_v26, %v2256_v8  ;;  %v2736_v33 = vld [vmem:[#allocation2 + $0x1c] sm:$0x7] }
 0x310   : > { %v2224_v56 = vmul.f32 %v2222_v60, %v5657_v31  ;;  %v2428_v41 = vmul.f32 %v2427_v16, %v2426_v15  ;;  %v2156_v9 = vadd.f32 %v2155_v23, %v2151_v25  ;;  %v2179_v51 = vadd.f32 %v2178_v50, %v2174_v13  ;;  %v5659_v13 = vld [vmem:[#allocation59_spill] sm:$0xff] }
 0x311   : > { %v2202_v1 = vadd.f32 %v2201_v44, %v2197_v27  ;;  %v2424_v47 = vadd.f32 %v5145_v58, %v2419_v38  ;;  %v2724_v34 = vadd.f32 %v2723_v53, %v5271_v19  ;;  %v2489_v30 = vmul.f32 %v2488_v2, %v2487_v35  ;;  %2259 = vst [vmem:[#allocation2 + $0x3c] sm:$0x7] %v2258_v37 }
 0x312   : > { %v2225_v24 = vadd.f32 %v2224_v56, %v2220_v10  ;;  %v2485_v16 = vadd.f32 %v5149_v28, %v2480_v7  ;;  %v2546_v17 = vadd.f32 %v5155_v55, %v2541_v40  ;;  %v2607_v0 = vadd.f32 %v5167_v52, %v2602_v48  ;;  %3116 = vst [vmem:[%s5658_s0 + $0x50] sm:$0x7] %v2156_v9 }
 0x313   : > { %v2550_v6 = vmul.f32 %v2549_v45, %v2548_v12  ;;  %v2668_v58 = vadd.f32 %v5171_v54, %v2663_v20  ;;  %v2611_v19 = vmul.f32 %v2610_v22, %v2609_v3  ;;  %v2672_v2 = vmul.f32 %v2671_v32, %v2670_v61  ;;  %3121 = vst [vmem:[%s5658_s0 + $0x54] sm:$0x7] %v2179_v51  ;;  %v5663_v51 = vld [vmem:[#allocation62_spill] sm:$0xff] }
 0x314   : > { %v2316_v28 = vstv %s5283_s25  ;;  %v2308_v55 = vadd.f32 %v2307_v14, %v2303_v57  ;;  %v2368_v39 = vadd.f32 %v2367_v46, %v2363_v5  ;;  %v2429_v52 = vadd.f32 %v2428_v41, %v2424_v47  ;;  %3126 = vst [vmem:[%s5658_s0 + $0x58] sm:$0x7] %v2202_v1  ;;  %v5662_v41 = vld [vmem:[#allocation61_spill] sm:$0xff] }
 0x315   : > { %v2733_v45 = vmul.f32 %v2732_v42, %v2731_v59  ;;  %v2729_v38 = vadd.f32 %v5175_v49, %v2724_v34  ;;  %v2490_v54 = vadd.f32 %v2489_v30, %v2485_v16  ;;  %v2376_v7 = vstv %s5300_s26  ;;  %3131 = vst [vmem:[%s5658_s0 + $0x5c] sm:$0x7] %v2225_v24 }
 0x316   : > { %v2437_v40 = vstv %s5303_s30  ;;  %v2551_v22 = vadd.f32 %v2550_v6, %v2546_v17  ;;  %v2498_v63 = vstv %s5311_s17  ;;  %v2559_v32 = vstv %s5315_s24 }
 0x317   : > { %v2620_v36 = vstv %s5322_s28  ;;  %v2612_v48 = vadd.f32 %v2611_v19, %v2607_v0  ;;  %v2673_v57 = vadd.f32 %v2672_v2, %v2668_v58  ;;  %v2681_v5 = vstv %s5324_s21 }
 0x318   : > { %v2742_v53 = vstv %s5336_s23  ;;  %v2734_v21 = vadd.f32 %v2733_v45, %v2729_v38  ;;  %v2313_v60 = vadd.f32 %v5177_v43, %v2308_v55  ;;  %v2373_v42 = vadd.f32 %v5183_v62, %v2368_v39  ;;  %v2315_v26 = vld [vmem:[#allocation2 + $0x3c] sm:$0x7] }
 0x319   : > { %v2434_v49 = vadd.f32 %v5187_v11, %v2429_v52  ;;  %v2375_v20 = vld [vmem:[#allocation2 + $0x3c] sm:$0x7]  ;;  %v2495_v27 = vadd.f32 %v5659_v13, %v2490_v54  ;;  %v2317_v15 = vmul.f32 %v2316_v28, %v2315_v26  ;;  %v2556_v50 = vadd.f32 %v5660_v4, %v2551_v22 }
 0x31a   : > { %v2436_v25 = vld [vmem:[#allocation2 + $0x3c] sm:$0x7]  ;;  %v2377_v8 = vmul.f32 %v2376_v7, %v2375_v20  ;;  %v5661_v56 = vstv %s5009_s29  ;;  %v2617_v3 = vadd.f32 %v5662_v41, %v2612_v48  ;;  %v2678_v1 = vadd.f32 %v5663_v51, %v2673_v57 }
 0x31b   : > { %v2438_v10 = vmul.f32 %v2437_v40, %v2436_v25  ;;  %v2497_v35 = vld [vmem:[#allocation2 + $0x3c] sm:$0x7]  ;;  %v2318_v14 = vadd.f32 %v2317_v15, %v2313_v60  ;;  %v2738_v37 = vmul.f32 %v5661_v56, %v2736_v33 }
 0x31c   : > { %v2558_v29 = vld [vmem:[#allocation2 + $0x3c] sm:$0x7]  ;;  %v2499_v43 = vmul.f32 %v2498_v63, %v2497_v35  ;;  %v2378_v46 = vadd.f32 %v2377_v8, %v2373_v42 }
 0x31d   : > { %v2619_v23 = vld [vmem:[#allocation2 + $0x3c] sm:$0x7]  ;;  %v2560_v18 = vmul.f32 %v2559_v32, %v2558_v29  ;;  %v2439_v12 = vadd.f32 %v2438_v10, %v2434_v49  ;;  %2319 = vst [vmem:[%s5658_s0] sm:$0x7] %v2318_v14  ;;  %v2739_v34 = vadd.f32 %v2738_v37, %v2734_v21 }
 0x31e   : > { %v2621_v62 = vmul.f32 %v2620_v36, %v2619_v23  ;;  %v2680_v11 = vld [vmem:[#allocation2 + $0x3c] sm:$0x7]  ;;  %v2500_v61 = vadd.f32 %v2499_v43, %v2495_v27  ;;  %3153 = vst [vmem:[%s5658_s0 + $0x4] sm:$0x7] %v2378_v46 }
 0x31f   : > { %v2741_v44 = vld [vmem:[#allocation2 + $0x3c] sm:$0x7]  ;;  %v2682_v31 = vmul.f32 %v2681_v5, %v2680_v11  ;;  %v2561_v47 = vadd.f32 %v2560_v18, %v2556_v50  ;;  %3166 = vst [vmem:[%s5658_s0 + $0x8] sm:$0x7] %v2439_v12 }
 0x320   : > { %v2743_v9 = vmul.f32 %v2742_v53, %v2741_v44  ;;  %v2622_v30 = vadd.f32 %v2621_v62, %v2617_v3  ;;  %3179 = vst [vmem:[%s5658_s0 + $0xc] sm:$0x7] %v2500_v61 }
 0x321   : > { %v2683_v59 = vadd.f32 %v2682_v31, %v2678_v1  ;;  %3192 = vst [vmem:[%s5658_s0 + $0x10] sm:$0x7] %v2561_v47 }
 0x322   : > { %v2744_v24 = vadd.f32 %v2743_v9, %v2739_v34  ;;  %3205 = vst [vmem:[%s5658_s0 + $0x14] sm:$0x7] %v2622_v30 }
 0x323   : > { %3218 = vst [vmem:[%s5658_s0 + $0x18] sm:$0x7] %v2683_v59 }
 0x324   : > { %3231 = vst [vmem:[%s5658_s0 + $0x1c] sm:$0x7] %v2744_v24 }
 0x325 PF: > { %s5664_s29 = sld [smem:[#allocation19_spill]] }
 0x32b   : > { %s22_s27 = sadd.s32 1, %s5664_s29  }
 0x32c   : > { %p19_p7 = scmp.ge.s32.totalorder %s22_s27, 4  }
 0x32e   :  { %21 = sbr.rel (!%p19_p7) target bundleno = 14 (0xe), region = 175 }
 0x333   :  { %2768 = vsyncpa [#allocation5], 1 }
 0x334   :  { %2770 = vsyncpa [#allocation5 + $0x1], 1 }
 0x335   :  { %2771 = vsyncpa [#allocation7], 1 }
 0x336   :  { %2772 = vsyncpa [#allocation10], 1 }
 0x337   :  { %2773 = vsyncpa [#allocation13], 1 }

</bundles_post_ra>
